<compile_context>
chip_gen: v7x
topology: tpu7x:2x2x1
jax: 0.10.0
libtpu: 0.0.40
codegen_flags: <defaults>
</compile_context>

<pallas_src>
import functools

import jax
import jax.numpy as jnp
from jax.experimental import pallas as pl
from jax.experimental.pallas import tpu as pltpu


def _round_up(x, m):
    return (x + m - 1) // m * m


def _shift_matrix(n, shift):
    # S[r, c] = 1 iff c == r + shift, so (S @ h)[r] = h[r + shift] with zero padding
    # outside [0, n).  Shifts are multiples of the padded batch size, so rows never
    # mix across batch elements in the flat time-major layout.
    r = jax.lax.broadcasted_iota(jnp.int32, (n, n), 0)
    c = jax.lax.broadcasted_iota(jnp.int32, (n, n), 1)
    return jnp.where(c == r + shift, 1.0, 0.0).astype(jnp.float32)


# ----------------------------------------------------------------------------
# Fused forward kernel.  Layout: flat time-major [n, C] with n = T * BP and
# row index r = t * BP + b  (b < B are real rows, the rest are zero padding).
# ----------------------------------------------------------------------------
def fused_forward_kernel(*refs, T, BP, H, dils):
    (tok_ref, emb_ref,
     tw1_0, tb1_0, tw2_0, tb2_0,
     tw1_1, tb1_1, tw2_1, tb2_1,
     tw1_2, tb1_2, tw2_2, tb2_2,
     wih_1f, whh_1f, b_1f, wih_1b, whh_1b, b_1b,
     wih_2f, whh_2f, b_2f, wih_2b, whh_2b, b_2b,
     wa_ref, ba_ref, v_ref, aw1_ref, ab1_ref, aw2_ref, ab2_ref, wn_ref, bn_ref,
     an_ref, nt_ref,
     lstm1_sc, lstm2_sc) = refs

    f32 = jnp.float32
    n = T * BP

    def mm(a, b):
        return jnp.dot(a, b, preferred_element_type=f32)

    # ---- embedding lookup as one-hot @ table (padded rows carry token -1 -> zero row)
    vocab = emb_ref.shape[0]
    tok = tok_ref[...]                                                  # [n, 1] int32
    lane = jax.lax.broadcasted_iota(jnp.int32, (n, vocab), 1)
    onehot = jnp.where(tok == lane, 1.0, 0.0).astype(f32)               # [n, vocab]
    x = mm(onehot, emb_ref[...])                                        # [n, E]

    # ---- TCN blocks: k=3 dilated "same" conv done as (x @ W_j) + MXU time-shift ----
    def conv(xv, w_ref, b_ref, d):
        # out[t] = W0 . x[t-d] + W1 . x[t] + W2 . x[t+d]  (zero padded)
        y = mm(xv, w_ref[1]) + b_ref[...]                               # center tap
        y = y + mm(_shift_matrix(n, -d * BP), mm(xv, w_ref[0]))         # needs x[t-d]
        y = y + mm(_shift_matrix(n, d * BP), mm(xv, w_ref[2]))          # needs x[t+d]
        return y

    def tcn_block(xv, w1, b1, w2, b2, d):
        h1 = jnp.maximum(conv(xv, w1, b1, d), 0.0)
        h2 = jnp.maximum(conv(h1, w2, b2, d), 0.0)
        return jnp.maximum(h2 + xv, 0.0)       # identity residual (in_ch == out_ch)

    x = tcn_block(x, tw1_0, tb1_0, tw2_0, tb2_0, dils[0])
    x = tcn_block(x, tw1_1, tb1_1, tw2_1, tb2_1, dils[1])
    x = tcn_block(x, tw1_2, tb1_2, tw2_2, tb2_2, dils[2])

    # ---- 2-layer bidirectional LSTM (PyTorch gate order i, f, g, o) ----
    def lstm_dir(xv, wih_ref, whh_ref, b_ref, reverse):
        # input projection hoisted out of the sequential loop (one big matmul)
        zx = mm(xv, wih_ref[...]) + b_ref[...]                          # [n, 4H]
        whh = whh_ref[...]
        h = jnp.zeros((BP, H), f32)
        c = jnp.zeros((BP, H), f32)
        outs = [None] * T
        steps = range(T - 1, -1, -1) if reverse else range(T)
        for t in steps:                          # static unroll, T is small
            z = zx[t * BP:(t + 1) * BP, :] + mm(h, whh)                 # [BP, 4H]
            i_g = jax.nn.sigmoid(z[:, 0:H])
            f_g = jax.nn.sigmoid(z[:, H:2 * H])
            g_g = jnp.tanh(z[:, 2 * H:3 * H])
            o_g = jax.nn.sigmoid(z[:, 3 * H:4 * H])
            c = f_g * c + i_g * g_g
            h = o_g * jnp.tanh(c)
            outs[t] = h
        return outs

    def bilstm(xv, fwd, bwd, out_sc):
        of = lstm_dir(xv, *fwd, reverse=False)
        ob = lstm_dir(xv, *bwd, reverse=True)
        for t in range(T):                       # aligned 8-row stores into VMEM
            out_sc[t * BP:(t + 1) * BP, 0:H] = of[t]
            out_sc[t * BP:(t + 1) * BP, H:2 * H] = ob[t]
        return out_sc[...]                       # [n, 2H]

    x = bilstm(x, (wih_1f, whh_1f, b_1f), (wih_1b, whh_1b, b_1b), lstm1_sc)
    x = bilstm(x, (wih_2f, whh_2f, b_2f), (wih_2b, whh_2b, b_2b), lstm2_sc)

    # ---- attention over time (per batch row) ----
    e = jnp.tanh(mm(x, wa_ref[...]) + ba_ref[...])                      # [n, 2H]
    s = mm(e, v_ref[...])                                               # [n, 1]
    s = s - jnp.max(s, axis=0, keepdims=True)    # global shift; per-row softmax unchanged
    p = jnp.exp(s)                                                      # [n, 1]
    # batch aggregation matrix: G[b, r] = 1 iff row r belongs to batch slot b
    bi = jax.lax.broadcasted_iota(jnp.int32, (BP, n), 0)
    ri = jax.lax.broadcasted_iota(jnp.int32, (BP, n), 1)
    G = jnp.where((ri % BP) == bi, 1.0, 0.0).astype(f32)                # [BP, n]
    denom = mm(G, p)                                                    # [BP, 1]
    ctx = mm(G, p * x) * pl.reciprocal(denom, approx=True)              # [BP, 2H]

    # ---- anomaly head: Linear -> ReLU -> (Dropout=id) -> Linear -> Sigmoid ----
    a1 = jnp.maximum(mm(ctx, aw1_ref[...]) + ab1_ref[...], 0.0)
    an_ref[...] = jax.nn.sigmoid(mm(a1, aw2_ref[...]) + ab2_ref[...])   # [BP, 1]

    # ---- next-token head on the last timestep (aligned tail slice) ----
    h_last = x[(T - 1) * BP:, :]                                        # [BP, 2H]
    nt_ref[...] = mm(h_last, wn_ref[...]) + bn_ref[...]                 # [BP, vocab]


# ----------------------------------------------------------------------------
# Wrapper: pads batch to a multiple of 8 sublanes, flattens time-major, and
# launches the single fused kernel.
# ----------------------------------------------------------------------------
def forward(params, tokens):
    B, T = tokens.shape
    emb = params["embedding"]
    V, E = emb.shape
    C = params["tcn"][0]["w1"].shape[2]
    H = params["lstm"][0]["fwd"][1].shape[0]
    assert E == C, "identity residual path requires embedding_dim == tcn_channels"
    # TODO(synk): lengths/pack_padded_sequence path not implemented (lengths=None only).

    BP = _round_up(B, 8)                          # pad batch rows to a sublane tile
    n = T * BP

    # time-major tokens, padded slots get -1 (one-hot row becomes exactly zero)
    tok_tm = jnp.transpose(tokens.astype(jnp.int32), (1, 0))            # [T, B]
    tok_pad = jnp.full((T, BP), -1, jnp.int32).at[:, :B].set(tok_tm)    # [T, BP]
    tok_flat = tok_pad.reshape(n, 1)                                    # [n, 1]

    args = [tok_flat, emb]
    for blk in params["tcn"]:
        args += [blk["w1"], blk["b1"], blk["w2"], blk["b2"]]
    for layer in params["lstm"]:
        args += list(layer["fwd"]) + list(layer["bwd"])
    hp = params["heads"]
    args += [hp["wa"], hp["ba"], hp["v"], hp["w1"], hp["b1"], hp["w2"], hp["b2"],
             hp["wn"], hp["bn"]]

    kern = functools.partial(fused_forward_kernel, T=T, BP=BP, H=H, dils=(1, 2, 4))
    an, nt = pl.pallas_call(
        kern,
        out_shape=(jax.ShapeDtypeStruct((BP, 1), jnp.float32),
                   jax.ShapeDtypeStruct((BP, V), jnp.float32)),
        scratch_shapes=[pltpu.VMEM((n, 2 * H), jnp.float32),
                        pltpu.VMEM((n, 2 * H), jnp.float32)],
    )(*args)
    return an[:B], nt[:B]                         # [B, 1], [B, vocab]


# ----------------------------------------------------------------------------
# Parameter init (deterministic, synthetic; biases = 0 as in init_weights)
# ----------------------------------------------------------------------------
def init_params(key, vocab, E, C, H, K=3):
    keys = list(jax.random.split(key, 64))
    it = iter(keys)

    def w(shape, s=0.1):
        return jax.random.normal(next(it), shape, jnp.float32) * s

    emb = w((vocab, E)).at[0].set(0.0)            # padding_idx=0

    tcn = []
    cin = E
    for _ in range(3):
        tcn.append(dict(
            w1=w((K, cin, C)), b1=jnp.zeros((1, C), jnp.float32),
            w2=w((K, C, C)), b2=jnp.zeros((1, C), jnp.float32)))
        cin = C

    lstm = []
    d = C
    for _ in range(2):
        layer = {}
        for dirn in ("fwd", "bwd"):
            layer[dirn] = (w((d, 4 * H)),                         # W_ih^T
                           w((H, 4 * H)),                         # W_hh^T
                           jnp.zeros((1, 4 * H), jnp.float32))    # b_ih + b_hh
        lstm.append(layer)
        d = 2 * H

    heads = dict(
        wa=w((2 * H, 2 * H)), ba=jnp.zeros((1, 2 * H), jnp.float32),
        v=w((2 * H, 1)),
        w1=w((2 * H, H)), b1=jnp.zeros((1, H), jnp.float32),
        w2=w((H, 1)), b2=jnp.zeros((1, 1), jnp.float32),
        wn=w((2 * H, vocab)), bn=jnp.zeros((1, vocab), jnp.float32))

    return dict(embedding=emb, tcn=tcn, lstm=lstm, heads=heads)


if __name__ == "__main__":
    VOCAB, E, C, H = 32, 32, 32, 32
    B, T = 2, 8

    key = jax.random.PRNGKey(0)
    pkey, xkey = jax.random.split(key)
    params = init_params(pkey, VOCAB, E, C, H)
    x = jax.random.randint(xkey, (B, T), 0, VOCAB, dtype=jnp.int32)

    fwd = jax.jit(forward)
    anomaly, next_tok = fwd(params, x)
    jax.block_until_ready((anomaly, next_tok))

    assert anomaly.shape == (B, 1)
    assert next_tok.shape == (B, VOCAB)
    assert bool(jnp.all(jnp.isfinite(anomaly))) and bool(jnp.all(jnp.isfinite(next_tok)))
    print("KERNEL_OK")
</pallas_src>

<mosaic_0001>
module attributes {stable_mosaic.version = 11 : i64} {
  func.func @fused_forward_kernel(%arg0: memref<64x1xi32, #tpu.memory_space<vmem>>, %arg1: memref<32x32xf32, #tpu.memory_space<vmem>>, %arg2: memref<3x32x32xf32, #tpu.memory_space<vmem>>, %arg3: memref<1x32xf32, #tpu.memory_space<vmem>>, %arg4: memref<3x32x32xf32, #tpu.memory_space<vmem>>, %arg5: memref<1x32xf32, #tpu.memory_space<vmem>>, %arg6: memref<3x32x32xf32, #tpu.memory_space<vmem>>, %arg7: memref<1x32xf32, #tpu.memory_space<vmem>>, %arg8: memref<3x32x32xf32, #tpu.memory_space<vmem>>, %arg9: memref<1x32xf32, #tpu.memory_space<vmem>>, %arg10: memref<3x32x32xf32, #tpu.memory_space<vmem>>, %arg11: memref<1x32xf32, #tpu.memory_space<vmem>>, %arg12: memref<3x32x32xf32, #tpu.memory_space<vmem>>, %arg13: memref<1x32xf32, #tpu.memory_space<vmem>>, %arg14: memref<32x128xf32, #tpu.memory_space<vmem>>, %arg15: memref<32x128xf32, #tpu.memory_space<vmem>>, %arg16: memref<1x128xf32, #tpu.memory_space<vmem>>, %arg17: memref<32x128xf32, #tpu.memory_space<vmem>>, %arg18: memref<32x128xf32, #tpu.memory_space<vmem>>, %arg19: memref<1x128xf32, #tpu.memory_space<vmem>>, %arg20: memref<64x128xf32, #tpu.memory_space<vmem>>, %arg21: memref<32x128xf32, #tpu.memory_space<vmem>>, %arg22: memref<1x128xf32, #tpu.memory_space<vmem>>, %arg23: memref<64x128xf32, #tpu.memory_space<vmem>>, %arg24: memref<32x128xf32, #tpu.memory_space<vmem>>, %arg25: memref<1x128xf32, #tpu.memory_space<vmem>>, %arg26: memref<64x64xf32, #tpu.memory_space<vmem>>, %arg27: memref<1x64xf32, #tpu.memory_space<vmem>>, %arg28: memref<64x1xf32, #tpu.memory_space<vmem>>, %arg29: memref<64x32xf32, #tpu.memory_space<vmem>>, %arg30: memref<1x32xf32, #tpu.memory_space<vmem>>, %arg31: memref<32x1xf32, #tpu.memory_space<vmem>>, %arg32: memref<1x1xf32, #tpu.memory_space<vmem>>, %arg33: memref<64x32xf32, #tpu.memory_space<vmem>>, %arg34: memref<1x32xf32, #tpu.memory_space<vmem>>, %arg35: memref<8x1xf32, #tpu.memory_space<vmem>>, %arg36: memref<8x32xf32, #tpu.memory_space<vmem>>, %arg37: memref<64x64xf32, #tpu.memory_space<vmem>>, %arg38: memref<64x64xf32, #tpu.memory_space<vmem>>) attributes {dimension_semantics = [], scalar_prefetch = 0 : i64, scratch_operands = 2 : i64, tpu.core_type = #tpu.core_type<tc>} {
    %c0 = arith.constant 0 : index
    %c0_0 = arith.constant 0 : index
    %0 = vector.load %arg0[%c0, %c0_0] : memref<64x1xi32, #tpu.memory_space<vmem>>, vector<64x1xi32>
    %1 = tpu.iota {dimensions = array<i32: 1>} : vector<64x32xi32>
    %2 = vector.broadcast %0 : vector<64x1xi32> to vector<64x32xi32>
    %3 = arith.cmpi eq, %2, %1 : vector<64x32xi32>
    %cst = arith.constant 1.000000e+00 : f32
    %cst_1 = arith.constant 0.000000e+00 : f32
    %4 = vector.broadcast %cst : f32 to vector<64x32xf32>
    %5 = vector.broadcast %cst_1 : f32 to vector<64x32xf32>
    %6 = arith.select %3, %4, %5 : vector<64x32xi1>, vector<64x32xf32>
    %c0_2 = arith.constant 0 : index
    %c0_3 = arith.constant 0 : index
    %7 = vector.load %arg1[%c0_2, %c0_3] : memref<32x32xf32, #tpu.memory_space<vmem>>, vector<32x32xf32>
    %cst_4 = arith.constant dense<0.000000e+00> : vector<64x32xf32>
    %8 = tpu.matmul %6, %7, %cst_4 {dimension_numbers = #tpu.dot_dimension_numbers<[1], [0], [0], [1], [0, 0, 1, 1], [], []>} : vector<64x32xf32>, vector<32x32xf32>, vector<64x32xf32> -> vector<64x32xf32>
    %c1 = arith.constant 1 : index
    %c0_5 = arith.constant 0 : index
    %c0_6 = arith.constant 0 : index
    %9 = vector.load %arg2[%c1, %c0_5, %c0_6] : memref<3x32x32xf32, #tpu.memory_space<vmem>>, vector<1x32x32xf32>
    %10 = vector.shape_cast %9 : vector<1x32x32xf32> to vector<32x32xf32>
    %cst_7 = arith.constant dense<0.000000e+00> : vector<64x32xf32>
    %11 = tpu.matmul %8, %10, %cst_7 {dimension_numbers = #tpu.dot_dimension_numbers<[1], [0], [0], [1], [0, 0, 1, 1], [], []>} : vector<64x32xf32>, vector<32x32xf32>, vector<64x32xf32> -> vector<64x32xf32>
    %c0_8 = arith.constant 0 : index
    %c0_9 = arith.constant 0 : index
    %12 = vector.load %arg3[%c0_8, %c0_9] : memref<1x32xf32, #tpu.memory_space<vmem>>, vector<1x32xf32>
    %13 = vector.broadcast %12 : vector<1x32xf32> to vector<64x32xf32>
    %14 = arith.addf %11, %13 : vector<64x32xf32>
    %15 = tpu.iota {dimensions = array<i32: 0>} : vector<64x64xi32>
    %16 = tpu.iota {dimensions = array<i32: 1>} : vector<64x64xi32>
    %c-8_i32 = arith.constant -8 : i32
    %17 = vector.broadcast %c-8_i32 : i32 to vector<64x64xi32>
    %18 = arith.addi %15, %17 : vector<64x64xi32>
    %19 = arith.cmpi eq, %16, %18 : vector<64x64xi32>
    %cst_10 = arith.constant 1.000000e+00 : f32
    %cst_11 = arith.constant 0.000000e+00 : f32
    %20 = vector.broadcast %cst_10 : f32 to vector<64x64xf32>
    %21 = vector.broadcast %cst_11 : f32 to vector<64x64xf32>
    %22 = arith.select %19, %20, %21 : vector<64x64xi1>, vector<64x64xf32>
    %c0_12 = arith.constant 0 : index
    %c0_13 = arith.constant 0 : index
    %c0_14 = arith.constant 0 : index
    %23 = vector.load %arg2[%c0_12, %c0_13, %c0_14] : memref<3x32x32xf32, #tpu.memory_space<vmem>>, vector<1x32x32xf32>
    %24 = vector.shape_cast %23 : vector<1x32x32xf32> to vector<32x32xf32>
    %cst_15 = arith.constant dense<0.000000e+00> : vector<64x32xf32>
    %25 = tpu.matmul %8, %24, %cst_15 {dimension_numbers = #tpu.dot_dimension_numbers<[1], [0], [0], [1], [0, 0, 1, 1], [], []>} : vector<64x32xf32>, vector<32x32xf32>, vector<64x32xf32> -> vector<64x32xf32>
    %cst_16 = arith.constant dense<0.000000e+00> : vector<64x32xf32>
    %26 = tpu.matmul %22, %25, %cst_16 {dimension_numbers = #tpu.dot_dimension_numbers<[1], [0], [0], [1], [0, 0, 1, 1], [], []>} : vector<64x64xf32>, vector<64x32xf32>, vector<64x32xf32> -> vector<64x32xf32>
    %27 = arith.addf %14, %26 : vector<64x32xf32>
    %28 = tpu.iota {dimensions = array<i32: 0>} : vector<64x64xi32>
    %29 = tpu.iota {dimensions = array<i32: 1>} : vector<64x64xi32>
    %c8_i32 = arith.constant 8 : i32
    %30 = vector.broadcast %c8_i32 : i32 to vector<64x64xi32>
    %31 = arith.addi %28, %30 : vector<64x64xi32>
    %32 = arith.cmpi eq, %29, %31 : vector<64x64xi32>
    %cst_17 = arith.constant 1.000000e+00 : f32
    %cst_18 = arith.constant 0.000000e+00 : f32
    %33 = vector.broadcast %cst_17 : f32 to vector<64x64xf32>
    %34 = vector.broadcast %cst_18 : f32 to vector<64x64xf32>
    %35 = arith.select %32, %33, %34 : vector<64x64xi1>, vector<64x64xf32>
    %c2 = arith.constant 2 : index
    %c0_19 = arith.constant 0 : index
    %c0_20 = arith.constant 0 : index
    %36 = vector.load %arg2[%c2, %c0_19, %c0_20] : memref<3x32x32xf32, #tpu.memory_space<vmem>>, vector<1x32x32xf32>
    %37 = vector.shape_cast %36 : vector<1x32x32xf32> to vector<32x32xf32>
    %cst_21 = arith.constant dense<0.000000e+00> : vector<64x32xf32>
    %38 = tpu.matmul %8, %37, %cst_21 {dimension_numbers = #tpu.dot_dimension_numbers<[1], [0], [0], [1], [0, 0, 1, 1], [], []>} : vector<64x32xf32>, vector<32x32xf32>, vector<64x32xf32> -> vector<64x32xf32>
    %cst_22 = arith.constant dense<0.000000e+00> : vector<64x32xf32>
    %39 = tpu.matmul %35, %38, %cst_22 {dimension_numbers = #tpu.dot_dimension_numbers<[1], [0], [0], [1], [0, 0, 1, 1], [], []>} : vector<64x64xf32>, vector<64x32xf32>, vector<64x32xf32> -> vector<64x32xf32>
    %40 = arith.addf %27, %39 : vector<64x32xf32>
    %cst_23 = arith.constant 0.000000e+00 : f32
    %41 = vector.broadcast %cst_23 : f32 to vector<64x32xf32>
    %42 = arith.maximumf %40, %41 : vector<64x32xf32>
    %c1_24 = arith.constant 1 : index
    %c0_25 = arith.constant 0 : index
    %c0_26 = arith.constant 0 : index
    %43 = vector.load %arg4[%c1_24, %c0_25, %c0_26] : memref<3x32x32xf32, #tpu.memory_space<vmem>>, vector<1x32x32xf32>
    %44 = vector.shape_cast %43 : vector<1x32x32xf32> to vector<32x32xf32>
    %cst_27 = arith.constant dense<0.000000e+00> : vector<64x32xf32>
    %45 = tpu.matmul %42, %44, %cst_27 {dimension_numbers = #tpu.dot_dimension_numbers<[1], [0], [0], [1], [0, 0, 1, 1], [], []>} : vector<64x32xf32>, vector<32x32xf32>, vector<64x32xf32> -> vector<64x32xf32>
    %c0_28 = arith.constant 0 : index
    %c0_29 = arith.constant 0 : index
    %46 = vector.load %arg5[%c0_28, %c0_29] : memref<1x32xf32, #tpu.memory_space<vmem>>, vector<1x32xf32>
    %47 = vector.broadcast %46 : vector<1x32xf32> to vector<64x32xf32>
    %48 = arith.addf %45, %47 : vector<64x32xf32>
    %49 = tpu.iota {dimensions = array<i32: 0>} : vector<64x64xi32>
    %50 = tpu.iota {dimensions = array<i32: 1>} : vector<64x64xi32>
    %c-8_i32_30 = arith.constant -8 : i32
    %51 = vector.broadcast %c-8_i32_30 : i32 to vector<64x64xi32>
    %52 = arith.addi %49, %51 : vector<64x64xi32>
    %53 = arith.cmpi eq, %50, %52 : vector<64x64xi32>
    %cst_31 = arith.constant 1.000000e+00 : f32
    %cst_32 = arith.constant 0.000000e+00 : f32
    %54 = vector.broadcast %cst_31 : f32 to vector<64x64xf32>
    %55 = vector.broadcast %cst_32 : f32 to vector<64x64xf32>
    %56 = arith.select %53, %54, %55 : vector<64x64xi1>, vector<64x64xf32>
    %c0_33 = arith.constant 0 : index
    %c0_34 = arith.constant 0 : index
    %c0_35 = arith.constant 0 : index
    %57 = vector.load %arg4[%c0_33, %c0_34, %c0_35] : memref<3x32x32xf32, #tpu.memory_space<vmem>>, vector<1x32x32xf32>
    %58 = vector.shape_cast %57 : vector<1x32x32xf32> to vector<32x32xf32>
    %cst_36 = arith.constant dense<0.000000e+00> : vector<64x32xf32>
    %59 = tpu.matmul %42, %58, %cst_36 {dimension_numbers = #tpu.dot_dimension_numbers<[1], [0], [0], [1], [0, 0, 1, 1], [], []>} : vector<64x32xf32>, vector<32x32xf32>, vector<64x32xf32> -> vector<64x32xf32>
    %cst_37 = arith.constant dense<0.000000e+00> : vector<64x32xf32>
    %60 = tpu.matmul %56, %59, %cst_37 {dimension_numbers = #tpu.dot_dimension_numbers<[1], [0], [0], [1], [0, 0, 1, 1], [], []>} : vector<64x64xf32>, vector<64x32xf32>, vector<64x32xf32> -> vector<64x32xf32>
    %61 = arith.addf %48, %60 : vector<64x32xf32>
    %62 = tpu.iota {dimensions = array<i32: 0>} : vector<64x64xi32>
    %63 = tpu.iota {dimensions = array<i32: 1>} : vector<64x64xi32>
    %c8_i32_38 = arith.constant 8 : i32
    %64 = vector.broadcast %c8_i32_38 : i32 to vector<64x64xi32>
    %65 = arith.addi %62, %64 : vector<64x64xi32>
    %66 = arith.cmpi eq, %63, %65 : vector<64x64xi32>
    %cst_39 = arith.constant 1.000000e+00 : f32
    %cst_40 = arith.constant 0.000000e+00 : f32
    %67 = vector.broadcast %cst_39 : f32 to vector<64x64xf32>
    %68 = vector.broadcast %cst_40 : f32 to vector<64x64xf32>
    %69 = arith.select %66, %67, %68 : vector<64x64xi1>, vector<64x64xf32>
    %c2_41 = arith.constant 2 : index
    %c0_42 = arith.constant 0 : index
    %c0_43 = arith.constant 0 : index
    %70 = vector.load %arg4[%c2_41, %c0_42, %c0_43] : memref<3x32x32xf32, #tpu.memory_space<vmem>>, vector<1x32x32xf32>
    %71 = vector.shape_cast %70 : vector<1x32x32xf32> to vector<32x32xf32>
    %cst_44 = arith.constant dense<0.000000e+00> : vector<64x32xf32>
    %72 = tpu.matmul %42, %71, %cst_44 {dimension_numbers = #tpu.dot_dimension_numbers<[1], [0], [0], [1], [0, 0, 1, 1], [], []>} : vector<64x32xf32>, vector<32x32xf32>, vector<64x32xf32> -> vector<64x32xf32>
    %cst_45 = arith.constant dense<0.000000e+00> : vector<64x32xf32>
    %73 = tpu.matmul %69, %72, %cst_45 {dimension_numbers = #tpu.dot_dimension_numbers<[1], [0], [0], [1], [0, 0, 1, 1], [], []>} : vector<64x64xf32>, vector<64x32xf32>, vector<64x32xf32> -> vector<64x32xf32>
    %74 = arith.addf %61, %73 : vector<64x32xf32>
    %cst_46 = arith.constant 0.000000e+00 : f32
    %75 = vector.broadcast %cst_46 : f32 to vector<64x32xf32>
    %76 = arith.maximumf %74, %75 : vector<64x32xf32>
    %77 = arith.addf %76, %8 : vector<64x32xf32>
    %cst_47 = arith.constant 0.000000e+00 : f32
    %78 = vector.broadcast %cst_47 : f32 to vector<64x32xf32>
    %79 = arith.maximumf %77, %78 : vector<64x32xf32>
    %c1_48 = arith.constant 1 : index
    %c0_49 = arith.constant 0 : index
    %c0_50 = arith.constant 0 : index
    %80 = vector.load %arg6[%c1_48, %c0_49, %c0_50] : memref<3x32x32xf32, #tpu.memory_space<vmem>>, vector<1x32x32xf32>
    %81 = vector.shape_cast %80 : vector<1x32x32xf32> to vector<32x32xf32>
    %cst_51 = arith.constant dense<0.000000e+00> : vector<64x32xf32>
    %82 = tpu.matmul %79, %81, %cst_51 {dimension_numbers = #tpu.dot_dimension_numbers<[1], [0], [0], [1], [0, 0, 1, 1], [], []>} : vector<64x32xf32>, vector<32x32xf32>, vector<64x32xf32> -> vector<64x32xf32>
    %c0_52 = arith.constant 0 : index
    %c0_53 = arith.constant 0 : index
    %83 = vector.load %arg7[%c0_52, %c0_53] : memref<1x32xf32, #tpu.memory_space<vmem>>, vector<1x32xf32>
    %84 = vector.broadcast %83 : vector<1x32xf32> to vector<64x32xf32>
    %85 = arith.addf %82, %84 : vector<64x32xf32>
    %86 = tpu.iota {dimensions = array<i32: 0>} : vector<64x64xi32>
    %87 = tpu.iota {dimensions = array<i32: 1>} : vector<64x64xi32>
    %c-16_i32 = arith.constant -16 : i32
    %88 = vector.broadcast %c-16_i32 : i32 to vector<64x64xi32>
    %89 = arith.addi %86, %88 : vector<64x64xi32>
    %90 = arith.cmpi eq, %87, %89 : vector<64x64xi32>
    %cst_54 = arith.constant 1.000000e+00 : f32
    %cst_55 = arith.constant 0.000000e+00 : f32
    %91 = vector.broadcast %cst_54 : f32 to vector<64x64xf32>
    %92 = vector.broadcast %cst_55 : f32 to vector<64x64xf32>
    %93 = arith.select %90, %91, %92 : vector<64x64xi1>, vector<64x64xf32>
    %c0_56 = arith.constant 0 : index
    %c0_57 = arith.constant 0 : index
    %c0_58 = arith.constant 0 : index
    %94 = vector.load %arg6[%c0_56, %c0_57, %c0_58] : memref<3x32x32xf32, #tpu.memory_space<vmem>>, vector<1x32x32xf32>
    %95 = vector.shape_cast %94 : vector<1x32x32xf32> to vector<32x32xf32>
    %cst_59 = arith.constant dense<0.000000e+00> : vector<64x32xf32>
    %96 = tpu.matmul %79, %95, %cst_59 {dimension_numbers = #tpu.dot_dimension_numbers<[1], [0], [0], [1], [0, 0, 1, 1], [], []>} : vector<64x32xf32>, vector<32x32xf32>, vector<64x32xf32> -> vector<64x32xf32>
    %cst_60 = arith.constant dense<0.000000e+00> : vector<64x32xf32>
    %97 = tpu.matmul %93, %96, %cst_60 {dimension_numbers = #tpu.dot_dimension_numbers<[1], [0], [0], [1], [0, 0, 1, 1], [], []>} : vector<64x64xf32>, vector<64x32xf32>, vector<64x32xf32> -> vector<64x32xf32>
    %98 = arith.addf %85, %97 : vector<64x32xf32>
    %99 = tpu.iota {dimensions = array<i32: 0>} : vector<64x64xi32>
    %100 = tpu.iota {dimensions = array<i32: 1>} : vector<64x64xi32>
    %c16_i32 = arith.constant 16 : i32
    %101 = vector.broadcast %c16_i32 : i32 to vector<64x64xi32>
    %102 = arith.addi %99, %101 : vector<64x64xi32>
    %103 = arith.cmpi eq, %100, %102 : vector<64x64xi32>
    %cst_61 = arith.constant 1.000000e+00 : f32
    %cst_62 = arith.constant 0.000000e+00 : f32
    %104 = vector.broadcast %cst_61 : f32 to vector<64x64xf32>
    %105 = vector.broadcast %cst_62 : f32 to vector<64x64xf32>
    %106 = arith.select %103, %104, %105 : vector<64x64xi1>, vector<64x64xf32>
    %c2_63 = arith.constant 2 : index
    %c0_64 = arith.constant 0 : index
    %c0_65 = arith.constant 0 : index
    %107 = vector.load %arg6[%c2_63, %c0_64, %c0_65] : memref<3x32x32xf32, #tpu.memory_space<vmem>>, vector<1x32x32xf32>
    %108 = vector.shape_cast %107 : vector<1x32x32xf32> to vector<32x32xf32>
    %cst_66 = arith.constant dense<0.000000e+00> : vector<64x32xf32>
    %109 = tpu.matmul %79, %108, %cst_66 {dimension_numbers = #tpu.dot_dimension_numbers<[1], [0], [0], [1], [0, 0, 1, 1], [], []>} : vector<64x32xf32>, vector<32x32xf32>, vector<64x32xf32> -> vector<64x32xf32>
    %cst_67 = arith.constant dense<0.000000e+00> : vector<64x32xf32>
    %110 = tpu.matmul %106, %109, %cst_67 {dimension_numbers = #tpu.dot_dimension_numbers<[1], [0], [0], [1], [0, 0, 1, 1], [], []>} : vector<64x64xf32>, vector<64x32xf32>, vector<64x32xf32> -> vector<64x32xf32>
    %111 = arith.addf %98, %110 : vector<64x32xf32>
    %cst_68 = arith.constant 0.000000e+00 : f32
    %112 = vector.broadcast %cst_68 : f32 to vector<64x32xf32>
    %113 = arith.maximumf %111, %112 : vector<64x32xf32>
    %c1_69 = arith.constant 1 : index
    %c0_70 = arith.constant 0 : index
    %c0_71 = arith.constant 0 : index
    %114 = vector.load %arg8[%c1_69, %c0_70, %c0_71] : memref<3x32x32xf32, #tpu.memory_space<vmem>>, vector<1x32x32xf32>
    %115 = vector.shape_cast %114 : vector<1x32x32xf32> to vector<32x32xf32>
    %cst_72 = arith.constant dense<0.000000e+00> : vector<64x32xf32>
    %116 = tpu.matmul %113, %115, %cst_72 {dimension_numbers = #tpu.dot_dimension_numbers<[1], [0], [0], [1], [0, 0, 1, 1], [], []>} : vector<64x32xf32>, vector<32x32xf32>, vector<64x32xf32> -> vector<64x32xf32>
    %c0_73 = arith.constant 0 : index
    %c0_74 = arith.constant 0 : index
    %117 = vector.load %arg9[%c0_73, %c0_74] : memref<1x32xf32, #tpu.memory_space<vmem>>, vector<1x32xf32>
    %118 = vector.broadcast %117 : vector<1x32xf32> to vector<64x32xf32>
    %119 = arith.addf %116, %118 : vector<64x32xf32>
    %120 = tpu.iota {dimensions = array<i32: 0>} : vector<64x64xi32>
    %121 = tpu.iota {dimensions = array<i32: 1>} : vector<64x64xi32>
    %c-16_i32_75 = arith.constant -16 : i32
    %122 = vector.broadcast %c-16_i32_75 : i32 to vector<64x64xi32>
    %123 = arith.addi %120, %122 : vector<64x64xi32>
    %124 = arith.cmpi eq, %121, %123 : vector<64x64xi32>
    %cst_76 = arith.constant 1.000000e+00 : f32
    %cst_77 = arith.constant 0.000000e+00 : f32
    %125 = vector.broadcast %cst_76 : f32 to vector<64x64xf32>
    %126 = vector.broadcast %cst_77 : f32 to vector<64x64xf32>
    %127 = arith.select %124, %125, %126 : vector<64x64xi1>, vector<64x64xf32>
    %c0_78 = arith.constant 0 : index
    %c0_79 = arith.constant 0 : index
    %c0_80 = arith.constant 0 : index
    %128 = vector.load %arg8[%c0_78, %c0_79, %c0_80] : memref<3x32x32xf32, #tpu.memory_space<vmem>>, vector<1x32x32xf32>
    %129 = vector.shape_cast %128 : vector<1x32x32xf32> to vector<32x32xf32>
    %cst_81 = arith.constant dense<0.000000e+00> : vector<64x32xf32>
    %130 = tpu.matmul %113, %129, %cst_81 {dimension_numbers = #tpu.dot_dimension_numbers<[1], [0], [0], [1], [0, 0, 1, 1], [], []>} : vector<64x32xf32>, vector<32x32xf32>, vector<64x32xf32> -> vector<64x32xf32>
    %cst_82 = arith.constant dense<0.000000e+00> : vector<64x32xf32>
    %131 = tpu.matmul %127, %130, %cst_82 {dimension_numbers = #tpu.dot_dimension_numbers<[1], [0], [0], [1], [0, 0, 1, 1], [], []>} : vector<64x64xf32>, vector<64x32xf32>, vector<64x32xf32> -> vector<64x32xf32>
    %132 = arith.addf %119, %131 : vector<64x32xf32>
    %133 = tpu.iota {dimensions = array<i32: 0>} : vector<64x64xi32>
    %134 = tpu.iota {dimensions = array<i32: 1>} : vector<64x64xi32>
    %c16_i32_83 = arith.constant 16 : i32
    %135 = vector.broadcast %c16_i32_83 : i32 to vector<64x64xi32>
    %136 = arith.addi %133, %135 : vector<64x64xi32>
    %137 = arith.cmpi eq, %134, %136 : vector<64x64xi32>
    %cst_84 = arith.constant 1.000000e+00 : f32
    %cst_85 = arith.constant 0.000000e+00 : f32
    %138 = vector.broadcast %cst_84 : f32 to vector<64x64xf32>
    %139 = vector.broadcast %cst_85 : f32 to vector<64x64xf32>
    %140 = arith.select %137, %138, %139 : vector<64x64xi1>, vector<64x64xf32>
    %c2_86 = arith.constant 2 : index
    %c0_87 = arith.constant 0 : index
    %c0_88 = arith.constant 0 : index
    %141 = vector.load %arg8[%c2_86, %c0_87, %c0_88] : memref<3x32x32xf32, #tpu.memory_space<vmem>>, vector<1x32x32xf32>
    %142 = vector.shape_cast %141 : vector<1x32x32xf32> to vector<32x32xf32>
    %cst_89 = arith.constant dense<0.000000e+00> : vector<64x32xf32>
    %143 = tpu.matmul %113, %142, %cst_89 {dimension_numbers = #tpu.dot_dimension_numbers<[1], [0], [0], [1], [0, 0, 1, 1], [], []>} : vector<64x32xf32>, vector<32x32xf32>, vector<64x32xf32> -> vector<64x32xf32>
    %cst_90 = arith.constant dense<0.000000e+00> : vector<64x32xf32>
    %144 = tpu.matmul %140, %143, %cst_90 {dimension_numbers = #tpu.dot_dimension_numbers<[1], [0], [0], [1], [0, 0, 1, 1], [], []>} : vector<64x64xf32>, vector<64x32xf32>, vector<64x32xf32> -> vector<64x32xf32>
    %145 = arith.addf %132, %144 : vector<64x32xf32>
    %cst_91 = arith.constant 0.000000e+00 : f32
    %146 = vector.broadcast %cst_91 : f32 to vector<64x32xf32>
    %147 = arith.maximumf %145, %146 : vector<64x32xf32>
    %148 = arith.addf %147, %79 : vector<64x32xf32>
    %cst_92 = arith.constant 0.000000e+00 : f32
    %149 = vector.broadcast %cst_92 : f32 to vector<64x32xf32>
    %150 = arith.maximumf %148, %149 : vector<64x32xf32>
    %c1_93 = arith.constant 1 : index
    %c0_94 = arith.constant 0 : index
    %c0_95 = arith.constant 0 : index
    %151 = vector.load %arg10[%c1_93, %c0_94, %c0_95] : memref<3x32x32xf32, #tpu.memory_space<vmem>>, vector<1x32x32xf32>
    %152 = vector.shape_cast %151 : vector<1x32x32xf32> to vector<32x32xf32>
    %cst_96 = arith.constant dense<0.000000e+00> : vector<64x32xf32>
    %153 = tpu.matmul %150, %152, %cst_96 {dimension_numbers = #tpu.dot_dimension_numbers<[1], [0], [0], [1], [0, 0, 1, 1], [], []>} : vector<64x32xf32>, vector<32x32xf32>, vector<64x32xf32> -> vector<64x32xf32>
    %c0_97 = arith.constant 0 : index
    %c0_98 = arith.constant 0 : index
    %154 = vector.load %arg11[%c0_97, %c0_98] : memref<1x32xf32, #tpu.memory_space<vmem>>, vector<1x32xf32>
    %155 = vector.broadcast %154 : vector<1x32xf32> to vector<64x32xf32>
    %156 = arith.addf %153, %155 : vector<64x32xf32>
    %157 = tpu.iota {dimensions = array<i32: 0>} : vector<64x64xi32>
    %158 = tpu.iota {dimensions = array<i32: 1>} : vector<64x64xi32>
    %c-32_i32 = arith.constant -32 : i32
    %159 = vector.broadcast %c-32_i32 : i32 to vector<64x64xi32>
    %160 = arith.addi %157, %159 : vector<64x64xi32>
    %161 = arith.cmpi eq, %158, %160 : vector<64x64xi32>
    %cst_99 = arith.constant 1.000000e+00 : f32
    %cst_100 = arith.constant 0.000000e+00 : f32
    %162 = vector.broadcast %cst_99 : f32 to vector<64x64xf32>
    %163 = vector.broadcast %cst_100 : f32 to vector<64x64xf32>
    %164 = arith.select %161, %162, %163 : vector<64x64xi1>, vector<64x64xf32>
    %c0_101 = arith.constant 0 : index
    %c0_102 = arith.constant 0 : index
    %c0_103 = arith.constant 0 : index
    %165 = vector.load %arg10[%c0_101, %c0_102, %c0_103] : memref<3x32x32xf32, #tpu.memory_space<vmem>>, vector<1x32x32xf32>
    %166 = vector.shape_cast %165 : vector<1x32x32xf32> to vector<32x32xf32>
    %cst_104 = arith.constant dense<0.000000e+00> : vector<64x32xf32>
    %167 = tpu.matmul %150, %166, %cst_104 {dimension_numbers = #tpu.dot_dimension_numbers<[1], [0], [0], [1], [0, 0, 1, 1], [], []>} : vector<64x32xf32>, vector<32x32xf32>, vector<64x32xf32> -> vector<64x32xf32>
    %cst_105 = arith.constant dense<0.000000e+00> : vector<64x32xf32>
    %168 = tpu.matmul %164, %167, %cst_105 {dimension_numbers = #tpu.dot_dimension_numbers<[1], [0], [0], [1], [0, 0, 1, 1], [], []>} : vector<64x64xf32>, vector<64x32xf32>, vector<64x32xf32> -> vector<64x32xf32>
    %169 = arith.addf %156, %168 : vector<64x32xf32>
    %170 = tpu.iota {dimensions = array<i32: 0>} : vector<64x64xi32>
    %171 = tpu.iota {dimensions = array<i32: 1>} : vector<64x64xi32>
    %c32_i32 = arith.constant 32 : i32
    %172 = vector.broadcast %c32_i32 : i32 to vector<64x64xi32>
    %173 = arith.addi %170, %172 : vector<64x64xi32>
    %174 = arith.cmpi eq, %171, %173 : vector<64x64xi32>
    %cst_106 = arith.constant 1.000000e+00 : f32
    %cst_107 = arith.constant 0.000000e+00 : f32
    %175 = vector.broadcast %cst_106 : f32 to vector<64x64xf32>
    %176 = vector.broadcast %cst_107 : f32 to vector<64x64xf32>
    %177 = arith.select %174, %175, %176 : vector<64x64xi1>, vector<64x64xf32>
    %c2_108 = arith.constant 2 : index
    %c0_109 = arith.constant 0 : index
    %c0_110 = arith.constant 0 : index
    %178 = vector.load %arg10[%c2_108, %c0_109, %c0_110] : memref<3x32x32xf32, #tpu.memory_space<vmem>>, vector<1x32x32xf32>
    %179 = vector.shape_cast %178 : vector<1x32x32xf32> to vector<32x32xf32>
    %cst_111 = arith.constant dense<0.000000e+00> : vector<64x32xf32>
    %180 = tpu.matmul %150, %179, %cst_111 {dimension_numbers = #tpu.dot_dimension_numbers<[1], [0], [0], [1], [0, 0, 1, 1], [], []>} : vector<64x32xf32>, vector<32x32xf32>, vector<64x32xf32> -> vector<64x32xf32>
    %cst_112 = arith.constant dense<0.000000e+00> : vector<64x32xf32>
    %181 = tpu.matmul %177, %180, %cst_112 {dimension_numbers = #tpu.dot_dimension_numbers<[1], [0], [0], [1], [0, 0, 1, 1], [], []>} : vector<64x64xf32>, vector<64x32xf32>, vector<64x32xf32> -> vector<64x32xf32>
    %182 = arith.addf %169, %181 : vector<64x32xf32>
    %cst_113 = arith.constant 0.000000e+00 : f32
    %183 = vector.broadcast %cst_113 : f32 to vector<64x32xf32>
    %184 = arith.maximumf %182, %183 : vector<64x32xf32>
    %c1_114 = arith.constant 1 : index
    %c0_115 = arith.constant 0 : index
    %c0_116 = arith.constant 0 : index
    %185 = vector.load %arg12[%c1_114, %c0_115, %c0_116] : memref<3x32x32xf32, #tpu.memory_space<vmem>>, vector<1x32x32xf32>
    %186 = vector.shape_cast %185 : vector<1x32x32xf32> to vector<32x32xf32>
    %cst_117 = arith.constant dense<0.000000e+00> : vector<64x32xf32>
    %187 = tpu.matmul %184, %186, %cst_117 {dimension_numbers = #tpu.dot_dimension_numbers<[1], [0], [0], [1], [0, 0, 1, 1], [], []>} : vector<64x32xf32>, vector<32x32xf32>, vector<64x32xf32> -> vector<64x32xf32>
    %c0_118 = arith.constant 0 : index
    %c0_119 = arith.constant 0 : index
    %188 = vector.load %arg13[%c0_118, %c0_119] : memref<1x32xf32, #tpu.memory_space<vmem>>, vector<1x32xf32>
    %189 = vector.broadcast %188 : vector<1x32xf32> to vector<64x32xf32>
    %190 = arith.addf %187, %189 : vector<64x32xf32>
    %191 = tpu.iota {dimensions = array<i32: 0>} : vector<64x64xi32>
    %192 = tpu.iota {dimensions = array<i32: 1>} : vector<64x64xi32>
    %c-32_i32_120 = arith.constant -32 : i32
    %193 = vector.broadcast %c-32_i32_120 : i32 to vector<64x64xi32>
    %194 = arith.addi %191, %193 : vector<64x64xi32>
    %195 = arith.cmpi eq, %192, %194 : vector<64x64xi32>
    %cst_121 = arith.constant 1.000000e+00 : f32
    %cst_122 = arith.constant 0.000000e+00 : f32
    %196 = vector.broadcast %cst_121 : f32 to vector<64x64xf32>
    %197 = vector.broadcast %cst_122 : f32 to vector<64x64xf32>
    %198 = arith.select %195, %196, %197 : vector<64x64xi1>, vector<64x64xf32>
    %c0_123 = arith.constant 0 : index
    %c0_124 = arith.constant 0 : index
    %c0_125 = arith.constant 0 : index
    %199 = vector.load %arg12[%c0_123, %c0_124, %c0_125] : memref<3x32x32xf32, #tpu.memory_space<vmem>>, vector<1x32x32xf32>
    %200 = vector.shape_cast %199 : vector<1x32x32xf32> to vector<32x32xf32>
    %cst_126 = arith.constant dense<0.000000e+00> : vector<64x32xf32>
    %201 = tpu.matmul %184, %200, %cst_126 {dimension_numbers = #tpu.dot_dimension_numbers<[1], [0], [0], [1], [0, 0, 1, 1], [], []>} : vector<64x32xf32>, vector<32x32xf32>, vector<64x32xf32> -> vector<64x32xf32>
    %cst_127 = arith.constant dense<0.000000e+00> : vector<64x32xf32>
    %202 = tpu.matmul %198, %201, %cst_127 {dimension_numbers = #tpu.dot_dimension_numbers<[1], [0], [0], [1], [0, 0, 1, 1], [], []>} : vector<64x64xf32>, vector<64x32xf32>, vector<64x32xf32> -> vector<64x32xf32>
    %203 = arith.addf %190, %202 : vector<64x32xf32>
    %204 = tpu.iota {dimensions = array<i32: 0>} : vector<64x64xi32>
    %205 = tpu.iota {dimensions = array<i32: 1>} : vector<64x64xi32>
    %c32_i32_128 = arith.constant 32 : i32
    %206 = vector.broadcast %c32_i32_128 : i32 to vector<64x64xi32>
    %207 = arith.addi %204, %206 : vector<64x64xi32>
    %208 = arith.cmpi eq, %205, %207 : vector<64x64xi32>
    %cst_129 = arith.constant 1.000000e+00 : f32
    %cst_130 = arith.constant 0.000000e+00 : f32
    %209 = vector.broadcast %cst_129 : f32 to vector<64x64xf32>
    %210 = vector.broadcast %cst_130 : f32 to vector<64x64xf32>
    %211 = arith.select %208, %209, %210 : vector<64x64xi1>, vector<64x64xf32>
    %c2_131 = arith.constant 2 : index
    %c0_132 = arith.constant 0 : index
    %c0_133 = arith.constant 0 : index
    %212 = vector.load %arg12[%c2_131, %c0_132, %c0_133] : memref<3x32x32xf32, #tpu.memory_space<vmem>>, vector<1x32x32xf32>
    %213 = vector.shape_cast %212 : vector<1x32x32xf32> to vector<32x32xf32>
    %cst_134 = arith.constant dense<0.000000e+00> : vector<64x32xf32>
    %214 = tpu.matmul %184, %213, %cst_134 {dimension_numbers = #tpu.dot_dimension_numbers<[1], [0], [0], [1], [0, 0, 1, 1], [], []>} : vector<64x32xf32>, vector<32x32xf32>, vector<64x32xf32> -> vector<64x32xf32>
    %cst_135 = arith.constant dense<0.000000e+00> : vector<64x32xf32>
    %215 = tpu.matmul %211, %214, %cst_135 {dimension_numbers = #tpu.dot_dimension_numbers<[1], [0], [0], [1], [0, 0, 1, 1], [], []>} : vector<64x64xf32>, vector<64x32xf32>, vector<64x32xf32> -> vector<64x32xf32>
    %216 = arith.addf %203, %215 : vector<64x32xf32>
    %cst_136 = arith.constant 0.000000e+00 : f32
    %217 = vector.broadcast %cst_136 : f32 to vector<64x32xf32>
    %218 = arith.maximumf %216, %217 : vector<64x32xf32>
    %219 = arith.addf %218, %150 : vector<64x32xf32>
    %cst_137 = arith.constant 0.000000e+00 : f32
    %220 = vector.broadcast %cst_137 : f32 to vector<64x32xf32>
    %221 = arith.maximumf %219, %220 : vector<64x32xf32>
    %c0_138 = arith.constant 0 : index
    %c0_139 = arith.constant 0 : index
    %222 = vector.load %arg14[%c0_138, %c0_139] : memref<32x128xf32, #tpu.memory_space<vmem>>, vector<32x128xf32>
    %cst_140 = arith.constant dense<0.000000e+00> : vector<64x128xf32>
    %223 = tpu.matmul %221, %222, %cst_140 {dimension_numbers = #tpu.dot_dimension_numbers<[1], [0], [0], [1], [0, 0, 1, 1], [], []>} : vector<64x32xf32>, vector<32x128xf32>, vector<64x128xf32> -> vector<64x128xf32>
    %c0_141 = arith.constant 0 : index
    %c0_142 = arith.constant 0 : index
    %224 = vector.load %arg16[%c0_141, %c0_142] : memref<1x128xf32, #tpu.memory_space<vmem>>, vector<1x128xf32>
    %225 = vector.broadcast %224 : vector<1x128xf32> to vector<64x128xf32>
    %226 = arith.addf %223, %225 : vector<64x128xf32>
    %c0_143 = arith.constant 0 : index
    %c0_144 = arith.constant 0 : index
    %227 = vector.load %arg15[%c0_143, %c0_144] : memref<32x128xf32, #tpu.memory_space<vmem>>, vector<32x128xf32>
    %cst_145 = arith.constant 0.000000e+00 : f32
    %228 = vector.broadcast %cst_145 : f32 to vector<8x32xf32>
    %cst_146 = arith.constant 0.000000e+00 : f32
    %229 = vector.broadcast %cst_146 : f32 to vector<8x32xf32>
    %230 = vector.extract_strided_slice %226 {offsets = [0, 0], sizes = [8, 128], strides = [1, 1]} : vector<64x128xf32> to vector<8x128xf32>
    %cst_147 = arith.constant dense<0.000000e+00> : vector<8x128xf32>
    %231 = tpu.matmul %228, %227, %cst_147 {dimension_numbers = #tpu.dot_dimension_numbers<[1], [0], [0], [1], [0, 0, 1, 1], [], []>} : vector<8x32xf32>, vector<32x128xf32>, vector<8x128xf32> -> vector<8x128xf32>
    %232 = arith.addf %230, %231 : vector<8x128xf32>
    %233 = vector.extract_strided_slice %232 {offsets = [0, 0], sizes = [8, 32], strides = [1, 1]} : vector<8x128xf32> to vector<8x32xf32>
    %234 = arith.negf %233 : vector<8x32xf32>
    %235 = math.exp %234 : vector<8x32xf32>
    %cst_148 = arith.constant 1.000000e+00 : f32
    %236 = vector.broadcast %cst_148 : f32 to vector<8x32xf32>
    %237 = arith.addf %236, %235 : vector<8x32xf32>
    %238 = arith.divf %236, %237 : vector<8x32xf32>
    %239 = vector.extract_strided_slice %232 {offsets = [0, 32], sizes = [8, 32], strides = [1, 1]} : vector<8x128xf32> to vector<8x32xf32>
    %240 = arith.negf %239 : vector<8x32xf32>
    %241 = math.exp %240 : vector<8x32xf32>
    %cst_149 = arith.constant 1.000000e+00 : f32
    %242 = vector.broadcast %cst_149 : f32 to vector<8x32xf32>
    %243 = arith.addf %242, %241 : vector<8x32xf32>
    %244 = arith.divf %242, %243 : vector<8x32xf32>
    %245 = vector.extract_strided_slice %232 {offsets = [0, 64], sizes = [8, 32], strides = [1, 1]} : vector<8x128xf32> to vector<8x32xf32>
    %246 = math.tanh %245 : vector<8x32xf32>
    %247 = vector.extract_strided_slice %232 {offsets = [0, 96], sizes = [8, 32], strides = [1, 1]} : vector<8x128xf32> to vector<8x32xf32>
    %248 = arith.negf %247 : vector<8x32xf32>
    %249 = math.exp %248 : vector<8x32xf32>
    %cst_150 = arith.constant 1.000000e+00 : f32
    %250 = vector.broadcast %cst_150 : f32 to vector<8x32xf32>
    %251 = arith.addf %250, %249 : vector<8x32xf32>
    %252 = arith.divf %250, %251 : vector<8x32xf32>
    %253 = arith.mulf %244, %229 : vector<8x32xf32>
    %254 = arith.mulf %238, %246 : vector<8x32xf32>
    %255 = arith.addf %253, %254 : vector<8x32xf32>
    %256 = math.tanh %255 : vector<8x32xf32>
    %257 = arith.mulf %252, %256 : vector<8x32xf32>
    %258 = vector.extract_strided_slice %226 {offsets = [8, 0], sizes = [8, 128], strides = [1, 1]} : vector<64x128xf32> to vector<8x128xf32>
    %cst_151 = arith.constant dense<0.000000e+00> : vector<8x128xf32>
    %259 = tpu.matmul %257, %227, %cst_151 {dimension_numbers = #tpu.dot_dimension_numbers<[1], [0], [0], [1], [0, 0, 1, 1], [], []>} : vector<8x32xf32>, vector<32x128xf32>, vector<8x128xf32> -> vector<8x128xf32>
    %260 = arith.addf %258, %259 : vector<8x128xf32>
    %261 = vector.extract_strided_slice %260 {offsets = [0, 0], sizes = [8, 32], strides = [1, 1]} : vector<8x128xf32> to vector<8x32xf32>
    %262 = arith.negf %261 : vector<8x32xf32>
    %263 = math.exp %262 : vector<8x32xf32>
    %cst_152 = arith.constant 1.000000e+00 : f32
    %264 = vector.broadcast %cst_152 : f32 to vector<8x32xf32>
    %265 = arith.addf %264, %263 : vector<8x32xf32>
    %266 = arith.divf %264, %265 : vector<8x32xf32>
    %267 = vector.extract_strided_slice %260 {offsets = [0, 32], sizes = [8, 32], strides = [1, 1]} : vector<8x128xf32> to vector<8x32xf32>
    %268 = arith.negf %267 : vector<8x32xf32>
    %269 = math.exp %268 : vector<8x32xf32>
    %cst_153 = arith.constant 1.000000e+00 : f32
    %270 = vector.broadcast %cst_153 : f32 to vector<8x32xf32>
    %271 = arith.addf %270, %269 : vector<8x32xf32>
    %272 = arith.divf %270, %271 : vector<8x32xf32>
    %273 = vector.extract_strided_slice %260 {offsets = [0, 64], sizes = [8, 32], strides = [1, 1]} : vector<8x128xf32> to vector<8x32xf32>
    %274 = math.tanh %273 : vector<8x32xf32>
    %275 = vector.extract_strided_slice %260 {offsets = [0, 96], sizes = [8, 32], strides = [1, 1]} : vector<8x128xf32> to vector<8x32xf32>
    %276 = arith.negf %275 : vector<8x32xf32>
    %277 = math.exp %276 : vector<8x32xf32>
    %cst_154 = arith.constant 1.000000e+00 : f32
    %278 = vector.broadcast %cst_154 : f32 to vector<8x32xf32>
    %279 = arith.addf %278, %277 : vector<8x32xf32>
    %280 = arith.divf %278, %279 : vector<8x32xf32>
    %281 = arith.mulf %272, %255 : vector<8x32xf32>
    %282 = arith.mulf %266, %274 : vector<8x32xf32>
    %283 = arith.addf %281, %282 : vector<8x32xf32>
    %284 = math.tanh %283 : vector<8x32xf32>
    %285 = arith.mulf %280, %284 : vector<8x32xf32>
    %286 = vector.extract_strided_slice %226 {offsets = [16, 0], sizes = [8, 128], strides = [1, 1]} : vector<64x128xf32> to vector<8x128xf32>
    %cst_155 = arith.constant dense<0.000000e+00> : vector<8x128xf32>
    %287 = tpu.matmul %285, %227, %cst_155 {dimension_numbers = #tpu.dot_dimension_numbers<[1], [0], [0], [1], [0, 0, 1, 1], [], []>} : vector<8x32xf32>, vector<32x128xf32>, vector<8x128xf32> -> vector<8x128xf32>
    %288 = arith.addf %286, %287 : vector<8x128xf32>
    %289 = vector.extract_strided_slice %288 {offsets = [0, 0], sizes = [8, 32], strides = [1, 1]} : vector<8x128xf32> to vector<8x32xf32>
    %290 = arith.negf %289 : vector<8x32xf32>
    %291 = math.exp %290 : vector<8x32xf32>
    %cst_156 = arith.constant 1.000000e+00 : f32
    %292 = vector.broadcast %cst_156 : f32 to vector<8x32xf32>
    %293 = arith.addf %292, %291 : vector<8x32xf32>
    %294 = arith.divf %292, %293 : vector<8x32xf32>
    %295 = vector.extract_strided_slice %288 {offsets = [0, 32], sizes = [8, 32], strides = [1, 1]} : vector<8x128xf32> to vector<8x32xf32>
    %296 = arith.negf %295 : vector<8x32xf32>
    %297 = math.exp %296 : vector<8x32xf32>
    %cst_157 = arith.constant 1.000000e+00 : f32
    %298 = vector.broadcast %cst_157 : f32 to vector<8x32xf32>
    %299 = arith.addf %298, %297 : vector<8x32xf32>
    %300 = arith.divf %298, %299 : vector<8x32xf32>
    %301 = vector.extract_strided_slice %288 {offsets = [0, 64], sizes = [8, 32], strides = [1, 1]} : vector<8x128xf32> to vector<8x32xf32>
    %302 = math.tanh %301 : vector<8x32xf32>
    %303 = vector.extract_strided_slice %288 {offsets = [0, 96], sizes = [8, 32], strides = [1, 1]} : vector<8x128xf32> to vector<8x32xf32>
    %304 = arith.negf %303 : vector<8x32xf32>
    %305 = math.exp %304 : vector<8x32xf32>
    %cst_158 = arith.constant 1.000000e+00 : f32
    %306 = vector.broadcast %cst_158 : f32 to vector<8x32xf32>
    %307 = arith.addf %306, %305 : vector<8x32xf32>
    %308 = arith.divf %306, %307 : vector<8x32xf32>
    %309 = arith.mulf %300, %283 : vector<8x32xf32>
    %310 = arith.mulf %294, %302 : vector<8x32xf32>
    %311 = arith.addf %309, %310 : vector<8x32xf32>
    %312 = math.tanh %311 : vector<8x32xf32>
    %313 = arith.mulf %308, %312 : vector<8x32xf32>
    %314 = vector.extract_strided_slice %226 {offsets = [24, 0], sizes = [8, 128], strides = [1, 1]} : vector<64x128xf32> to vector<8x128xf32>
    %cst_159 = arith.constant dense<0.000000e+00> : vector<8x128xf32>
    %315 = tpu.matmul %313, %227, %cst_159 {dimension_numbers = #tpu.dot_dimension_numbers<[1], [0], [0], [1], [0, 0, 1, 1], [], []>} : vector<8x32xf32>, vector<32x128xf32>, vector<8x128xf32> -> vector<8x128xf32>
    %316 = arith.addf %314, %315 : vector<8x128xf32>
    %317 = vector.extract_strided_slice %316 {offsets = [0, 0], sizes = [8, 32], strides = [1, 1]} : vector<8x128xf32> to vector<8x32xf32>
    %318 = arith.negf %317 : vector<8x32xf32>
    %319 = math.exp %318 : vector<8x32xf32>
    %cst_160 = arith.constant 1.000000e+00 : f32
    %320 = vector.broadcast %cst_160 : f32 to vector<8x32xf32>
    %321 = arith.addf %320, %319 : vector<8x32xf32>
    %322 = arith.divf %320, %321 : vector<8x32xf32>
    %323 = vector.extract_strided_slice %316 {offsets = [0, 32], sizes = [8, 32], strides = [1, 1]} : vector<8x128xf32> to vector<8x32xf32>
    %324 = arith.negf %323 : vector<8x32xf32>
    %325 = math.exp %324 : vector<8x32xf32>
    %cst_161 = arith.constant 1.000000e+00 : f32
    %326 = vector.broadcast %cst_161 : f32 to vector<8x32xf32>
    %327 = arith.addf %326, %325 : vector<8x32xf32>
    %328 = arith.divf %326, %327 : vector<8x32xf32>
    %329 = vector.extract_strided_slice %316 {offsets = [0, 64], sizes = [8, 32], strides = [1, 1]} : vector<8x128xf32> to vector<8x32xf32>
    %330 = math.tanh %329 : vector<8x32xf32>
    %331 = vector.extract_strided_slice %316 {offsets = [0, 96], sizes = [8, 32], strides = [1, 1]} : vector<8x128xf32> to vector<8x32xf32>
    %332 = arith.negf %331 : vector<8x32xf32>
    %333 = math.exp %332 : vector<8x32xf32>
    %cst_162 = arith.constant 1.000000e+00 : f32
    %334 = vector.broadcast %cst_162 : f32 to vector<8x32xf32>
    %335 = arith.addf %334, %333 : vector<8x32xf32>
    %336 = arith.divf %334, %335 : vector<8x32xf32>
    %337 = arith.mulf %328, %311 : vector<8x32xf32>
    %338 = arith.mulf %322, %330 : vector<8x32xf32>
    %339 = arith.addf %337, %338 : vector<8x32xf32>
    %340 = math.tanh %339 : vector<8x32xf32>
    %341 = arith.mulf %336, %340 : vector<8x32xf32>
    %342 = vector.extract_strided_slice %226 {offsets = [32, 0], sizes = [8, 128], strides = [1, 1]} : vector<64x128xf32> to vector<8x128xf32>
    %cst_163 = arith.constant dense<0.000000e+00> : vector<8x128xf32>
    %343 = tpu.matmul %341, %227, %cst_163 {dimension_numbers = #tpu.dot_dimension_numbers<[1], [0], [0], [1], [0, 0, 1, 1], [], []>} : vector<8x32xf32>, vector<32x128xf32>, vector<8x128xf32> -> vector<8x128xf32>
    %344 = arith.addf %342, %343 : vector<8x128xf32>
    %345 = vector.extract_strided_slice %344 {offsets = [0, 0], sizes = [8, 32], strides = [1, 1]} : vector<8x128xf32> to vector<8x32xf32>
    %346 = arith.negf %345 : vector<8x32xf32>
    %347 = math.exp %346 : vector<8x32xf32>
    %cst_164 = arith.constant 1.000000e+00 : f32
    %348 = vector.broadcast %cst_164 : f32 to vector<8x32xf32>
    %349 = arith.addf %348, %347 : vector<8x32xf32>
    %350 = arith.divf %348, %349 : vector<8x32xf32>
    %351 = vector.extract_strided_slice %344 {offsets = [0, 32], sizes = [8, 32], strides = [1, 1]} : vector<8x128xf32> to vector<8x32xf32>
    %352 = arith.negf %351 : vector<8x32xf32>
    %353 = math.exp %352 : vector<8x32xf32>
    %cst_165 = arith.constant 1.000000e+00 : f32
    %354 = vector.broadcast %cst_165 : f32 to vector<8x32xf32>
    %355 = arith.addf %354, %353 : vector<8x32xf32>
    %356 = arith.divf %354, %355 : vector<8x32xf32>
    %357 = vector.extract_strided_slice %344 {offsets = [0, 64], sizes = [8, 32], strides = [1, 1]} : vector<8x128xf32> to vector<8x32xf32>
    %358 = math.tanh %357 : vector<8x32xf32>
    %359 = vector.extract_strided_slice %344 {offsets = [0, 96], sizes = [8, 32], strides = [1, 1]} : vector<8x128xf32> to vector<8x32xf32>
    %360 = arith.negf %359 : vector<8x32xf32>
    %361 = math.exp %360 : vector<8x32xf32>
    %cst_166 = arith.constant 1.000000e+00 : f32
    %362 = vector.broadcast %cst_166 : f32 to vector<8x32xf32>
    %363 = arith.addf %362, %361 : vector<8x32xf32>
    %364 = arith.divf %362, %363 : vector<8x32xf32>
    %365 = arith.mulf %356, %339 : vector<8x32xf32>
    %366 = arith.mulf %350, %358 : vector<8x32xf32>
    %367 = arith.addf %365, %366 : vector<8x32xf32>
    %368 = math.tanh %367 : vector<8x32xf32>
    %369 = arith.mulf %364, %368 : vector<8x32xf32>
    %370 = vector.extract_strided_slice %226 {offsets = [40, 0], sizes = [8, 128], strides = [1, 1]} : vector<64x128xf32> to vector<8x128xf32>
    %cst_167 = arith.constant dense<0.000000e+00> : vector<8x128xf32>
    %371 = tpu.matmul %369, %227, %cst_167 {dimension_numbers = #tpu.dot_dimension_numbers<[1], [0], [0], [1], [0, 0, 1, 1], [], []>} : vector<8x32xf32>, vector<32x128xf32>, vector<8x128xf32> -> vector<8x128xf32>
    %372 = arith.addf %370, %371 : vector<8x128xf32>
    %373 = vector.extract_strided_slice %372 {offsets = [0, 0], sizes = [8, 32], strides = [1, 1]} : vector<8x128xf32> to vector<8x32xf32>
    %374 = arith.negf %373 : vector<8x32xf32>
    %375 = math.exp %374 : vector<8x32xf32>
    %cst_168 = arith.constant 1.000000e+00 : f32
    %376 = vector.broadcast %cst_168 : f32 to vector<8x32xf32>
    %377 = arith.addf %376, %375 : vector<8x32xf32>
    %378 = arith.divf %376, %377 : vector<8x32xf32>
    %379 = vector.extract_strided_slice %372 {offsets = [0, 32], sizes = [8, 32], strides = [1, 1]} : vector<8x128xf32> to vector<8x32xf32>
    %380 = arith.negf %379 : vector<8x32xf32>
    %381 = math.exp %380 : vector<8x32xf32>
    %cst_169 = arith.constant 1.000000e+00 : f32
    %382 = vector.broadcast %cst_169 : f32 to vector<8x32xf32>
    %383 = arith.addf %382, %381 : vector<8x32xf32>
    %384 = arith.divf %382, %383 : vector<8x32xf32>
    %385 = vector.extract_strided_slice %372 {offsets = [0, 64], sizes = [8, 32], strides = [1, 1]} : vector<8x128xf32> to vector<8x32xf32>
    %386 = math.tanh %385 : vector<8x32xf32>
    %387 = vector.extract_strided_slice %372 {offsets = [0, 96], sizes = [8, 32], strides = [1, 1]} : vector<8x128xf32> to vector<8x32xf32>
    %388 = arith.negf %387 : vector<8x32xf32>
    %389 = math.exp %388 : vector<8x32xf32>
    %cst_170 = arith.constant 1.000000e+00 : f32
    %390 = vector.broadcast %cst_170 : f32 to vector<8x32xf32>
    %391 = arith.addf %390, %389 : vector<8x32xf32>
    %392 = arith.divf %390, %391 : vector<8x32xf32>
    %393 = arith.mulf %384, %367 : vector<8x32xf32>
    %394 = arith.mulf %378, %386 : vector<8x32xf32>
    %395 = arith.addf %393, %394 : vector<8x32xf32>
    %396 = math.tanh %395 : vector<8x32xf32>
    %397 = arith.mulf %392, %396 : vector<8x32xf32>
    %398 = vector.extract_strided_slice %226 {offsets = [48, 0], sizes = [8, 128], strides = [1, 1]} : vector<64x128xf32> to vector<8x128xf32>
    %cst_171 = arith.constant dense<0.000000e+00> : vector<8x128xf32>
    %399 = tpu.matmul %397, %227, %cst_171 {dimension_numbers = #tpu.dot_dimension_numbers<[1], [0], [0], [1], [0, 0, 1, 1], [], []>} : vector<8x32xf32>, vector<32x128xf32>, vector<8x128xf32> -> vector<8x128xf32>
    %400 = arith.addf %398, %399 : vector<8x128xf32>
    %401 = vector.extract_strided_slice %400 {offsets = [0, 0], sizes = [8, 32], strides = [1, 1]} : vector<8x128xf32> to vector<8x32xf32>
    %402 = arith.negf %401 : vector<8x32xf32>
    %403 = math.exp %402 : vector<8x32xf32>
    %cst_172 = arith.constant 1.000000e+00 : f32
    %404 = vector.broadcast %cst_172 : f32 to vector<8x32xf32>
    %405 = arith.addf %404, %403 : vector<8x32xf32>
    %406 = arith.divf %404, %405 : vector<8x32xf32>
    %407 = vector.extract_strided_slice %400 {offsets = [0, 32], sizes = [8, 32], strides = [1, 1]} : vector<8x128xf32> to vector<8x32xf32>
    %408 = arith.negf %407 : vector<8x32xf32>
    %409 = math.exp %408 : vector<8x32xf32>
    %cst_173 = arith.constant 1.000000e+00 : f32
    %410 = vector.broadcast %cst_173 : f32 to vector<8x32xf32>
    %411 = arith.addf %410, %409 : vector<8x32xf32>
    %412 = arith.divf %410, %411 : vector<8x32xf32>
    %413 = vector.extract_strided_slice %400 {offsets = [0, 64], sizes = [8, 32], strides = [1, 1]} : vector<8x128xf32> to vector<8x32xf32>
    %414 = math.tanh %413 : vector<8x32xf32>
    %415 = vector.extract_strided_slice %400 {offsets = [0, 96], sizes = [8, 32], strides = [1, 1]} : vector<8x128xf32> to vector<8x32xf32>
    %416 = arith.negf %415 : vector<8x32xf32>
    %417 = math.exp %416 : vector<8x32xf32>
    %cst_174 = arith.constant 1.000000e+00 : f32
    %418 = vector.broadcast %cst_174 : f32 to vector<8x32xf32>
    %419 = arith.addf %418, %417 : vector<8x32xf32>
    %420 = arith.divf %418, %419 : vector<8x32xf32>
    %421 = arith.mulf %412, %395 : vector<8x32xf32>
    %422 = arith.mulf %406, %414 : vector<8x32xf32>
    %423 = arith.addf %421, %422 : vector<8x32xf32>
    %424 = math.tanh %423 : vector<8x32xf32>
    %425 = arith.mulf %420, %424 : vector<8x32xf32>
    %426 = vector.extract_strided_slice %226 {offsets = [56, 0], sizes = [8, 128], strides = [1, 1]} : vector<64x128xf32> to vector<8x128xf32>
    %cst_175 = arith.constant dense<0.000000e+00> : vector<8x128xf32>
    %427 = tpu.matmul %425, %227, %cst_175 {dimension_numbers = #tpu.dot_dimension_numbers<[1], [0], [0], [1], [0, 0, 1, 1], [], []>} : vector<8x32xf32>, vector<32x128xf32>, vector<8x128xf32> -> vector<8x128xf32>
    %428 = arith.addf %426, %427 : vector<8x128xf32>
    %429 = vector.extract_strided_slice %428 {offsets = [0, 0], sizes = [8, 32], strides = [1, 1]} : vector<8x128xf32> to vector<8x32xf32>
    %430 = arith.negf %429 : vector<8x32xf32>
    %431 = math.exp %430 : vector<8x32xf32>
    %cst_176 = arith.constant 1.000000e+00 : f32
    %432 = vector.broadcast %cst_176 : f32 to vector<8x32xf32>
    %433 = arith.addf %432, %431 : vector<8x32xf32>
    %434 = arith.divf %432, %433 : vector<8x32xf32>
    %435 = vector.extract_strided_slice %428 {offsets = [0, 32], sizes = [8, 32], strides = [1, 1]} : vector<8x128xf32> to vector<8x32xf32>
    %436 = arith.negf %435 : vector<8x32xf32>
    %437 = math.exp %436 : vector<8x32xf32>
    %cst_177 = arith.constant 1.000000e+00 : f32
    %438 = vector.broadcast %cst_177 : f32 to vector<8x32xf32>
    %439 = arith.addf %438, %437 : vector<8x32xf32>
    %440 = arith.divf %438, %439 : vector<8x32xf32>
    %441 = vector.extract_strided_slice %428 {offsets = [0, 64], sizes = [8, 32], strides = [1, 1]} : vector<8x128xf32> to vector<8x32xf32>
    %442 = math.tanh %441 : vector<8x32xf32>
    %443 = vector.extract_strided_slice %428 {offsets = [0, 96], sizes = [8, 32], strides = [1, 1]} : vector<8x128xf32> to vector<8x32xf32>
    %444 = arith.negf %443 : vector<8x32xf32>
    %445 = math.exp %444 : vector<8x32xf32>
    %cst_178 = arith.constant 1.000000e+00 : f32
    %446 = vector.broadcast %cst_178 : f32 to vector<8x32xf32>
    %447 = arith.addf %446, %445 : vector<8x32xf32>
    %448 = arith.divf %446, %447 : vector<8x32xf32>
    %449 = arith.mulf %440, %423 : vector<8x32xf32>
    %450 = arith.mulf %434, %442 : vector<8x32xf32>
    %451 = arith.addf %449, %450 : vector<8x32xf32>
    %452 = math.tanh %451 : vector<8x32xf32>
    %453 = arith.mulf %448, %452 : vector<8x32xf32>
    %c0_179 = arith.constant 0 : index
    %c0_180 = arith.constant 0 : index
    %454 = vector.load %arg17[%c0_179, %c0_180] : memref<32x128xf32, #tpu.memory_space<vmem>>, vector<32x128xf32>
    %cst_181 = arith.constant dense<0.000000e+00> : vector<64x128xf32>
    %455 = tpu.matmul %221, %454, %cst_181 {dimension_numbers = #tpu.dot_dimension_numbers<[1], [0], [0], [1], [0, 0, 1, 1], [], []>} : vector<64x32xf32>, vector<32x128xf32>, vector<64x128xf32> -> vector<64x128xf32>
    %c0_182 = arith.constant 0 : index
    %c0_183 = arith.constant 0 : index
    %456 = vector.load %arg19[%c0_182, %c0_183] : memref<1x128xf32, #tpu.memory_space<vmem>>, vector<1x128xf32>
    %457 = vector.broadcast %456 : vector<1x128xf32> to vector<64x128xf32>
    %458 = arith.addf %455, %457 : vector<64x128xf32>
    %c0_184 = arith.constant 0 : index
    %c0_185 = arith.constant 0 : index
    %459 = vector.load %arg18[%c0_184, %c0_185] : memref<32x128xf32, #tpu.memory_space<vmem>>, vector<32x128xf32>
    %cst_186 = arith.constant 0.000000e+00 : f32
    %460 = vector.broadcast %cst_186 : f32 to vector<8x32xf32>
    %cst_187 = arith.constant 0.000000e+00 : f32
    %461 = vector.broadcast %cst_187 : f32 to vector<8x32xf32>
    %462 = vector.extract_strided_slice %458 {offsets = [56, 0], sizes = [8, 128], strides = [1, 1]} : vector<64x128xf32> to vector<8x128xf32>
    %cst_188 = arith.constant dense<0.000000e+00> : vector<8x128xf32>
    %463 = tpu.matmul %460, %459, %cst_188 {dimension_numbers = #tpu.dot_dimension_numbers<[1], [0], [0], [1], [0, 0, 1, 1], [], []>} : vector<8x32xf32>, vector<32x128xf32>, vector<8x128xf32> -> vector<8x128xf32>
    %464 = arith.addf %462, %463 : vector<8x128xf32>
    %465 = vector.extract_strided_slice %464 {offsets = [0, 0], sizes = [8, 32], strides = [1, 1]} : vector<8x128xf32> to vector<8x32xf32>
    %466 = arith.negf %465 : vector<8x32xf32>
    %467 = math.exp %466 : vector<8x32xf32>
    %cst_189 = arith.constant 1.000000e+00 : f32
    %468 = vector.broadcast %cst_189 : f32 to vector<8x32xf32>
    %469 = arith.addf %468, %467 : vector<8x32xf32>
    %470 = arith.divf %468, %469 : vector<8x32xf32>
    %471 = vector.extract_strided_slice %464 {offsets = [0, 32], sizes = [8, 32], strides = [1, 1]} : vector<8x128xf32> to vector<8x32xf32>
    %472 = arith.negf %471 : vector<8x32xf32>
    %473 = math.exp %472 : vector<8x32xf32>
    %cst_190 = arith.constant 1.000000e+00 : f32
    %474 = vector.broadcast %cst_190 : f32 to vector<8x32xf32>
    %475 = arith.addf %474, %473 : vector<8x32xf32>
    %476 = arith.divf %474, %475 : vector<8x32xf32>
    %477 = vector.extract_strided_slice %464 {offsets = [0, 64], sizes = [8, 32], strides = [1, 1]} : vector<8x128xf32> to vector<8x32xf32>
    %478 = math.tanh %477 : vector<8x32xf32>
    %479 = vector.extract_strided_slice %464 {offsets = [0, 96], sizes = [8, 32], strides = [1, 1]} : vector<8x128xf32> to vector<8x32xf32>
    %480 = arith.negf %479 : vector<8x32xf32>
    %481 = math.exp %480 : vector<8x32xf32>
    %cst_191 = arith.constant 1.000000e+00 : f32
    %482 = vector.broadcast %cst_191 : f32 to vector<8x32xf32>
    %483 = arith.addf %482, %481 : vector<8x32xf32>
    %484 = arith.divf %482, %483 : vector<8x32xf32>
    %485 = arith.mulf %476, %461 : vector<8x32xf32>
    %486 = arith.mulf %470, %478 : vector<8x32xf32>
    %487 = arith.addf %485, %486 : vector<8x32xf32>
    %488 = math.tanh %487 : vector<8x32xf32>
    %489 = arith.mulf %484, %488 : vector<8x32xf32>
    %490 = vector.extract_strided_slice %458 {offsets = [48, 0], sizes = [8, 128], strides = [1, 1]} : vector<64x128xf32> to vector<8x128xf32>
    %cst_192 = arith.constant dense<0.000000e+00> : vector<8x128xf32>
    %491 = tpu.matmul %489, %459, %cst_192 {dimension_numbers = #tpu.dot_dimension_numbers<[1], [0], [0], [1], [0, 0, 1, 1], [], []>} : vector<8x32xf32>, vector<32x128xf32>, vector<8x128xf32> -> vector<8x128xf32>
    %492 = arith.addf %490, %491 : vector<8x128xf32>
    %493 = vector.extract_strided_slice %492 {offsets = [0, 0], sizes = [8, 32], strides = [1, 1]} : vector<8x128xf32> to vector<8x32xf32>
    %494 = arith.negf %493 : vector<8x32xf32>
    %495 = math.exp %494 : vector<8x32xf32>
    %cst_193 = arith.constant 1.000000e+00 : f32
    %496 = vector.broadcast %cst_193 : f32 to vector<8x32xf32>
    %497 = arith.addf %496, %495 : vector<8x32xf32>
    %498 = arith.divf %496, %497 : vector<8x32xf32>
    %499 = vector.extract_strided_slice %492 {offsets = [0, 32], sizes = [8, 32], strides = [1, 1]} : vector<8x128xf32> to vector<8x32xf32>
    %500 = arith.negf %499 : vector<8x32xf32>
    %501 = math.exp %500 : vector<8x32xf32>
    %cst_194 = arith.constant 1.000000e+00 : f32
    %502 = vector.broadcast %cst_194 : f32 to vector<8x32xf32>
    %503 = arith.addf %502, %501 : vector<8x32xf32>
    %504 = arith.divf %502, %503 : vector<8x32xf32>
    %505 = vector.extract_strided_slice %492 {offsets = [0, 64], sizes = [8, 32], strides = [1, 1]} : vector<8x128xf32> to vector<8x32xf32>
    %506 = math.tanh %505 : vector<8x32xf32>
    %507 = vector.extract_strided_slice %492 {offsets = [0, 96], sizes = [8, 32], strides = [1, 1]} : vector<8x128xf32> to vector<8x32xf32>
    %508 = arith.negf %507 : vector<8x32xf32>
    %509 = math.exp %508 : vector<8x32xf32>
    %cst_195 = arith.constant 1.000000e+00 : f32
    %510 = vector.broadcast %cst_195 : f32 to vector<8x32xf32>
    %511 = arith.addf %510, %509 : vector<8x32xf32>
    %512 = arith.divf %510, %511 : vector<8x32xf32>
    %513 = arith.mulf %504, %487 : vector<8x32xf32>
    %514 = arith.mulf %498, %506 : vector<8x32xf32>
    %515 = arith.addf %513, %514 : vector<8x32xf32>
    %516 = math.tanh %515 : vector<8x32xf32>
    %517 = arith.mulf %512, %516 : vector<8x32xf32>
    %518 = vector.extract_strided_slice %458 {offsets = [40, 0], sizes = [8, 128], strides = [1, 1]} : vector<64x128xf32> to vector<8x128xf32>
    %cst_196 = arith.constant dense<0.000000e+00> : vector<8x128xf32>
    %519 = tpu.matmul %517, %459, %cst_196 {dimension_numbers = #tpu.dot_dimension_numbers<[1], [0], [0], [1], [0, 0, 1, 1], [], []>} : vector<8x32xf32>, vector<32x128xf32>, vector<8x128xf32> -> vector<8x128xf32>
    %520 = arith.addf %518, %519 : vector<8x128xf32>
    %521 = vector.extract_strided_slice %520 {offsets = [0, 0], sizes = [8, 32], strides = [1, 1]} : vector<8x128xf32> to vector<8x32xf32>
    %522 = arith.negf %521 : vector<8x32xf32>
    %523 = math.exp %522 : vector<8x32xf32>
    %cst_197 = arith.constant 1.000000e+00 : f32
    %524 = vector.broadcast %cst_197 : f32 to vector<8x32xf32>
    %525 = arith.addf %524, %523 : vector<8x32xf32>
    %526 = arith.divf %524, %525 : vector<8x32xf32>
    %527 = vector.extract_strided_slice %520 {offsets = [0, 32], sizes = [8, 32], strides = [1, 1]} : vector<8x128xf32> to vector<8x32xf32>
    %528 = arith.negf %527 : vector<8x32xf32>
    %529 = math.exp %528 : vector<8x32xf32>
    %cst_198 = arith.constant 1.000000e+00 : f32
    %530 = vector.broadcast %cst_198 : f32 to vector<8x32xf32>
    %531 = arith.addf %530, %529 : vector<8x32xf32>
    %532 = arith.divf %530, %531 : vector<8x32xf32>
    %533 = vector.extract_strided_slice %520 {offsets = [0, 64], sizes = [8, 32], strides = [1, 1]} : vector<8x128xf32> to vector<8x32xf32>
    %534 = math.tanh %533 : vector<8x32xf32>
    %535 = vector.extract_strided_slice %520 {offsets = [0, 96], sizes = [8, 32], strides = [1, 1]} : vector<8x128xf32> to vector<8x32xf32>
    %536 = arith.negf %535 : vector<8x32xf32>
    %537 = math.exp %536 : vector<8x32xf32>
    %cst_199 = arith.constant 1.000000e+00 : f32
    %538 = vector.broadcast %cst_199 : f32 to vector<8x32xf32>
    %539 = arith.addf %538, %537 : vector<8x32xf32>
    %540 = arith.divf %538, %539 : vector<8x32xf32>
    %541 = arith.mulf %532, %515 : vector<8x32xf32>
    %542 = arith.mulf %526, %534 : vector<8x32xf32>
    %543 = arith.addf %541, %542 : vector<8x32xf32>
    %544 = math.tanh %543 : vector<8x32xf32>
    %545 = arith.mulf %540, %544 : vector<8x32xf32>
    %546 = vector.extract_strided_slice %458 {offsets = [32, 0], sizes = [8, 128], strides = [1, 1]} : vector<64x128xf32> to vector<8x128xf32>
    %cst_200 = arith.constant dense<0.000000e+00> : vector<8x128xf32>
    %547 = tpu.matmul %545, %459, %cst_200 {dimension_numbers = #tpu.dot_dimension_numbers<[1], [0], [0], [1], [0, 0, 1, 1], [], []>} : vector<8x32xf32>, vector<32x128xf32>, vector<8x128xf32> -> vector<8x128xf32>
    %548 = arith.addf %546, %547 : vector<8x128xf32>
    %549 = vector.extract_strided_slice %548 {offsets = [0, 0], sizes = [8, 32], strides = [1, 1]} : vector<8x128xf32> to vector<8x32xf32>
    %550 = arith.negf %549 : vector<8x32xf32>
    %551 = math.exp %550 : vector<8x32xf32>
    %cst_201 = arith.constant 1.000000e+00 : f32
    %552 = vector.broadcast %cst_201 : f32 to vector<8x32xf32>
    %553 = arith.addf %552, %551 : vector<8x32xf32>
    %554 = arith.divf %552, %553 : vector<8x32xf32>
    %555 = vector.extract_strided_slice %548 {offsets = [0, 32], sizes = [8, 32], strides = [1, 1]} : vector<8x128xf32> to vector<8x32xf32>
    %556 = arith.negf %555 : vector<8x32xf32>
    %557 = math.exp %556 : vector<8x32xf32>
    %cst_202 = arith.constant 1.000000e+00 : f32
    %558 = vector.broadcast %cst_202 : f32 to vector<8x32xf32>
    %559 = arith.addf %558, %557 : vector<8x32xf32>
    %560 = arith.divf %558, %559 : vector<8x32xf32>
    %561 = vector.extract_strided_slice %548 {offsets = [0, 64], sizes = [8, 32], strides = [1, 1]} : vector<8x128xf32> to vector<8x32xf32>
    %562 = math.tanh %561 : vector<8x32xf32>
    %563 = vector.extract_strided_slice %548 {offsets = [0, 96], sizes = [8, 32], strides = [1, 1]} : vector<8x128xf32> to vector<8x32xf32>
    %564 = arith.negf %563 : vector<8x32xf32>
    %565 = math.exp %564 : vector<8x32xf32>
    %cst_203 = arith.constant 1.000000e+00 : f32
    %566 = vector.broadcast %cst_203 : f32 to vector<8x32xf32>
    %567 = arith.addf %566, %565 : vector<8x32xf32>
    %568 = arith.divf %566, %567 : vector<8x32xf32>
    %569 = arith.mulf %560, %543 : vector<8x32xf32>
    %570 = arith.mulf %554, %562 : vector<8x32xf32>
    %571 = arith.addf %569, %570 : vector<8x32xf32>
    %572 = math.tanh %571 : vector<8x32xf32>
    %573 = arith.mulf %568, %572 : vector<8x32xf32>
    %574 = vector.extract_strided_slice %458 {offsets = [24, 0], sizes = [8, 128], strides = [1, 1]} : vector<64x128xf32> to vector<8x128xf32>
    %cst_204 = arith.constant dense<0.000000e+00> : vector<8x128xf32>
    %575 = tpu.matmul %573, %459, %cst_204 {dimension_numbers = #tpu.dot_dimension_numbers<[1], [0], [0], [1], [0, 0, 1, 1], [], []>} : vector<8x32xf32>, vector<32x128xf32>, vector<8x128xf32> -> vector<8x128xf32>
    %576 = arith.addf %574, %575 : vector<8x128xf32>
    %577 = vector.extract_strided_slice %576 {offsets = [0, 0], sizes = [8, 32], strides = [1, 1]} : vector<8x128xf32> to vector<8x32xf32>
    %578 = arith.negf %577 : vector<8x32xf32>
    %579 = math.exp %578 : vector<8x32xf32>
    %cst_205 = arith.constant 1.000000e+00 : f32
    %580 = vector.broadcast %cst_205 : f32 to vector<8x32xf32>
    %581 = arith.addf %580, %579 : vector<8x32xf32>
    %582 = arith.divf %580, %581 : vector<8x32xf32>
    %583 = vector.extract_strided_slice %576 {offsets = [0, 32], sizes = [8, 32], strides = [1, 1]} : vector<8x128xf32> to vector<8x32xf32>
    %584 = arith.negf %583 : vector<8x32xf32>
    %585 = math.exp %584 : vector<8x32xf32>
    %cst_206 = arith.constant 1.000000e+00 : f32
    %586 = vector.broadcast %cst_206 : f32 to vector<8x32xf32>
    %587 = arith.addf %586, %585 : vector<8x32xf32>
    %588 = arith.divf %586, %587 : vector<8x32xf32>
    %589 = vector.extract_strided_slice %576 {offsets = [0, 64], sizes = [8, 32], strides = [1, 1]} : vector<8x128xf32> to vector<8x32xf32>
    %590 = math.tanh %589 : vector<8x32xf32>
    %591 = vector.extract_strided_slice %576 {offsets = [0, 96], sizes = [8, 32], strides = [1, 1]} : vector<8x128xf32> to vector<8x32xf32>
    %592 = arith.negf %591 : vector<8x32xf32>
    %593 = math.exp %592 : vector<8x32xf32>
    %cst_207 = arith.constant 1.000000e+00 : f32
    %594 = vector.broadcast %cst_207 : f32 to vector<8x32xf32>
    %595 = arith.addf %594, %593 : vector<8x32xf32>
    %596 = arith.divf %594, %595 : vector<8x32xf32>
    %597 = arith.mulf %588, %571 : vector<8x32xf32>
    %598 = arith.mulf %582, %590 : vector<8x32xf32>
    %599 = arith.addf %597, %598 : vector<8x32xf32>
    %600 = math.tanh %599 : vector<8x32xf32>
    %601 = arith.mulf %596, %600 : vector<8x32xf32>
    %602 = vector.extract_strided_slice %458 {offsets = [16, 0], sizes = [8, 128], strides = [1, 1]} : vector<64x128xf32> to vector<8x128xf32>
    %cst_208 = arith.constant dense<0.000000e+00> : vector<8x128xf32>
    %603 = tpu.matmul %601, %459, %cst_208 {dimension_numbers = #tpu.dot_dimension_numbers<[1], [0], [0], [1], [0, 0, 1, 1], [], []>} : vector<8x32xf32>, vector<32x128xf32>, vector<8x128xf32> -> vector<8x128xf32>
    %604 = arith.addf %602, %603 : vector<8x128xf32>
    %605 = vector.extract_strided_slice %604 {offsets = [0, 0], sizes = [8, 32], strides = [1, 1]} : vector<8x128xf32> to vector<8x32xf32>
    %606 = arith.negf %605 : vector<8x32xf32>
    %607 = math.exp %606 : vector<8x32xf32>
    %cst_209 = arith.constant 1.000000e+00 : f32
    %608 = vector.broadcast %cst_209 : f32 to vector<8x32xf32>
    %609 = arith.addf %608, %607 : vector<8x32xf32>
    %610 = arith.divf %608, %609 : vector<8x32xf32>
    %611 = vector.extract_strided_slice %604 {offsets = [0, 32], sizes = [8, 32], strides = [1, 1]} : vector<8x128xf32> to vector<8x32xf32>
    %612 = arith.negf %611 : vector<8x32xf32>
    %613 = math.exp %612 : vector<8x32xf32>
    %cst_210 = arith.constant 1.000000e+00 : f32
    %614 = vector.broadcast %cst_210 : f32 to vector<8x32xf32>
    %615 = arith.addf %614, %613 : vector<8x32xf32>
    %616 = arith.divf %614, %615 : vector<8x32xf32>
    %617 = vector.extract_strided_slice %604 {offsets = [0, 64], sizes = [8, 32], strides = [1, 1]} : vector<8x128xf32> to vector<8x32xf32>
    %618 = math.tanh %617 : vector<8x32xf32>
    %619 = vector.extract_strided_slice %604 {offsets = [0, 96], sizes = [8, 32], strides = [1, 1]} : vector<8x128xf32> to vector<8x32xf32>
    %620 = arith.negf %619 : vector<8x32xf32>
    %621 = math.exp %620 : vector<8x32xf32>
    %cst_211 = arith.constant 1.000000e+00 : f32
    %622 = vector.broadcast %cst_211 : f32 to vector<8x32xf32>
    %623 = arith.addf %622, %621 : vector<8x32xf32>
    %624 = arith.divf %622, %623 : vector<8x32xf32>
    %625 = arith.mulf %616, %599 : vector<8x32xf32>
    %626 = arith.mulf %610, %618 : vector<8x32xf32>
    %627 = arith.addf %625, %626 : vector<8x32xf32>
    %628 = math.tanh %627 : vector<8x32xf32>
    %629 = arith.mulf %624, %628 : vector<8x32xf32>
    %630 = vector.extract_strided_slice %458 {offsets = [8, 0], sizes = [8, 128], strides = [1, 1]} : vector<64x128xf32> to vector<8x128xf32>
    %cst_212 = arith.constant dense<0.000000e+00> : vector<8x128xf32>
    %631 = tpu.matmul %629, %459, %cst_212 {dimension_numbers = #tpu.dot_dimension_numbers<[1], [0], [0], [1], [0, 0, 1, 1], [], []>} : vector<8x32xf32>, vector<32x128xf32>, vector<8x128xf32> -> vector<8x128xf32>
    %632 = arith.addf %630, %631 : vector<8x128xf32>
    %633 = vector.extract_strided_slice %632 {offsets = [0, 0], sizes = [8, 32], strides = [1, 1]} : vector<8x128xf32> to vector<8x32xf32>
    %634 = arith.negf %633 : vector<8x32xf32>
    %635 = math.exp %634 : vector<8x32xf32>
    %cst_213 = arith.constant 1.000000e+00 : f32
    %636 = vector.broadcast %cst_213 : f32 to vector<8x32xf32>
    %637 = arith.addf %636, %635 : vector<8x32xf32>
    %638 = arith.divf %636, %637 : vector<8x32xf32>
    %639 = vector.extract_strided_slice %632 {offsets = [0, 32], sizes = [8, 32], strides = [1, 1]} : vector<8x128xf32> to vector<8x32xf32>
    %640 = arith.negf %639 : vector<8x32xf32>
    %641 = math.exp %640 : vector<8x32xf32>
    %cst_214 = arith.constant 1.000000e+00 : f32
    %642 = vector.broadcast %cst_214 : f32 to vector<8x32xf32>
    %643 = arith.addf %642, %641 : vector<8x32xf32>
    %644 = arith.divf %642, %643 : vector<8x32xf32>
    %645 = vector.extract_strided_slice %632 {offsets = [0, 64], sizes = [8, 32], strides = [1, 1]} : vector<8x128xf32> to vector<8x32xf32>
    %646 = math.tanh %645 : vector<8x32xf32>
    %647 = vector.extract_strided_slice %632 {offsets = [0, 96], sizes = [8, 32], strides = [1, 1]} : vector<8x128xf32> to vector<8x32xf32>
    %648 = arith.negf %647 : vector<8x32xf32>
    %649 = math.exp %648 : vector<8x32xf32>
    %cst_215 = arith.constant 1.000000e+00 : f32
    %650 = vector.broadcast %cst_215 : f32 to vector<8x32xf32>
    %651 = arith.addf %650, %649 : vector<8x32xf32>
    %652 = arith.divf %650, %651 : vector<8x32xf32>
    %653 = arith.mulf %644, %627 : vector<8x32xf32>
    %654 = arith.mulf %638, %646 : vector<8x32xf32>
    %655 = arith.addf %653, %654 : vector<8x32xf32>
    %656 = math.tanh %655 : vector<8x32xf32>
    %657 = arith.mulf %652, %656 : vector<8x32xf32>
    %658 = vector.extract_strided_slice %458 {offsets = [0, 0], sizes = [8, 128], strides = [1, 1]} : vector<64x128xf32> to vector<8x128xf32>
    %cst_216 = arith.constant dense<0.000000e+00> : vector<8x128xf32>
    %659 = tpu.matmul %657, %459, %cst_216 {dimension_numbers = #tpu.dot_dimension_numbers<[1], [0], [0], [1], [0, 0, 1, 1], [], []>} : vector<8x32xf32>, vector<32x128xf32>, vector<8x128xf32> -> vector<8x128xf32>
    %660 = arith.addf %658, %659 : vector<8x128xf32>
    %661 = vector.extract_strided_slice %660 {offsets = [0, 0], sizes = [8, 32], strides = [1, 1]} : vector<8x128xf32> to vector<8x32xf32>
    %662 = arith.negf %661 : vector<8x32xf32>
    %663 = math.exp %662 : vector<8x32xf32>
    %cst_217 = arith.constant 1.000000e+00 : f32
    %664 = vector.broadcast %cst_217 : f32 to vector<8x32xf32>
    %665 = arith.addf %664, %663 : vector<8x32xf32>
    %666 = arith.divf %664, %665 : vector<8x32xf32>
    %667 = vector.extract_strided_slice %660 {offsets = [0, 32], sizes = [8, 32], strides = [1, 1]} : vector<8x128xf32> to vector<8x32xf32>
    %668 = arith.negf %667 : vector<8x32xf32>
    %669 = math.exp %668 : vector<8x32xf32>
    %cst_218 = arith.constant 1.000000e+00 : f32
    %670 = vector.broadcast %cst_218 : f32 to vector<8x32xf32>
    %671 = arith.addf %670, %669 : vector<8x32xf32>
    %672 = arith.divf %670, %671 : vector<8x32xf32>
    %673 = vector.extract_strided_slice %660 {offsets = [0, 64], sizes = [8, 32], strides = [1, 1]} : vector<8x128xf32> to vector<8x32xf32>
    %674 = math.tanh %673 : vector<8x32xf32>
    %675 = vector.extract_strided_slice %660 {offsets = [0, 96], sizes = [8, 32], strides = [1, 1]} : vector<8x128xf32> to vector<8x32xf32>
    %676 = arith.negf %675 : vector<8x32xf32>
    %677 = math.exp %676 : vector<8x32xf32>
    %cst_219 = arith.constant 1.000000e+00 : f32
    %678 = vector.broadcast %cst_219 : f32 to vector<8x32xf32>
    %679 = arith.addf %678, %677 : vector<8x32xf32>
    %680 = arith.divf %678, %679 : vector<8x32xf32>
    %681 = arith.mulf %672, %655 : vector<8x32xf32>
    %682 = arith.mulf %666, %674 : vector<8x32xf32>
    %683 = arith.addf %681, %682 : vector<8x32xf32>
    %684 = math.tanh %683 : vector<8x32xf32>
    %685 = arith.mulf %680, %684 : vector<8x32xf32>
    %c0_220 = arith.constant 0 : index
    %c0_221 = arith.constant 0 : index
    %686 = vector.load %arg37[%c0_220, %c0_221] : memref<64x64xf32, #tpu.memory_space<vmem>>, vector<8x32xf32>
    tpu.vector_store %arg37[%c0_220, %c0_221], %257 {strides = array<i32>} : memref<64x64xf32, #tpu.memory_space<vmem>>, vector<8x32xf32>,
    %c0_222 = arith.constant 0 : index
    %c32 = arith.constant 32 : index
    %687 = vector.load %arg37[%c0_222, %c32] : memref<64x64xf32, #tpu.memory_space<vmem>>, vector<8x32xf32>
    tpu.vector_store %arg37[%c0_222, %c32], %685 {strides = array<i32>} : memref<64x64xf32, #tpu.memory_space<vmem>>, vector<8x32xf32>,
    %c8 = arith.constant 8 : index
    %c0_223 = arith.constant 0 : index
    %688 = vector.load %arg37[%c8, %c0_223] : memref<64x64xf32, #tpu.memory_space<vmem>>, vector<8x32xf32>
    tpu.vector_store %arg37[%c8, %c0_223], %285 {strides = array<i32>} : memref<64x64xf32, #tpu.memory_space<vmem>>, vector<8x32xf32>,
    %c8_224 = arith.constant 8 : index
    %c32_225 = arith.constant 32 : index
    %689 = vector.load %arg37[%c8_224, %c32_225] : memref<64x64xf32, #tpu.memory_space<vmem>>, vector<8x32xf32>
    tpu.vector_store %arg37[%c8_224, %c32_225], %657 {strides = array<i32>} : memref<64x64xf32, #tpu.memory_space<vmem>>, vector<8x32xf32>,
    %c16 = arith.constant 16 : index
    %c0_226 = arith.constant 0 : index
    %690 = vector.load %arg37[%c16, %c0_226] : memref<64x64xf32, #tpu.memory_space<vmem>>, vector<8x32xf32>
    tpu.vector_store %arg37[%c16, %c0_226], %313 {strides = array<i32>} : memref<64x64xf32, #tpu.memory_space<vmem>>, vector<8x32xf32>,
    %c16_227 = arith.constant 16 : index
    %c32_228 = arith.constant 32 : index
    %691 = vector.load %arg37[%c16_227, %c32_228] : memref<64x64xf32, #tpu.memory_space<vmem>>, vector<8x32xf32>
    tpu.vector_store %arg37[%c16_227, %c32_228], %629 {strides = array<i32>} : memref<64x64xf32, #tpu.memory_space<vmem>>, vector<8x32xf32>,
    %c24 = arith.constant 24 : index
    %c0_229 = arith.constant 0 : index
    %692 = vector.load %arg37[%c24, %c0_229] : memref<64x64xf32, #tpu.memory_space<vmem>>, vector<8x32xf32>
    tpu.vector_store %arg37[%c24, %c0_229], %341 {strides = array<i32>} : memref<64x64xf32, #tpu.memory_space<vmem>>, vector<8x32xf32>,
    %c24_230 = arith.constant 24 : index
    %c32_231 = arith.constant 32 : index
    %693 = vector.load %arg37[%c24_230, %c32_231] : memref<64x64xf32, #tpu.memory_space<vmem>>, vector<8x32xf32>
    tpu.vector_store %arg37[%c24_230, %c32_231], %601 {strides = array<i32>} : memref<64x64xf32, #tpu.memory_space<vmem>>, vector<8x32xf32>,
    %c32_232 = arith.constant 32 : index
    %c0_233 = arith.constant 0 : index
    %694 = vector.load %arg37[%c32_232, %c0_233] : memref<64x64xf32, #tpu.memory_space<vmem>>, vector<8x32xf32>
    tpu.vector_store %arg37[%c32_232, %c0_233], %369 {strides = array<i32>} : memref<64x64xf32, #tpu.memory_space<vmem>>, vector<8x32xf32>,
    %c32_234 = arith.constant 32 : index
    %c32_235 = arith.constant 32 : index
    %695 = vector.load %arg37[%c32_234, %c32_235] : memref<64x64xf32, #tpu.memory_space<vmem>>, vector<8x32xf32>
    tpu.vector_store %arg37[%c32_234, %c32_235], %573 {strides = array<i32>} : memref<64x64xf32, #tpu.memory_space<vmem>>, vector<8x32xf32>,
    %c40 = arith.constant 40 : index
    %c0_236 = arith.constant 0 : index
    %696 = vector.load %arg37[%c40, %c0_236] : memref<64x64xf32, #tpu.memory_space<vmem>>, vector<8x32xf32>
    tpu.vector_store %arg37[%c40, %c0_236], %397 {strides = array<i32>} : memref<64x64xf32, #tpu.memory_space<vmem>>, vector<8x32xf32>,
    %c40_237 = arith.constant 40 : index
    %c32_238 = arith.constant 32 : index
    %697 = vector.load %arg37[%c40_237, %c32_238] : memref<64x64xf32, #tpu.memory_space<vmem>>, vector<8x32xf32>
    tpu.vector_store %arg37[%c40_237, %c32_238], %545 {strides = array<i32>} : memref<64x64xf32, #tpu.memory_space<vmem>>, vector<8x32xf32>,
    %c48 = arith.constant 48 : index
    %c0_239 = arith.constant 0 : index
    %698 = vector.load %arg37[%c48, %c0_239] : memref<64x64xf32, #tpu.memory_space<vmem>>, vector<8x32xf32>
    tpu.vector_store %arg37[%c48, %c0_239], %425 {strides = array<i32>} : memref<64x64xf32, #tpu.memory_space<vmem>>, vector<8x32xf32>,
    %c48_240 = arith.constant 48 : index
    %c32_241 = arith.constant 32 : index
    %699 = vector.load %arg37[%c48_240, %c32_241] : memref<64x64xf32, #tpu.memory_space<vmem>>, vector<8x32xf32>
    tpu.vector_store %arg37[%c48_240, %c32_241], %517 {strides = array<i32>} : memref<64x64xf32, #tpu.memory_space<vmem>>, vector<8x32xf32>,
    %c56 = arith.constant 56 : index
    %c0_242 = arith.constant 0 : index
    %700 = vector.load %arg37[%c56, %c0_242] : memref<64x64xf32, #tpu.memory_space<vmem>>, vector<8x32xf32>
    tpu.vector_store %arg37[%c56, %c0_242], %453 {strides = array<i32>} : memref<64x64xf32, #tpu.memory_space<vmem>>, vector<8x32xf32>,
    %c56_243 = arith.constant 56 : index
    %c32_244 = arith.constant 32 : index
    %701 = vector.load %arg37[%c56_243, %c32_244] : memref<64x64xf32, #tpu.memory_space<vmem>>, vector<8x32xf32>
    tpu.vector_store %arg37[%c56_243, %c32_244], %489 {strides = array<i32>} : memref<64x64xf32, #tpu.memory_space<vmem>>, vector<8x32xf32>,
    %c0_245 = arith.constant 0 : index
    %c0_246 = arith.constant 0 : index
    %702 = vector.load %arg37[%c0_245, %c0_246] : memref<64x64xf32, #tpu.memory_space<vmem>>, vector<64x64xf32>
    %c0_247 = arith.constant 0 : index
    %c0_248 = arith.constant 0 : index
    %703 = vector.load %arg20[%c0_247, %c0_248] : memref<64x128xf32, #tpu.memory_space<vmem>>, vector<64x128xf32>
    %cst_249 = arith.constant dense<0.000000e+00> : vector<64x128xf32>
    %704 = tpu.matmul %702, %703, %cst_249 {dimension_numbers = #tpu.dot_dimension_numbers<[1], [0], [0], [1], [0, 0, 1, 1], [], []>} : vector<64x64xf32>, vector<64x128xf32>, vector<64x128xf32> -> vector<64x128xf32>
    %c0_250 = arith.constant 0 : index
    %c0_251 = arith.constant 0 : index
    %705 = vector.load %arg22[%c0_250, %c0_251] : memref<1x128xf32, #tpu.memory_space<vmem>>, vector<1x128xf32>
    %706 = vector.broadcast %705 : vector<1x128xf32> to vector<64x128xf32>
    %707 = arith.addf %704, %706 : vector<64x128xf32>
    %c0_252 = arith.constant 0 : index
    %c0_253 = arith.constant 0 : index
    %708 = vector.load %arg21[%c0_252, %c0_253] : memref<32x128xf32, #tpu.memory_space<vmem>>, vector<32x128xf32>
    %cst_254 = arith.constant 0.000000e+00 : f32
    %709 = vector.broadcast %cst_254 : f32 to vector<8x32xf32>
    %cst_255 = arith.constant 0.000000e+00 : f32
    %710 = vector.broadcast %cst_255 : f32 to vector<8x32xf32>
    %711 = vector.extract_strided_slice %707 {offsets = [0, 0], sizes = [8, 128], strides = [1, 1]} : vector<64x128xf32> to vector<8x128xf32>
    %cst_256 = arith.constant dense<0.000000e+00> : vector<8x128xf32>
    %712 = tpu.matmul %709, %708, %cst_256 {dimension_numbers = #tpu.dot_dimension_numbers<[1], [0], [0], [1], [0, 0, 1, 1], [], []>} : vector<8x32xf32>, vector<32x128xf32>, vector<8x128xf32> -> vector<8x128xf32>
    %713 = arith.addf %711, %712 : vector<8x128xf32>
    %714 = vector.extract_strided_slice %713 {offsets = [0, 0], sizes = [8, 32], strides = [1, 1]} : vector<8x128xf32> to vector<8x32xf32>
    %715 = arith.negf %714 : vector<8x32xf32>
    %716 = math.exp %715 : vector<8x32xf32>
    %cst_257 = arith.constant 1.000000e+00 : f32
    %717 = vector.broadcast %cst_257 : f32 to vector<8x32xf32>
    %718 = arith.addf %717, %716 : vector<8x32xf32>
    %719 = arith.divf %717, %718 : vector<8x32xf32>
    %720 = vector.extract_strided_slice %713 {offsets = [0, 32], sizes = [8, 32], strides = [1, 1]} : vector<8x128xf32> to vector<8x32xf32>
    %721 = arith.negf %720 : vector<8x32xf32>
    %722 = math.exp %721 : vector<8x32xf32>
    %cst_258 = arith.constant 1.000000e+00 : f32
    %723 = vector.broadcast %cst_258 : f32 to vector<8x32xf32>
    %724 = arith.addf %723, %722 : vector<8x32xf32>
    %725 = arith.divf %723, %724 : vector<8x32xf32>
    %726 = vector.extract_strided_slice %713 {offsets = [0, 64], sizes = [8, 32], strides = [1, 1]} : vector<8x128xf32> to vector<8x32xf32>
    %727 = math.tanh %726 : vector<8x32xf32>
    %728 = vector.extract_strided_slice %713 {offsets = [0, 96], sizes = [8, 32], strides = [1, 1]} : vector<8x128xf32> to vector<8x32xf32>
    %729 = arith.negf %728 : vector<8x32xf32>
    %730 = math.exp %729 : vector<8x32xf32>
    %cst_259 = arith.constant 1.000000e+00 : f32
    %731 = vector.broadcast %cst_259 : f32 to vector<8x32xf32>
    %732 = arith.addf %731, %730 : vector<8x32xf32>
    %733 = arith.divf %731, %732 : vector<8x32xf32>
    %734 = arith.mulf %725, %710 : vector<8x32xf32>
    %735 = arith.mulf %719, %727 : vector<8x32xf32>
    %736 = arith.addf %734, %735 : vector<8x32xf32>
    %737 = math.tanh %736 : vector<8x32xf32>
    %738 = arith.mulf %733, %737 : vector<8x32xf32>
    %739 = vector.extract_strided_slice %707 {offsets = [8, 0], sizes = [8, 128], strides = [1, 1]} : vector<64x128xf32> to vector<8x128xf32>
    %cst_260 = arith.constant dense<0.000000e+00> : vector<8x128xf32>
    %740 = tpu.matmul %738, %708, %cst_260 {dimension_numbers = #tpu.dot_dimension_numbers<[1], [0], [0], [1], [0, 0, 1, 1], [], []>} : vector<8x32xf32>, vector<32x128xf32>, vector<8x128xf32> -> vector<8x128xf32>
    %741 = arith.addf %739, %740 : vector<8x128xf32>
    %742 = vector.extract_strided_slice %741 {offsets = [0, 0], sizes = [8, 32], strides = [1, 1]} : vector<8x128xf32> to vector<8x32xf32>
    %743 = arith.negf %742 : vector<8x32xf32>
    %744 = math.exp %743 : vector<8x32xf32>
    %cst_261 = arith.constant 1.000000e+00 : f32
    %745 = vector.broadcast %cst_261 : f32 to vector<8x32xf32>
    %746 = arith.addf %745, %744 : vector<8x32xf32>
    %747 = arith.divf %745, %746 : vector<8x32xf32>
    %748 = vector.extract_strided_slice %741 {offsets = [0, 32], sizes = [8, 32], strides = [1, 1]} : vector<8x128xf32> to vector<8x32xf32>
    %749 = arith.negf %748 : vector<8x32xf32>
    %750 = math.exp %749 : vector<8x32xf32>
    %cst_262 = arith.constant 1.000000e+00 : f32
    %751 = vector.broadcast %cst_262 : f32 to vector<8x32xf32>
    %752 = arith.addf %751, %750 : vector<8x32xf32>
    %753 = arith.divf %751, %752 : vector<8x32xf32>
    %754 = vector.extract_strided_slice %741 {offsets = [0, 64], sizes = [8, 32], strides = [1, 1]} : vector<8x128xf32> to vector<8x32xf32>
    %755 = math.tanh %754 : vector<8x32xf32>
    %756 = vector.extract_strided_slice %741 {offsets = [0, 96], sizes = [8, 32], strides = [1, 1]} : vector<8x128xf32> to vector<8x32xf32>
    %757 = arith.negf %756 : vector<8x32xf32>
    %758 = math.exp %757 : vector<8x32xf32>
    %cst_263 = arith.constant 1.000000e+00 : f32
    %759 = vector.broadcast %cst_263 : f32 to vector<8x32xf32>
    %760 = arith.addf %759, %758 : vector<8x32xf32>
    %761 = arith.divf %759, %760 : vector<8x32xf32>
    %762 = arith.mulf %753, %736 : vector<8x32xf32>
    %763 = arith.mulf %747, %755 : vector<8x32xf32>
    %764 = arith.addf %762, %763 : vector<8x32xf32>
    %765 = math.tanh %764 : vector<8x32xf32>
    %766 = arith.mulf %761, %765 : vector<8x32xf32>
    %767 = vector.extract_strided_slice %707 {offsets = [16, 0], sizes = [8, 128], strides = [1, 1]} : vector<64x128xf32> to vector<8x128xf32>
    %cst_264 = arith.constant dense<0.000000e+00> : vector<8x128xf32>
    %768 = tpu.matmul %766, %708, %cst_264 {dimension_numbers = #tpu.dot_dimension_numbers<[1], [0], [0], [1], [0, 0, 1, 1], [], []>} : vector<8x32xf32>, vector<32x128xf32>, vector<8x128xf32> -> vector<8x128xf32>
    %769 = arith.addf %767, %768 : vector<8x128xf32>
    %770 = vector.extract_strided_slice %769 {offsets = [0, 0], sizes = [8, 32], strides = [1, 1]} : vector<8x128xf32> to vector<8x32xf32>
    %771 = arith.negf %770 : vector<8x32xf32>
    %772 = math.exp %771 : vector<8x32xf32>
    %cst_265 = arith.constant 1.000000e+00 : f32
    %773 = vector.broadcast %cst_265 : f32 to vector<8x32xf32>
    %774 = arith.addf %773, %772 : vector<8x32xf32>
    %775 = arith.divf %773, %774 : vector<8x32xf32>
    %776 = vector.extract_strided_slice %769 {offsets = [0, 32], sizes = [8, 32], strides = [1, 1]} : vector<8x128xf32> to vector<8x32xf32>
    %777 = arith.negf %776 : vector<8x32xf32>
    %778 = math.exp %777 : vector<8x32xf32>
    %cst_266 = arith.constant 1.000000e+00 : f32
    %779 = vector.broadcast %cst_266 : f32 to vector<8x32xf32>
    %780 = arith.addf %779, %778 : vector<8x32xf32>
    %781 = arith.divf %779, %780 : vector<8x32xf32>
    %782 = vector.extract_strided_slice %769 {offsets = [0, 64], sizes = [8, 32], strides = [1, 1]} : vector<8x128xf32> to vector<8x32xf32>
    %783 = math.tanh %782 : vector<8x32xf32>
    %784 = vector.extract_strided_slice %769 {offsets = [0, 96], sizes = [8, 32], strides = [1, 1]} : vector<8x128xf32> to vector<8x32xf32>
    %785 = arith.negf %784 : vector<8x32xf32>
    %786 = math.exp %785 : vector<8x32xf32>
    %cst_267 = arith.constant 1.000000e+00 : f32
    %787 = vector.broadcast %cst_267 : f32 to vector<8x32xf32>
    %788 = arith.addf %787, %786 : vector<8x32xf32>
    %789 = arith.divf %787, %788 : vector<8x32xf32>
    %790 = arith.mulf %781, %764 : vector<8x32xf32>
    %791 = arith.mulf %775, %783 : vector<8x32xf32>
    %792 = arith.addf %790, %791 : vector<8x32xf32>
    %793 = math.tanh %792 : vector<8x32xf32>
    %794 = arith.mulf %789, %793 : vector<8x32xf32>
    %795 = vector.extract_strided_slice %707 {offsets = [24, 0], sizes = [8, 128], strides = [1, 1]} : vector<64x128xf32> to vector<8x128xf32>
    %cst_268 = arith.constant dense<0.000000e+00> : vector<8x128xf32>
    %796 = tpu.matmul %794, %708, %cst_268 {dimension_numbers = #tpu.dot_dimension_numbers<[1], [0], [0], [1], [0, 0, 1, 1], [], []>} : vector<8x32xf32>, vector<32x128xf32>, vector<8x128xf32> -> vector<8x128xf32>
    %797 = arith.addf %795, %796 : vector<8x128xf32>
    %798 = vector.extract_strided_slice %797 {offsets = [0, 0], sizes = [8, 32], strides = [1, 1]} : vector<8x128xf32> to vector<8x32xf32>
    %799 = arith.negf %798 : vector<8x32xf32>
    %800 = math.exp %799 : vector<8x32xf32>
    %cst_269 = arith.constant 1.000000e+00 : f32
    %801 = vector.broadcast %cst_269 : f32 to vector<8x32xf32>
    %802 = arith.addf %801, %800 : vector<8x32xf32>
    %803 = arith.divf %801, %802 : vector<8x32xf32>
    %804 = vector.extract_strided_slice %797 {offsets = [0, 32], sizes = [8, 32], strides = [1, 1]} : vector<8x128xf32> to vector<8x32xf32>
    %805 = arith.negf %804 : vector<8x32xf32>
    %806 = math.exp %805 : vector<8x32xf32>
    %cst_270 = arith.constant 1.000000e+00 : f32
    %807 = vector.broadcast %cst_270 : f32 to vector<8x32xf32>
    %808 = arith.addf %807, %806 : vector<8x32xf32>
    %809 = arith.divf %807, %808 : vector<8x32xf32>
    %810 = vector.extract_strided_slice %797 {offsets = [0, 64], sizes = [8, 32], strides = [1, 1]} : vector<8x128xf32> to vector<8x32xf32>
    %811 = math.tanh %810 : vector<8x32xf32>
    %812 = vector.extract_strided_slice %797 {offsets = [0, 96], sizes = [8, 32], strides = [1, 1]} : vector<8x128xf32> to vector<8x32xf32>
    %813 = arith.negf %812 : vector<8x32xf32>
    %814 = math.exp %813 : vector<8x32xf32>
    %cst_271 = arith.constant 1.000000e+00 : f32
    %815 = vector.broadcast %cst_271 : f32 to vector<8x32xf32>
    %816 = arith.addf %815, %814 : vector<8x32xf32>
    %817 = arith.divf %815, %816 : vector<8x32xf32>
    %818 = arith.mulf %809, %792 : vector<8x32xf32>
    %819 = arith.mulf %803, %811 : vector<8x32xf32>
    %820 = arith.addf %818, %819 : vector<8x32xf32>
    %821 = math.tanh %820 : vector<8x32xf32>
    %822 = arith.mulf %817, %821 : vector<8x32xf32>
    %823 = vector.extract_strided_slice %707 {offsets = [32, 0], sizes = [8, 128], strides = [1, 1]} : vector<64x128xf32> to vector<8x128xf32>
    %cst_272 = arith.constant dense<0.000000e+00> : vector<8x128xf32>
    %824 = tpu.matmul %822, %708, %cst_272 {dimension_numbers = #tpu.dot_dimension_numbers<[1], [0], [0], [1], [0, 0, 1, 1], [], []>} : vector<8x32xf32>, vector<32x128xf32>, vector<8x128xf32> -> vector<8x128xf32>
    %825 = arith.addf %823, %824 : vector<8x128xf32>
    %826 = vector.extract_strided_slice %825 {offsets = [0, 0], sizes = [8, 32], strides = [1, 1]} : vector<8x128xf32> to vector<8x32xf32>
    %827 = arith.negf %826 : vector<8x32xf32>
    %828 = math.exp %827 : vector<8x32xf32>
    %cst_273 = arith.constant 1.000000e+00 : f32
    %829 = vector.broadcast %cst_273 : f32 to vector<8x32xf32>
    %830 = arith.addf %829, %828 : vector<8x32xf32>
    %831 = arith.divf %829, %830 : vector<8x32xf32>
    %832 = vector.extract_strided_slice %825 {offsets = [0, 32], sizes = [8, 32], strides = [1, 1]} : vector<8x128xf32> to vector<8x32xf32>
    %833 = arith.negf %832 : vector<8x32xf32>
    %834 = math.exp %833 : vector<8x32xf32>
    %cst_274 = arith.constant 1.000000e+00 : f32
    %835 = vector.broadcast %cst_274 : f32 to vector<8x32xf32>
    %836 = arith.addf %835, %834 : vector<8x32xf32>
    %837 = arith.divf %835, %836 : vector<8x32xf32>
    %838 = vector.extract_strided_slice %825 {offsets = [0, 64], sizes = [8, 32], strides = [1, 1]} : vector<8x128xf32> to vector<8x32xf32>
    %839 = math.tanh %838 : vector<8x32xf32>
    %840 = vector.extract_strided_slice %825 {offsets = [0, 96], sizes = [8, 32], strides = [1, 1]} : vector<8x128xf32> to vector<8x32xf32>
    %841 = arith.negf %840 : vector<8x32xf32>
    %842 = math.exp %841 : vector<8x32xf32>
    %cst_275 = arith.constant 1.000000e+00 : f32
    %843 = vector.broadcast %cst_275 : f32 to vector<8x32xf32>
    %844 = arith.addf %843, %842 : vector<8x32xf32>
    %845 = arith.divf %843, %844 : vector<8x32xf32>
    %846 = arith.mulf %837, %820 : vector<8x32xf32>
    %847 = arith.mulf %831, %839 : vector<8x32xf32>
    %848 = arith.addf %846, %847 : vector<8x32xf32>
    %849 = math.tanh %848 : vector<8x32xf32>
    %850 = arith.mulf %845, %849 : vector<8x32xf32>
    %851 = vector.extract_strided_slice %707 {offsets = [40, 0], sizes = [8, 128], strides = [1, 1]} : vector<64x128xf32> to vector<8x128xf32>
    %cst_276 = arith.constant dense<0.000000e+00> : vector<8x128xf32>
    %852 = tpu.matmul %850, %708, %cst_276 {dimension_numbers = #tpu.dot_dimension_numbers<[1], [0], [0], [1], [0, 0, 1, 1], [], []>} : vector<8x32xf32>, vector<32x128xf32>, vector<8x128xf32> -> vector<8x128xf32>
    %853 = arith.addf %851, %852 : vector<8x128xf32>
    %854 = vector.extract_strided_slice %853 {offsets = [0, 0], sizes = [8, 32], strides = [1, 1]} : vector<8x128xf32> to vector<8x32xf32>
    %855 = arith.negf %854 : vector<8x32xf32>
    %856 = math.exp %855 : vector<8x32xf32>
    %cst_277 = arith.constant 1.000000e+00 : f32
    %857 = vector.broadcast %cst_277 : f32 to vector<8x32xf32>
    %858 = arith.addf %857, %856 : vector<8x32xf32>
    %859 = arith.divf %857, %858 : vector<8x32xf32>
    %860 = vector.extract_strided_slice %853 {offsets = [0, 32], sizes = [8, 32], strides = [1, 1]} : vector<8x128xf32> to vector<8x32xf32>
    %861 = arith.negf %860 : vector<8x32xf32>
    %862 = math.exp %861 : vector<8x32xf32>
    %cst_278 = arith.constant 1.000000e+00 : f32
    %863 = vector.broadcast %cst_278 : f32 to vector<8x32xf32>
    %864 = arith.addf %863, %862 : vector<8x32xf32>
    %865 = arith.divf %863, %864 : vector<8x32xf32>
    %866 = vector.extract_strided_slice %853 {offsets = [0, 64], sizes = [8, 32], strides = [1, 1]} : vector<8x128xf32> to vector<8x32xf32>
    %867 = math.tanh %866 : vector<8x32xf32>
    %868 = vector.extract_strided_slice %853 {offsets = [0, 96], sizes = [8, 32], strides = [1, 1]} : vector<8x128xf32> to vector<8x32xf32>
    %869 = arith.negf %868 : vector<8x32xf32>
    %870 = math.exp %869 : vector<8x32xf32>
    %cst_279 = arith.constant 1.000000e+00 : f32
    %871 = vector.broadcast %cst_279 : f32 to vector<8x32xf32>
    %872 = arith.addf %871, %870 : vector<8x32xf32>
    %873 = arith.divf %871, %872 : vector<8x32xf32>
    %874 = arith.mulf %865, %848 : vector<8x32xf32>
    %875 = arith.mulf %859, %867 : vector<8x32xf32>
    %876 = arith.addf %874, %875 : vector<8x32xf32>
    %877 = math.tanh %876 : vector<8x32xf32>
    %878 = arith.mulf %873, %877 : vector<8x32xf32>
    %879 = vector.extract_strided_slice %707 {offsets = [48, 0], sizes = [8, 128], strides = [1, 1]} : vector<64x128xf32> to vector<8x128xf32>
    %cst_280 = arith.constant dense<0.000000e+00> : vector<8x128xf32>
    %880 = tpu.matmul %878, %708, %cst_280 {dimension_numbers = #tpu.dot_dimension_numbers<[1], [0], [0], [1], [0, 0, 1, 1], [], []>} : vector<8x32xf32>, vector<32x128xf32>, vector<8x128xf32> -> vector<8x128xf32>
    %881 = arith.addf %879, %880 : vector<8x128xf32>
    %882 = vector.extract_strided_slice %881 {offsets = [0, 0], sizes = [8, 32], strides = [1, 1]} : vector<8x128xf32> to vector<8x32xf32>
    %883 = arith.negf %882 : vector<8x32xf32>
    %884 = math.exp %883 : vector<8x32xf32>
    %cst_281 = arith.constant 1.000000e+00 : f32
    %885 = vector.broadcast %cst_281 : f32 to vector<8x32xf32>
    %886 = arith.addf %885, %884 : vector<8x32xf32>
    %887 = arith.divf %885, %886 : vector<8x32xf32>
    %888 = vector.extract_strided_slice %881 {offsets = [0, 32], sizes = [8, 32], strides = [1, 1]} : vector<8x128xf32> to vector<8x32xf32>
    %889 = arith.negf %888 : vector<8x32xf32>
    %890 = math.exp %889 : vector<8x32xf32>
    %cst_282 = arith.constant 1.000000e+00 : f32
    %891 = vector.broadcast %cst_282 : f32 to vector<8x32xf32>
    %892 = arith.addf %891, %890 : vector<8x32xf32>
    %893 = arith.divf %891, %892 : vector<8x32xf32>
    %894 = vector.extract_strided_slice %881 {offsets = [0, 64], sizes = [8, 32], strides = [1, 1]} : vector<8x128xf32> to vector<8x32xf32>
    %895 = math.tanh %894 : vector<8x32xf32>
    %896 = vector.extract_strided_slice %881 {offsets = [0, 96], sizes = [8, 32], strides = [1, 1]} : vector<8x128xf32> to vector<8x32xf32>
    %897 = arith.negf %896 : vector<8x32xf32>
    %898 = math.exp %897 : vector<8x32xf32>
    %cst_283 = arith.constant 1.000000e+00 : f32
    %899 = vector.broadcast %cst_283 : f32 to vector<8x32xf32>
    %900 = arith.addf %899, %898 : vector<8x32xf32>
    %901 = arith.divf %899, %900 : vector<8x32xf32>
    %902 = arith.mulf %893, %876 : vector<8x32xf32>
    %903 = arith.mulf %887, %895 : vector<8x32xf32>
    %904 = arith.addf %902, %903 : vector<8x32xf32>
    %905 = math.tanh %904 : vector<8x32xf32>
    %906 = arith.mulf %901, %905 : vector<8x32xf32>
    %907 = vector.extract_strided_slice %707 {offsets = [56, 0], sizes = [8, 128], strides = [1, 1]} : vector<64x128xf32> to vector<8x128xf32>
    %cst_284 = arith.constant dense<0.000000e+00> : vector<8x128xf32>
    %908 = tpu.matmul %906, %708, %cst_284 {dimension_numbers = #tpu.dot_dimension_numbers<[1], [0], [0], [1], [0, 0, 1, 1], [], []>} : vector<8x32xf32>, vector<32x128xf32>, vector<8x128xf32> -> vector<8x128xf32>
    %909 = arith.addf %907, %908 : vector<8x128xf32>
    %910 = vector.extract_strided_slice %909 {offsets = [0, 0], sizes = [8, 32], strides = [1, 1]} : vector<8x128xf32> to vector<8x32xf32>
    %911 = arith.negf %910 : vector<8x32xf32>
    %912 = math.exp %911 : vector<8x32xf32>
    %cst_285 = arith.constant 1.000000e+00 : f32
    %913 = vector.broadcast %cst_285 : f32 to vector<8x32xf32>
    %914 = arith.addf %913, %912 : vector<8x32xf32>
    %915 = arith.divf %913, %914 : vector<8x32xf32>
    %916 = vector.extract_strided_slice %909 {offsets = [0, 32], sizes = [8, 32], strides = [1, 1]} : vector<8x128xf32> to vector<8x32xf32>
    %917 = arith.negf %916 : vector<8x32xf32>
    %918 = math.exp %917 : vector<8x32xf32>
    %cst_286 = arith.constant 1.000000e+00 : f32
    %919 = vector.broadcast %cst_286 : f32 to vector<8x32xf32>
    %920 = arith.addf %919, %918 : vector<8x32xf32>
    %921 = arith.divf %919, %920 : vector<8x32xf32>
    %922 = vector.extract_strided_slice %909 {offsets = [0, 64], sizes = [8, 32], strides = [1, 1]} : vector<8x128xf32> to vector<8x32xf32>
    %923 = math.tanh %922 : vector<8x32xf32>
    %924 = vector.extract_strided_slice %909 {offsets = [0, 96], sizes = [8, 32], strides = [1, 1]} : vector<8x128xf32> to vector<8x32xf32>
    %925 = arith.negf %924 : vector<8x32xf32>
    %926 = math.exp %925 : vector<8x32xf32>
    %cst_287 = arith.constant 1.000000e+00 : f32
    %927 = vector.broadcast %cst_287 : f32 to vector<8x32xf32>
    %928 = arith.addf %927, %926 : vector<8x32xf32>
    %929 = arith.divf %927, %928 : vector<8x32xf32>
    %930 = arith.mulf %921, %904 : vector<8x32xf32>
    %931 = arith.mulf %915, %923 : vector<8x32xf32>
    %932 = arith.addf %930, %931 : vector<8x32xf32>
    %933 = math.tanh %932 : vector<8x32xf32>
    %934 = arith.mulf %929, %933 : vector<8x32xf32>
    %c0_288 = arith.constant 0 : index
    %c0_289 = arith.constant 0 : index
    %935 = vector.load %arg23[%c0_288, %c0_289] : memref<64x128xf32, #tpu.memory_space<vmem>>, vector<64x128xf32>
    %cst_290 = arith.constant dense<0.000000e+00> : vector<64x128xf32>
    %936 = tpu.matmul %702, %935, %cst_290 {dimension_numbers = #tpu.dot_dimension_numbers<[1], [0], [0], [1], [0, 0, 1, 1], [], []>} : vector<64x64xf32>, vector<64x128xf32>, vector<64x128xf32> -> vector<64x128xf32>
    %c0_291 = arith.constant 0 : index
    %c0_292 = arith.constant 0 : index
    %937 = vector.load %arg25[%c0_291, %c0_292] : memref<1x128xf32, #tpu.memory_space<vmem>>, vector<1x128xf32>
    %938 = vector.broadcast %937 : vector<1x128xf32> to vector<64x128xf32>
    %939 = arith.addf %936, %938 : vector<64x128xf32>
    %c0_293 = arith.constant 0 : index
    %c0_294 = arith.constant 0 : index
    %940 = vector.load %arg24[%c0_293, %c0_294] : memref<32x128xf32, #tpu.memory_space<vmem>>, vector<32x128xf32>
    %cst_295 = arith.constant 0.000000e+00 : f32
    %941 = vector.broadcast %cst_295 : f32 to vector<8x32xf32>
    %cst_296 = arith.constant 0.000000e+00 : f32
    %942 = vector.broadcast %cst_296 : f32 to vector<8x32xf32>
    %943 = vector.extract_strided_slice %939 {offsets = [56, 0], sizes = [8, 128], strides = [1, 1]} : vector<64x128xf32> to vector<8x128xf32>
    %cst_297 = arith.constant dense<0.000000e+00> : vector<8x128xf32>
    %944 = tpu.matmul %941, %940, %cst_297 {dimension_numbers = #tpu.dot_dimension_numbers<[1], [0], [0], [1], [0, 0, 1, 1], [], []>} : vector<8x32xf32>, vector<32x128xf32>, vector<8x128xf32> -> vector<8x128xf32>
    %945 = arith.addf %943, %944 : vector<8x128xf32>
    %946 = vector.extract_strided_slice %945 {offsets = [0, 0], sizes = [8, 32], strides = [1, 1]} : vector<8x128xf32> to vector<8x32xf32>
    %947 = arith.negf %946 : vector<8x32xf32>
    %948 = math.exp %947 : vector<8x32xf32>
    %cst_298 = arith.constant 1.000000e+00 : f32
    %949 = vector.broadcast %cst_298 : f32 to vector<8x32xf32>
    %950 = arith.addf %949, %948 : vector<8x32xf32>
    %951 = arith.divf %949, %950 : vector<8x32xf32>
    %952 = vector.extract_strided_slice %945 {offsets = [0, 32], sizes = [8, 32], strides = [1, 1]} : vector<8x128xf32> to vector<8x32xf32>
    %953 = arith.negf %952 : vector<8x32xf32>
    %954 = math.exp %953 : vector<8x32xf32>
    %cst_299 = arith.constant 1.000000e+00 : f32
    %955 = vector.broadcast %cst_299 : f32 to vector<8x32xf32>
    %956 = arith.addf %955, %954 : vector<8x32xf32>
    %957 = arith.divf %955, %956 : vector<8x32xf32>
    %958 = vector.extract_strided_slice %945 {offsets = [0, 64], sizes = [8, 32], strides = [1, 1]} : vector<8x128xf32> to vector<8x32xf32>
    %959 = math.tanh %958 : vector<8x32xf32>
    %960 = vector.extract_strided_slice %945 {offsets = [0, 96], sizes = [8, 32], strides = [1, 1]} : vector<8x128xf32> to vector<8x32xf32>
    %961 = arith.negf %960 : vector<8x32xf32>
    %962 = math.exp %961 : vector<8x32xf32>
    %cst_300 = arith.constant 1.000000e+00 : f32
    %963 = vector.broadcast %cst_300 : f32 to vector<8x32xf32>
    %964 = arith.addf %963, %962 : vector<8x32xf32>
    %965 = arith.divf %963, %964 : vector<8x32xf32>
    %966 = arith.mulf %957, %942 : vector<8x32xf32>
    %967 = arith.mulf %951, %959 : vector<8x32xf32>
    %968 = arith.addf %966, %967 : vector<8x32xf32>
    %969 = math.tanh %968 : vector<8x32xf32>
    %970 = arith.mulf %965, %969 : vector<8x32xf32>
    %971 = vector.extract_strided_slice %939 {offsets = [48, 0], sizes = [8, 128], strides = [1, 1]} : vector<64x128xf32> to vector<8x128xf32>
    %cst_301 = arith.constant dense<0.000000e+00> : vector<8x128xf32>
    %972 = tpu.matmul %970, %940, %cst_301 {dimension_numbers = #tpu.dot_dimension_numbers<[1], [0], [0], [1], [0, 0, 1, 1], [], []>} : vector<8x32xf32>, vector<32x128xf32>, vector<8x128xf32> -> vector<8x128xf32>
    %973 = arith.addf %971, %972 : vector<8x128xf32>
    %974 = vector.extract_strided_slice %973 {offsets = [0, 0], sizes = [8, 32], strides = [1, 1]} : vector<8x128xf32> to vector<8x32xf32>
    %975 = arith.negf %974 : vector<8x32xf32>
    %976 = math.exp %975 : vector<8x32xf32>
    %cst_302 = arith.constant 1.000000e+00 : f32
    %977 = vector.broadcast %cst_302 : f32 to vector<8x32xf32>
    %978 = arith.addf %977, %976 : vector<8x32xf32>
    %979 = arith.divf %977, %978 : vector<8x32xf32>
    %980 = vector.extract_strided_slice %973 {offsets = [0, 32], sizes = [8, 32], strides = [1, 1]} : vector<8x128xf32> to vector<8x32xf32>
    %981 = arith.negf %980 : vector<8x32xf32>
    %982 = math.exp %981 : vector<8x32xf32>
    %cst_303 = arith.constant 1.000000e+00 : f32
    %983 = vector.broadcast %cst_303 : f32 to vector<8x32xf32>
    %984 = arith.addf %983, %982 : vector<8x32xf32>
    %985 = arith.divf %983, %984 : vector<8x32xf32>
    %986 = vector.extract_strided_slice %973 {offsets = [0, 64], sizes = [8, 32], strides = [1, 1]} : vector<8x128xf32> to vector<8x32xf32>
    %987 = math.tanh %986 : vector<8x32xf32>
    %988 = vector.extract_strided_slice %973 {offsets = [0, 96], sizes = [8, 32], strides = [1, 1]} : vector<8x128xf32> to vector<8x32xf32>
    %989 = arith.negf %988 : vector<8x32xf32>
    %990 = math.exp %989 : vector<8x32xf32>
    %cst_304 = arith.constant 1.000000e+00 : f32
    %991 = vector.broadcast %cst_304 : f32 to vector<8x32xf32>
    %992 = arith.addf %991, %990 : vector<8x32xf32>
    %993 = arith.divf %991, %992 : vector<8x32xf32>
    %994 = arith.mulf %985, %968 : vector<8x32xf32>
    %995 = arith.mulf %979, %987 : vector<8x32xf32>
    %996 = arith.addf %994, %995 : vector<8x32xf32>
    %997 = math.tanh %996 : vector<8x32xf32>
    %998 = arith.mulf %993, %997 : vector<8x32xf32>
    %999 = vector.extract_strided_slice %939 {offsets = [40, 0], sizes = [8, 128], strides = [1, 1]} : vector<64x128xf32> to vector<8x128xf32>
    %cst_305 = arith.constant dense<0.000000e+00> : vector<8x128xf32>
    %1000 = tpu.matmul %998, %940, %cst_305 {dimension_numbers = #tpu.dot_dimension_numbers<[1], [0], [0], [1], [0, 0, 1, 1], [], []>} : vector<8x32xf32>, vector<32x128xf32>, vector<8x128xf32> -> vector<8x128xf32>
    %1001 = arith.addf %999, %1000 : vector<8x128xf32>
    %1002 = vector.extract_strided_slice %1001 {offsets = [0, 0], sizes = [8, 32], strides = [1, 1]} : vector<8x128xf32> to vector<8x32xf32>
    %1003 = arith.negf %1002 : vector<8x32xf32>
    %1004 = math.exp %1003 : vector<8x32xf32>
    %cst_306 = arith.constant 1.000000e+00 : f32
    %1005 = vector.broadcast %cst_306 : f32 to vector<8x32xf32>
    %1006 = arith.addf %1005, %1004 : vector<8x32xf32>
    %1007 = arith.divf %1005, %1006 : vector<8x32xf32>
    %1008 = vector.extract_strided_slice %1001 {offsets = [0, 32], sizes = [8, 32], strides = [1, 1]} : vector<8x128xf32> to vector<8x32xf32>
    %1009 = arith.negf %1008 : vector<8x32xf32>
    %1010 = math.exp %1009 : vector<8x32xf32>
    %cst_307 = arith.constant 1.000000e+00 : f32
    %1011 = vector.broadcast %cst_307 : f32 to vector<8x32xf32>
    %1012 = arith.addf %1011, %1010 : vector<8x32xf32>
    %1013 = arith.divf %1011, %1012 : vector<8x32xf32>
    %1014 = vector.extract_strided_slice %1001 {offsets = [0, 64], sizes = [8, 32], strides = [1, 1]} : vector<8x128xf32> to vector<8x32xf32>
    %1015 = math.tanh %1014 : vector<8x32xf32>
    %1016 = vector.extract_strided_slice %1001 {offsets = [0, 96], sizes = [8, 32], strides = [1, 1]} : vector<8x128xf32> to vector<8x32xf32>
    %1017 = arith.negf %1016 : vector<8x32xf32>
    %1018 = math.exp %1017 : vector<8x32xf32>
    %cst_308 = arith.constant 1.000000e+00 : f32
    %1019 = vector.broadcast %cst_308 : f32 to vector<8x32xf32>
    %1020 = arith.addf %1019, %1018 : vector<8x32xf32>
    %1021 = arith.divf %1019, %1020 : vector<8x32xf32>
    %1022 = arith.mulf %1013, %996 : vector<8x32xf32>
    %1023 = arith.mulf %1007, %1015 : vector<8x32xf32>
    %1024 = arith.addf %1022, %1023 : vector<8x32xf32>
    %1025 = math.tanh %1024 : vector<8x32xf32>
    %1026 = arith.mulf %1021, %1025 : vector<8x32xf32>
    %1027 = vector.extract_strided_slice %939 {offsets = [32, 0], sizes = [8, 128], strides = [1, 1]} : vector<64x128xf32> to vector<8x128xf32>
    %cst_309 = arith.constant dense<0.000000e+00> : vector<8x128xf32>
    %1028 = tpu.matmul %1026, %940, %cst_309 {dimension_numbers = #tpu.dot_dimension_numbers<[1], [0], [0], [1], [0, 0, 1, 1], [], []>} : vector<8x32xf32>, vector<32x128xf32>, vector<8x128xf32> -> vector<8x128xf32>
    %1029 = arith.addf %1027, %1028 : vector<8x128xf32>
    %1030 = vector.extract_strided_slice %1029 {offsets = [0, 0], sizes = [8, 32], strides = [1, 1]} : vector<8x128xf32> to vector<8x32xf32>
    %1031 = arith.negf %1030 : vector<8x32xf32>
    %1032 = math.exp %1031 : vector<8x32xf32>
    %cst_310 = arith.constant 1.000000e+00 : f32
    %1033 = vector.broadcast %cst_310 : f32 to vector<8x32xf32>
    %1034 = arith.addf %1033, %1032 : vector<8x32xf32>
    %1035 = arith.divf %1033, %1034 : vector<8x32xf32>
    %1036 = vector.extract_strided_slice %1029 {offsets = [0, 32], sizes = [8, 32], strides = [1, 1]} : vector<8x128xf32> to vector<8x32xf32>
    %1037 = arith.negf %1036 : vector<8x32xf32>
    %1038 = math.exp %1037 : vector<8x32xf32>
    %cst_311 = arith.constant 1.000000e+00 : f32
    %1039 = vector.broadcast %cst_311 : f32 to vector<8x32xf32>
    %1040 = arith.addf %1039, %1038 : vector<8x32xf32>
    %1041 = arith.divf %1039, %1040 : vector<8x32xf32>
    %1042 = vector.extract_strided_slice %1029 {offsets = [0, 64], sizes = [8, 32], strides = [1, 1]} : vector<8x128xf32> to vector<8x32xf32>
    %1043 = math.tanh %1042 : vector<8x32xf32>
    %1044 = vector.extract_strided_slice %1029 {offsets = [0, 96], sizes = [8, 32], strides = [1, 1]} : vector<8x128xf32> to vector<8x32xf32>
    %1045 = arith.negf %1044 : vector<8x32xf32>
    %1046 = math.exp %1045 : vector<8x32xf32>
    %cst_312 = arith.constant 1.000000e+00 : f32
    %1047 = vector.broadcast %cst_312 : f32 to vector<8x32xf32>
    %1048 = arith.addf %1047, %1046 : vector<8x32xf32>
    %1049 = arith.divf %1047, %1048 : vector<8x32xf32>
    %1050 = arith.mulf %1041, %1024 : vector<8x32xf32>
    %1051 = arith.mulf %1035, %1043 : vector<8x32xf32>
    %1052 = arith.addf %1050, %1051 : vector<8x32xf32>
    %1053 = math.tanh %1052 : vector<8x32xf32>
    %1054 = arith.mulf %1049, %1053 : vector<8x32xf32>
    %1055 = vector.extract_strided_slice %939 {offsets = [24, 0], sizes = [8, 128], strides = [1, 1]} : vector<64x128xf32> to vector<8x128xf32>
    %cst_313 = arith.constant dense<0.000000e+00> : vector<8x128xf32>
    %1056 = tpu.matmul %1054, %940, %cst_313 {dimension_numbers = #tpu.dot_dimension_numbers<[1], [0], [0], [1], [0, 0, 1, 1], [], []>} : vector<8x32xf32>, vector<32x128xf32>, vector<8x128xf32> -> vector<8x128xf32>
    %1057 = arith.addf %1055, %1056 : vector<8x128xf32>
    %1058 = vector.extract_strided_slice %1057 {offsets = [0, 0], sizes = [8, 32], strides = [1, 1]} : vector<8x128xf32> to vector<8x32xf32>
    %1059 = arith.negf %1058 : vector<8x32xf32>
    %1060 = math.exp %1059 : vector<8x32xf32>
    %cst_314 = arith.constant 1.000000e+00 : f32
    %1061 = vector.broadcast %cst_314 : f32 to vector<8x32xf32>
    %1062 = arith.addf %1061, %1060 : vector<8x32xf32>
    %1063 = arith.divf %1061, %1062 : vector<8x32xf32>
    %1064 = vector.extract_strided_slice %1057 {offsets = [0, 32], sizes = [8, 32], strides = [1, 1]} : vector<8x128xf32> to vector<8x32xf32>
    %1065 = arith.negf %1064 : vector<8x32xf32>
    %1066 = math.exp %1065 : vector<8x32xf32>
    %cst_315 = arith.constant 1.000000e+00 : f32
    %1067 = vector.broadcast %cst_315 : f32 to vector<8x32xf32>
    %1068 = arith.addf %1067, %1066 : vector<8x32xf32>
    %1069 = arith.divf %1067, %1068 : vector<8x32xf32>
    %1070 = vector.extract_strided_slice %1057 {offsets = [0, 64], sizes = [8, 32], strides = [1, 1]} : vector<8x128xf32> to vector<8x32xf32>
    %1071 = math.tanh %1070 : vector<8x32xf32>
    %1072 = vector.extract_strided_slice %1057 {offsets = [0, 96], sizes = [8, 32], strides = [1, 1]} : vector<8x128xf32> to vector<8x32xf32>
    %1073 = arith.negf %1072 : vector<8x32xf32>
    %1074 = math.exp %1073 : vector<8x32xf32>
    %cst_316 = arith.constant 1.000000e+00 : f32
    %1075 = vector.broadcast %cst_316 : f32 to vector<8x32xf32>
    %1076 = arith.addf %1075, %1074 : vector<8x32xf32>
    %1077 = arith.divf %1075, %1076 : vector<8x32xf32>
    %1078 = arith.mulf %1069, %1052 : vector<8x32xf32>
    %1079 = arith.mulf %1063, %1071 : vector<8x32xf32>
    %1080 = arith.addf %1078, %1079 : vector<8x32xf32>
    %1081 = math.tanh %1080 : vector<8x32xf32>
    %1082 = arith.mulf %1077, %1081 : vector<8x32xf32>
    %1083 = vector.extract_strided_slice %939 {offsets = [16, 0], sizes = [8, 128], strides = [1, 1]} : vector<64x128xf32> to vector<8x128xf32>
    %cst_317 = arith.constant dense<0.000000e+00> : vector<8x128xf32>
    %1084 = tpu.matmul %1082, %940, %cst_317 {dimension_numbers = #tpu.dot_dimension_numbers<[1], [0], [0], [1], [0, 0, 1, 1], [], []>} : vector<8x32xf32>, vector<32x128xf32>, vector<8x128xf32> -> vector<8x128xf32>
    %1085 = arith.addf %1083, %1084 : vector<8x128xf32>
    %1086 = vector.extract_strided_slice %1085 {offsets = [0, 0], sizes = [8, 32], strides = [1, 1]} : vector<8x128xf32> to vector<8x32xf32>
    %1087 = arith.negf %1086 : vector<8x32xf32>
    %1088 = math.exp %1087 : vector<8x32xf32>
    %cst_318 = arith.constant 1.000000e+00 : f32
    %1089 = vector.broadcast %cst_318 : f32 to vector<8x32xf32>
    %1090 = arith.addf %1089, %1088 : vector<8x32xf32>
    %1091 = arith.divf %1089, %1090 : vector<8x32xf32>
    %1092 = vector.extract_strided_slice %1085 {offsets = [0, 32], sizes = [8, 32], strides = [1, 1]} : vector<8x128xf32> to vector<8x32xf32>
    %1093 = arith.negf %1092 : vector<8x32xf32>
    %1094 = math.exp %1093 : vector<8x32xf32>
    %cst_319 = arith.constant 1.000000e+00 : f32
    %1095 = vector.broadcast %cst_319 : f32 to vector<8x32xf32>
    %1096 = arith.addf %1095, %1094 : vector<8x32xf32>
    %1097 = arith.divf %1095, %1096 : vector<8x32xf32>
    %1098 = vector.extract_strided_slice %1085 {offsets = [0, 64], sizes = [8, 32], strides = [1, 1]} : vector<8x128xf32> to vector<8x32xf32>
    %1099 = math.tanh %1098 : vector<8x32xf32>
    %1100 = vector.extract_strided_slice %1085 {offsets = [0, 96], sizes = [8, 32], strides = [1, 1]} : vector<8x128xf32> to vector<8x32xf32>
    %1101 = arith.negf %1100 : vector<8x32xf32>
    %1102 = math.exp %1101 : vector<8x32xf32>
    %cst_320 = arith.constant 1.000000e+00 : f32
    %1103 = vector.broadcast %cst_320 : f32 to vector<8x32xf32>
    %1104 = arith.addf %1103, %1102 : vector<8x32xf32>
    %1105 = arith.divf %1103, %1104 : vector<8x32xf32>
    %1106 = arith.mulf %1097, %1080 : vector<8x32xf32>
    %1107 = arith.mulf %1091, %1099 : vector<8x32xf32>
    %1108 = arith.addf %1106, %1107 : vector<8x32xf32>
    %1109 = math.tanh %1108 : vector<8x32xf32>
    %1110 = arith.mulf %1105, %1109 : vector<8x32xf32>
    %1111 = vector.extract_strided_slice %939 {offsets = [8, 0], sizes = [8, 128], strides = [1, 1]} : vector<64x128xf32> to vector<8x128xf32>
    %cst_321 = arith.constant dense<0.000000e+00> : vector<8x128xf32>
    %1112 = tpu.matmul %1110, %940, %cst_321 {dimension_numbers = #tpu.dot_dimension_numbers<[1], [0], [0], [1], [0, 0, 1, 1], [], []>} : vector<8x32xf32>, vector<32x128xf32>, vector<8x128xf32> -> vector<8x128xf32>
    %1113 = arith.addf %1111, %1112 : vector<8x128xf32>
    %1114 = vector.extract_strided_slice %1113 {offsets = [0, 0], sizes = [8, 32], strides = [1, 1]} : vector<8x128xf32> to vector<8x32xf32>
    %1115 = arith.negf %1114 : vector<8x32xf32>
    %1116 = math.exp %1115 : vector<8x32xf32>
    %cst_322 = arith.constant 1.000000e+00 : f32
    %1117 = vector.broadcast %cst_322 : f32 to vector<8x32xf32>
    %1118 = arith.addf %1117, %1116 : vector<8x32xf32>
    %1119 = arith.divf %1117, %1118 : vector<8x32xf32>
    %1120 = vector.extract_strided_slice %1113 {offsets = [0, 32], sizes = [8, 32], strides = [1, 1]} : vector<8x128xf32> to vector<8x32xf32>
    %1121 = arith.negf %1120 : vector<8x32xf32>
    %1122 = math.exp %1121 : vector<8x32xf32>
    %cst_323 = arith.constant 1.000000e+00 : f32
    %1123 = vector.broadcast %cst_323 : f32 to vector<8x32xf32>
    %1124 = arith.addf %1123, %1122 : vector<8x32xf32>
    %1125 = arith.divf %1123, %1124 : vector<8x32xf32>
    %1126 = vector.extract_strided_slice %1113 {offsets = [0, 64], sizes = [8, 32], strides = [1, 1]} : vector<8x128xf32> to vector<8x32xf32>
    %1127 = math.tanh %1126 : vector<8x32xf32>
    %1128 = vector.extract_strided_slice %1113 {offsets = [0, 96], sizes = [8, 32], strides = [1, 1]} : vector<8x128xf32> to vector<8x32xf32>
    %1129 = arith.negf %1128 : vector<8x32xf32>
    %1130 = math.exp %1129 : vector<8x32xf32>
    %cst_324 = arith.constant 1.000000e+00 : f32
    %1131 = vector.broadcast %cst_324 : f32 to vector<8x32xf32>
    %1132 = arith.addf %1131, %1130 : vector<8x32xf32>
    %1133 = arith.divf %1131, %1132 : vector<8x32xf32>
    %1134 = arith.mulf %1125, %1108 : vector<8x32xf32>
    %1135 = arith.mulf %1119, %1127 : vector<8x32xf32>
    %1136 = arith.addf %1134, %1135 : vector<8x32xf32>
    %1137 = math.tanh %1136 : vector<8x32xf32>
    %1138 = arith.mulf %1133, %1137 : vector<8x32xf32>
    %1139 = vector.extract_strided_slice %939 {offsets = [0, 0], sizes = [8, 128], strides = [1, 1]} : vector<64x128xf32> to vector<8x128xf32>
    %cst_325 = arith.constant dense<0.000000e+00> : vector<8x128xf32>
    %1140 = tpu.matmul %1138, %940, %cst_325 {dimension_numbers = #tpu.dot_dimension_numbers<[1], [0], [0], [1], [0, 0, 1, 1], [], []>} : vector<8x32xf32>, vector<32x128xf32>, vector<8x128xf32> -> vector<8x128xf32>
    %1141 = arith.addf %1139, %1140 : vector<8x128xf32>
    %1142 = vector.extract_strided_slice %1141 {offsets = [0, 0], sizes = [8, 32], strides = [1, 1]} : vector<8x128xf32> to vector<8x32xf32>
    %1143 = arith.negf %1142 : vector<8x32xf32>
    %1144 = math.exp %1143 : vector<8x32xf32>
    %cst_326 = arith.constant 1.000000e+00 : f32
    %1145 = vector.broadcast %cst_326 : f32 to vector<8x32xf32>
    %1146 = arith.addf %1145, %1144 : vector<8x32xf32>
    %1147 = arith.divf %1145, %1146 : vector<8x32xf32>
    %1148 = vector.extract_strided_slice %1141 {offsets = [0, 32], sizes = [8, 32], strides = [1, 1]} : vector<8x128xf32> to vector<8x32xf32>
    %1149 = arith.negf %1148 : vector<8x32xf32>
    %1150 = math.exp %1149 : vector<8x32xf32>
    %cst_327 = arith.constant 1.000000e+00 : f32
    %1151 = vector.broadcast %cst_327 : f32 to vector<8x32xf32>
    %1152 = arith.addf %1151, %1150 : vector<8x32xf32>
    %1153 = arith.divf %1151, %1152 : vector<8x32xf32>
    %1154 = vector.extract_strided_slice %1141 {offsets = [0, 64], sizes = [8, 32], strides = [1, 1]} : vector<8x128xf32> to vector<8x32xf32>
    %1155 = math.tanh %1154 : vector<8x32xf32>
    %1156 = vector.extract_strided_slice %1141 {offsets = [0, 96], sizes = [8, 32], strides = [1, 1]} : vector<8x128xf32> to vector<8x32xf32>
    %1157 = arith.negf %1156 : vector<8x32xf32>
    %1158 = math.exp %1157 : vector<8x32xf32>
    %cst_328 = arith.constant 1.000000e+00 : f32
    %1159 = vector.broadcast %cst_328 : f32 to vector<8x32xf32>
    %1160 = arith.addf %1159, %1158 : vector<8x32xf32>
    %1161 = arith.divf %1159, %1160 : vector<8x32xf32>
    %1162 = arith.mulf %1153, %1136 : vector<8x32xf32>
    %1163 = arith.mulf %1147, %1155 : vector<8x32xf32>
    %1164 = arith.addf %1162, %1163 : vector<8x32xf32>
    %1165 = math.tanh %1164 : vector<8x32xf32>
    %1166 = arith.mulf %1161, %1165 : vector<8x32xf32>
    %c0_329 = arith.constant 0 : index
    %c0_330 = arith.constant 0 : index
    %1167 = vector.load %arg38[%c0_329, %c0_330] : memref<64x64xf32, #tpu.memory_space<vmem>>, vector<8x32xf32>
    tpu.vector_store %arg38[%c0_329, %c0_330], %738 {strides = array<i32>} : memref<64x64xf32, #tpu.memory_space<vmem>>, vector<8x32xf32>,
    %c0_331 = arith.constant 0 : index
    %c32_332 = arith.constant 32 : index
    %1168 = vector.load %arg38[%c0_331, %c32_332] : memref<64x64xf32, #tpu.memory_space<vmem>>, vector<8x32xf32>
    tpu.vector_store %arg38[%c0_331, %c32_332], %1166 {strides = array<i32>} : memref<64x64xf32, #tpu.memory_space<vmem>>, vector<8x32xf32>,
    %c8_333 = arith.constant 8 : index
    %c0_334 = arith.constant 0 : index
    %1169 = vector.load %arg38[%c8_333, %c0_334] : memref<64x64xf32, #tpu.memory_space<vmem>>, vector<8x32xf32>
    tpu.vector_store %arg38[%c8_333, %c0_334], %766 {strides = array<i32>} : memref<64x64xf32, #tpu.memory_space<vmem>>, vector<8x32xf32>,
    %c8_335 = arith.constant 8 : index
    %c32_336 = arith.constant 32 : index
    %1170 = vector.load %arg38[%c8_335, %c32_336] : memref<64x64xf32, #tpu.memory_space<vmem>>, vector<8x32xf32>
    tpu.vector_store %arg38[%c8_335, %c32_336], %1138 {strides = array<i32>} : memref<64x64xf32, #tpu.memory_space<vmem>>, vector<8x32xf32>,
    %c16_337 = arith.constant 16 : index
    %c0_338 = arith.constant 0 : index
    %1171 = vector.load %arg38[%c16_337, %c0_338] : memref<64x64xf32, #tpu.memory_space<vmem>>, vector<8x32xf32>
    tpu.vector_store %arg38[%c16_337, %c0_338], %794 {strides = array<i32>} : memref<64x64xf32, #tpu.memory_space<vmem>>, vector<8x32xf32>,
    %c16_339 = arith.constant 16 : index
    %c32_340 = arith.constant 32 : index
    %1172 = vector.load %arg38[%c16_339, %c32_340] : memref<64x64xf32, #tpu.memory_space<vmem>>, vector<8x32xf32>
    tpu.vector_store %arg38[%c16_339, %c32_340], %1110 {strides = array<i32>} : memref<64x64xf32, #tpu.memory_space<vmem>>, vector<8x32xf32>,
    %c24_341 = arith.constant 24 : index
    %c0_342 = arith.constant 0 : index
    %1173 = vector.load %arg38[%c24_341, %c0_342] : memref<64x64xf32, #tpu.memory_space<vmem>>, vector<8x32xf32>
    tpu.vector_store %arg38[%c24_341, %c0_342], %822 {strides = array<i32>} : memref<64x64xf32, #tpu.memory_space<vmem>>, vector<8x32xf32>,
    %c24_343 = arith.constant 24 : index
    %c32_344 = arith.constant 32 : index
    %1174 = vector.load %arg38[%c24_343, %c32_344] : memref<64x64xf32, #tpu.memory_space<vmem>>, vector<8x32xf32>
    tpu.vector_store %arg38[%c24_343, %c32_344], %1082 {strides = array<i32>} : memref<64x64xf32, #tpu.memory_space<vmem>>, vector<8x32xf32>,
    %c32_345 = arith.constant 32 : index
    %c0_346 = arith.constant 0 : index
    %1175 = vector.load %arg38[%c32_345, %c0_346] : memref<64x64xf32, #tpu.memory_space<vmem>>, vector<8x32xf32>
    tpu.vector_store %arg38[%c32_345, %c0_346], %850 {strides = array<i32>} : memref<64x64xf32, #tpu.memory_space<vmem>>, vector<8x32xf32>,
    %c32_347 = arith.constant 32 : index
    %c32_348 = arith.constant 32 : index
    %1176 = vector.load %arg38[%c32_347, %c32_348] : memref<64x64xf32, #tpu.memory_space<vmem>>, vector<8x32xf32>
    tpu.vector_store %arg38[%c32_347, %c32_348], %1054 {strides = array<i32>} : memref<64x64xf32, #tpu.memory_space<vmem>>, vector<8x32xf32>,
    %c40_349 = arith.constant 40 : index
    %c0_350 = arith.constant 0 : index
    %1177 = vector.load %arg38[%c40_349, %c0_350] : memref<64x64xf32, #tpu.memory_space<vmem>>, vector<8x32xf32>
    tpu.vector_store %arg38[%c40_349, %c0_350], %878 {strides = array<i32>} : memref<64x64xf32, #tpu.memory_space<vmem>>, vector<8x32xf32>,
    %c40_351 = arith.constant 40 : index
    %c32_352 = arith.constant 32 : index
    %1178 = vector.load %arg38[%c40_351, %c32_352] : memref<64x64xf32, #tpu.memory_space<vmem>>, vector<8x32xf32>
    tpu.vector_store %arg38[%c40_351, %c32_352], %1026 {strides = array<i32>} : memref<64x64xf32, #tpu.memory_space<vmem>>, vector<8x32xf32>,
    %c48_353 = arith.constant 48 : index
    %c0_354 = arith.constant 0 : index
    %1179 = vector.load %arg38[%c48_353, %c0_354] : memref<64x64xf32, #tpu.memory_space<vmem>>, vector<8x32xf32>
    tpu.vector_store %arg38[%c48_353, %c0_354], %906 {strides = array<i32>} : memref<64x64xf32, #tpu.memory_space<vmem>>, vector<8x32xf32>,
    %c48_355 = arith.constant 48 : index
    %c32_356 = arith.constant 32 : index
    %1180 = vector.load %arg38[%c48_355, %c32_356] : memref<64x64xf32, #tpu.memory_space<vmem>>, vector<8x32xf32>
    tpu.vector_store %arg38[%c48_355, %c32_356], %998 {strides = array<i32>} : memref<64x64xf32, #tpu.memory_space<vmem>>, vector<8x32xf32>,
    %c56_357 = arith.constant 56 : index
    %c0_358 = arith.constant 0 : index
    %1181 = vector.load %arg38[%c56_357, %c0_358] : memref<64x64xf32, #tpu.memory_space<vmem>>, vector<8x32xf32>
    tpu.vector_store %arg38[%c56_357, %c0_358], %934 {strides = array<i32>} : memref<64x64xf32, #tpu.memory_space<vmem>>, vector<8x32xf32>,
    %c56_359 = arith.constant 56 : index
    %c32_360 = arith.constant 32 : index
    %1182 = vector.load %arg38[%c56_359, %c32_360] : memref<64x64xf32, #tpu.memory_space<vmem>>, vector<8x32xf32>
    tpu.vector_store %arg38[%c56_359, %c32_360], %970 {strides = array<i32>} : memref<64x64xf32, #tpu.memory_space<vmem>>, vector<8x32xf32>,
    %c0_361 = arith.constant 0 : index
    %c0_362 = arith.constant 0 : index
    %1183 = vector.load %arg38[%c0_361, %c0_362] : memref<64x64xf32, #tpu.memory_space<vmem>>, vector<64x64xf32>
    %c0_363 = arith.constant 0 : index
    %c0_364 = arith.constant 0 : index
    %1184 = vector.load %arg26[%c0_363, %c0_364] : memref<64x64xf32, #tpu.memory_space<vmem>>, vector<64x64xf32>
    %cst_365 = arith.constant dense<0.000000e+00> : vector<64x64xf32>
    %1185 = tpu.matmul %1183, %1184, %cst_365 {dimension_numbers = #tpu.dot_dimension_numbers<[1], [0], [0], [1], [0, 0, 1, 1], [], []>} : vector<64x64xf32>, vector<64x64xf32>, vector<64x64xf32> -> vector<64x64xf32>
    %c0_366 = arith.constant 0 : index
    %c0_367 = arith.constant 0 : index
    %1186 = vector.load %arg27[%c0_366, %c0_367] : memref<1x64xf32, #tpu.memory_space<vmem>>, vector<1x64xf32>
    %1187 = vector.broadcast %1186 : vector<1x64xf32> to vector<64x64xf32>
    %1188 = arith.addf %1185, %1187 : vector<64x64xf32>
    %1189 = math.tanh %1188 : vector<64x64xf32>
    %c0_368 = arith.constant 0 : index
    %c0_369 = arith.constant 0 : index
    %1190 = vector.load %arg28[%c0_368, %c0_369] : memref<64x1xf32, #tpu.memory_space<vmem>>, vector<64x1xf32>
    %cst_370 = arith.constant dense<0.000000e+00> : vector<64x1xf32>
    %1191 = tpu.matmul %1189, %1190, %cst_370 {dimension_numbers = #tpu.dot_dimension_numbers<[1], [0], [0], [1], [0, 0, 1, 1], [], []>} : vector<64x64xf32>, vector<64x1xf32>, vector<64x1xf32> -> vector<64x1xf32>
    %cst_371 = arith.constant dense<0xFF800000> : vector<1xf32>
    %1192 = vector.multi_reduction <maximumf>, %1191, %cst_371 [0] : vector<64x1xf32> to vector<1xf32>
    %1193 = vector.shape_cast %1192 : vector<1xf32> to vector<1x1xf32>
    %1194 = vector.broadcast %1193 : vector<1x1xf32> to vector<64x1xf32>
    %1195 = arith.subf %1191, %1194 : vector<64x1xf32>
    %1196 = math.exp %1195 : vector<64x1xf32>
    %1197 = tpu.iota {dimensions = array<i32: 0>} : vector<8x64xi32>
    %1198 = tpu.iota {dimensions = array<i32: 1>} : vector<8x64xi32>
    %c8_i32_372 = arith.constant 8 : i32
    %c0_i32 = arith.constant 0 : i32
    %1199 = arith.cmpi eq, %c8_i32_372, %c0_i32 : i32
    %c1_i32 = arith.constant 1 : i32
    %1200 = arith.select %1199, %c1_i32, %c8_i32_372 : i32
    %1201 = vector.broadcast %1200 : i32 to vector<8x64xi32>
    %1202 = arith.remsi %1198, %1201 : vector<8x64xi32>
    %c0_i32_373 = arith.constant 0 : i32
    %1203 = vector.broadcast %c0_i32_373 : i32 to vector<8x64xi32>
    %1204 = arith.cmpi ne, %1202, %1203 : vector<8x64xi32>
    %c0_i32_374 = arith.constant 0 : i32
    %1205 = vector.broadcast %c0_i32_374 : i32 to vector<8x64xi32>
    %1206 = arith.cmpi slt, %1202, %1205 : vector<8x64xi32>
    %c0_i32_375 = arith.constant 0 : i32
    %1207 = arith.cmpi slt, %1200, %c0_i32_375 : i32
    %1208 = vector.broadcast %1207 : i1 to vector<8x64xi1>
    %1209 = vector.broadcast %1208 : vector<8x64xi1> to vector<8x64xi1>
    %1210 = arith.xori %1206, %1209 : vector<8x64xi1>
    %1211 = arith.andi %1210, %1204 : vector<8x64xi1>
    %1212 = vector.broadcast %1200 : i32 to vector<8x64xi32>
    %1213 = arith.addi %1202, %1212 : vector<8x64xi32>
    %1214 = arith.select %1211, %1213, %1202 : vector<8x64xi1>, vector<8x64xi32>
    %1215 = arith.cmpi eq, %1214, %1197 : vector<8x64xi32>
    %cst_376 = arith.constant 1.000000e+00 : f32
    %cst_377 = arith.constant 0.000000e+00 : f32
    %1216 = vector.broadcast %cst_376 : f32 to vector<8x64xf32>
    %1217 = vector.broadcast %cst_377 : f32 to vector<8x64xf32>
    %1218 = arith.select %1215, %1216, %1217 : vector<8x64xi1>, vector<8x64xf32>
    %cst_378 = arith.constant dense<0.000000e+00> : vector<8x1xf32>
    %1219 = tpu.matmul %1218, %1196, %cst_378 {dimension_numbers = #tpu.dot_dimension_numbers<[1], [0], [0], [1], [0, 0, 1, 1], [], []>} : vector<8x64xf32>, vector<64x1xf32>, vector<8x1xf32> -> vector<8x1xf32>
    %1220 = vector.broadcast %1196 : vector<64x1xf32> to vector<64x64xf32>
    %1221 = arith.mulf %1220, %1183 : vector<64x64xf32>
    %cst_379 = arith.constant dense<0.000000e+00> : vector<8x64xf32>
    %1222 = tpu.matmul %1218, %1221, %cst_379 {dimension_numbers = #tpu.dot_dimension_numbers<[1], [0], [0], [1], [0, 0, 1, 1], [], []>} : vector<8x64xf32>, vector<64x64xf32>, vector<8x64xf32> -> vector<8x64xf32>
    %1223 = tpu.reciprocal %1219 {approx = true} : vector<8x1xf32> -> vector<8x1xf32>
    %1224 = vector.broadcast %1223 : vector<8x1xf32> to vector<8x64xf32>
    %1225 = arith.mulf %1222, %1224 : vector<8x64xf32>
    %c0_380 = arith.constant 0 : index
    %c0_381 = arith.constant 0 : index
    %1226 = vector.load %arg29[%c0_380, %c0_381] : memref<64x32xf32, #tpu.memory_space<vmem>>, vector<64x32xf32>
    %cst_382 = arith.constant dense<0.000000e+00> : vector<8x32xf32>
    %1227 = tpu.matmul %1225, %1226, %cst_382 {dimension_numbers = #tpu.dot_dimension_numbers<[1], [0], [0], [1], [0, 0, 1, 1], [], []>} : vector<8x64xf32>, vector<64x32xf32>, vector<8x32xf32> -> vector<8x32xf32>
    %c0_383 = arith.constant 0 : index
    %c0_384 = arith.constant 0 : index
    %1228 = vector.load %arg30[%c0_383, %c0_384] : memref<1x32xf32, #tpu.memory_space<vmem>>, vector<1x32xf32>
    %1229 = vector.broadcast %1228 : vector<1x32xf32> to vector<8x32xf32>
    %1230 = arith.addf %1227, %1229 : vector<8x32xf32>
    %cst_385 = arith.constant 0.000000e+00 : f32
    %1231 = vector.broadcast %cst_385 : f32 to vector<8x32xf32>
    %1232 = arith.maximumf %1230, %1231 : vector<8x32xf32>
    %c0_386 = arith.constant 0 : index
    %c0_387 = arith.constant 0 : index
    %1233 = vector.load %arg31[%c0_386, %c0_387] : memref<32x1xf32, #tpu.memory_space<vmem>>, vector<32x1xf32>
    %cst_388 = arith.constant dense<0.000000e+00> : vector<8x1xf32>
    %1234 = tpu.matmul %1232, %1233, %cst_388 {dimension_numbers = #tpu.dot_dimension_numbers<[1], [0], [0], [1], [0, 0, 1, 1], [], []>} : vector<8x32xf32>, vector<32x1xf32>, vector<8x1xf32> -> vector<8x1xf32>
    %c0_389 = arith.constant 0 : index
    %c0_390 = arith.constant 0 : index
    %1235 = vector.load %arg32[%c0_389, %c0_390] : memref<1x1xf32, #tpu.memory_space<vmem>>, vector<1x1xf32>
    %1236 = vector.broadcast %1235 : vector<1x1xf32> to vector<8x1xf32>
    %1237 = arith.addf %1234, %1236 : vector<8x1xf32>
    %1238 = arith.negf %1237 : vector<8x1xf32>
    %1239 = math.exp %1238 : vector<8x1xf32>
    %cst_391 = arith.constant 1.000000e+00 : f32
    %1240 = vector.broadcast %cst_391 : f32 to vector<8x1xf32>
    %1241 = arith.addf %1240, %1239 : vector<8x1xf32>
    %1242 = arith.divf %1240, %1241 : vector<8x1xf32>
    %c0_392 = arith.constant 0 : index
    %c0_393 = arith.constant 0 : index
    %1243 = vector.load %arg35[%c0_392, %c0_393] : memref<8x1xf32, #tpu.memory_space<vmem>>, vector<8x1xf32>
    tpu.vector_store %arg35[%c0_392, %c0_393], %1242 {strides = array<i32>} : memref<8x1xf32, #tpu.memory_space<vmem>>, vector<8x1xf32>,
    %1244 = vector.extract_strided_slice %1183 {offsets = [56, 0], sizes = [8, 64], strides = [1, 1]} : vector<64x64xf32> to vector<8x64xf32>
    %c0_394 = arith.constant 0 : index
    %c0_395 = arith.constant 0 : index
    %1245 = vector.load %arg33[%c0_394, %c0_395] : memref<64x32xf32, #tpu.memory_space<vmem>>, vector<64x32xf32>
    %cst_396 = arith.constant dense<0.000000e+00> : vector<8x32xf32>
    %1246 = tpu.matmul %1244, %1245, %cst_396 {dimension_numbers = #tpu.dot_dimension_numbers<[1], [0], [0], [1], [0, 0, 1, 1], [], []>} : vector<8x64xf32>, vector<64x32xf32>, vector<8x32xf32> -> vector<8x32xf32>
    %c0_397 = arith.constant 0 : index
    %c0_398 = arith.constant 0 : index
    %1247 = vector.load %arg34[%c0_397, %c0_398] : memref<1x32xf32, #tpu.memory_space<vmem>>, vector<1x32xf32>
    %1248 = vector.broadcast %1247 : vector<1x32xf32> to vector<8x32xf32>
    %1249 = arith.addf %1246, %1248 : vector<8x32xf32>
    %c0_399 = arith.constant 0 : index
    %c0_400 = arith.constant 0 : index
    %1250 = vector.load %arg36[%c0_399, %c0_400] : memref<8x32xf32, #tpu.memory_space<vmem>>, vector<8x32xf32>
    tpu.vector_store %arg36[%c0_399, %c0_400], %1249 {strides = array<i32>} : memref<8x32xf32, #tpu.memory_space<vmem>>, vector<8x32xf32>,
    return
  }
}

</mosaic_0001>

<bundles_post_ra>
// kernel: forward.1
= control target key start
LH: loop header
LB: loop body
LE: loop exit
PB: predicated region body
PF: predicated region fallthrough
CT: control target
= control target key end

     0   :  { %s13219_s6 = smov 1   ;;  %s13220_s10 = smov 2   ;;  %s15194_s0 = inlined_call_operand.smem [shape: u32[37], index: -1, kind: input, shape index: {}] }
   0x1   :  { %s13290_s5 = sld [smem:[%s15194_s0]]   ;;  %s13221_s14 = smov 3  }
   0x2   :  { %s13295_s9 = sld [smem:[%s15194_s0 + %s13219_s6]]   ;;  %s13222_s18 = smov 4  }
   0x3   :  { %s13300_s13 = sld [smem:[%s15194_s0 + %s13220_s10]]   ;;  %s13223_s22 = smov 5  }
   0x4   :  { %s13305_s17 = sld [smem:[%s15194_s0 + %s13221_s14]]   ;;  %s13224_s26 = smov 6  }
   0x5   :  { %s13310_s21 = sld [smem:[%s15194_s0 + %s13222_s18]]   ;;  %s13225_s30 = smov 7  }
   0x6   :  { %s13315_s25 = sld [smem:[%s15194_s0 + %s13223_s22]]   ;;  %s13226_s4 = smov 8  }
   0x7   :  { %15209 = sst [smem:[#allocation44_spill]] %s13290_s5  ;;  %s13227_s10 = smov 9  }
   0x8   :  { %s13320_s29 = sld [smem:[%s15194_s0 + %s13224_s26]]   ;;  %s13228_s15 = smov 10  }
   0x9   :  { %15210 = sst [smem:[#allocation45_spill]] %s13300_s13  ;;  %s13229_s20 = smov 11  }
   0xa   :  { %s13325_s3 = sld [smem:[%s15194_s0 + %s13225_s30]]   ;;  %s13230_s26 = smov 12  }
   0xb   :  { %15211 = sst [smem:[#allocation46_spill]] %s13310_s21  ;;  %s13231_s1 = smov 13  }
   0xc   :  { %15212 = sst [smem:[#allocation47_spill]] %s13315_s25  ;;  %s13232_s7 = smov 14  }
   0xd   :  { %s13330_s8 = sld [smem:[%s15194_s0 + %s13226_s4]]   ;;  %s13234_s22 = smov 16  }
   0xe   :  { %15213 = sst [smem:[#allocation48_spill]] %s13320_s29  ;;  %s13235_s28 = smov 17  }
   0xf   :  { %s13335_s14 = sld [smem:[%s15194_s0 + %s13227_s10]]   ;;  %s13252_s10 = smov 34  }
  0x10   :  { %15214 = sst [smem:[#allocation49_spill]] %s13325_s3  ;;  %s13253_s16 = smov 35  }
  0x11   :  { %s13340_s19 = sld [smem:[%s15194_s0 + %s13228_s15]]   ;;  %s13233_s15 = smov 15  }
  0x12   :  { %s13345_s24 = sld [smem:[%s15194_s0 + %s13229_s20]]   ;;  %s13254_s23 = smov 36  }
  0x13   :  { %15215 = sst [smem:[#allocation50_spill]] %s13330_s8 }
  0x14   :  { %s13350_s30 = sld [smem:[%s15194_s0 + %s13230_s26]]  }
  0x15   :  { %15216 = sst [smem:[#allocation51_spill]] %s13335_s14 }
  0x16   :  { %s13355_s6 = sld [smem:[%s15194_s0 + %s13231_s1]]   ;;  %s13251_s1 = smov 33  }
  0x17   :  { %15217 = sst [smem:[#allocation52_spill]] %s13340_s19 }
  0x18   :  { %15218 = sst [smem:[#allocation53_spill]] %s13345_s24 }
  0x19   :  { %s13360_s12 = sld [smem:[%s15194_s0 + %s13232_s7]]   ;;  %s13236_s7 = smov 18  }
  0x1a   :  { %s13365_s20 = sld [smem:[%s15194_s0 + %s13233_s15]]   ;;  %s13237_s15 = smov 19  }
  0x1b   :  { %s13370_s27 = sld [smem:[%s15194_s0 + %s13234_s22]]   ;;  %s13238_s22 = smov 20  }
  0x1c   :  { %15219 = sst [smem:[#allocation54_spill]] %s13355_s6 }
  0x1d   :  { %s13375_s4 = sld [smem:[%s15194_s0 + %s13235_s28]]   ;;  %s13239_s28 = smov 21  }
  0x1e   :  { %s13380_s6 = sld [smem:[%s15194_s0 + %s13236_s7]]   ;;  %s13240_s7 = smov 22  }
  0x1f   :  { %s13385_s24 = sld [smem:[%s15194_s0 + %s13237_s15]]   ;;  %s13241_s15 = smov 23  }
  0x20   :  { %s13390_s14 = sld [smem:[%s15194_s0 + %s13238_s22]]   ;;  %s13242_s22 = smov 24  }
  0x21   :  { %s13395_s19 = sld [smem:[%s15194_s0 + %s13239_s28]]   ;;  %s13243_s28 = smov 25  }
  0x22   :  { %s13400_s3 = sld [smem:[%s15194_s0 + %s13240_s7]]   ;;  %s13244_s7 = smov 26  }
  0x23   :  { %s13405_s8 = sld [smem:[%s15194_s0 + %s13241_s15]]   ;;  %s13245_s15 = smov 27  }
  0x24   :  { %s13410_s25 = sld [smem:[%s15194_s0 + %s13242_s22]]   ;;  %s13246_s22 = smov 28  }
  0x25   :  { %15220 = sst [smem:[#allocation55_spill]] %s13385_s24 }
  0x26   :  { %s13415_s29 = sld [smem:[%s15194_s0 + %s13243_s28]]   ;;  %s13247_s28 = smov 29  }
  0x27   :  { %15221 = sst [smem:[#allocation56_spill]] %s13395_s19 }
  0x28   :  { %s13420_s21 = sld [smem:[%s15194_s0 + %s13244_s7]]   ;;  %s13248_s7 = smov 30  }
  0x29   :  { %15222 = sst [smem:[#allocation57_spill]] %s13405_s8 }
  0x2a   :  { %s13425_s13 = sld [smem:[%s15194_s0 + %s13245_s15]]   ;;  %s13249_s15 = smov 31  }
  0x2b   :  { %s13430_s5 = sld [smem:[%s15194_s0 + %s13246_s22]]   ;;  %s13250_s22 = smov 32  }
  0x2c   :  { %15223 = sst [smem:[#allocation58_spill]] %s13415_s29 }
  0x2d   :  { %s13435_s29 = sld [smem:[%s15194_s0 + %s13247_s28]]  }
  0x2e   :  { %s13440_s8 = sld [smem:[%s15194_s0 + %s13248_s7]]  }
  0x2f   :  { %s13458_s19 = sld [smem:[%s15194_s0 + %s13252_s10]]  }
  0x30   :  { %15224 = sst [smem:[#allocation59_spill]] %s13425_s13 }
  0x31   :  { %15225 = sst [smem:[#allocation60_spill]] %s13430_s5 }
  0x32   :  { %s13445_s13 = sld [smem:[%s15194_s0 + %s13249_s15]]  }
  0x33   :  { %15226 = sst [smem:[#allocation61_spill]] %s13435_s29 }
  0x34   :  { %s9185_s5 = sld [smem:[%s15194_s0 + %s13250_s22]]  }
  0x35   :  { %s13453_s29 = sld [smem:[%s15194_s0 + %s13251_s1]]  }
  0x36   :  { %s13468_s24 = sld [smem:[%s15194_s0 + %s13254_s23]]  }
  0x38   :  { %15227 = sst [smem:[#allocation62_spill]] %s13445_s13 }
  0x39   :  { %s13463_s13 = sld [smem:[%s15194_s0 + %s13253_s16]]  }
  0x3a   :  { %v79_v0 = vstv %s9185_s5 }
  0x3b   :  { %80 = vst [vmem:[#allocation4] sm:$0x1] %v79_v0 }
  0x3c   :  { %81 = vsyncpa [#allocation6], 0 }
  0x3d   :  { %82 = vsyncpa [#allocation8], 0 }
  0x3e   :  { %83 = vsyncpa [#allocation11], 0 }
  0x3f   :  { %84 = vsyncpa [#allocation14], 0 }
  0x40   :  { %85 = vsyncpa [#allocation17], 0 }
  0x41   :  { %86 = vsyncpa [#allocation20], 0 }
  0x42   :  { %87 = vsyncpa [#allocation23], 0 }
  0x43   :  { %88 = vsyncpa [#allocation26], 0 }
  0x44   :  { %89 = vsyncpa [#allocation29], 0 }
  0x45   :  { %90 = vsyncpa [#allocation32], 0  ;;  %s13255_s1 = smov [#allocation7]   ;;  %s12781_s0 = scalar_lea.hbm %s13305_s17, 16 }
  0x46   :  { %s113_s28 = sshll.u32 %s13255_s1, 4  ;;  %p12782_p0 = scmp.ne.s32.totalorder %s13305_s17, %s12781_s0  ;;  %s114_s28 = int_to_ptr.vmem [resolvable:$true] %s113_s28 }
  0x47   :  { %p12785_p1 = scmp.lt.u32.totalorder %s12781_s0, %s13305_s17 }
  0x49   :  { %p12787_p2 = pnand %p12785_p1, %p12782_p0 }
  0x4b   :  { %12790 = shalt.err (!%p12787_p2)
}
  0x4c   :  { %s12791_s5 = scalar_lea.vmem %s114_s28, 16  ;;  %s12795_s2 = scalar_lea.vmem %s114_s28, 32 }
  0x4d   :  { %p12792_p3 = scmp.ne.s32.totalorder %s114_s28, %s12791_s5  ;;  %p12796_p4 = scmp.lt.s32.totalorder %s114_s28, %s114_s28 }
  0x4e   :  { %p12797_p5 = scmp.lt.s32.totalorder %s12795_s2, %s12791_s5 }
  0x50   :  { %p12798_p6 = por %p12797_p5, %p12796_p4 }
  0x52   :  { %p12799_p7 = pnand %p12798_p6, %p12792_p3 }
  0x54   :  { %12802 = shalt.err (!%p12799_p7)
}
  0x55   :  { %116 = dma.hbm_to_vmem [thread:$0]  %s13305_s17, 16, %s114_s28, [#allocation8]  }
  0x56   :  { %s13256_s10 = smov [#allocation10]   ;;  %s13257_s11 = smov [#allocation13]  }
  0x57   :  { %s152_s7 = sshll.u32 %s13256_s10, 4  ;;  %s177_s16 = sshll.u32 %s13257_s11, 4  ;;  %s153_s7 = int_to_ptr.vmem [resolvable:$true] %s152_s7  ;;  %s178_s16 = int_to_ptr.vmem [resolvable:$true] %s177_s16 }
  0x58   :  { %s12803_s15 = scalar_lea.hbm %s13360_s12, 512 }
  0x59   :  { %p12804_p8 = scmp.ne.s32.totalorder %s13360_s12, %s12803_s15  ;;  %p12807_p9 = scmp.lt.u32.totalorder %s12803_s15, %s13360_s12 }
  0x5b   :  { %p12809_p10 = pnand %p12807_p9, %p12804_p8 }
  0x5d   :  { %12812 = shalt.err (!%p12809_p10)
}
  0x5e   :  { %s12813_s18 = scalar_lea.vmem %s153_s7, 512  ;;  %p12818_p12 = scmp.lt.s32.totalorder %s153_s7, %s153_s7 }
  0x5f   :  { %p12814_p11 = scmp.ne.s32.totalorder %s153_s7, %s12813_s18  ;;  %p12819_p13 = scmp.lt.s32.totalorder %s12813_s18, %s12813_s18 }
  0x61   :  { %p12820_p0 = por %p12819_p13, %p12818_p12 }
  0x63   :  { %p12821_p1 = pnand %p12820_p0, %p12814_p11 }
  0x65   :  { %12824 = shalt.err (!%p12821_p1)
}
  0x66   :  { %s13258_s23 = smov 128   ;;  %s13259_s17 = smov 8  }
  0x67   :  { %158 = dma.hbm_to_vmem [thread:$0]  %s13360_s12, 512, %s153_s7, [#allocation11], %s13258_s23, %s13258_s23, %s13259_s17  }
  0x68   :  { %s12825_s22 = scalar_lea.hbm %s13370_s27, 16 }
  0x69   :  { %p12826_p2 = scmp.ne.s32.totalorder %s13370_s27, %s12825_s22  ;;  %p12829_p3 = scmp.lt.u32.totalorder %s12825_s22, %s13370_s27 }
  0x6b   :  { %p12831_p4 = pnand %p12829_p3, %p12826_p2 }
  0x6d   :  { %12834 = shalt.err (!%p12831_p4)
}
  0x6e   :  { %s12835_s26 = scalar_lea.vmem %s178_s16, 16  ;;  %s12839_s1 = scalar_lea.vmem %s178_s16, 32 }
  0x6f   :  { %p12836_p5 = scmp.ne.s32.totalorder %s178_s16, %s12835_s26  ;;  %p12840_p6 = scmp.lt.s32.totalorder %s178_s16, %s178_s16 }
  0x70   :  { %p12841_p7 = scmp.lt.s32.totalorder %s12839_s1, %s12835_s26 }
  0x72   :  { %p12842_p8 = por %p12841_p7, %p12840_p6 }
  0x74   :  { %p12843_p9 = pnand %p12842_p8, %p12836_p5 }
  0x76   :  { %12846 = shalt.err (!%p12843_p9)
}
  0x77   :  { %180 = dma.hbm_to_vmem [thread:$0]  %s13370_s27, 16, %s178_s16, [#allocation14]  }
  0x78   :  { %s13260_s12 = smov [#allocation16]   ;;  %s13261_s0 = smov [#allocation19]  }
  0x79   :  { %s198_s28 = sshll.u32 %s13260_s12, 4  ;;  %s220_s5 = sshll.u32 %s13261_s0, 4  ;;  %s199_s28 = int_to_ptr.vmem [resolvable:$true] %s198_s28  ;;  %s221_s5 = int_to_ptr.vmem [resolvable:$true] %s220_s5 }
  0x7a   :  { %s12847_s2 = scalar_lea.hbm %s13380_s6, 512 }
  0x7b   :  { %p12848_p10 = scmp.ne.s32.totalorder %s13380_s6, %s12847_s2  ;;  %p12851_p11 = scmp.lt.u32.totalorder %s12847_s2, %s13380_s6 }
  0x7d   :  { %p12853_p12 = pnand %p12851_p11, %p12848_p10 }
  0x7f   :  { %12856 = shalt.err (!%p12853_p12)
}
  0x80   :  { %s12857_s10 = scalar_lea.vmem %s199_s28, 512  ;;  %p12862_p0 = scmp.lt.s32.totalorder %s199_s28, %s199_s28 }
  0x81   :  { %p12858_p13 = scmp.ne.s32.totalorder %s199_s28, %s12857_s10  ;;  %p12863_p1 = scmp.lt.s32.totalorder %s12857_s10, %s12857_s10 }
  0x83   :  { %p12864_p2 = por %p12863_p1, %p12862_p0 }
  0x85   :  { %p12865_p3 = pnand %p12864_p2, %p12858_p13 }
  0x87   :  { %12868 = shalt.err (!%p12865_p3)
}
  0x88   :  { %204 = dma.hbm_to_vmem [thread:$0]  %s13380_s6, 512, %s199_s28, [#allocation17], %s13258_s23, %s13258_s23, %s13259_s17  }
  0x89   :  { %s12869_s27 = scalar_lea.hbm %s13390_s14, 1024 }
  0x8a   :  { %p12870_p4 = scmp.ne.s32.totalorder %s13390_s14, %s12869_s27  ;;  %p12873_p5 = scmp.lt.u32.totalorder %s12869_s27, %s13390_s14 }
  0x8c   :  { %p12875_p6 = pnand %p12873_p5, %p12870_p4 }
  0x8e   :  { %12878 = shalt.err (!%p12875_p6)
}
  0x8f   :  { %s12879_s7 = scalar_lea.vmem %s221_s5, 1024  ;;  %p12884_p8 = scmp.lt.s32.totalorder %s221_s5, %s221_s5 }
  0x90   :  { %p12880_p7 = scmp.ne.s32.totalorder %s221_s5, %s12879_s7  ;;  %p12885_p9 = scmp.lt.s32.totalorder %s12879_s7, %s12879_s7 }
  0x92   :  { %p12886_p10 = por %p12885_p9, %p12884_p8 }
  0x94   :  { %p12887_p11 = pnand %p12886_p10, %p12880_p7 }
  0x96   :  { %12890 = shalt.err (!%p12887_p11)
}
  0x97   :  { %226 = dma.hbm_to_vmem [thread:$0]  %s13390_s14, 1024, %s221_s5, [#allocation20], %s13258_s23, %s13258_s23, %s13259_s17  }
  0x98   :  { %s13262_s6 = smov [#allocation22]   ;;  %s13263_s16 = smov [#allocation25]  }
  0x99   :  { %s245_s11 = sshll.u32 %s13262_s6, 4  ;;  %s266_s15 = sshll.u32 %s13263_s16, 4  ;;  %s246_s11 = int_to_ptr.vmem [resolvable:$true] %s245_s11  ;;  %s267_s15 = int_to_ptr.vmem [resolvable:$true] %s266_s15 }
  0x9a   :  { %s12891_s18 = scalar_lea.hbm %s13400_s3, 16 }
  0x9b   :  { %p12892_p12 = scmp.ne.s32.totalorder %s13400_s3, %s12891_s18  ;;  %p12895_p13 = scmp.lt.u32.totalorder %s12891_s18, %s13400_s3 }
  0x9d   :  { %p12897_p0 = pnand %p12895_p13, %p12892_p12 }
  0x9f   :  { %12900 = shalt.err (!%p12897_p0)
}
  0xa0   :  { %s12901_s22 = scalar_lea.vmem %s246_s11, 16  ;;  %s12905_s26 = scalar_lea.vmem %s246_s11, 32 }
  0xa1   :  { %p12902_p1 = scmp.ne.s32.totalorder %s246_s11, %s12901_s22  ;;  %p12906_p2 = scmp.lt.s32.totalorder %s246_s11, %s246_s11 }
  0xa2   :  { %p12907_p3 = scmp.lt.s32.totalorder %s12905_s26, %s12901_s22 }
  0xa4   :  { %p12908_p4 = por %p12907_p3, %p12906_p2 }
  0xa6   :  { %p12909_p5 = pnand %p12908_p4, %p12902_p1 }
  0xa8   :  { %12912 = shalt.err (!%p12909_p5)
}
  0xa9   :  { %248 = dma.hbm_to_vmem [thread:$0]  %s13400_s3, 16, %s246_s11, [#allocation23]  }
  0xaa   :  { %s12913_s14 = scalar_lea.hbm %s13410_s25, 512 }
  0xab   :  { %p12914_p6 = scmp.ne.s32.totalorder %s13410_s25, %s12913_s14  ;;  %p12917_p7 = scmp.lt.u32.totalorder %s12913_s14, %s13410_s25 }
  0xad   :  { %p12919_p8 = pnand %p12917_p7, %p12914_p6 }
  0xaf   :  { %12922 = shalt.err (!%p12919_p8)
}
  0xb0   :  { %s12923_s1 = scalar_lea.vmem %s267_s15, 512  ;;  %p12928_p10 = scmp.lt.s32.totalorder %s267_s15, %s267_s15 }
  0xb1   :  { %p12924_p9 = scmp.ne.s32.totalorder %s267_s15, %s12923_s1  ;;  %p12929_p11 = scmp.lt.s32.totalorder %s12923_s1, %s12923_s1 }
  0xb3   :  { %p12930_p12 = por %p12929_p11, %p12928_p10 }
  0xb5   :  { %p12931_p13 = pnand %p12930_p12, %p12924_p9 }
  0xb7   :  { %12934 = shalt.err (!%p12931_p13)
}
  0xb8   :  { %272 = dma.hbm_to_vmem [thread:$0]  %s13410_s25, 512, %s267_s15, [#allocation26], %s13258_s23, %s13258_s23, %s13259_s17  }
  0xb9   :  { %s13264_s3 = smov [#allocation28]   ;;  %s13265_s28 = smov [#allocation31]  }
  0xba   :  { %s288_s12 = sshll.u32 %s13264_s3, 4  ;;  %s315_s0 = sshll.u32 %s13265_s28, 4  ;;  %s289_s12 = int_to_ptr.vmem [resolvable:$true] %s288_s12  ;;  %s316_s0 = int_to_ptr.vmem [resolvable:$true] %s315_s0 }
  0xbb   :  { %s12935_s5 = scalar_lea.hbm %s13420_s21, 1024 }
  0xbc   :  { %p12936_p0 = scmp.ne.s32.totalorder %s13420_s21, %s12935_s5  ;;  %p12939_p1 = scmp.lt.u32.totalorder %s12935_s5, %s13420_s21 }
  0xbe   :  { %p12941_p2 = pnand %p12939_p1, %p12936_p0 }
  0xc0   :  { %12944 = shalt.err (!%p12941_p2)
}
  0xc1   :  { %s12945_s2 = scalar_lea.vmem %s289_s12, 1024  ;;  %p12950_p4 = scmp.lt.s32.totalorder %s289_s12, %s289_s12 }
  0xc2   :  { %p12946_p3 = scmp.ne.s32.totalorder %s289_s12, %s12945_s2  ;;  %p12951_p5 = scmp.lt.s32.totalorder %s12945_s2, %s12945_s2 }
  0xc4   :  { %p12952_p6 = por %p12951_p5, %p12950_p4 }
  0xc6   :  { %p12953_p7 = pnand %p12952_p6, %p12946_p3 }
  0xc8   :  { %12956 = shalt.err (!%p12953_p7)
}
  0xc9   :  { %294 = dma.hbm_to_vmem [thread:$0]  %s13420_s21, 1024, %s289_s12, [#allocation29], %s13258_s23, %s13258_s23, %s13259_s17  }
  0xca   :  { %s12957_s25 = scalar_lea.hbm %s13440_s8, 16 }
  0xcb   :  { %p12958_p8 = scmp.ne.s32.totalorder %s13440_s8, %s12957_s25  ;;  %p12961_p9 = scmp.lt.u32.totalorder %s12957_s25, %s13440_s8 }
  0xcd   :  { %p12963_p10 = pnand %p12961_p9, %p12958_p8 }
  0xcf   :  { %12966 = shalt.err (!%p12963_p10)
}
  0xd0   :  { %s12967_s10 = scalar_lea.vmem %s316_s0, 16  ;;  %s12971_s27 = scalar_lea.vmem %s316_s0, 32 }
  0xd1   :  { %p12968_p11 = scmp.ne.s32.totalorder %s316_s0, %s12967_s10  ;;  %p12972_p12 = scmp.lt.s32.totalorder %s316_s0, %s316_s0 }
  0xd2   :  { %p12973_p13 = scmp.lt.s32.totalorder %s12971_s27, %s12967_s10 }
  0xd4   :  { %p12974_p0 = por %p12973_p13, %p12972_p12 }
  0xd6   :  { %p12975_p1 = pnand %p12974_p0, %p12968_p11 }
  0xd8   :  { %12978 = shalt.err (!%p12975_p1)
}
  0xd9   :  { %318 = dma.hbm_to_vmem [thread:$0]  %s13440_s8, 16, %s316_s0, [#allocation32]  }
  0xda   :  { %s13266_s21 = smov [#allocation5]   ;;  %s13267_s6 = smov [#allocation9]  }
  0xdb   :  { %s98_s7 = sshll.u32 %s13266_s21, 4  ;;  %s138_s11 = sshll.u32 %s13267_s6, 4  ;;  %s99_s7 = int_to_ptr.vmem [resolvable:$true] %s98_s7  ;;  %s139_s11 = int_to_ptr.vmem [resolvable:$true] %s138_s11 }
  0xdc   :  { %s12979_s16 = scalar_lea.hbm %s13295_s9, 512 }
  0xdd   :  { %p12980_p2 = scmp.ne.s32.totalorder %s13295_s9, %s12979_s16  ;;  %p12983_p3 = scmp.lt.u32.totalorder %s12979_s16, %s13295_s9 }
  0xdf   :  { %p12985_p4 = pnand %p12983_p3, %p12980_p2 }
  0xe1   :  { %12988 = shalt.err (!%p12985_p4)
}
  0xe2   :  { %s12989_s15 = scalar_lea.vmem %s99_s7, 512  ;;  %p12994_p6 = scmp.lt.s32.totalorder %s99_s7, %s99_s7 }
  0xe3   :  { %p12990_p5 = scmp.ne.s32.totalorder %s99_s7, %s12989_s15  ;;  %p12995_p7 = scmp.lt.s32.totalorder %s12989_s15, %s12989_s15 }
  0xe5   :  { %p12996_p8 = por %p12995_p7, %p12994_p6 }
  0xe7   :  { %p12997_p9 = pnand %p12996_p8, %p12990_p5 }
  0xe9   :  { %13000 = shalt.err (!%p12997_p9)
}
  0xea   :  { %104 = dma.hbm_to_vmem [thread:$0]  %s13295_s9, 512, %s99_s7, [#allocation6], %s13258_s23, %s13258_s23, %s13259_s17  }
  0xeb   :  { %s13001_s8 = scalar_lea.hbm %s13350_s30, 1536 }
  0xec   :  { %p13002_p10 = scmp.ne.s32.totalorder %s13350_s30, %s13001_s8  ;;  %p13005_p11 = scmp.lt.u32.totalorder %s13001_s8, %s13350_s30 }
  0xee   :  { %p13007_p12 = pnand %p13005_p11, %p13002_p10 }
  0xf0   :  { %13010 = shalt.err (!%p13007_p12)
}
  0xf1   :  { %s13011_s18 = scalar_lea.vmem %s139_s11, 1536  ;;  %p13016_p0 = scmp.lt.s32.totalorder %s139_s11, %s139_s11 }
  0xf2   :  { %p13012_p13 = scmp.ne.s32.totalorder %s139_s11, %s13011_s18  ;;  %p13017_p1 = scmp.lt.s32.totalorder %s13011_s18, %s13011_s18 }
  0xf4   :  { %p13018_p2 = por %p13017_p1, %p13016_p0 }
  0xf6   :  { %p13019_p3 = pnand %p13018_p2, %p13012_p13 }
  0xf8   :  { %13022 = shalt.err (!%p13019_p3)
}
  0xf9   :  { %144 = dma.hbm_to_vmem [thread:$0]  %s13350_s30, 1536, %s139_s11, [#allocation8], %s13258_s23, %s13258_s23, %s13259_s17  }
  0xfa   :  { %s13268_s9 = smov [#allocation12]   ;;  %s13269_s26 = smov [#allocation15]  }
  0xfb   :  { %s164_s22 = sshll.u32 %s13268_s9, 4  ;;  %s186_s14 = sshll.u32 %s13269_s26, 4  ;;  %s165_s22 = int_to_ptr.vmem [resolvable:$true] %s164_s22  ;;  %s187_s14 = int_to_ptr.vmem [resolvable:$true] %s186_s14 }
  0xfc   :  { %s13023_s1 = scalar_lea.hbm %s13365_s20, 512 }
  0xfd   :  { %p13024_p4 = scmp.ne.s32.totalorder %s13365_s20, %s13023_s1  ;;  %p13027_p5 = scmp.lt.u32.totalorder %s13023_s1, %s13365_s20 }
  0xff   :  { %p13029_p6 = pnand %p13027_p5, %p13024_p4 }
 0x101   :  { %13032 = shalt.err (!%p13029_p6)
}
 0x102   :  { %s13033_s3 = scalar_lea.vmem %s165_s22, 512  ;;  %p13038_p8 = scmp.lt.s32.totalorder %s165_s22, %s165_s22 }
 0x103   :  { %p13034_p7 = scmp.ne.s32.totalorder %s165_s22, %s13033_s3  ;;  %p13039_p9 = scmp.lt.s32.totalorder %s13033_s3, %s13033_s3 }
 0x105   :  { %p13040_p10 = por %p13039_p9, %p13038_p8 }
 0x107   :  { %p13041_p11 = pnand %p13040_p10, %p13034_p7 }
 0x109   :  { %13044 = shalt.err (!%p13041_p11)
}
 0x10a   :  { %170 = dma.hbm_to_vmem [thread:$0]  %s13365_s20, 512, %s165_s22, [#allocation11], %s13258_s23, %s13258_s23, %s13259_s17  }
 0x10b   :  { %s13045_s30 = scalar_lea.hbm %s13375_s4, 512 }
 0x10c   :  { %p13046_p12 = scmp.ne.s32.totalorder %s13375_s4, %s13045_s30  ;;  %p13049_p13 = scmp.lt.u32.totalorder %s13045_s30, %s13375_s4 }
 0x10e   :  { %p13051_p0 = pnand %p13049_p13, %p13046_p12 }
 0x110   :  { %13054 = shalt.err (!%p13051_p0)
}
 0x111   :  { %s13055_s12 = scalar_lea.vmem %s187_s14, 512  ;;  %p13060_p2 = scmp.lt.s32.totalorder %s187_s14, %s187_s14 }
 0x112   :  { %p13056_p1 = scmp.ne.s32.totalorder %s187_s14, %s13055_s12  ;;  %p13061_p3 = scmp.lt.s32.totalorder %s13055_s12, %s13055_s12 }
 0x114   :  { %p13062_p4 = por %p13061_p3, %p13060_p2 }
 0x116   :  { %p13063_p5 = pnand %p13062_p4, %p13056_p1 }
 0x118   :  { %13066 = shalt.err (!%p13063_p5)
}
 0x119   :  { %s15228_s28 = sld [smem:[#allocation55_spill]]  ;;  %s13270_s20 = smov [#allocation18]  }
 0x11a   :  { %192 = dma.hbm_to_vmem [thread:$0]  %s13375_s4, 512, %s187_s14, [#allocation14], %s13258_s23, %s13258_s23, %s13259_s17  }
 0x11b   :  { %s211_s0 = sshll.u32 %s13270_s20, 4  ;;  %s13271_s5 = smov [#allocation21]   ;;  %s212_s0 = int_to_ptr.vmem [resolvable:$true] %s211_s0 }
 0x11c   :  { %s232_s2 = sshll.u32 %s13271_s5, 4  ;;  %s233_s2 = int_to_ptr.vmem [resolvable:$true] %s232_s2 }
 0x11f   :  { %s13067_s25 = scalar_lea.hbm %s15228_s28, 16 }
 0x120   :  { %p13068_p6 = scmp.ne.s32.totalorder %s15228_s28, %s13067_s25  ;;  %p13071_p7 = scmp.lt.u32.totalorder %s13067_s25, %s15228_s28 }
 0x122   :  { %p13073_p8 = pnand %p13071_p7, %p13068_p6 }
 0x124   :  { %13076 = shalt.err (!%p13073_p8)
}
 0x125   :  { %s13077_s10 = scalar_lea.vmem %s212_s0, 16  ;;  %s13081_s27 = scalar_lea.vmem %s212_s0, 32 }
 0x126   :  { %p13078_p9 = scmp.ne.s32.totalorder %s212_s0, %s13077_s10  ;;  %p13082_p10 = scmp.lt.s32.totalorder %s212_s0, %s212_s0 }
 0x127   :  { %p13083_p11 = scmp.lt.s32.totalorder %s13081_s27, %s13077_s10 }
 0x129   :  { %p13084_p12 = por %p13083_p11, %p13082_p10 }
 0x12b   :  { %p13085_p13 = pnand %p13084_p12, %p13078_p9 }
 0x12d   :  { %13088 = shalt.err (!%p13085_p13)
}
 0x12e   :  { %s15229_s4 = sld [smem:[#allocation56_spill]] }
 0x12f   :  { %214 = dma.hbm_to_vmem [thread:$0]  %s15228_s28, 16, %s212_s0, [#allocation17]  }
 0x134   :  { %s13089_s21 = scalar_lea.hbm %s15229_s4, 512 }
 0x135   :  { %p13090_p0 = scmp.ne.s32.totalorder %s15229_s4, %s13089_s21  ;;  %p13093_p1 = scmp.lt.u32.totalorder %s13089_s21, %s15229_s4 }
 0x137   :  { %p13095_p2 = pnand %p13093_p1, %p13090_p0 }
 0x139   :  { %13098 = shalt.err (!%p13095_p2)
}
 0x13a   :  { %s13099_s7 = scalar_lea.vmem %s233_s2, 512  ;;  %p13104_p4 = scmp.lt.s32.totalorder %s233_s2, %s233_s2 }
 0x13b   :  { %p13100_p3 = scmp.ne.s32.totalorder %s233_s2, %s13099_s7  ;;  %p13105_p5 = scmp.lt.s32.totalorder %s13099_s7, %s13099_s7 }
 0x13d   :  { %p13106_p6 = por %p13105_p5, %p13104_p4 }
 0x13f   :  { %p13107_p7 = pnand %p13106_p6, %p13100_p3 }
 0x141   :  { %13110 = shalt.err (!%p13107_p7)
}
 0x142   :  { %s15230_s6 = sld [smem:[#allocation57_spill]]  ;;  %s13272_s11 = smov [#allocation24]  }
 0x143   :  { %238 = dma.hbm_to_vmem [thread:$0]  %s15229_s4, 512, %s233_s2, [#allocation20], %s13258_s23, %s13258_s23, %s13259_s17  }
 0x144   :  { %s254_s16 = sshll.u32 %s13272_s11, 4  ;;  %s13273_s15 = smov [#allocation27]   ;;  %s255_s16 = int_to_ptr.vmem [resolvable:$true] %s254_s16 }
 0x145   :  { %s279_s8 = sshll.u32 %s13273_s15, 4  ;;  %s280_s8 = int_to_ptr.vmem [resolvable:$true] %s279_s8 }
 0x148   :  { %s13111_s18 = scalar_lea.hbm %s15230_s6, 1024 }
 0x149   :  { %p13112_p8 = scmp.ne.s32.totalorder %s15230_s6, %s13111_s18  ;;  %p13115_p9 = scmp.lt.u32.totalorder %s13111_s18, %s15230_s6 }
 0x14b   :  { %p13117_p10 = pnand %p13115_p9, %p13112_p8 }
 0x14d   :  { %13120 = shalt.err (!%p13117_p10)
}
 0x14e   :  { %s13121_s9 = scalar_lea.vmem %s255_s16, 1024  ;;  %p13126_p12 = scmp.lt.s32.totalorder %s255_s16, %s255_s16 }
 0x14f   :  { %p13122_p11 = scmp.ne.s32.totalorder %s255_s16, %s13121_s9  ;;  %p13127_p13 = scmp.lt.s32.totalorder %s13121_s9, %s13121_s9 }
 0x151   :  { %p13128_p0 = por %p13127_p13, %p13126_p12 }
 0x153   :  { %p13129_p1 = pnand %p13128_p0, %p13122_p11 }
 0x155   :  { %13132 = shalt.err (!%p13129_p1)
}
 0x156   :  { %s15231_s22 = sld [smem:[#allocation58_spill]] }
 0x157   :  { %260 = dma.hbm_to_vmem [thread:$0]  %s15230_s6, 1024, %s255_s16, [#allocation23], %s13258_s23, %s13258_s23, %s13259_s17  }
 0x15c   :  { %s13133_s26 = scalar_lea.hbm %s15231_s22, 16 }
 0x15d   :  { %p13134_p2 = scmp.ne.s32.totalorder %s15231_s22, %s13133_s26  ;;  %p13137_p3 = scmp.lt.u32.totalorder %s13133_s26, %s15231_s22 }
 0x15f   :  { %p13139_p4 = pnand %p13137_p3, %p13134_p2 }
 0x161   :  { %13142 = shalt.err (!%p13139_p4)
}
 0x162   :  { %s13143_s14 = scalar_lea.vmem %s280_s8, 16  ;;  %s13147_s1 = scalar_lea.vmem %s280_s8, 32 }
 0x163   :  { %p13144_p5 = scmp.ne.s32.totalorder %s280_s8, %s13143_s14  ;;  %p13148_p6 = scmp.lt.s32.totalorder %s280_s8, %s280_s8 }
 0x164   :  { %p13149_p7 = scmp.lt.s32.totalorder %s13147_s1, %s13143_s14 }
 0x166   :  { %p13150_p8 = por %p13149_p7, %p13148_p6 }
 0x168   :  { %p13151_p9 = pnand %p13150_p8, %p13144_p5 }
 0x16a   :  { %13154 = shalt.err (!%p13151_p9)
}
 0x16b   :  { %s15232_s3 = sld [smem:[#allocation59_spill]]  ;;  %s13274_s23 = smov [#allocation30]  }
 0x16c   :  { %282 = dma.hbm_to_vmem [thread:$0]  %s15231_s22, 16, %s280_s8, [#allocation26]  }
 0x16d   :  { %s301_s17 = sshll.u32 %s13274_s23, 4  ;;  %s13275_s30 = smov [#allocation33]   ;;  %s302_s17 = int_to_ptr.vmem [resolvable:$true] %s301_s17 }
 0x16e   :  { %s331_s12 = sshll.u32 %s13275_s30, 4  ;;  %s332_s12 = int_to_ptr.vmem [resolvable:$true] %s331_s12 }
 0x171   :  { %s13155_s28 = scalar_lea.hbm %s15232_s3, 16 }
 0x172   :  { %p13156_p10 = scmp.ne.s32.totalorder %s15232_s3, %s13155_s28  ;;  %p13159_p11 = scmp.lt.u32.totalorder %s13155_s28, %s15232_s3 }
 0x174   :  { %p13161_p12 = pnand %p13159_p11, %p13156_p10 }
 0x176   :  { %13164 = shalt.err (!%p13161_p12)
}
 0x177   :  { %s13165_s20 = scalar_lea.vmem %s302_s17, 16  ;;  %s13169_s0 = scalar_lea.vmem %s302_s17, 32 }
 0x178   :  { %p13166_p13 = scmp.ne.s32.totalorder %s302_s17, %s13165_s20  ;;  %p13170_p0 = scmp.lt.s32.totalorder %s302_s17, %s302_s17 }
 0x179   :  { %p13171_p1 = scmp.lt.s32.totalorder %s13169_s0, %s13165_s20 }
 0x17b   :  { %p13172_p2 = por %p13171_p1, %p13170_p0 }
 0x17d   :  { %p13173_p3 = pnand %p13172_p2, %p13166_p13 }
 0x17f   :  { %13176 = shalt.err (!%p13173_p3)
}
 0x180   :  { %304 = dma.hbm_to_vmem [thread:$0]  %s15232_s3, 16, %s302_s17, [#allocation29]  }
 0x181   :  { %s13177_s5 = scalar_lea.hbm %s13458_s19, 16 }
 0x182   :  { %p13178_p4 = scmp.ne.s32.totalorder %s13458_s19, %s13177_s5  ;;  %p13181_p5 = scmp.lt.u32.totalorder %s13177_s5, %s13458_s19 }
 0x184   :  { %p13183_p6 = pnand %p13181_p5, %p13178_p4 }
 0x186   :  { %13186 = shalt.err (!%p13183_p6)
}
 0x187   :  { %s13187_s2 = scalar_lea.vmem %s332_s12, 16  ;;  %s13191_s25 = scalar_lea.vmem %s332_s12, 32 }
 0x188   :  { %p13188_p7 = scmp.ne.s32.totalorder %s332_s12, %s13187_s2  ;;  %p13192_p8 = scmp.lt.s32.totalorder %s332_s12, %s332_s12 }
 0x189   :  { %p13193_p9 = scmp.lt.s32.totalorder %s13191_s25, %s13187_s2 }
 0x18b   :  { %p13194_p10 = por %p13193_p9, %p13192_p8 }
 0x18d   :  { %p13195_p11 = pnand %p13194_p10, %p13188_p7 }
 0x18f   :  { %13198 = shalt.err (!%p13195_p11)
}
 0x190   :  { %334 = dma.hbm_to_vmem [thread:$0]  %s13458_s19, 16, %s332_s12, [#allocation32]  }
 0x191   :  { %13199 = dma.done.wait [#allocation6], 512  }
 0x192   :  { %13200 = vsyncadd [#allocation6], 4294966784 }
 0x193   :  { %13201 = dma.done.wait [#allocation8], 1552  }
 0x194   :  { %13202 = vsyncadd [#allocation8], 4294965744 }
 0x195   :  { %13203 = dma.done.wait [#allocation11], 1024  }
 0x196   :  { %13204 = vsyncadd [#allocation11], 4294966272 }
 0x197   :  { %13205 = dma.done.wait [#allocation14], 528  }
 0x198   :  { %13206 = vsyncadd [#allocation14], 4294966768 }
 0x199   :  { %13207 = dma.done.wait [#allocation17], 528  }
 0x19a   :  { %13208 = vsyncadd [#allocation17], 4294966768 }
 0x19b   :  { %13209 = dma.done.wait [#allocation20], 1536  }
 0x19c   :  { %13210 = vsyncadd [#allocation20], 4294965760 }
 0x19d   :  { %13211 = dma.done.wait [#allocation23], 1040  }
 0x19e   :  { %13212 = vsyncadd [#allocation23], 4294966256 }
 0x19f   :  { %13213 = dma.done.wait [#allocation26], 528  }
 0x1a0   :  { %13214 = vsyncadd [#allocation26], 4294966768 }
 0x1a1   :  { %13215 = dma.done.wait [#allocation29], 1040  }
 0x1a2   :  { %13216 = vsyncadd [#allocation29], 4294966256 }
 0x1a3   :  { %13217 = dma.done.wait [#allocation32], 32  }
 0x1a4   :  { %13218 = vsyncadd [#allocation32], 4294967264  ;;  %s15233_s19 = sld [smem:[#allocation44_spill]]  ;;  %v13276_v1 = vmov 0   ;;  %v442_v6 = vld [vmem:[#allocation5] sm:$0xff]  ;;  %v443_v7 = vld [vmem:[#allocation5 + $0x8] sm:$0xff]  ;;  %v400_v25 = vlaneseq }
 0x1a5   :  { %12486 = vset.pattern.permute.xlu1 %v13276_v1  ;;  %12485 = vset.pattern.permute.xlu0 %v13276_v1  ;;  %v444_v8 = vld [vmem:[#allocation5 + $0x10] sm:$0xff]  ;;  %v445_v9 = vld [vmem:[#allocation5 + $0x18] sm:$0xff]  ;;  %v11608_v10 = vpack.c.bf16 %v443_v7, %v442_v6  ;;  %s15234_s10 = sld [smem:[#allocation45_spill]]  ;;  %vm446_vm0 = vcmask 261120   ;;  %v13277_v29 = vmov 0.0   ;;  %s15235_s27 = sld [smem:[#allocation46_spill]] }
 0x1a6   :  { %v11612_v11 = vpack.c.bf16 %v445_v9, %v444_v8  ;;  %v13594_v26 = vand.u32 127, %v400_v25  ;;  %vm859_vm11 = vcmask 523264   ;;  %s15236_s4 = sld [smem:[#allocation48_spill]]  ;;  %s15237_s21 = sld [smem:[#allocation47_spill]] }
 0x1a7   :  { %11609 = vmatprep.subr.bf16.mxu0 %v11608_v10  ;;  %s15238_s7 = sld [smem:[#allocation50_spill]]  ;;  %s15239_s6 = sld [smem:[#allocation49_spill]] }
 0x1a8   :  { %11611 = vmatpush3.bf16.msra.mxu0 %v11608_v10  ;;  %s15240_s11 = sld [smem:[#allocation52_spill]]  ;;  %s15241_s16 = sld [smem:[#allocation51_spill]] }
 0x1a9   :  { %11613 = vmatprep.subr.bf16.mxu0 %v11612_v11  ;;  %s15242_s15 = sld [smem:[#allocation53_spill]]  ;;  %s15243_s8 = sld [smem:[#allocation54_spill]] }
 0x1aa   :  { %v394_v2 = vld [vmem:[%s15233_s19 + $0x10] sm:$0xff]  ;;  %v392_v3 = vld [vmem:[%s15233_s19] sm:$0xff]  ;;  %v395_v4 = vld [vmem:[%s15233_s19 + $0x18] sm:$0xff]  ;;  %s13280_s18 = smov 64   ;;  %s13281_s9 = smov 32  }
 0x1ab   :  { %409 = vperm.xlu1 %12486, %v394_v2   ;;  %403 = vperm.xlu0 %12485, %v392_v3   ;;  %v393_v5 = vld [vmem:[%s15233_s19 + $0x8] sm:$0xff]  ;;  %v396_v13 = vld [vmem:[%s15233_s19 + $0x20] sm:$0xff]  ;;  %v399_v14 = vld [vmem:[%s15233_s19 + $0x38] sm:$0xff]  ;;  %v13694_v2 = vshrl.u32 %v400_v25, 7  ;;  %s15244_s22 = sld [smem:[#allocation60_spill]]  ;;  %s15245_s26 = sld [smem:[#allocation61_spill]] }
 0x1ac   :  { %v397_v12 = vld [vmem:[%s15233_s19 + $0x28] sm:$0xff]  ;;  %v398_v15 = vld [vmem:[%s15233_s19 + $0x30] sm:$0xff]  ;;  %11615 = vmatpush3.bf16.msra.mxu0 %v11612_v11  ;;  %v750_v16 = vld [vmem:[%s15234_s10] sm:$0xff]  ;;  %s15246_s14 = sld [smem:[#allocation62_spill]] }
 0x1ad   :  { %v751_v17 = vld [vmem:[%s15234_s10 + $0x8] sm:$0xff]  ;;  %v9198_v18 = vld [vmem:[%s15234_s10 + $0x20] sm:$0xff]  ;;  %v9200_v22 = vld [vmem:[%s15234_s10 + $0x30] sm:$0xff]  ;;  %v13697_v6 = vadd.s32 8, %v13694_v2  ;;  %v13700_v8 = vadd.s32 16, %v13694_v2 }
 0x1ae   :  { %v11624_v19 = vpack.c.bf16 %v751_v17, %v750_v16  ;;  %v9199_v20 = vld [vmem:[%s15234_s10 + $0x28] sm:$0xff]  ;;  %v9201_v23 = vld [vmem:[%s15234_s10 + $0x38] sm:$0xff]  ;;  %v752_v31 = vld [vmem:[%s15234_s10 + $0x10] sm:$0xff] }
 0x1af   :  { %412 = vperm.xlu1 %12486, %v395_v4   ;;  %406 = vperm.xlu0 %12485, %v393_v5   ;;  %v11616_v21 = vpack.c.bf16 %v9199_v20, %v9198_v18  ;;  %v11620_v24 = vpack.c.bf16 %v9201_v23, %v9200_v22  ;;  %v753_v32 = vld [vmem:[%s15234_s10 + $0x18] sm:$0xff]  ;;  %v9226_v47 = vld [vmem:[%s15234_s10 + $0x40] sm:$0xff]  ;;  %v9227_v48 = vld [vmem:[%s15234_s10 + $0x48] sm:$0xff]  ;;  %v727_v11 = vadd.s32 4294967288, %v13697_v6  ;;  %v13718_v22 = vadd.s32 48, %v13694_v2 }
 0x1b0   :  { %11625 = vmatprep.subr.bf16.mxu0 %v11624_v19  ;;  %v11628_v36 = vpack.c.bf16 %v753_v32, %v752_v31  ;;  %v11648_v49 = vpack.c.bf16 %v9227_v48, %v9226_v47  ;;  %v9228_v50 = vld [vmem:[%s15234_s10 + $0x50] sm:$0xff]  ;;  %v9229_v51 = vld [vmem:[%s15234_s10 + $0x58] sm:$0xff]  ;;  %v9246_v61 = vld [vmem:[%s15235_s27 + $0x20] sm:$0xff]  ;;  %v13731_v32 = vadd.s32 56, %v13694_v2 }
 0x1b1   :  { %11617 = vmatprep.subr.bf16.mxu1 %v11616_v21  ;;  %v11652_v54 = vpack.c.bf16 %v9229_v51, %v9228_v50  ;;  %v9247_v62 = vld [vmem:[%s15235_s27 + $0x28] sm:$0xff]  ;;  %vm735_vm9 = vcmp.eq.s32.totalorder %v13594_v26, %v727_v11  ;;  %v732_v31 = vadd.s32 4294967288, %v13718_v22 }
 0x1b2   :  { %11619 = vmatpush3.bf16.msra.mxu1 %v11616_v21  ;;  %v11672_v63 = vpack.c.bf16 %v9247_v62, %v9246_v61  ;;  %v13721_v25 = vsel %vm735_vm9, 1.0, %v13277_v29  ;;  %v1417_v47 = vld [vmem:[%s15235_s27 + $0x8] sm:$0xff] }
 0x1b3   :  { %418 = vperm.xlu1 %12486, %v397_v12   ;;  %415 = vperm.xlu0 %12485, %v396_v13   ;;  %v13704_v12 = vadd.s32 24, %v13694_v2  ;;  %vm740_vm15 = vcmp.eq.s32.totalorder %v13594_v26, %v732_v31 }
 0x1b4   :  { %11621 = vmatprep.subr.bf16.mxu1 %v11620_v24 }
 0x1b5   :  { %v729_v18 = vadd.s32 4294967288, %v13704_v12  ;;  %v999_v61 = vadd.s32 8, %v13704_v12 }
 0x1b6   :  { %11623 = vmatpush3.bf16.msra.mxu1 %v11620_v24 }
 0x1b7   :  { %424 = vperm.xlu1 %12486, %v399_v14   ;;  %421 = vperm.xlu0 %12485, %v398_v15   ;;  %v728_v14 = vadd.s32 4294967288, %v13700_v8  ;;  %v13708_v15 = vadd.s32 32, %v13694_v2  ;;  %vm737_vm12 = vcmp.eq.s32.totalorder %v13594_v26, %v729_v18  ;;  %v9248_v18 = vld [vmem:[%s15235_s27 + $0x30] sm:$0xff] }
 0x1b9   :  { %vm736_vm10 = vcmp.eq.s32.totalorder %v13594_v26, %v728_v14  ;;  %v730_v21 = vadd.s32 4294967288, %v13708_v15 }
 0x1bb   :  { %vm738_vm13 = vcmp.eq.s32.totalorder %v13594_v26, %v730_v21 }
 0x22a   :  { %v410_v27 = vpop.permute.xlu1 %409  ;;  %v404_v28 = vpop.permute.xlu0 %403 }
 0x22b   :  { %vm426_vm1 = vcmp.eq.s32.totalorder %v404_v28, %v13594_v26  ;;  %vm428_vm2 = vcmp.eq.s32.totalorder %v410_v27, %v13594_v26  ;;  %v13724_v27 = vsel %vm736_vm10, 1.0, %v13277_v29 }
 0x22c   :  { %v434_v30 = vsel %vm426_vm1, 1.0, %v13277_v29  ;;  %v436_v35 = vsel %vm428_vm2, 1.0, %v13277_v29  ;;  %vm1004_vm2 = vcmp.eq.s32.totalorder %v13594_v26, %v13697_v6 }
 0x22d   :  { %10309 = vmatprep.mubr.msk.f32.mxu0 %vm446_vm0, %v434_v30  ;;  %v13771_v51 = vsel %vm1004_vm2, 1.0, %v13277_v29  ;;  %vm2303_vm2 = vcmp.eq.s32.totalorder %v13594_v26, %v13700_v8 }
 0x22e   :  { %v413_v33 = vpop.permute.xlu1 %412  ;;  %v407_v34 = vpop.permute.xlu0 %406 }
 0x22f   :  { %vm427_vm3 = vcmp.eq.s32.totalorder %v407_v34, %v13594_v26  ;;  %vm429_vm4 = vcmp.eq.s32.totalorder %v413_v33, %v13594_v26 }
 0x230   :  { %v435_v37 = vsel %vm427_vm3, 1.0, %v13277_v29  ;;  %v437_v40 = vsel %vm429_vm4, 1.0, %v13277_v29 }
 0x231   :  { %10310 = vmatmul.mubr.msk.f32.vlgmr.msra.gmra.mrb[0].mxu0 %vm446_vm0, %v435_v37 }
 0x232   :  { %v419_v38 = vpop.permute.xlu1 %418  ;;  %10312 = vmatprep.mubr.msk.f32.mxu0 %vm446_vm0, %v436_v35  ;;  %v416_v39 = vpop.permute.xlu0 %415  ;;  %11627 = vmatpush3.bf16.msra.mxu0 %v11624_v19  ;;  %v13713_v19 = vadd.s32 40, %v13694_v2  ;;  %v13738_v35 = vsel %vm737_vm12, 1.0, %v13277_v29 }
 0x233   :  { %vm430_vm5 = vcmp.eq.s32.totalorder %v416_v39, %v13594_v26  ;;  %11629 = vmatprep.subr.bf16.mxu0 %v11628_v36  ;;  %vm431_vm6 = vcmp.eq.s32.totalorder %v419_v38, %v13594_v26  ;;  %v733_v38 = vadd.s32 4294967288, %v13731_v32 }
 0x234   :  { %v438_v41 = vsel %vm430_vm5, 1.0, %v13277_v29  ;;  %v439_v44 = vsel %vm431_vm6, 1.0, %v13277_v29  ;;  %v731_v28 = vadd.s32 4294967288, %v13713_v19  ;;  %vm1007_vm5 = vcmp.eq.s32.totalorder %v13594_v26, %v999_v61 }
 0x235   :  { %10313 = vmatmul.mubr.msk.f32.gmra.mrb[2].mxu0 %vm446_vm0, %v437_v40  ;;  %vm741_vm1 = vcmp.eq.s32.totalorder %v13594_v26, %v733_v38  ;;  %v9276_v38 = vld [vmem:[%s15235_s27 + $0x50] sm:$0xff] }
 0x236   :  { %v425_v42 = vpop.permute.xlu1 %424  ;;  %10315 = vmatprep.mubr.msk.f32.mxu0 %vm446_vm0, %v438_v41  ;;  %v422_v43 = vpop.permute.xlu0 %421  ;;  %11631 = vmatpush3.bf16.msra.mxu0 %v11628_v36  ;;  %v13741_v36 = vsel %vm738_vm13, 1.0, %v13277_v29  ;;  %vm739_vm14 = vcmp.eq.s32.totalorder %v13594_v26, %v731_v28  ;;  %v13768_v50 = vsel %vm741_vm1, 1.0, %v13277_v29 }
 0x237   :  { %vm432_vm7 = vcmp.eq.s32.totalorder %v422_v43, %v13594_v26  ;;  %vm433_vm8 = vcmp.eq.s32.totalorder %v425_v42, %v13594_v26  ;;  %11649 = vmatprep.subr.bf16.mxu0 %v11648_v49  ;;  %v13751_v41 = vsel %vm739_vm14, 1.0, %v13277_v29  ;;  %v13754_v42 = vsel %vm740_vm15, 1.0, %v13277_v29 }
 0x238   :  { %v440_v45 = vsel %vm432_vm7, 1.0, %v13277_v29  ;;  %v441_v46 = vsel %vm433_vm8, 1.0, %v13277_v29 }
 0x239   :  { %10316 = vmatmul.mubr.msk.f32.gmra.mrb[4].mxu0 %vm446_vm0, %v439_v44  ;;  %v997_v44 = vadd.s32 8, %v13697_v6 }
 0x23a   :  { %10318 = vmatprep.mubr.msk.f32.mxu0 %vm446_vm0, %v440_v45  ;;  %v998_v45 = vadd.s32 8, %v13700_v8 }
 0x23b   :  { %vm1005_vm3 = vcmp.eq.s32.totalorder %v13594_v26, %v997_v44 }
 0x23c   :  { %vm1006_vm4 = vcmp.eq.s32.totalorder %v13594_v26, %v998_v45 }
 0x23d   :  { %10319 = vmatmul.mubr.msk.f32.gmra.mrb[6].mxu0 %vm446_vm0, %v441_v46  ;;  %v1416_v46 = vld [vmem:[%s15235_s27] sm:$0xff] }
 0x23e   :  { %v11680_v62 = vpack.c.bf16 %v1417_v47, %v1416_v46 }
 0x304   :  { %v13626_v52 = vpop.f32.mrb[0].mxu0 }
 0x305   :  { %v13628_v53 = vpop.f32.mrb[1].mxu0 }
 0x306   :  { %10329 = vmatprep.mubr.msk.f32.mxu1 %vm446_vm0, %v13628_v53  ;;  %10349 = vmatprep.mubr.msk.f32.mxu0 %vm446_vm0, %v13628_v53 }
 0x307   :  { %10330 = vmatmul.mubr.msk.f32.vlgmr.msra.gmra.mrb[0].mxu1 %vm446_vm0, %v13626_v52  ;;  %10350 = vmatmul.mubr.msk.f32.vlgmr.msra.gmra.mrb[8].mxu0 %vm446_vm0, %v13626_v52 }
 0x308   :  { %v13638_v55 = vpop.f32.mrb[2].mxu0  ;;  %11651 = vmatpush3.bf16.msra.mxu0 %v11648_v49 }
 0x309   :  { %v13640_v56 = vpop.f32.mrb[3].mxu0  ;;  %11653 = vmatprep.subr.bf16.mxu0 %v11652_v54 }
 0x30a   :  { %10332 = vmatprep.mubr.msk.f32.mxu1 %vm446_vm0, %v13640_v56  ;;  %10352 = vmatprep.mubr.msk.f32.mxu0 %vm446_vm0, %v13640_v56 }
 0x30b   :  { %10333 = vmatmul.mubr.msk.f32.gmra.mrb[2].mxu1 %vm446_vm0, %v13638_v55  ;;  %10353 = vmatmul.mubr.msk.f32.gmra.mrb[10].mxu0 %vm446_vm0, %v13638_v55 }
 0x30c   :  { %v13650_v57 = vpop.f32.mrb[4].mxu0  ;;  %11655 = vmatpush3.bf16.msra.mxu0 %v11652_v54 }
 0x30d   :  { %v13652_v58 = vpop.f32.mrb[5].mxu0  ;;  %11673 = vmatprep.subr.bf16.mxu0 %v11672_v63 }
 0x30e   :  { %10335 = vmatprep.mubr.msk.f32.mxu1 %vm446_vm0, %v13652_v58  ;;  %10355 = vmatprep.mubr.msk.f32.mxu0 %vm446_vm0, %v13652_v58 }
 0x30f   :  { %10336 = vmatmul.mubr.msk.f32.gmra.mrb[4].mxu1 %vm446_vm0, %v13650_v57  ;;  %10356 = vmatmul.mubr.msk.f32.gmra.mrb[12].mxu0 %vm446_vm0, %v13650_v57 }
 0x310   :  { %v13662_v59 = vpop.f32.mrb[6].mxu0 }
 0x311   :  { %v13664_v60 = vpop.f32.mrb[7].mxu0 }
 0x312   :  { %10338 = vmatprep.mubr.msk.f32.mxu1 %vm446_vm0, %v13664_v60  ;;  %10358 = vmatprep.mubr.msk.f32.mxu0 %vm446_vm0, %v13664_v60 }
 0x313   :  { %10339 = vmatmul.mubr.msk.f32.gmra.mrb[6].mxu1 %vm446_vm0, %v13662_v59  ;;  %10359 = vmatmul.mubr.msk.f32.gmra.mrb[14].mxu0 %vm446_vm0, %v13662_v59 }
 0x314   :  { %10397 = vmatprep.mubr.msk.f32.mxu0 %vm446_vm0, %v13628_v53  ;;  %10377 = vmatprep.mubr.f32.mxu1 %v13277_v29 }
 0x317   :  { %10398 = vmatmul.mubr.msk.f32.vlgmr.msra.gmra.mrb[16].mxu0 %vm446_vm0, %v13626_v52 }
 0x318   :  { %10400 = vmatprep.mubr.msk.f32.mxu0 %vm446_vm0, %v13640_v56  ;;  %11675 = vmatpush3.bf16.msra.mxu0 %v11672_v63  ;;  %v1000_v63 = vadd.s32 8, %v13708_v15 }
 0x31a   :  { %vm1008_vm6 = vcmp.eq.s32.totalorder %v13594_v26, %v1000_v63 }
 0x31b   :  { %10401 = vmatmul.mubr.msk.f32.gmra.mrb[18].mxu0 %vm446_vm0, %v13638_v55  ;;  %v13801_v11 = vsel %vm1008_vm6, 1.0, %v13277_v29 }
 0x31c   :  { %10403 = vmatprep.mubr.msk.f32.mxu0 %vm446_vm0, %v13652_v58 }
 0x31f   :  { %10404 = vmatmul.mubr.msk.f32.gmra.mrb[20].mxu0 %vm446_vm0, %v13650_v57 }
 0x320   :  { %10406 = vmatprep.mubr.msk.f32.mxu0 %vm446_vm0, %v13664_v60 }
 0x323   :  { %10407 = vmatmul.mubr.msk.f32.gmra.mrb[22].mxu0 %vm446_vm0, %v13662_v59 }
 0x3da   :  { %v10351_v0 = vpop.f32.mrb[8].mxu0 }
 0x3db   :  { %v820_v1 = vpop.f32.mrb[9].mxu0 }
 0x3dc   :  { %v11632_v3 = vpack.c.bf16 %v10351_v0, %v820_v1  ;;  %v1418_v0 = vld [vmem:[%s15235_s27 + $0x10] sm:$0xff]  ;;  %v1419_v1 = vld [vmem:[%s15235_s27 + $0x18] sm:$0xff] }
 0x3de   :  { %v10354_v4 = vpop.f32.mrb[10].mxu0  ;;  %11633 = vmatprep.subr.bf16.mxu1 %v11632_v3 }
 0x3df   :  { %v830_v5 = vpop.f32.mrb[11].mxu0  ;;  %11635 = vmatpush3.bf16.msra.mxu1 %v11632_v3  ;;  %v13784_v3 = vsel %vm1005_vm3, 1.0, %v13277_v29 }
 0x3e0   :  { %v11636_v7 = vpack.c.bf16 %v10354_v4, %v830_v5  ;;  %v13787_v4 = vsel %vm1006_vm4, 1.0, %v13277_v29  ;;  %v1001_v5 = vadd.s32 8, %v13713_v19 }
 0x3e2   :  { %v10357_v9 = vpop.f32.mrb[12].mxu0  ;;  %11637 = vmatprep.subr.bf16.mxu1 %v11636_v7  ;;  %vm1009_vm7 = vcmp.eq.s32.totalorder %v13594_v26, %v1001_v5 }
 0x3e3   :  { %v840_v10 = vpop.f32.mrb[13].mxu0  ;;  %11639 = vmatpush3.bf16.msra.mxu1 %v11636_v7  ;;  %v11684_v7 = vpack.c.bf16 %v1419_v1, %v1418_v0  ;;  %v13811_v14 = vsel %vm1009_vm7, 1.0, %v13277_v29 }
 0x3e4   :  { %v11640_v13 = vpack.c.bf16 %v10357_v9, %v840_v10  ;;  %v1002_v9 = vadd.s32 8, %v13718_v22  ;;  %v13798_v10 = vsel %vm1007_vm5, 1.0, %v13277_v29 }
 0x3e6   :  { %v10360_v16 = vpop.f32.mrb[14].mxu0  ;;  %11641 = vmatprep.subr.bf16.mxu1 %v11640_v13  ;;  %vm1010_vm8 = vcmp.eq.s32.totalorder %v13594_v26, %v1002_v9 }
 0x3e7   :  { %v850_v17 = vpop.f32.mrb[15].mxu0  ;;  %11643 = vmatpush3.bf16.msra.mxu1 %v11640_v13  ;;  %v1003_v13 = vadd.s32 8, %v13731_v32 }
 0x3e8   :  { %v11644_v20 = vpack.c.bf16 %v10360_v16, %v850_v17  ;;  %v13814_v16 = vsel %vm1010_vm8, 1.0, %v13277_v29 }
 0x3e9   :  { %vm1011_vm9 = vcmp.eq.s32.totalorder %v13594_v26, %v1003_v13 }
 0x3ea   :  { %11645 = vmatprep.subr.bf16.mxu1 %v11644_v20  ;;  %v10399_v23 = vpop.f32.mrb[16].mxu0  ;;  %v13822_v17 = vsel %vm1011_vm9, 1.0, %v13277_v29 }
 0x3eb   :  { %11647 = vmatpush3.bf16.msra.mxu1 %v11644_v20  ;;  %v1091_v24 = vpop.f32.mrb[17].mxu0  ;;  %v9249_v20 = vld [vmem:[%s15235_s27 + $0x38] sm:$0xff] }
 0x3ec   :  { %v11656_v30 = vpack.c.bf16 %v10399_v23, %v1091_v24  ;;  %v11676_v21 = vpack.c.bf16 %v9249_v20, %v9248_v18  ;;  %v9274_v23 = vld [vmem:[%s15235_s27 + $0x40] sm:$0xff]  ;;  %v9275_v24 = vld [vmem:[%s15235_s27 + $0x48] sm:$0xff] }
 0x3ed   :  { %v11704_v28 = vpack.c.bf16 %v9275_v24, %v9274_v23 }
 0x3ee   :  { %10378 = vmatmul.mubr.msk.f32.vlgmr.msra.gmra.mrb[0].mxu1 %vm859_vm11, %v13721_v25  ;;  %v10402_v33 = vpop.f32.mrb[18].mxu0  ;;  %11657 = vmatprep.subr.bf16.mxu1 %v11656_v30 }
 0x3ef   :  { %v1101_v34 = vpop.f32.mrb[19].mxu0  ;;  %11659 = vmatpush3.bf16.msra.mxu1 %v11656_v30  ;;  %10380 = vmatprep.mubr.msk.f32.mxu1 %vm859_vm11, %v13724_v27  ;;  %v9202_v30 = vld [vmem:[#allocation7] ss:$0 sm:$0xff] }
 0x3f0   :  { %v11660_v37 = vpack.c.bf16 %v10402_v33, %v1101_v34  ;;  %11677 = vmatprep.subr.bf16.mxu0 %v11676_v21 }
 0x3f1   :  { %11679 = vmatpush3.bf16.msra.mxu0 %v11676_v21 }
 0x3f2   :  { %10381 = vmatmul.mubr.msk.f32.gmra.mrb[2].mxu1 %vm859_vm11, %v13738_v35  ;;  %v10405_v39 = vpop.f32.mrb[20].mxu0  ;;  %11661 = vmatprep.subr.bf16.mxu1 %v11660_v37 }
 0x3f3   :  { %v1111_v40 = vpop.f32.mrb[21].mxu0  ;;  %11663 = vmatpush3.bf16.msra.mxu1 %v11660_v37  ;;  %10383 = vmatprep.mubr.msk.f32.mxu1 %vm859_vm11, %v13741_v36 }
 0x3f4   :  { %v11664_v43 = vpack.c.bf16 %v10405_v39, %v1111_v40  ;;  %v9277_v39 = vld [vmem:[%s15235_s27 + $0x58] sm:$0xff] }
 0x3f5   :  { %v11708_v47 = vpack.c.bf16 %v9277_v39, %v9276_v38 }
 0x3f6   :  { %10384 = vmatmul.mubr.msk.f32.gmra.mrb[4].mxu1 %vm859_vm11, %v13751_v41  ;;  %v10408_v48 = vpop.f32.mrb[22].mxu0  ;;  %11665 = vmatprep.subr.bf16.mxu1 %v11664_v43 }
 0x3f7   :  { %v1121_v49 = vpop.f32.mrb[23].mxu0  ;;  %11667 = vmatpush3.bf16.msra.mxu1 %v11664_v43  ;;  %10386 = vmatprep.mubr.msk.f32.mxu1 %vm859_vm11, %v13754_v42 }
 0x3f8   :  { %v11668_v54 = vpack.c.bf16 %v10408_v48, %v1121_v49 }
 0x3fa   :  { %10387 = vmatmul.mubr.msk.f32.gmra.mrb[6].mxu1 %vm859_vm11, %v13768_v50  ;;  %11669 = vmatprep.subr.bf16.mxu1 %v11668_v54 }
 0x3fb   :  { %11671 = vmatpush3.bf16.msra.mxu1 %v11668_v54  ;;  %10425 = vmatprep.mubr.msk.f32.mxu1 %vm859_vm11, %v13771_v51 }
 0x3fc   :  { %11681 = vmatprep.subr.bf16.mxu1 %v11680_v62 }
 0x3fe   :  { %10426 = vmatmul.mubr.msk.f32.vlgmr.msra.gmra.mrb[0].mxu1 %vm859_vm11, %v13784_v3 }
 0x3ff   :  { %10428 = vmatprep.mubr.msk.f32.mxu1 %vm859_vm11, %v13787_v4  ;;  %11683 = vmatpush3.bf16.msra.mxu1 %v11680_v62 }
 0x400   :  { %11685 = vmatprep.subr.bf16.mxu1 %v11684_v7 }
 0x402   :  { %10429 = vmatmul.mubr.msk.f32.gmra.mrb[2].mxu1 %vm859_vm11, %v13798_v10 }
 0x403   :  { %10431 = vmatprep.mubr.msk.f32.mxu1 %vm859_vm11, %v13801_v11  ;;  %11687 = vmatpush3.bf16.msra.mxu1 %v11684_v7 }
 0x404   :  { %11705 = vmatprep.subr.bf16.mxu1 %v11704_v28 }
 0x406   :  { %10432 = vmatmul.mubr.msk.f32.gmra.mrb[4].mxu1 %vm859_vm11, %v13811_v14 }
 0x407   :  { %10434 = vmatprep.mubr.msk.f32.mxu1 %vm859_vm11, %v13814_v16 }
 0x40a   :  { %10435 = vmatmul.mubr.msk.f32.gmra.mrb[6].mxu1 %vm859_vm11, %v13822_v17 }
 0x4d1   :  { %v10427_v31 = vpop.f32.mrb[0].mxu1 }
 0x4d2   :  { %v12278_v33 = vadd.f32 %v10427_v31, %v9202_v30  ;;  %v1220_v34 = vpop.f32.mrb[1].mxu1 }
 0x4d3   :  { %v12279_v37 = vadd.f32 %v9202_v30, %v1220_v34 }
 0x4d4   :  { %v1268_v44 = vmax.f32 %v12278_v33, 0.0 }
 0x4d5   :  { %v1267_v40 = vmax.f32 %v12279_v37, 0.0  ;;  %v10430_v43 = vpop.f32.mrb[2].mxu1 }
 0x4d6   :  { %v12280_v45 = vadd.f32 %v10430_v43, %v9202_v30  ;;  %v1230_v46 = vpop.f32.mrb[3].mxu1 }
 0x4d7   :  { %v12281_v48 = vadd.f32 %v9202_v30, %v1230_v46  ;;  %10445 = vmatprep.mubr.msk.f32.mxu0 %vm446_vm0, %v1267_v40  ;;  %10465 = vmatprep.mubr.msk.f32.mxu1 %vm446_vm0, %v1267_v40 }
 0x4d8   :  { %10446 = vmatmul.mubr.msk.f32.vlgmr.msra.gmra.mrb[24].mxu0 %vm446_vm0, %v1268_v44  ;;  %10466 = vmatmul.mubr.msk.f32.vlgmr.msra.gmra.mrb[8].mxu1 %vm446_vm0, %v1268_v44  ;;  %v1270_v61 = vmax.f32 %v12280_v45, 0.0 }
 0x4d9   :  { %v1269_v49 = vmax.f32 %v12281_v48, 0.0  ;;  %v10433_v54 = vpop.f32.mrb[4].mxu1  ;;  %11707 = vmatpush3.bf16.msra.mxu1 %v11704_v28 }
 0x4da   :  { %v12282_v62 = vadd.f32 %v10433_v54, %v9202_v30  ;;  %v1240_v63 = vpop.f32.mrb[5].mxu1  ;;  %11709 = vmatprep.subr.bf16.mxu1 %v11708_v47 }
 0x4db   :  { %v12283_v0 = vadd.f32 %v9202_v30, %v1240_v63  ;;  %10448 = vmatprep.mubr.msk.f32.mxu0 %vm446_vm0, %v1269_v49  ;;  %10468 = vmatprep.mubr.msk.f32.mxu1 %vm446_vm0, %v1269_v49  ;;  %v2051_v63 = vld [vmem:[%s15236_s4 + $0x8] sm:$0xff] }
 0x4dc   :  { %10449 = vmatmul.mubr.msk.f32.gmra.mrb[26].mxu0 %vm446_vm0, %v1270_v61  ;;  %10469 = vmatmul.mubr.msk.f32.gmra.mrb[10].mxu1 %vm446_vm0, %v1270_v61  ;;  %v1272_v7 = vmax.f32 %v12282_v62, 0.0 }
 0x4dd   :  { %v1271_v1 = vmax.f32 %v12283_v0, 0.0  ;;  %v10436_v5 = vpop.f32.mrb[6].mxu1  ;;  %11711 = vmatpush3.bf16.msra.mxu1 %v11708_v47 }
 0x4de   :  { %v12284_v9 = vadd.f32 %v10436_v5, %v9202_v30  ;;  %v1250_v13 = vpop.f32.mrb[7].mxu1  ;;  %v9250_v5 = vld [vmem:[%s15237_s21] ss:$0 sm:$0xff] }
 0x4df   :  { %v12285_v18 = vadd.f32 %v9202_v30, %v1250_v13  ;;  %10451 = vmatprep.mubr.msk.f32.mxu0 %vm446_vm0, %v1271_v1  ;;  %10471 = vmatprep.mubr.msk.f32.mxu1 %vm446_vm0, %v1271_v1 }
 0x4e0   :  { %10452 = vmatmul.mubr.msk.f32.gmra.mrb[28].mxu0 %vm446_vm0, %v1272_v7  ;;  %10472 = vmatmul.mubr.msk.f32.gmra.mrb[12].mxu1 %vm446_vm0, %v1272_v7  ;;  %v1274_v21 = vmax.f32 %v12284_v9, 0.0 }
 0x4e1   :  { %v1273_v20 = vmax.f32 %v12285_v18, 0.0 }
 0x4e3   :  { %10454 = vmatprep.mubr.msk.f32.mxu0 %vm446_vm0, %v1273_v20  ;;  %10474 = vmatprep.mubr.msk.f32.mxu1 %vm446_vm0, %v1273_v20 }
 0x4e4   :  { %10455 = vmatmul.mubr.msk.f32.gmra.mrb[30].mxu0 %vm446_vm0, %v1274_v21  ;;  %10475 = vmatmul.mubr.msk.f32.gmra.mrb[14].mxu1 %vm446_vm0, %v1274_v21 }
 0x4e5   :  { %10513 = vmatprep.mubr.msk.f32.mxu1 %vm446_vm0, %v1267_v40  ;;  %10493 = vmatprep.mubr.f32.mxu0 %v13277_v29 }
 0x4e8   :  { %10514 = vmatmul.mubr.msk.f32.vlgmr.msra.gmra.mrb[16].mxu1 %vm446_vm0, %v1268_v44 }
 0x4e9   :  { %10516 = vmatprep.mubr.msk.f32.mxu1 %vm446_vm0, %v1269_v49 }
 0x4ec   :  { %10517 = vmatmul.mubr.msk.f32.gmra.mrb[18].mxu1 %vm446_vm0, %v1270_v61 }
 0x4ed   :  { %10519 = vmatprep.mubr.msk.f32.mxu1 %vm446_vm0, %v1271_v1 }
 0x4f0   :  { %10520 = vmatmul.mubr.msk.f32.gmra.mrb[20].mxu1 %vm446_vm0, %v1272_v7 }
 0x4f1   :  { %10522 = vmatprep.mubr.msk.f32.mxu1 %vm446_vm0, %v1273_v20 }
 0x4f4   :  { %10523 = vmatmul.mubr.msk.f32.gmra.mrb[22].mxu1 %vm446_vm0, %v1274_v21 }
 0x5ab   :  { %v10467_v23 = vpop.f32.mrb[8].mxu1 }
 0x5ac   :  { %v1486_v24 = vpop.f32.mrb[9].mxu1 }
 0x5ad   :  { %v11688_v28 = vpack.c.bf16 %v10467_v23, %v1486_v24 }
 0x5af   :  { %v10470_v30 = vpop.f32.mrb[10].mxu1  ;;  %11689 = vmatprep.subr.bf16.mxu0 %v11688_v28 }
 0x5b0   :  { %v1496_v31 = vpop.f32.mrb[11].mxu1  ;;  %11691 = vmatpush3.bf16.msra.mxu0 %v11688_v28 }
 0x5b1   :  { %v11692_v33 = vpack.c.bf16 %v10470_v30, %v1496_v31 }
 0x5b3   :  { %v10473_v34 = vpop.f32.mrb[12].mxu1  ;;  %11693 = vmatprep.subr.bf16.mxu0 %v11692_v33 }
 0x5b4   :  { %v1506_v37 = vpop.f32.mrb[13].mxu1  ;;  %11695 = vmatpush3.bf16.msra.mxu0 %v11692_v33 }
 0x5b5   :  { %v11696_v38 = vpack.c.bf16 %v10473_v34, %v1506_v37  ;;  %v9323_v34 = vld [vmem:[%s15236_s4 + $0x50] sm:$0xff]  ;;  %v9324_v37 = vld [vmem:[%s15236_s4 + $0x58] sm:$0xff] }
 0x5b7   :  { %v10476_v39 = vpop.f32.mrb[14].mxu1  ;;  %11697 = vmatprep.subr.bf16.mxu0 %v11696_v38 }
 0x5b8   :  { %v1516_v40 = vpop.f32.mrb[15].mxu1  ;;  %11699 = vmatpush3.bf16.msra.mxu0 %v11696_v38 }
 0x5b9   :  { %v11700_v43 = vpack.c.bf16 %v10476_v39, %v1516_v40 }
 0x5bb   :  { %11701 = vmatprep.subr.bf16.mxu0 %v11700_v43  ;;  %v10515_v44 = vpop.f32.mrb[16].mxu1 }
 0x5bc   :  { %11703 = vmatpush3.bf16.msra.mxu0 %v11700_v43  ;;  %v1709_v45 = vpop.f32.mrb[17].mxu1 }
 0x5bd   :  { %v11712_v46 = vpack.c.bf16 %v10515_v44, %v1709_v45 }
 0x5bf   :  { %10494 = vmatmul.mubr.msk.f32.vlgmr.msra.gmra.mrb[24].mxu0 %vm859_vm11, %v13721_v25  ;;  %v10518_v47 = vpop.f32.mrb[18].mxu1  ;;  %11713 = vmatprep.subr.bf16.mxu0 %v11712_v46  ;;  %v2050_v25 = vld [vmem:[%s15236_s4] sm:$0xff] }
 0x5c0   :  { %v1719_v48 = vpop.f32.mrb[19].mxu1  ;;  %11715 = vmatpush3.bf16.msra.mxu0 %v11712_v46  ;;  %10496 = vmatprep.mubr.msk.f32.mxu0 %vm859_vm11, %v13724_v27  ;;  %v11736_v1 = vpack.c.bf16 %v2051_v63, %v2050_v25 }
 0x5c1   :  { %v11716_v49 = vpack.c.bf16 %v10518_v47, %v1719_v48  ;;  %v11764_v48 = vpack.c.bf16 %v9324_v37, %v9323_v34  ;;  %v2032_v34 = vadd.s32 4294967280, %v13718_v22 }
 0x5c3   :  { %10497 = vmatmul.mubr.msk.f32.gmra.mrb[26].mxu0 %vm859_vm11, %v13738_v35  ;;  %v10521_v54 = vpop.f32.mrb[20].mxu1  ;;  %11717 = vmatprep.subr.bf16.mxu0 %v11716_v49  ;;  %vm2040_vm15 = vcmp.eq.s32.totalorder %v13594_v26, %v2032_v34 }
 0x5c4   :  { %v1729_v61 = vpop.f32.mrb[21].mxu1  ;;  %11719 = vmatpush3.bf16.msra.mxu0 %v11716_v49  ;;  %10499 = vmatprep.mubr.msk.f32.mxu0 %vm859_vm11, %v13741_v36  ;;  %v9294_v36 = vld [vmem:[%s15236_s4 + $0x20] sm:$0xff] }
 0x5c5   :  { %v11720_v62 = vpack.c.bf16 %v10521_v54, %v1729_v61 }
 0x5c7   :  { %10500 = vmatmul.mubr.msk.f32.gmra.mrb[28].mxu0 %vm859_vm11, %v13751_v41  ;;  %v10524_v0 = vpop.f32.mrb[22].mxu1  ;;  %11721 = vmatprep.subr.bf16.mxu0 %v11720_v62  ;;  %v9295_v41 = vld [vmem:[%s15236_s4 + $0x28] sm:$0xff] }
 0x5c8   :  { %v1739_v27 = vpop.f32.mrb[23].mxu1  ;;  %11723 = vmatpush3.bf16.msra.mxu0 %v11720_v62  ;;  %10502 = vmatprep.mubr.msk.f32.mxu0 %vm859_vm11, %v13754_v42  ;;  %v11728_v42 = vpack.c.bf16 %v9295_v41, %v9294_v36 }
 0x5c9   :  { %v11724_v35 = vpack.c.bf16 %v10524_v0, %v1739_v27 }
 0x5ca   :  { %11729 = vmatprep.subr.bf16.mxu1 %v11728_v42 }
 0x5cb   :  { %10503 = vmatmul.mubr.msk.f32.gmra.mrb[30].mxu0 %vm859_vm11, %v13768_v50  ;;  %11725 = vmatprep.subr.bf16.mxu0 %v11724_v35  ;;  %v2052_v50 = vld [vmem:[%s15236_s4 + $0x10] sm:$0xff] }
 0x5cc   :  { %11727 = vmatpush3.bf16.msra.mxu0 %v11724_v35  ;;  %10541 = vmatprep.mubr.msk.f32.mxu0 %vm859_vm11, %v13771_v51  ;;  %v2053_v51 = vld [vmem:[%s15236_s4 + $0x18] sm:$0xff] }
 0x5cd   :  { %11737 = vmatprep.subr.bf16.mxu0 %v11736_v1  ;;  %11731 = vmatpush3.bf16.msra.mxu1 %v11728_v42 }
 0x5cf   :  { %10542 = vmatmul.mubr.msk.f32.vlgmr.msra.gmra.mrb[24].mxu0 %vm859_vm11, %v13784_v3  ;;  %v9296_v3 = vld [vmem:[%s15236_s4 + $0x30] sm:$0xff] }
 0x5d0   :  { %10544 = vmatprep.mubr.msk.f32.mxu0 %vm859_vm11, %v13787_v4  ;;  %11739 = vmatpush3.bf16.msra.mxu0 %v11736_v1  ;;  %v11740_v4 = vpack.c.bf16 %v2053_v51, %v2052_v50 }
 0x5d2   :  { %11741 = vmatprep.subr.bf16.mxu0 %v11740_v4 }
 0x5d3   :  { %10545 = vmatmul.mubr.msk.f32.gmra.mrb[26].mxu0 %vm859_vm11, %v13798_v10  ;;  %v9297_v10 = vld [vmem:[%s15236_s4 + $0x38] sm:$0xff] }
 0x5d4   :  { %10547 = vmatprep.mubr.msk.f32.mxu0 %vm859_vm11, %v13801_v11  ;;  %v11732_v11 = vpack.c.bf16 %v9297_v10, %v9296_v3  ;;  %11743 = vmatpush3.bf16.msra.mxu0 %v11740_v4 }
 0x5d6   :  { %11733 = vmatprep.subr.bf16.mxu1 %v11732_v11 }
 0x5d7   :  { %10548 = vmatmul.mubr.msk.f32.gmra.mrb[28].mxu0 %vm859_vm11, %v13811_v14  ;;  %11735 = vmatpush3.bf16.msra.mxu1 %v11732_v11  ;;  %v9321_v14 = vld [vmem:[%s15236_s4 + $0x40] sm:$0xff] }
 0x5d8   :  { %10550 = vmatprep.mubr.msk.f32.mxu0 %vm859_vm11, %v13814_v16  ;;  %v9322_v16 = vld [vmem:[%s15236_s4 + $0x48] sm:$0xff] }
 0x5db   :  { %10551 = vmatmul.mubr.msk.f32.gmra.mrb[30].mxu0 %vm859_vm11, %v13822_v17  ;;  %v11760_v17 = vpack.c.bf16 %v9322_v16, %v9321_v14 }
 0x5dd   :  { %11761 = vmatprep.subr.bf16.mxu0 %v11760_v17 }
 0x6a2   :  { %v10543_v7 = vpop.f32.mrb[24].mxu0 }
 0x6a3   :  { %v12286_v9 = vadd.f32 %v10543_v7, %v9250_v5  ;;  %v1814_v13 = vpop.f32.mrb[25].mxu0 }
 0x6a4   :  { %v12287_v18 = vadd.f32 %v9250_v5, %v1814_v13 }
 0x6a5   :  { %v1862_v20 = vmax.f32 %v12286_v9, 0.0  ;;  %v2028_v9 = vadd.s32 4294967280, %v13700_v8 }
 0x6a6   :  { %v1861_v21 = vmax.f32 %v12287_v18, 0.0  ;;  %v10546_v23 = vpop.f32.mrb[26].mxu0 }
 0x6a7   :  { %v1870_v24 = vadd.f32 %v13626_v52, %v1862_v20  ;;  %v12288_v28 = vadd.f32 %v10546_v23, %v9250_v5  ;;  %v1824_v30 = vpop.f32.mrb[27].mxu0  ;;  %v2029_v20 = vadd.s32 4294967280, %v13704_v12  ;;  %vm2036_vm10 = vcmp.eq.s32.totalorder %v13594_v26, %v2028_v9 }
 0x6a8   :  { %v1869_v31 = vadd.f32 %v1861_v21, %v13628_v53  ;;  %v12289_v33 = vadd.f32 %v9250_v5, %v1824_v30  ;;  %v2030_v23 = vadd.s32 4294967280, %v13708_v15  ;;  %v13980_v30 = vsel %vm2036_vm10, 1.0, %v13277_v29 }
 0x6a9   :  { %v1864_v38 = vmax.f32 %v12288_v28, 0.0  ;;  %v13904_v44 = vmax.f32 %v1870_v24, 0.0  ;;  %vm2037_vm12 = vcmp.eq.s32.totalorder %v13594_v26, %v2029_v20  ;;  %v9344_v20 = vld [vmem:[%s15238_s7 + $0x38] sm:$0xff] }
 0x6aa   :  { %v13902_v39 = vmax.f32 %v1869_v31, 0.0  ;;  %v1863_v40 = vmax.f32 %v12289_v33, 0.0  ;;  %v10549_v43 = vpop.f32.mrb[28].mxu0  ;;  %vm2038_vm13 = vcmp.eq.s32.totalorder %v13594_v26, %v2030_v23  ;;  %v2031_v33 = vadd.s32 4294967280, %v13713_v19  ;;  %v9368_v23 = vld [vmem:[%s15238_s7 + $0x40] sm:$0xff] }
 0x6ab   :  { %v1872_v45 = vadd.f32 %v13638_v55, %v1864_v38  ;;  %v12290_v46 = vadd.f32 %v10549_v43, %v9250_v5  ;;  %v1834_v47 = vpop.f32.mrb[29].mxu0  ;;  %v13993_v43 = vsel %vm2038_vm13, 1.0, %v13277_v29 }
 0x6ac   :  { %v1871_v52 = vadd.f32 %v1863_v40, %v13640_v56  ;;  %v12291_v49 = vadd.f32 %v9250_v5, %v1834_v47  ;;  %10561 = vmatprep.mubr.msk.f32.mxu1 %vm446_vm0, %v13902_v39  ;;  %10581 = vmatprep.mubr.msk.f32.mxu0 %vm446_vm0, %v13902_v39  ;;  %v13990_v40 = vsel %vm2037_vm12, 1.0, %v13277_v29  ;;  %vm2039_vm14 = vcmp.eq.s32.totalorder %v13594_v26, %v2031_v33 }
 0x6ad   :  { %v1866_v53 = vmax.f32 %v12290_v46, 0.0  ;;  %10562 = vmatmul.mubr.msk.f32.vlgmr.msra.gmra.mrb[24].mxu1 %vm446_vm0, %v13904_v44  ;;  %10582 = vmatmul.mubr.msk.f32.vlgmr.msra.gmra.mrb[32].mxu0 %vm446_vm0, %v13904_v44  ;;  %v13918_v56 = vmax.f32 %v1872_v45, 0.0  ;;  %v2033_v46 = vadd.s32 4294967280, %v13731_v32 }
 0x6ae   :  { %v13916_v55 = vmax.f32 %v1871_v52, 0.0  ;;  %v1865_v54 = vmax.f32 %v12291_v49, 0.0  ;;  %v10552_v61 = vpop.f32.mrb[30].mxu0  ;;  %11763 = vmatpush3.bf16.msra.mxu0 %v11760_v17  ;;  %v14003_v52 = vsel %vm2039_vm14, 1.0, %v13277_v29  ;;  %v14006_v49 = vsel %vm2040_vm15, 1.0, %v13277_v29 }
 0x6af   :  { %v1874_v62 = vadd.f32 %v13650_v57, %v1866_v53  ;;  %v12292_v25 = vadd.f32 %v10552_v61, %v9250_v5  ;;  %v1844_v63 = vpop.f32.mrb[31].mxu0  ;;  %11765 = vmatprep.subr.bf16.mxu0 %v11764_v48  ;;  %vm2041_vm1 = vcmp.eq.s32.totalorder %v13594_v26, %v2033_v46  ;;  %v2297_v61 = vadd.s32 16, %v13700_v8  ;;  %v9371_v46 = vld [vmem:[%s15238_s7 + $0x58] sm:$0xff] }
 0x6b0   :  { %v1873_v0 = vadd.f32 %v1865_v54, %v13652_v58  ;;  %v12293_v27 = vadd.f32 %v9250_v5, %v1844_v63  ;;  %10564 = vmatprep.mubr.msk.f32.mxu1 %vm446_vm0, %v13916_v55  ;;  %10584 = vmatprep.mubr.msk.f32.mxu0 %vm446_vm0, %v13916_v55  ;;  %v2296_v54 = vadd.s32 16, %v13697_v6  ;;  %vm3602_vm15 = vcmp.eq.s32.totalorder %v13594_v26, %v13708_v15 }
 0x6b1   :  { %v1868_v35 = vmax.f32 %v12292_v25, 0.0  ;;  %10565 = vmatmul.mubr.msk.f32.gmra.mrb[26].mxu1 %vm446_vm0, %v13918_v56  ;;  %10585 = vmatmul.mubr.msk.f32.gmra.mrb[34].mxu0 %vm446_vm0, %v13918_v56  ;;  %v13932_v36 = vmax.f32 %v1874_v62, 0.0  ;;  %v2715_v62 = vld [vmem:[%s15238_s7] sm:$0xff]  ;;  %v2716_v25 = vld [vmem:[%s15238_s7 + $0x8] sm:$0xff]  ;;  %vm2305_vm4 = vcmp.eq.s32.totalorder %v13594_v26, %v2297_v61 }
 0x6b2   :  { %v13930_v57 = vmax.f32 %v1873_v0, 0.0  ;;  %v1867_v1 = vmax.f32 %v12293_v27, 0.0  ;;  %11767 = vmatpush3.bf16.msra.mxu0 %v11764_v48  ;;  %v14020_v27 = vsel %vm2041_vm1, 1.0, %v13277_v29  ;;  %vm2304_vm3 = vcmp.eq.s32.totalorder %v13594_v26, %v2296_v54 }
 0x6b3   :  { %v1876_v58 = vadd.f32 %v13662_v59, %v1868_v35  ;;  %v9341_v59 = vld [vmem:[%s15238_s7 + $0x20] sm:$0xff]  ;;  %v14023_v35 = vsel %vm2303_vm2, 1.0, %v13277_v29 }
 0x6b4   :  { %v1875_v41 = vadd.f32 %v1867_v1, %v13664_v60  ;;  %10567 = vmatprep.mubr.msk.f32.mxu1 %vm446_vm0, %v13930_v57  ;;  %10587 = vmatprep.mubr.msk.f32.mxu0 %vm446_vm0, %v13930_v57  ;;  %v9342_v60 = vld [vmem:[%s15238_s7 + $0x28] sm:$0xff] }
 0x6b5   :  { %10568 = vmatmul.mubr.msk.f32.gmra.mrb[28].mxu1 %vm446_vm0, %v13932_v36  ;;  %10588 = vmatmul.mubr.msk.f32.gmra.mrb[36].mxu0 %vm446_vm0, %v13932_v36  ;;  %v13946_v50 = vmax.f32 %v1876_v58, 0.0  ;;  %v11784_v51 = vpack.c.bf16 %v9342_v60, %v9341_v59  ;;  %v2298_v58 = vadd.s32 16, %v13704_v12  ;;  %v2299_v59 = vadd.s32 16, %v13708_v15  ;;  %v2717_v60 = vld [vmem:[%s15238_s7 + $0x10] sm:$0xff] }
 0x6b6   :  { %v13944_v42 = vmax.f32 %v1875_v41, 0.0  ;;  %v11792_v41 = vpack.c.bf16 %v2716_v25, %v2715_v62 }
 0x6b7   :  { %11785 = vmatprep.subr.bf16.mxu0 %v11784_v51  ;;  %vm2306_vm5 = vcmp.eq.s32.totalorder %v13594_v26, %v2298_v58  ;;  %vm2307_vm6 = vcmp.eq.s32.totalorder %v13594_v26, %v2299_v59 }
 0x6b8   :  { %10570 = vmatprep.mubr.msk.f32.mxu1 %vm446_vm0, %v13944_v42  ;;  %10590 = vmatprep.mubr.msk.f32.mxu0 %vm446_vm0, %v13944_v42 }
 0x6b9   :  { %10571 = vmatmul.mubr.msk.f32.gmra.mrb[30].mxu1 %vm446_vm0, %v13946_v50  ;;  %10591 = vmatmul.mubr.msk.f32.gmra.mrb[38].mxu0 %vm446_vm0, %v13946_v50 }
 0x6ba   :  { %10629 = vmatprep.mubr.msk.f32.mxu0 %vm446_vm0, %v13902_v39  ;;  %10609 = vmatprep.mubr.f32.mxu1 %v13277_v29 }
 0x6bd   :  { %10630 = vmatmul.mubr.msk.f32.vlgmr.msra.gmra.mrb[40].mxu0 %vm446_vm0, %v13904_v44 }
 0x6be   :  { %10632 = vmatprep.mubr.msk.f32.mxu0 %vm446_vm0, %v13916_v55  ;;  %11787 = vmatpush3.bf16.msra.mxu0 %v11784_v51  ;;  %v2718_v51 = vld [vmem:[%s15238_s7 + $0x18] sm:$0xff] }
 0x6c1   :  { %10633 = vmatmul.mubr.msk.f32.gmra.mrb[42].mxu0 %vm446_vm0, %v13918_v56 }
 0x6c2   :  { %10635 = vmatprep.mubr.msk.f32.mxu0 %vm446_vm0, %v13930_v57 }
 0x6c5   :  { %10636 = vmatmul.mubr.msk.f32.gmra.mrb[44].mxu0 %vm446_vm0, %v13932_v36 }
 0x6c6   :  { %10638 = vmatprep.mubr.msk.f32.mxu0 %vm446_vm0, %v13944_v42 }
 0x6c9   :  { %10639 = vmatmul.mubr.msk.f32.gmra.mrb[46].mxu0 %vm446_vm0, %v13946_v50 }
 0x780   :  { %v10583_v3 = vpop.f32.mrb[32].mxu0 }
 0x781   :  { %v2120_v4 = vpop.f32.mrb[33].mxu0 }
 0x782   :  { %v11744_v10 = vpack.c.bf16 %v10583_v3, %v2120_v4  ;;  %v14036_v3 = vsel %vm2304_vm3, 1.0, %v13277_v29  ;;  %v14039_v4 = vsel %vm2305_vm4, 1.0, %v13277_v29 }
 0x784   :  { %v10586_v11 = vpop.f32.mrb[34].mxu0  ;;  %11745 = vmatprep.subr.bf16.mxu1 %v11744_v10 }
 0x785   :  { %v2130_v14 = vpop.f32.mrb[35].mxu0  ;;  %11747 = vmatpush3.bf16.msra.mxu1 %v11744_v10  ;;  %v2300_v10 = vadd.s32 16, %v13713_v19 }
 0x786   :  { %v11748_v16 = vpack.c.bf16 %v10586_v11, %v2130_v14  ;;  %v11796_v11 = vpack.c.bf16 %v2718_v51, %v2717_v60  ;;  %v2301_v14 = vadd.s32 16, %v13718_v22 }
 0x787   :  { %vm2308_vm7 = vcmp.eq.s32.totalorder %v13594_v26, %v2300_v10 }
 0x788   :  { %v10589_v17 = vpop.f32.mrb[36].mxu0  ;;  %11749 = vmatprep.subr.bf16.mxu1 %v11748_v16  ;;  %vm2309_vm8 = vcmp.eq.s32.totalorder %v13594_v26, %v2301_v14 }
 0x789   :  { %v2140_v5 = vpop.f32.mrb[37].mxu0  ;;  %11751 = vmatpush3.bf16.msra.mxu1 %v11748_v16  ;;  %v14050_v16 = vsel %vm2306_vm5, 1.0, %v13277_v29  ;;  %v14066_v9 = vsel %vm2309_vm8, 1.0, %v13277_v29  ;;  %vm13279_vm8 = vmmov 0  }
 0x78a   :  { %v11752_v7 = vpack.c.bf16 %v10589_v17, %v2140_v5  ;;  %v14053_v17 = vsel %vm2307_vm6, 1.0, %v13277_v29  ;;  %v2302_v5 = vadd.s32 16, %v13731_v32 }
 0x78c   :  { %v10592_v13 = vpop.f32.mrb[38].mxu0  ;;  %11753 = vmatprep.subr.bf16.mxu1 %v11752_v7  ;;  %vm2310_vm9 = vcmp.eq.s32.totalorder %v13594_v26, %v2302_v5 }
 0x78d   :  { %v2150_v18 = vpop.f32.mrb[39].mxu0  ;;  %11755 = vmatpush3.bf16.msra.mxu1 %v11752_v7  ;;  %v14063_v7 = vsel %vm2308_vm7, 1.0, %v13277_v29 }
 0x78e   :  { %v11756_v21 = vpack.c.bf16 %v10592_v13, %v2150_v18  ;;  %v14074_v13 = vsel %vm2310_vm9, 1.0, %v13277_v29  ;;  %v9343_v18 = vld [vmem:[%s15238_s7 + $0x30] sm:$0xff]  ;;  %vm6346_vm9 = vcmask 523520  }
 0x790   :  { %11757 = vmatprep.subr.bf16.mxu1 %v11756_v21  ;;  %v10631_v24 = vpop.f32.mrb[40].mxu0 }
 0x791   :  { %11759 = vmatpush3.bf16.msra.mxu1 %v11756_v21  ;;  %v2390_v28 = vpop.f32.mrb[41].mxu0  ;;  %v11788_v21 = vpack.c.bf16 %v9344_v20, %v9343_v18 }
 0x792   :  { %v11768_v31 = vpack.c.bf16 %v10631_v24, %v2390_v28  ;;  %v9369_v24 = vld [vmem:[%s15238_s7 + $0x48] sm:$0xff] }
 0x793   :  { %11789 = vmatprep.subr.bf16.mxu0 %v11788_v21  ;;  %v11816_v28 = vpack.c.bf16 %v9369_v24, %v9368_v23 }
 0x794   :  { %10610 = vmatmul.mubr.f32.vlgmr.msra.gmra.mrb[24].mxu1 %v13277_v29  ;;  %v10634_v37 = vpop.f32.mrb[42].mxu0  ;;  %11769 = vmatprep.subr.bf16.mxu1 %v11768_v31 }
 0x795   :  { %v2400_v38 = vpop.f32.mrb[43].mxu0  ;;  %11771 = vmatpush3.bf16.msra.mxu1 %v11768_v31  ;;  %10612 = vmatprep.mubr.msk.f32.mxu1 %vm859_vm11, %v13980_v30  ;;  %v9298_v31 = vld [vmem:[%s15239_s6] ss:$0 sm:$0xff] }
 0x796   :  { %v11772_v45 = vpack.c.bf16 %v10634_v37, %v2400_v38  ;;  %11791 = vmatpush3.bf16.msra.mxu0 %v11788_v21 }
 0x798   :  { %10613 = vmatmul.mubr.msk.f32.gmra.mrb[26].mxu1 %vm859_vm11, %v13990_v40  ;;  %v10637_v47 = vpop.f32.mrb[44].mxu0  ;;  %11773 = vmatprep.subr.bf16.mxu1 %v11772_v45 }
 0x799   :  { %v2410_v48 = vpop.f32.mrb[45].mxu0  ;;  %11775 = vmatpush3.bf16.msra.mxu1 %v11772_v45  ;;  %10615 = vmatprep.mubr.msk.f32.mxu1 %vm859_vm11, %v13993_v43  ;;  %v9370_v45 = vld [vmem:[%s15238_s7 + $0x50] sm:$0xff] }
 0x79a   :  { %v11776_v53 = vpack.c.bf16 %v10637_v47, %v2410_v48  ;;  %v11820_v62 = vpack.c.bf16 %v9371_v46, %v9370_v45 }
 0x79c   :  { %10616 = vmatmul.mubr.msk.f32.gmra.mrb[28].mxu1 %vm859_vm11, %v14003_v52  ;;  %v10640_v63 = vpop.f32.mrb[46].mxu0  ;;  %11777 = vmatprep.subr.bf16.mxu1 %v11776_v53 }
 0x79d   :  { %v2420_v0 = vpop.f32.mrb[47].mxu0  ;;  %11779 = vmatpush3.bf16.msra.mxu1 %v11776_v53  ;;  %10618 = vmatprep.mubr.msk.f32.mxu1 %vm859_vm11, %v14006_v49 }
 0x79e   :  { %v11780_v1 = vpack.c.bf16 %v10640_v63, %v2420_v0 }
 0x7a0   :  { %10619 = vmatmul.mubr.msk.f32.gmra.mrb[30].mxu1 %vm859_vm11, %v14020_v27  ;;  %11781 = vmatprep.subr.bf16.mxu1 %v11780_v1 }
 0x7a1   :  { %11783 = vmatpush3.bf16.msra.mxu1 %v11780_v1  ;;  %10657 = vmatprep.mubr.msk.f32.mxu1 %vm859_vm11, %v14023_v35 }
 0x7a2   :  { %11793 = vmatprep.subr.bf16.mxu1 %v11792_v41 }
 0x7a4   :  { %10658 = vmatmul.mubr.msk.f32.vlgmr.msra.gmra.mrb[24].mxu1 %vm859_vm11, %v14036_v3 }
 0x7a5   :  { %10660 = vmatprep.mubr.msk.f32.mxu1 %vm859_vm11, %v14039_v4  ;;  %11795 = vmatpush3.bf16.msra.mxu1 %v11792_v41 }
 0x7a6   :  { %11797 = vmatprep.subr.bf16.mxu1 %v11796_v11 }
 0x7a8   :  { %10661 = vmatmul.mubr.msk.f32.gmra.mrb[26].mxu1 %vm859_vm11, %v14050_v16 }
 0x7a9   :  { %10663 = vmatprep.mubr.msk.f32.mxu1 %vm859_vm11, %v14053_v17  ;;  %11799 = vmatpush3.bf16.msra.mxu1 %v11796_v11 }
 0x7aa   :  { %11817 = vmatprep.subr.bf16.mxu1 %v11816_v28 }
 0x7ac   :  { %10664 = vmatmul.mubr.msk.f32.gmra.mrb[28].mxu1 %vm859_vm11, %v14063_v7 }
 0x7ad   :  { %10666 = vmatprep.mubr.msk.f32.mxu1 %vm859_vm11, %v14066_v9 }
 0x7b0   :  { %10667 = vmatmul.mubr.msk.f32.gmra.mrb[30].mxu1 %vm859_vm11, %v14074_v13 }
 0x877   :  { %v10659_v33 = vpop.f32.mrb[24].mxu1 }
 0x878   :  { %v12294_v34 = vadd.f32 %v10659_v33, %v9298_v31  ;;  %v2519_v37 = vpop.f32.mrb[25].mxu1 }
 0x879   :  { %v12295_v38 = vadd.f32 %v9298_v31, %v2519_v37 }
 0x87a   :  { %v2567_v53 = vmax.f32 %v12294_v34, 0.0 }
 0x87b   :  { %v2566_v47 = vmax.f32 %v12295_v38, 0.0  ;;  %v10662_v48 = vpop.f32.mrb[26].mxu1 }
 0x87c   :  { %v12296_v54 = vadd.f32 %v10662_v48, %v9298_v31  ;;  %v2529_v61 = vpop.f32.mrb[27].mxu1 }
 0x87d   :  { %v12297_v25 = vadd.f32 %v9298_v31, %v2529_v61  ;;  %10677 = vmatprep.mubr.msk.f32.mxu0 %vm446_vm0, %v2566_v47  ;;  %10697 = vmatprep.mubr.msk.f32.mxu1 %vm446_vm0, %v2566_v47 }
 0x87e   :  { %10678 = vmatmul.mubr.msk.f32.vlgmr.msra.gmra.mrb[48].mxu0 %vm446_vm0, %v2567_v53  ;;  %10698 = vmatmul.mubr.msk.f32.vlgmr.msra.gmra.mrb[32].mxu1 %vm446_vm0, %v2567_v53  ;;  %v2569_v1 = vmax.f32 %v12296_v54, 0.0 }
 0x87f   :  { %v2568_v63 = vmax.f32 %v12297_v25, 0.0  ;;  %v10665_v0 = vpop.f32.mrb[28].mxu1  ;;  %11819 = vmatpush3.bf16.msra.mxu1 %v11816_v28 }
 0x880   :  { %v12298_v58 = vadd.f32 %v10665_v0, %v9298_v31  ;;  %v2539_v41 = vpop.f32.mrb[29].mxu1  ;;  %11821 = vmatprep.subr.bf16.mxu1 %v11820_v62 }
 0x881   :  { %v12299_v59 = vadd.f32 %v9298_v31, %v2539_v41  ;;  %10680 = vmatprep.mubr.msk.f32.mxu0 %vm446_vm0, %v2568_v63  ;;  %10700 = vmatprep.mubr.msk.f32.mxu1 %vm446_vm0, %v2568_v63  ;;  %v3350_v41 = vld [vmem:[%s15240_s11 + $0x8] sm:$0xff] }
 0x882   :  { %10681 = vmatmul.mubr.msk.f32.gmra.mrb[50].mxu0 %vm446_vm0, %v2569_v1  ;;  %10701 = vmatmul.mubr.msk.f32.gmra.mrb[34].mxu1 %vm446_vm0, %v2569_v1  ;;  %v2571_v10 = vmax.f32 %v12298_v58, 0.0  ;;  %v3349_v58 = vld [vmem:[%s15240_s11] sm:$0xff] }
 0x883   :  { %v2570_v60 = vmax.f32 %v12299_v59, 0.0  ;;  %v10668_v51 = vpop.f32.mrb[30].mxu1  ;;  %11823 = vmatpush3.bf16.msra.mxu1 %v11820_v62 }
 0x884   :  { %v12300_v11 = vadd.f32 %v10668_v51, %v9298_v31  ;;  %v2549_v14 = vpop.f32.mrb[31].mxu1  ;;  %v9345_v51 = vld [vmem:[%s15241_s16] ss:$0 sm:$0xff] }
 0x885   :  { %v12301_v5 = vadd.f32 %v9298_v31, %v2549_v14  ;;  %10683 = vmatprep.mubr.msk.f32.mxu0 %vm446_vm0, %v2570_v60  ;;  %10703 = vmatprep.mubr.msk.f32.mxu1 %vm446_vm0, %v2570_v60 }
 0x886   :  { %10684 = vmatmul.mubr.msk.f32.gmra.mrb[52].mxu0 %vm446_vm0, %v2571_v10  ;;  %10704 = vmatmul.mubr.msk.f32.gmra.mrb[36].mxu1 %vm446_vm0, %v2571_v10  ;;  %v2573_v20 = vmax.f32 %v12300_v11, 0.0 }
 0x887   :  { %v2572_v18 = vmax.f32 %v12301_v5, 0.0 }
 0x889   :  { %10686 = vmatprep.mubr.msk.f32.mxu0 %vm446_vm0, %v2572_v18  ;;  %10706 = vmatprep.mubr.msk.f32.mxu1 %vm446_vm0, %v2572_v18 }
 0x88a   :  { %10687 = vmatmul.mubr.msk.f32.gmra.mrb[54].mxu0 %vm446_vm0, %v2573_v20  ;;  %10707 = vmatmul.mubr.msk.f32.gmra.mrb[38].mxu1 %vm446_vm0, %v2573_v20 }
 0x88b   :  { %10745 = vmatprep.mubr.msk.f32.mxu1 %vm446_vm0, %v2566_v47  ;;  %10725 = vmatprep.mubr.f32.mxu0 %v13277_v29 }
 0x88e   :  { %10746 = vmatmul.mubr.msk.f32.vlgmr.msra.gmra.mrb[40].mxu1 %vm446_vm0, %v2567_v53 }
 0x88f   :  { %10748 = vmatprep.mubr.msk.f32.mxu1 %vm446_vm0, %v2568_v63 }
 0x892   :  { %10749 = vmatmul.mubr.msk.f32.gmra.mrb[42].mxu1 %vm446_vm0, %v2569_v1 }
 0x893   :  { %10751 = vmatprep.mubr.msk.f32.mxu1 %vm446_vm0, %v2570_v60  ;;  %v11848_v60 = vpack.c.bf16 %v3350_v41, %v3349_v58 }
 0x896   :  { %10752 = vmatmul.mubr.msk.f32.gmra.mrb[44].mxu1 %vm446_vm0, %v2571_v10 }
 0x897   :  { %10754 = vmatprep.mubr.msk.f32.mxu1 %vm446_vm0, %v2572_v18 }
 0x89a   :  { %10755 = vmatmul.mubr.msk.f32.gmra.mrb[46].mxu1 %vm446_vm0, %v2573_v20 }
 0x951   :  { %v10699_v21 = vpop.f32.mrb[32].mxu1 }
 0x952   :  { %v2785_v23 = vpop.f32.mrb[33].mxu1 }
 0x953   :  { %v11800_v24 = vpack.c.bf16 %v10699_v21, %v2785_v23 }
 0x955   :  { %v10702_v28 = vpop.f32.mrb[34].mxu1  ;;  %11801 = vmatprep.subr.bf16.mxu0 %v11800_v24 }
 0x956   :  { %v2795_v31 = vpop.f32.mrb[35].mxu1  ;;  %11803 = vmatpush3.bf16.msra.mxu0 %v11800_v24 }
 0x957   :  { %v11804_v33 = vpack.c.bf16 %v10702_v28, %v2795_v31 }
 0x959   :  { %v10705_v34 = vpop.f32.mrb[36].mxu1  ;;  %11805 = vmatprep.subr.bf16.mxu0 %v11804_v33 }
 0x95a   :  { %v2805_v37 = vpop.f32.mrb[37].mxu1  ;;  %11807 = vmatpush3.bf16.msra.mxu0 %v11804_v33 }
 0x95b   :  { %v11808_v38 = vpack.c.bf16 %v10705_v34, %v2805_v37  ;;  %v9415_v34 = vld [vmem:[%s15240_s11 + $0x50] sm:$0xff]  ;;  %v9416_v37 = vld [vmem:[%s15240_s11 + $0x58] sm:$0xff] }
 0x95d   :  { %v10708_v45 = vpop.f32.mrb[38].mxu1  ;;  %11809 = vmatprep.subr.bf16.mxu0 %v11808_v38 }
 0x95e   :  { %v2815_v46 = vpop.f32.mrb[39].mxu1  ;;  %11811 = vmatpush3.bf16.msra.mxu0 %v11808_v38 }
 0x95f   :  { %v11812_v47 = vpack.c.bf16 %v10708_v45, %v2815_v46 }
 0x961   :  { %11813 = vmatprep.subr.bf16.mxu0 %v11812_v47  ;;  %v10747_v48 = vpop.f32.mrb[40].mxu1 }
 0x962   :  { %11815 = vmatpush3.bf16.msra.mxu0 %v11812_v47  ;;  %v3008_v53 = vpop.f32.mrb[41].mxu1 }
 0x963   :  { %v11824_v54 = vpack.c.bf16 %v10747_v48, %v3008_v53 }
 0x965   :  { %10726 = vmatmul.mubr.f32.vlgmr.msra.gmra.mrb[48].mxu0 %v13277_v29  ;;  %v10750_v61 = vpop.f32.mrb[42].mxu1  ;;  %11825 = vmatprep.subr.bf16.mxu0 %v11824_v54 }
 0x966   :  { %v3018_v62 = vpop.f32.mrb[43].mxu1  ;;  %11827 = vmatpush3.bf16.msra.mxu0 %v11824_v54  ;;  %10728 = vmatprep.mubr.msk.f32.mxu0 %vm859_vm11, %v13980_v30 }
 0x967   :  { %v11828_v25 = vpack.c.bf16 %v10750_v61, %v3018_v62  ;;  %v11876_v62 = vpack.c.bf16 %v9416_v37, %v9415_v34 }
 0x969   :  { %10729 = vmatmul.mubr.msk.f32.gmra.mrb[50].mxu0 %vm859_vm11, %v13990_v40  ;;  %v10753_v63 = vpop.f32.mrb[44].mxu1  ;;  %11829 = vmatprep.subr.bf16.mxu0 %v11828_v25 }
 0x96a   :  { %v3028_v0 = vpop.f32.mrb[45].mxu1  ;;  %11831 = vmatpush3.bf16.msra.mxu0 %v11828_v25  ;;  %10731 = vmatprep.mubr.msk.f32.mxu0 %vm859_vm11, %v13993_v43  ;;  %v9388_v43 = vld [vmem:[%s15240_s11 + $0x20] sm:$0xff] }
 0x96b   :  { %v11832_v1 = vpack.c.bf16 %v10753_v63, %v3028_v0 }
 0x96d   :  { %10732 = vmatmul.mubr.msk.f32.gmra.mrb[52].mxu0 %vm859_vm11, %v14003_v52  ;;  %v10756_v59 = vpop.f32.mrb[46].mxu1  ;;  %11833 = vmatprep.subr.bf16.mxu0 %v11832_v1  ;;  %v9389_v52 = vld [vmem:[%s15240_s11 + $0x28] sm:$0xff] }
 0x96e   :  { %v3038_v30 = vpop.f32.mrb[47].mxu1  ;;  %11835 = vmatpush3.bf16.msra.mxu0 %v11832_v1  ;;  %10734 = vmatprep.mubr.msk.f32.mxu0 %vm859_vm11, %v14006_v49  ;;  %v11840_v49 = vpack.c.bf16 %v9389_v52, %v9388_v43 }
 0x96f   :  { %v11836_v40 = vpack.c.bf16 %v10756_v59, %v3038_v30 }
 0x970   :  { %11841 = vmatprep.subr.bf16.mxu1 %v11840_v49 }
 0x971   :  { %10735 = vmatmul.mubr.msk.f32.gmra.mrb[54].mxu0 %vm859_vm11, %v14020_v27  ;;  %11837 = vmatprep.subr.bf16.mxu0 %v11836_v40  ;;  %v3351_v27 = vld [vmem:[%s15240_s11 + $0x10] sm:$0xff] }
 0x972   :  { %11839 = vmatpush3.bf16.msra.mxu0 %v11836_v40  ;;  %10773 = vmatprep.mubr.msk.f32.mxu0 %vm859_vm11, %v14023_v35  ;;  %v3352_v35 = vld [vmem:[%s15240_s11 + $0x18] sm:$0xff] }
 0x973   :  { %11849 = vmatprep.subr.bf16.mxu0 %v11848_v60  ;;  %11843 = vmatpush3.bf16.msra.mxu1 %v11840_v49 }
 0x975   :  { %10774 = vmatmul.mubr.msk.f32.vlgmr.msra.gmra.mrb[48].mxu0 %vm859_vm11, %v14036_v3  ;;  %v9390_v3 = vld [vmem:[%s15240_s11 + $0x30] sm:$0xff] }
 0x976   :  { %10776 = vmatprep.mubr.msk.f32.mxu0 %vm859_vm11, %v14039_v4  ;;  %11851 = vmatpush3.bf16.msra.mxu0 %v11848_v60  ;;  %v11852_v4 = vpack.c.bf16 %v3352_v35, %v3351_v27 }
 0x978   :  { %11853 = vmatprep.subr.bf16.mxu0 %v11852_v4 }
 0x979   :  { %10777 = vmatmul.mubr.msk.f32.gmra.mrb[50].mxu0 %vm859_vm11, %v14050_v16  ;;  %v9391_v16 = vld [vmem:[%s15240_s11 + $0x38] sm:$0xff] }
 0x97a   :  { %10779 = vmatprep.mubr.msk.f32.mxu0 %vm859_vm11, %v14053_v17  ;;  %v11844_v17 = vpack.c.bf16 %v9391_v16, %v9390_v3  ;;  %11855 = vmatpush3.bf16.msra.mxu0 %v11852_v4 }
 0x97c   :  { %11845 = vmatprep.subr.bf16.mxu1 %v11844_v17 }
 0x97d   :  { %10780 = vmatmul.mubr.msk.f32.gmra.mrb[52].mxu0 %vm859_vm11, %v14063_v7  ;;  %11847 = vmatpush3.bf16.msra.mxu1 %v11844_v17  ;;  %v9413_v7 = vld [vmem:[%s15240_s11 + $0x40] sm:$0xff] }
 0x97e   :  { %10782 = vmatprep.mubr.msk.f32.mxu0 %vm859_vm11, %v14066_v9  ;;  %v9414_v9 = vld [vmem:[%s15240_s11 + $0x48] sm:$0xff] }
 0x981   :  { %10783 = vmatmul.mubr.msk.f32.gmra.mrb[54].mxu0 %vm859_vm11, %v14074_v13  ;;  %v11872_v13 = vpack.c.bf16 %v9414_v9, %v9413_v7 }
 0x983   :  { %11873 = vmatprep.subr.bf16.mxu0 %v11872_v13 }
 0xa48   :  { %v10775_v10 = vpop.f32.mrb[48].mxu0 }
 0xa49   :  { %v12302_v11 = vadd.f32 %v10775_v10, %v9345_v51  ;;  %v3113_v14 = vpop.f32.mrb[49].mxu0 }
 0xa4a   :  { %v12303_v5 = vadd.f32 %v9345_v51, %v3113_v14 }
 0xa4b   :  { %v3161_v18 = vmax.f32 %v12302_v11, 0.0 }
 0xa4c   :  { %v3160_v20 = vmax.f32 %v12303_v5, 0.0  ;;  %v10778_v21 = vpop.f32.mrb[50].mxu0 }
 0xa4d   :  { %v3169_v23 = vadd.f32 %v3161_v18, %v13904_v44  ;;  %v12304_v24 = vadd.f32 %v10778_v21, %v9345_v51  ;;  %v3123_v28 = vpop.f32.mrb[51].mxu0  ;;  %v3329_v18 = vadd.s32 4294967264, %v13708_v15 }
 0xa4e   :  { %v3168_v31 = vadd.f32 %v3160_v20, %v13902_v39  ;;  %v12305_v33 = vadd.f32 %v9345_v51, %v3123_v28  ;;  %v3331_v28 = vadd.s32 4294967264, %v13718_v22 }
 0xa4f   :  { %v3163_v38 = vmax.f32 %v12304_v24, 0.0  ;;  %v14156_v48 = vmax.f32 %v3169_v23, 0.0  ;;  %vm3337_vm10 = vcmp.eq.s32.totalorder %v13594_v26, %v3329_v18  ;;  %v3330_v24 = vadd.s32 4294967264, %v13713_v19  ;;  %v4240_v18 = vld [vmem:[#allocation9 + $0x58] sm:$0xff] }
 0xa50   :  { %v14154_v45 = vmax.f32 %v3168_v31, 0.0  ;;  %v3162_v46 = vmax.f32 %v12305_v33, 0.0  ;;  %v10781_v47 = vpop.f32.mrb[52].mxu0  ;;  %v14232_v34 = vsel %vm3337_vm10, 1.0, %v13277_v29  ;;  %vm3339_vm13 = vcmp.eq.s32.totalorder %v13594_v26, %v3331_v28 }
 0xa51   :  { %v3171_v53 = vadd.f32 %v3163_v38, %v13918_v56  ;;  %v12306_v54 = vadd.f32 %v10781_v47, %v9345_v51  ;;  %v3133_v61 = vpop.f32.mrb[53].mxu0  ;;  %vm3338_vm12 = vcmp.eq.s32.totalorder %v13594_v26, %v3330_v24  ;;  %v3332_v38 = vadd.s32 4294967264, %v13731_v32 }
 0xa52   :  { %v3170_v44 = vadd.f32 %v3162_v46, %v13916_v55  ;;  %v12307_v25 = vadd.f32 %v9345_v51, %v3133_v61  ;;  %10793 = vmatprep.mubr.msk.f32.mxu1 %vm446_vm0, %v14154_v45  ;;  %10813 = vmatprep.mubr.msk.f32.mxu0 %vm446_vm0, %v14154_v45  ;;  %vm8612_vm10 = vcmask 7168  }
 0xa53   :  { %v3165_v39 = vmax.f32 %v12306_v54, 0.0  ;;  %10794 = vmatmul.mubr.msk.f32.vlgmr.msra.gmra.mrb[48].mxu1 %vm446_vm0, %v14156_v48  ;;  %10814 = vmatmul.mubr.msk.f32.vlgmr.msra.gmra.mrb[56].mxu0 %vm446_vm0, %v14156_v48  ;;  %v14170_v55 = vmax.f32 %v3171_v53, 0.0  ;;  %v14241_v53 = vsel %vm3338_vm12, 1.0, %v13277_v29  ;;  %v14244_v54 = vsel %vm3339_vm13, 1.0, %v13277_v29 }
 0xa54   :  { %v14168_v56 = vmax.f32 %v3170_v44, 0.0  ;;  %v3164_v63 = vmax.f32 %v12307_v25, 0.0  ;;  %v10784_v0 = vpop.f32.mrb[54].mxu0  ;;  %11875 = vmatpush3.bf16.msra.mxu0 %v11872_v13  ;;  %vm3340_vm14 = vcmp.eq.s32.totalorder %v13594_v26, %v3332_v38  ;;  %v3596_v44 = vadd.s32 32, %v13700_v8  ;;  %v4014_v25 = vld [vmem:[#allocation9] sm:$0xff] }
 0xa55   :  { %v3173_v1 = vadd.f32 %v3165_v39, %v13932_v36  ;;  %v12308_v58 = vadd.f32 %v10784_v0, %v9345_v51  ;;  %v3143_v41 = vpop.f32.mrb[55].mxu0  ;;  %11877 = vmatprep.subr.bf16.mxu0 %v11876_v62  ;;  %v4015_v39 = vld [vmem:[#allocation9 + $0x8] sm:$0xff]  ;;  %v3597_v8 = vadd.s32 32, %v13704_v12 }
 0xa56   :  { %v3172_v59 = vadd.f32 %v3164_v63, %v13930_v57  ;;  %v12309_v30 = vadd.f32 %v9345_v51, %v3143_v41  ;;  %10796 = vmatprep.mubr.msk.f32.mxu1 %vm446_vm0, %v14168_v56  ;;  %10816 = vmatprep.mubr.msk.f32.mxu0 %vm446_vm0, %v14168_v56  ;;  %v11904_v41 = vpack.c.bf16 %v4015_v39, %v4014_v25 }
 0xa57   :  { %v3167_v40 = vmax.f32 %v12308_v58, 0.0  ;;  %10797 = vmatmul.mubr.msk.f32.gmra.mrb[50].mxu1 %vm446_vm0, %v14170_v55  ;;  %10817 = vmatmul.mubr.msk.f32.gmra.mrb[58].mxu0 %vm446_vm0, %v14170_v55  ;;  %v14184_v43 = vmax.f32 %v3173_v1, 0.0  ;;  %v14256_v1 = vsel %vm3340_vm14, 1.0, %v13277_v29  ;;  %v14259_v58 = vsel %vm3602_vm15, 1.0, %v13277_v29 }
 0xa58   :  { %v14182_v36 = vmax.f32 %v3172_v59, 0.0  ;;  %v3166_v60 = vmax.f32 %v12309_v30, 0.0  ;;  %11879 = vmatpush3.bf16.msra.mxu0 %v11876_v62  ;;  %v3595_v62 = vadd.s32 32, %v13697_v6  ;;  %vm3604_vm2 = vcmp.eq.s32.totalorder %v13594_v26, %v3596_v44  ;;  %v4016_v30 = vld [vmem:[#allocation9 + $0x10] sm:$0xff] }
 0xa59   :  { %v3175_v57 = vadd.f32 %v3167_v40, %v13946_v50  ;;  %v3875_v50 = vld [vmem:[#allocation9 + $0x28] sm:$0xff]  ;;  %v3598_v59 = vadd.s32 32, %v13708_v15  ;;  %v4017_v40 = vld [vmem:[#allocation9 + $0x18] sm:$0xff]  ;;  %v14273_v12 = vsel %vm3604_vm2, 1.0, %v13277_v29  ;;  %vm3605_vm3 = vcmp.eq.s32.totalorder %v13594_v26, %v3597_v8 }
 0xa5a   :  { %v3174_v52 = vadd.f32 %v3166_v60, %v13944_v42  ;;  %10799 = vmatprep.mubr.msk.f32.mxu1 %vm446_vm0, %v14182_v36  ;;  %10819 = vmatprep.mubr.msk.f32.mxu0 %vm446_vm0, %v14182_v36  ;;  %v3874_v42 = vld [vmem:[#allocation9 + $0x20] sm:$0xff]  ;;  %vm3603_vm1 = vcmp.eq.s32.totalorder %v13594_v26, %v3595_v62  ;;  %v3599_v15 = vadd.s32 32, %v13713_v19  ;;  %v3601_v19 = vadd.s32 32, %v13731_v32 }
 0xa5b   :  { %10800 = vmatmul.mubr.msk.f32.gmra.mrb[52].mxu1 %vm446_vm0, %v14184_v43  ;;  %10820 = vmatmul.mubr.msk.f32.gmra.mrb[60].mxu0 %vm446_vm0, %v14184_v43  ;;  %v14198_v27 = vmax.f32 %v3175_v57, 0.0  ;;  %v11896_v35 = vpack.c.bf16 %v3875_v50, %v3874_v42  ;;  %v14270_v60 = vsel %vm3603_vm1, 1.0, %v13277_v29  ;;  %v11908_v57 = vpack.c.bf16 %v4017_v40, %v4016_v30  ;;  %v4484_v30 = vld [vmem:[#allocation10 + $0x8] sm:$0xff] }
 0xa5c   :  { %v14196_v49 = vmax.f32 %v3174_v52, 0.0  ;;  %vm3606_vm4 = vcmp.eq.s32.totalorder %v13594_v26, %v3598_v59  ;;  %v3600_v52 = vadd.s32 32, %v13718_v22  ;;  %v14284_v42 = vsel %vm3605_vm3, 1.0, %v13277_v29  ;;  %v4483_v59 = vld [vmem:[#allocation10] sm:$0xff] }
 0xa5d   :  { %11897 = vmatprep.subr.bf16.mxu0 %v11896_v35  ;;  %v14287_v50 = vsel %vm3606_vm4, 1.0, %v13277_v29  ;;  %vm3607_vm5 = vcmp.eq.s32.totalorder %v13594_v26, %v3599_v15  ;;  %vm3609_vm7 = vcmp.eq.s32.totalorder %v13594_v26, %v3601_v19  ;;  %v11952_v40 = vpack.c.bf16 %v4484_v30, %v4483_v59 }
 0xa5e   :  { %10802 = vmatprep.mubr.msk.f32.mxu1 %vm446_vm0, %v14196_v49  ;;  %10822 = vmatprep.mubr.msk.f32.mxu0 %vm446_vm0, %v14196_v49  ;;  %vm3608_vm6 = vcmp.eq.s32.totalorder %v13594_v26, %v3600_v52  ;;  %v14297_v22 = vsel %vm3607_vm5, 1.0, %v13277_v29  ;;  %v14308_v32 = vsel %vm3609_vm7, 1.0, %v13277_v29 }
 0xa5f   :  { %10803 = vmatmul.mubr.msk.f32.gmra.mrb[54].mxu1 %vm446_vm0, %v14198_v27  ;;  %10823 = vmatmul.mubr.msk.f32.gmra.mrb[62].mxu0 %vm446_vm0, %v14198_v27 }
 0xa60   :  { %10861 = vmatprep.mubr.msk.f32.mxu0 %vm446_vm0, %v14154_v45  ;;  %10841 = vmatprep.mubr.f32.mxu1 %v13277_v29 }
 0xa63   :  { %10862 = vmatmul.mubr.msk.f32.vlgmr.msra.gmra.mrb[64].mxu0 %vm446_vm0, %v14156_v48 }
 0xa64   :  { %10864 = vmatprep.mubr.msk.f32.mxu0 %vm446_vm0, %v14168_v56  ;;  %11899 = vmatpush3.bf16.msra.mxu0 %v11896_v35  ;;  %v14300_v35 = vsel %vm3608_vm6, 1.0, %v13277_v29 }
 0xa67   :  { %10865 = vmatmul.mubr.msk.f32.gmra.mrb[66].mxu0 %vm446_vm0, %v14170_v55 }
 0xa68   :  { %10867 = vmatprep.mubr.msk.f32.mxu0 %vm446_vm0, %v14182_v36 }
 0xa6b   :  { %10868 = vmatmul.mubr.msk.f32.gmra.mrb[68].mxu0 %vm446_vm0, %v14184_v43 }
 0xa6c   :  { %10870 = vmatprep.mubr.msk.f32.mxu0 %vm446_vm0, %v14196_v49 }
 0xa6f   :  { %10871 = vmatmul.mubr.msk.f32.gmra.mrb[70].mxu0 %vm446_vm0, %v14198_v27 }
 0xb26   :  { %v10815_v3 = vpop.f32.mrb[56].mxu0 }
 0xb27   :  { %v3419_v4 = vpop.f32.mrb[57].mxu0 }
 0xb28   :  { %v11856_v16 = vpack.c.bf16 %v10815_v3, %v3419_v4  ;;  %v3876_v3 = vld [vmem:[#allocation9 + $0x30] sm:$0xff]  ;;  %v3877_v4 = vld [vmem:[#allocation9 + $0x38] sm:$0xff] }
 0xb2a   :  { %v10818_v17 = vpop.f32.mrb[58].mxu0  ;;  %11857 = vmatprep.subr.bf16.mxu1 %v11856_v16 }
 0xb2b   :  { %v3429_v7 = vpop.f32.mrb[59].mxu0  ;;  %11859 = vmatpush3.bf16.msra.mxu1 %v11856_v16  ;;  %v11900_v16 = vpack.c.bf16 %v3877_v4, %v3876_v3 }
 0xb2c   :  { %v11860_v9 = vpack.c.bf16 %v10818_v17, %v3429_v7  ;;  %v4237_v17 = vld [vmem:[#allocation9 + $0x40] sm:$0xff]  ;;  %v4238_v7 = vld [vmem:[#allocation9 + $0x48] sm:$0xff] }
 0xb2d   :  { %11901 = vmatprep.subr.bf16.mxu0 %v11900_v16 }
 0xb2e   :  { %v10821_v13 = vpop.f32.mrb[60].mxu0  ;;  %11861 = vmatprep.subr.bf16.mxu1 %v11860_v9  ;;  %11903 = vmatpush3.bf16.msra.mxu0 %v11900_v16 }
 0xb2f   :  { %v3439_v51 = vpop.f32.mrb[61].mxu0  ;;  %11863 = vmatpush3.bf16.msra.mxu1 %v11860_v9  ;;  %v11928_v9 = vpack.c.bf16 %v4238_v7, %v4237_v17 }
 0xb30   :  { %v11864_v10 = vpack.c.bf16 %v10821_v13, %v3439_v51  ;;  %v9392_v13 = vld [vmem:[%s15242_s15] ss:$0 sm:$0xff] }
 0xb32   :  { %v10824_v11 = vpop.f32.mrb[62].mxu0  ;;  %11865 = vmatprep.subr.bf16.mxu1 %v11864_v10 }
 0xb33   :  { %v3449_v14 = vpop.f32.mrb[63].mxu0  ;;  %11867 = vmatpush3.bf16.msra.mxu1 %v11864_v10 }
 0xb34   :  { %v11868_v5 = vpack.c.bf16 %v10824_v11, %v3449_v14 }
 0xb36   :  { %11869 = vmatprep.subr.bf16.mxu1 %v11868_v5  ;;  %v10863_v20 = vpop.f32.mrb[64].mxu0 }
 0xb37   :  { %11871 = vmatpush3.bf16.msra.mxu1 %v11868_v5  ;;  %v3689_v21 = vpop.f32.mrb[65].mxu0  ;;  %v4239_v5 = vld [vmem:[#allocation9 + $0x50] sm:$0xff] }
 0xb38   :  { %v11880_v23 = vpack.c.bf16 %v10863_v20, %v3689_v21 }
 0xb3a   :  { %10842 = vmatmul.mubr.f32.vlgmr.msra.gmra.mrb[48].mxu1 %v13277_v29  ;;  %v10866_v31 = vpop.f32.mrb[66].mxu0  ;;  %11881 = vmatprep.subr.bf16.mxu1 %v11880_v23 }
 0xb3b   :  { %v3699_v33 = vpop.f32.mrb[67].mxu0  ;;  %11883 = vmatpush3.bf16.msra.mxu1 %v11880_v23  ;;  %10844 = vmatprep.mubr.f32.mxu1 %v13277_v29 }
 0xb3c   :  { %v11884_v37 = vpack.c.bf16 %v10866_v31, %v3699_v33  ;;  %v11932_v31 = vpack.c.bf16 %v4240_v18, %v4239_v5 }
 0xb3e   :  { %10845 = vmatmul.mubr.f32.gmra.mrb[50].mxu1 %v13277_v29  ;;  %v10869_v46 = vpop.f32.mrb[68].mxu0  ;;  %11885 = vmatprep.subr.bf16.mxu1 %v11884_v37 }
 0xb3f   :  { %v3709_v47 = vpop.f32.mrb[69].mxu0  ;;  %11887 = vmatpush3.bf16.msra.mxu1 %v11884_v37  ;;  %10847 = vmatprep.mubr.msk.f32.mxu1 %vm859_vm11, %v14232_v34 }
 0xb40   :  { %v11888_v61 = vpack.c.bf16 %v10869_v46, %v3709_v47 }
 0xb42   :  { %10848 = vmatmul.mubr.msk.f32.gmra.mrb[52].mxu1 %vm859_vm11, %v14241_v53  ;;  %v10872_v63 = vpop.f32.mrb[70].mxu0  ;;  %11889 = vmatprep.subr.bf16.mxu1 %v11888_v61 }
 0xb43   :  { %v3719_v0 = vpop.f32.mrb[71].mxu0  ;;  %11891 = vmatpush3.bf16.msra.mxu1 %v11888_v61  ;;  %10850 = vmatprep.mubr.msk.f32.mxu1 %vm859_vm11, %v14244_v54 }
 0xb44   :  { %v11892_v6 = vpack.c.bf16 %v10872_v63, %v3719_v0 }
 0xb46   :  { %10851 = vmatmul.mubr.msk.f32.gmra.mrb[54].mxu1 %vm859_vm11, %v14256_v1  ;;  %11893 = vmatprep.subr.bf16.mxu1 %v11892_v6 }
 0xb47   :  { %11895 = vmatpush3.bf16.msra.mxu1 %v11892_v6  ;;  %10889 = vmatprep.mubr.msk.f32.mxu1 %vm859_vm11, %v14259_v58 }
 0xb48   :  { %11905 = vmatprep.subr.bf16.mxu1 %v11904_v41 }
 0xb4a   :  { %10890 = vmatmul.mubr.msk.f32.vlgmr.msra.gmra.mrb[48].mxu1 %vm859_vm11, %v14270_v60 }
 0xb4b   :  { %10892 = vmatprep.mubr.msk.f32.mxu1 %vm859_vm11, %v14273_v12  ;;  %11907 = vmatpush3.bf16.msra.mxu1 %v11904_v41 }
 0xb4c   :  { %11909 = vmatprep.subr.bf16.mxu1 %v11908_v57 }
 0xb4e   :  { %10893 = vmatmul.mubr.msk.f32.gmra.mrb[50].mxu1 %vm859_vm11, %v14284_v42 }
 0xb4f   :  { %10895 = vmatprep.mubr.msk.f32.mxu1 %vm859_vm11, %v14287_v50  ;;  %11911 = vmatpush3.bf16.msra.mxu1 %v11908_v57 }
 0xb50   :  { %11929 = vmatprep.subr.bf16.mxu1 %v11928_v9 }
 0xb52   :  { %10896 = vmatmul.mubr.msk.f32.gmra.mrb[52].mxu1 %vm859_vm11, %v14297_v22 }
 0xb53   :  { %10898 = vmatprep.mubr.msk.f32.mxu1 %vm859_vm11, %v14300_v35 }
 0xb56   :  { %10899 = vmatmul.mubr.msk.f32.gmra.mrb[54].mxu1 %vm859_vm11, %v14308_v32 }
 0xc1d   :  { %v10891_v51 = vpop.f32.mrb[48].mxu1 }
 0xc1e   :  { %v12310_v10 = vadd.f32 %v10891_v51, %v9392_v13  ;;  %v3818_v11 = vpop.f32.mrb[49].mxu1 }
 0xc1f   :  { %v12311_v14 = vadd.f32 %v9392_v13, %v3818_v11 }
 0xc20   :  { %v3866_v23 = vmax.f32 %v12310_v10, 0.0 }
 0xc21   :  { %v3865_v20 = vmax.f32 %v12311_v14, 0.0  ;;  %v10894_v21 = vpop.f32.mrb[50].mxu1 }
 0xc22   :  { %v12312_v24 = vadd.f32 %v10894_v21, %v9392_v13  ;;  %v3828_v28 = vpop.f32.mrb[51].mxu1 }
 0xc23   :  { %v12313_v33 = vadd.f32 %v9392_v13, %v3828_v28  ;;  %10909 = vmatprep.mubr.msk.f32.mxu0 %vm446_vm0, %v3865_v20  ;;  %10929 = vmatprep.mubr.msk.f32.mxu1 %vm446_vm0, %v3865_v20 }
 0xc24   :  { %10910 = vmatmul.mubr.msk.f32.vlgmr.msra.gmra.mrb[72].mxu0 %vm446_vm0, %v3866_v23  ;;  %10930 = vmatmul.mubr.msk.f32.vlgmr.msra.gmra.mrb[56].mxu1 %vm446_vm0, %v3866_v23  ;;  %v3868_v46 = vmax.f32 %v12312_v24, 0.0 }
 0xc25   :  { %v3867_v37 = vmax.f32 %v12313_v33, 0.0  ;;  %v10897_v38 = vpop.f32.mrb[52].mxu1  ;;  %11931 = vmatpush3.bf16.msra.mxu1 %v11928_v9 }
 0xc26   :  { %v12314_v47 = vadd.f32 %v10897_v38, %v9392_v13  ;;  %v3838_v61 = vpop.f32.mrb[53].mxu1  ;;  %11933 = vmatprep.subr.bf16.mxu1 %v11932_v31  ;;  %v4624_v38 = vld [vmem:[#allocation12 + $0x8] sm:$0xff] }
 0xc27   :  { %v12315_v62 = vadd.f32 %v9392_v13, %v3838_v61  ;;  %10912 = vmatprep.mubr.msk.f32.mxu0 %vm446_vm0, %v3867_v37  ;;  %10932 = vmatprep.mubr.msk.f32.mxu1 %vm446_vm0, %v3867_v37 }
 0xc28   :  { %10913 = vmatmul.mubr.msk.f32.gmra.mrb[74].mxu0 %vm446_vm0, %v3868_v46  ;;  %10933 = vmatmul.mubr.msk.f32.gmra.mrb[58].mxu1 %vm446_vm0, %v3868_v46  ;;  %v3870_v39 = vmax.f32 %v12314_v47, 0.0 }
 0xc29   :  { %v3869_v44 = vmax.f32 %v12315_v62, 0.0  ;;  %v10900_v25 = vpop.f32.mrb[54].mxu1  ;;  %11935 = vmatpush3.bf16.msra.mxu1 %v11932_v31 }
 0xc2a   :  { %v12316_v63 = vadd.f32 %v10900_v25, %v9392_v13  ;;  %v3848_v0 = vpop.f32.mrb[55].mxu1  ;;  %11953 = vmatprep.subr.bf16.mxu1 %v11952_v40 }
 0xc2b   :  { %v12317_v6 = vadd.f32 %v9392_v13, %v3848_v0  ;;  %10915 = vmatprep.mubr.msk.f32.mxu0 %vm446_vm0, %v3869_v44  ;;  %10935 = vmatprep.mubr.msk.f32.mxu1 %vm446_vm0, %v3869_v44 }
 0xc2c   :  { %10916 = vmatmul.mubr.msk.f32.gmra.mrb[76].mxu0 %vm446_vm0, %v3870_v39  ;;  %10936 = vmatmul.mubr.msk.f32.gmra.mrb[60].mxu1 %vm446_vm0, %v3870_v39  ;;  %v3872_v41 = vmax.f32 %v12316_v63, 0.0 }
 0xc2d   :  { %v3871_v8 = vmax.f32 %v12317_v6, 0.0 }
 0xc2f   :  { %10918 = vmatprep.mubr.msk.f32.mxu0 %vm446_vm0, %v3871_v8  ;;  %10938 = vmatprep.mubr.msk.f32.mxu1 %vm446_vm0, %v3871_v8 }
 0xc30   :  { %10919 = vmatmul.mubr.msk.f32.gmra.mrb[78].mxu0 %vm446_vm0, %v3872_v41  ;;  %10939 = vmatmul.mubr.msk.f32.gmra.mrb[62].mxu1 %vm446_vm0, %v3872_v41 }
 0xc31   :  { %10977 = vmatprep.mubr.msk.f32.mxu1 %vm446_vm0, %v3865_v20  ;;  %10957 = vmatprep.mubr.f32.mxu0 %v13277_v29 }
 0xc34   :  { %10978 = vmatmul.mubr.msk.f32.vlgmr.msra.gmra.mrb[64].mxu1 %vm446_vm0, %v3866_v23 }
 0xc35   :  { %10980 = vmatprep.mubr.msk.f32.mxu1 %vm446_vm0, %v3867_v37  ;;  %11955 = vmatpush3.bf16.msra.mxu1 %v11952_v40  ;;  %v4623_v37 = vld [vmem:[#allocation12] sm:$0xff] }
 0xc38   :  { %10981 = vmatmul.mubr.msk.f32.gmra.mrb[66].mxu1 %vm446_vm0, %v3868_v46 }
 0xc39   :  { %10983 = vmatprep.mubr.msk.f32.mxu1 %vm446_vm0, %v3869_v44 }
 0xc3c   :  { %10984 = vmatmul.mubr.msk.f32.gmra.mrb[68].mxu1 %vm446_vm0, %v3870_v39 }
 0xc3d   :  { %10986 = vmatprep.mubr.msk.f32.mxu1 %vm446_vm0, %v3871_v8 }
 0xc40   :  { %10987 = vmatmul.mubr.msk.f32.gmra.mrb[70].mxu1 %vm446_vm0, %v3872_v41 }
 0xcf7   :  { %v10931_v15 = vpop.f32.mrb[56].mxu1 }
 0xcf8   :  { %v4084_v57 = vpop.f32.mrb[57].mxu1 }
 0xcf9   :  { %v11912_v52 = vpack.c.bf16 %v10931_v15, %v4084_v57 }
 0xcfb   :  { %v10934_v19 = vpop.f32.mrb[58].mxu1  ;;  %11913 = vmatprep.subr.bf16.mxu0 %v11912_v52 }
 0xcfc   :  { %v4094_v3 = vpop.f32.mrb[59].mxu1  ;;  %11915 = vmatpush3.bf16.msra.mxu0 %v11912_v52 }
 0xcfd   :  { %v11916_v4 = vpack.c.bf16 %v10934_v19, %v4094_v3 }
 0xcff   :  { %v10937_v16 = vpop.f32.mrb[60].mxu1  ;;  %11917 = vmatprep.subr.bf16.mxu0 %v11916_v4 }
 0xd00   :  { %v4104_v17 = vpop.f32.mrb[61].mxu1  ;;  %11919 = vmatpush3.bf16.msra.mxu0 %v11916_v4 }
 0xd01   :  { %v11920_v7 = vpack.c.bf16 %v10937_v16, %v4104_v17 }
 0xd03   :  { %v10940_v9 = vpop.f32.mrb[62].mxu1  ;;  %11921 = vmatprep.subr.bf16.mxu0 %v11920_v7 }
 0xd04   :  { %v4114_v13 = vpop.f32.mrb[63].mxu1  ;;  %11923 = vmatpush3.bf16.msra.mxu0 %v11920_v7 }
 0xd05   :  { %v11924_v51 = vpack.c.bf16 %v10940_v9, %v4114_v13 }
 0xd07   :  { %11925 = vmatprep.subr.bf16.mxu0 %v11924_v51  ;;  %v10979_v10 = vpop.f32.mrb[64].mxu1 }
 0xd08   :  { %11927 = vmatpush3.bf16.msra.mxu0 %v11924_v51  ;;  %v4307_v11 = vpop.f32.mrb[65].mxu1 }
 0xd09   :  { %v11936_v14 = vpack.c.bf16 %v10979_v10, %v4307_v11 }
 0xd0b   :  { %10958 = vmatmul.mubr.f32.vlgmr.msra.gmra.mrb[72].mxu0 %v13277_v29  ;;  %v10982_v5 = vpop.f32.mrb[66].mxu1  ;;  %11937 = vmatprep.subr.bf16.mxu0 %v11936_v14 }
 0xd0c   :  { %v4317_v18 = vpop.f32.mrb[67].mxu1  ;;  %11939 = vmatpush3.bf16.msra.mxu0 %v11936_v14  ;;  %10960 = vmatprep.mubr.f32.mxu0 %v13277_v29 }
 0xd0d   :  { %v11940_v20 = vpack.c.bf16 %v10982_v5, %v4317_v18  ;;  %v9470_v18 = vld [vmem:[#allocation13] ss:$0 sm:$0xff] }
 0xd0f   :  { %10961 = vmatmul.mubr.f32.gmra.mrb[74].mxu0 %v13277_v29  ;;  %v10985_v21 = vpop.f32.mrb[68].mxu1  ;;  %11941 = vmatprep.subr.bf16.mxu0 %v11940_v20 }
 0xd10   :  { %v4327_v23 = vpop.f32.mrb[69].mxu1  ;;  %11943 = vmatpush3.bf16.msra.mxu0 %v11940_v20  ;;  %10963 = vmatprep.mubr.msk.f32.mxu0 %vm859_vm11, %v14232_v34  ;;  %v14351_v34 = vpack.c.bf16 %v4624_v38, %v4623_v37 }
 0xd11   :  { %v11944_v24 = vpack.c.bf16 %v10985_v21, %v4327_v23 }
 0xd13   :  { %10964 = vmatmul.mubr.msk.f32.gmra.mrb[76].mxu0 %vm859_vm11, %v14241_v53  ;;  %v10988_v28 = vpop.f32.mrb[70].mxu1  ;;  %11945 = vmatprep.subr.bf16.mxu0 %v11944_v24  ;;  %v13278_v53 = vmov 0.0|0.0  }
 0xd14   :  { %v4337_v31 = vpop.f32.mrb[71].mxu1  ;;  %11947 = vmatpush3.bf16.msra.mxu0 %v11944_v24  ;;  %10966 = vmatprep.mubr.msk.f32.mxu0 %vm859_vm11, %v14244_v54  ;;  %v4485_v54 = vld [vmem:[#allocation10 + $0x10] sm:$0xff] }
 0xd15   :  { %v11948_v33 = vpack.c.bf16 %v10988_v28, %v4337_v31 }
 0xd17   :  { %10967 = vmatmul.mubr.msk.f32.gmra.mrb[78].mxu0 %vm859_vm11, %v14256_v1  ;;  %11949 = vmatprep.subr.bf16.mxu0 %v11948_v33  ;;  %v4486_v1 = vld [vmem:[#allocation10 + $0x18] sm:$0xff] }
 0xd18   :  { %11951 = vmatpush3.bf16.msra.mxu0 %v11948_v33  ;;  %11005 = vmatprep.mubr.msk.f32.mxu0 %vm859_vm11, %v14259_v58  ;;  %v11956_v58 = vpack.c.bf16 %v4486_v1, %v4485_v54 }
 0xd19   :  { %11960 = vmatprep.subr.bf16.mxu0 %v13278_v53 }
 0xd1a   :  { %11957 = vmatprep.subr.bf16.mxu1 %v11956_v58 }
 0xd1b   :  { %11006 = vmatmul.mubr.msk.f32.vlgmr.msra.gmra.mrb[72].mxu0 %vm859_vm11, %v14270_v60  ;;  %v4625_v60 = vld [vmem:[#allocation12 + $0x10] sm:$0xff]  ;;  %11959 = vmatpush3.bf16.msra.mxu1 %v11956_v58 }
 0xd1c   :  { %11008 = vmatprep.mubr.msk.f32.mxu0 %vm859_vm11, %v14273_v12  ;;  %11962 = vmatpush3.bf16.msra.mxu0 %v14351_v34  ;;  %v4626_v12 = vld [vmem:[#allocation12 + $0x18] sm:$0xff] }
 0xd1d   :  { %11963 = vmatprep.subr.bf16.mxu0 %v13278_v53  ;;  %11966 = vmatprep.subr.bf16.mxu1 %v13278_v53 }
 0xd1f   :  { %11009 = vmatmul.mubr.msk.f32.gmra.mrb[74].mxu0 %vm859_vm11, %v14284_v42  ;;  %v14370_v42 = vpack.c.bf16 %v4626_v12, %v4625_v60 }
 0xd20   :  { %11011 = vmatprep.mubr.msk.f32.mxu0 %vm859_vm11, %v14287_v50  ;;  %v9433_v50 = vld [vmem:[%s15243_s8] ss:$0 sm:$0xff] }
 0xd21   :  { %11965 = vmatpush3.bf16.msra.mxu0 %v14370_v42 }
 0xd22   :  { %11972 = vmatprep.subr.bf16.mxu0 %v13278_v53 }
 0xd23   :  { %11012 = vmatmul.mubr.msk.f32.gmra.mrb[76].mxu0 %vm859_vm11, %v14297_v22 }
 0xd24   :  { %11014 = vmatprep.mubr.msk.f32.mxu0 %vm859_vm11, %v14300_v35 }
 0xd27   :  { %11015 = vmatmul.mubr.msk.f32.gmra.mrb[78].mxu0 %vm859_vm11, %v14308_v32 }
 0xd28   :  { %11045 = vmatprep.mubr.msk.f32.mxu0 %vm13279_vm8, %v13277_v29 }
 0xd2b   :  { %11046 = vmatmul.mubr.f32.vlgmr.msra.gmra.mrb[80].mxu0 %v13277_v29 }
 0xd2c   :  { %11974 = vmatpush3.bf16.msra.mxu0 %v14351_v34  ;;  %11067 = vmatprep.mubr.msk.f32.mxu0 %vm13279_vm8, %v13277_v29 }
 0xd2d   :  { %11975 = vmatprep.subr.bf16.mxu0 %v13278_v53 }
 0xd30   :  { %11977 = vmatpush3.bf16.msra.mxu0 %v14370_v42 }
 0xd31   :  { %11984 = vmatprep.subr.bf16.mxu0 %v13278_v53 }
 0xdee   :  { %v11007_v22 = vpop.f32.mrb[72].mxu0 }
 0xdef   :  { %v12318_v35 = vadd.f32 %v11007_v22, %v9433_v50  ;;  %v4412_v32 = vpop.f32.mrb[73].mxu0 }
 0xdf0   :  { %v12319_v46 = vadd.f32 %v9433_v50, %v4412_v32 }
 0xdf1   :  { %v4460_v47 = vmax.f32 %v12318_v35, 0.0 }
 0xdf2   :  { %v4459_v61 = vmax.f32 %v12319_v46, 0.0  ;;  %v11010_v62 = vpop.f32.mrb[74].mxu0 }
 0xdf3   :  { %v14386_v44 = vadd.f32 %v4460_v47, %v14156_v48  ;;  %v12320_v25 = vadd.f32 %v11010_v62, %v9433_v50  ;;  %v4422_v39 = vpop.f32.mrb[75].mxu0 }
 0xdf4   :  { %v14389_v63 = vadd.f32 %v4459_v61, %v14154_v45  ;;  %v12321_v0 = vadd.f32 %v9433_v50, %v4422_v39 }
 0xdf5   :  { %v4462_v6 = vmax.f32 %v12320_v25, 0.0  ;;  %v4476_v30 = vmax.f32 %v14386_v44, 0.0 }
 0xdf6   :  { %v4475_v8 = vmax.f32 %v14389_v63, 0.0  ;;  %v4461_v41 = vmax.f32 %v12321_v0, 0.0  ;;  %v11013_v59 = vpop.f32.mrb[76].mxu0 }
 0xdf7   :  { %v14394_v40 = vadd.f32 %v4462_v6, %v14170_v55  ;;  %v12322_v15 = vadd.f32 %v11013_v59, %v9433_v50  ;;  %v4432_v57 = vpop.f32.mrb[77].mxu0 }
 0xdf8   :  { %v14397_v48 = vadd.f32 %v4461_v41, %v14168_v56  ;;  %v12323_v52 = vadd.f32 %v9433_v50, %v4432_v57  ;;  %11025 = vmatprep.mubr.msk.f32.mxu1 %vm446_vm0, %v4475_v8 }
 0xdf9   :  { %v4464_v45 = vmax.f32 %v12322_v15, 0.0  ;;  %11026 = vmatmul.mubr.msk.f32.vlgmr.msra.gmra.mrb[72].mxu1 %vm446_vm0, %v4476_v30  ;;  %v4478_v4 = vmax.f32 %v14394_v40, 0.0 }
 0xdfa   :  { %v4477_v19 = vmax.f32 %v14397_v48, 0.0  ;;  %v4463_v3 = vmax.f32 %v12323_v52, 0.0  ;;  %v11016_v55 = vpop.f32.mrb[78].mxu0  ;;  %11968 = vmatpush3.bf16.msra.mxu1 %v14351_v34 }
 0xdfb   :  { %v14409_v56 = vadd.f32 %v4464_v45, %v14184_v43  ;;  %v12324_v16 = vadd.f32 %v11016_v55, %v9433_v50  ;;  %v4442_v17 = vpop.f32.mrb[79].mxu0  ;;  %11969 = vmatprep.subr.bf16.mxu1 %v13278_v53 }
 0xdfc   :  { %v14413_v7 = vadd.f32 %v4463_v3, %v14182_v36  ;;  %v12325_v9 = vadd.f32 %v9433_v50, %v4442_v17  ;;  %11028 = vmatprep.mubr.msk.f32.mxu1 %vm446_vm0, %v4477_v19 }
 0xdfd   :  { %v4466_v13 = vmax.f32 %v12324_v16, 0.0  ;;  %11029 = vmatmul.mubr.msk.f32.gmra.mrb[74].mxu1 %vm446_vm0, %v4478_v4  ;;  %v4480_v10 = vmax.f32 %v14409_v56, 0.0 }
 0xdfe   :  { %v4479_v43 = vmax.f32 %v14413_v7, 0.0  ;;  %v4465_v51 = vmax.f32 %v12325_v9, 0.0  ;;  %11971 = vmatpush3.bf16.msra.mxu1 %v14370_v42 }
 0xdff   :  { %v14425_v36 = vadd.f32 %v4466_v13, %v14198_v27  ;;  %11978 = vmatprep.subr.bf16.mxu1 %v13278_v53 }
 0xe00   :  { %v14429_v11 = vadd.f32 %v4465_v51, %v14196_v49  ;;  %11031 = vmatprep.mubr.msk.f32.mxu1 %vm446_vm0, %v4479_v43  ;;  %v4696_v49 = vpop.f32.mrb[80].mxu0 }
 0xe01   :  { %11032 = vmatmul.mubr.msk.f32.gmra.mrb[76].mxu1 %vm446_vm0, %v4480_v10  ;;  %v4482_v5 = vmax.f32 %v14425_v36, 0.0  ;;  %v11047_v27 = vpop.f32.mrb[81].mxu0 }
 0xe02   :  { %v4481_v14 = vmax.f32 %v14429_v11, 0.0 }
 0xe04   :  { %11034 = vmatprep.mubr.msk.f32.mxu1 %vm446_vm0, %v4481_v14 }
 0xe05   :  { %11035 = vmatmul.mubr.msk.f32.gmra.mrb[78].mxu1 %vm446_vm0, %v4482_v5 }
 0xe06   :  { %11056 = vmatprep.mubr.msk.f32.mxu1 %vm13279_vm8, %v13277_v29 }
 0xecc   :  { %v11027_v20 = vpop.f32.mrb[72].mxu1 }
 0xecd   :  { %v4590_v21 = vadd.f32 %v11027_v20, %v9470_v18  ;;  %v4584_v23 = vpop.f32.mrb[73].mxu1 }
 0xece   :  { %v4585_v24 = vadd.f32 %v9470_v18, %v4584_v23 }
 0xed0   :  { %v4700_v28 = vadd.f32 %v4696_v49, %v4585_v24  ;;  %v11030_v31 = vpop.f32.mrb[74].mxu1 }
 0xed1   :  { %v14447_v33 = vadd.f32 %v11030_v31, %v9470_v18  ;;  %v4594_v37 = vpop.f32.mrb[75].mxu1 }
 0xed2   :  { %12487 = vtanh.f32 %v4700_v28  ;;  %v14449_v38 = vadd.f32 %v9470_v18, %v4594_v37  ;;  %v9479_v46 = vmul.f32 -1.442695, %v4700_v28 }
 0xed4   :  { %v11033_v54 = vpop.f32.mrb[76].mxu1  ;;  %12489 = vpow2.f32 %v9479_v46 }
 0xed5   :  { %v14451_v1 = vadd.f32 %v11033_v54, %v9470_v18  ;;  %v4604_v58 = vpop.f32.mrb[77].mxu1 }
 0xed6   :  { %v14453_v60 = vadd.f32 %v9470_v18, %v4604_v58 }
 0xed8   :  { %v11036_v12 = vpop.f32.mrb[78].mxu1 }
 0xed9   :  { %v14455_v50 = vadd.f32 %v11036_v12, %v9470_v18  ;;  %v4614_v22 = vpop.f32.mrb[79].mxu1 }
 0xeda   :  { %v14457_v35 = vadd.f32 %v9470_v18, %v4614_v22 }
 0xedc   :  { %v12488_v32 = vpop.eup %12487 }
 0xedd   :  { %4710 = vrot.lane.b32.xlu0 %v12488_v32, %s13280_s18 }
 0xede   :  { %v12490_v47 = vpop.eup %12489 }
 0xedf   :  { %v4704_v61 = vadd.f32 1.0, %v12490_v47 }
 0xee1   :  { %12491 = vrcp.f32 %v4704_v61 }
 0xeeb   :  { %v12492_v62 = vpop.eup %12491 }
 0xeec   :  { %v4708_v0 = vmul.f32 0.0, %v12492_v62 }
 0xf4f   :  { %v4711_v25 = vpop.permute.xlu0 %4710 }
 0xf50   :  { %v4713_v39 = vmul.f32 %v12492_v62, %v4711_v25 }
 0xf52   :  { %4715 = vrot.lane.b32.xlu1 %v4713_v39, %s13281_s9 }
 0xfc4   :  { %v4716_v6 = vpop.permute.xlu1 %4715 }
 0xfc5   :  { %v4718_v41 = vadd.f32 %v4716_v6, %v4708_v0 }
 0xfc7   :  { %12493 = vtanh.f32 %v4718_v41 }
 0xfd1   :  { %v12494_v59 = vpop.eup %12493 }
 0xfd2   :  { %4721 = vrot.lane.b32.xlu0 %v12494_v59, %s13280_s18 }
0x1044   :  { %v4722_v15 = vpop.permute.xlu0 %4721 }
0x1045   :  { %v4724_v57 = vmul.f32 %v12492_v62, %v4722_v15 }
0x1047   :  { %4726 = vrot.lane.b32.xlu1 %v4724_v57, %s13281_s9 }
0x10b9   :  { %v4727_v52 = vpop.permute.xlu1 %4726 }
0x10ba   :  { %6341 = vst.msk [vmem:[#allocation2] sm:$0xff] %vm446_vm0, %v4727_v52  ;;  %11057 = vmatmul.mubr.msk.f32.vlgmr.msra.gmra.mrb[80].mxu1 %vm446_vm0, %v4727_v52 }
0x10bb   :  { %11980 = vmatpush3.bf16.msra.mxu1 %v14351_v34  ;;  %11078 = vmatprep.mubr.msk.f32.mxu1 %vm13279_vm8, %v13277_v29 }
0x10bc   :  { %11981 = vmatprep.subr.bf16.mxu1 %v13278_v53 }
0x10bf   :  { %11983 = vmatpush3.bf16.msra.mxu1 %v14370_v42 }
0x10c0   :  { %11990 = vmatprep.subr.bf16.mxu1 %v13278_v53 }
0x118d   :  { %v4796_v45 = vpop.f32.mrb[80].mxu1 }
0x118e   :  { %v4800_v3 = vadd.f32 %v4796_v45, %v4590_v21  ;;  %v11058_v55 = vpop.f32.mrb[81].mxu1 }
0x1190   :  { %12495 = vtanh.f32 %v4800_v3  ;;  %v9481_v17 = vmul.f32 -1.442695, %v4800_v3 }
0x1192   :  { %12497 = vpow2.f32 %v9481_v17 }
0x119a   :  { %v12496_v16 = vpop.eup %12495 }
0x119b   :  { %4810 = vrot.lane.b32.xlu0 %v12496_v16, %s13280_s18 }
0x119c   :  { %v12498_v9 = vpop.eup %12497 }
0x119d   :  { %v4804_v13 = vadd.f32 1.0, %v12498_v9 }
0x119f   :  { %12499 = vrcp.f32 %v4804_v13 }
0x11a9   :  { %v12500_v51 = vpop.eup %12499 }
0x11aa   :  { %v4808_v18 = vmul.f32 %v12500_v51, %v4718_v41 }
0x120d   :  { %v4811_v49 = vpop.permute.xlu0 %4810 }
0x120e   :  { %v4813_v27 = vmul.f32 %v12500_v51, %v4811_v49 }
0x1210   :  { %4815 = vrot.lane.b32.xlu1 %v4813_v27, %s13281_s9 }
0x1282   :  { %v4816_v20 = vpop.permute.xlu1 %4815 }
0x1283   :  { %v4818_v23 = vadd.f32 %v4816_v20, %v4808_v18 }
0x1285   :  { %12501 = vtanh.f32 %v4818_v23 }
0x128f   :  { %v12502_v21 = vpop.eup %12501 }
0x1290   :  { %4821 = vrot.lane.b32.xlu0 %v12502_v21, %s13280_s18 }
0x1302   :  { %v4822_v24 = vpop.permute.xlu0 %4821 }
0x1303   :  { %v4824_v28 = vmul.f32 %v12500_v51, %v4822_v24 }
0x1305   :  { %4826 = vrot.lane.b32.xlu1 %v4824_v28, %s13281_s9 }
0x1377   :  { %v4827_v31 = vpop.permute.xlu1 %4826 }
0x1378   :  { %6349 = vst.msk [vmem:[#allocation2 + $0x8] sm:$0xff] %vm446_vm0, %v4827_v31  ;;  %11068 = vmatmul.mubr.msk.f32.vlgmr.msra.gmra.mrb[82].mxu0 %vm446_vm0, %v4827_v31 }
0x1379   :  { %11986 = vmatpush3.bf16.msra.mxu0 %v14351_v34  ;;  %11089 = vmatprep.mubr.msk.f32.mxu0 %vm13279_vm8, %v13277_v29 }
0x137a   :  { %11987 = vmatprep.subr.bf16.mxu0 %v13278_v53 }
0x137d   :  { %11989 = vmatpush3.bf16.msra.mxu0 %v14370_v42 }
0x137e   :  { %11996 = vmatprep.subr.bf16.mxu0 %v13278_v53 }
0x144b   :  { %v4896_v37 = vpop.f32.mrb[82].mxu0 }
0x144c   :  { %v4900_v54 = vadd.f32 %v4896_v37, %v14449_v38  ;;  %v11069_v58 = vpop.f32.mrb[83].mxu0 }
0x144e   :  { %12503 = vtanh.f32 %v4900_v54  ;;  %v9483_v22 = vmul.f32 -1.442695, %v4900_v54 }
0x1450   :  { %12505 = vpow2.f32 %v9483_v22 }
0x1458   :  { %v12504_v12 = vpop.eup %12503 }
0x1459   :  { %4910 = vrot.lane.b32.xlu0 %v12504_v12, %s13280_s18 }
0x145a   :  { %v12506_v32 = vpop.eup %12505 }
0x145b   :  { %v4904_v46 = vadd.f32 1.0, %v12506_v32 }
0x145d   :  { %12507 = vrcp.f32 %v4904_v46 }
0x1467   :  { %v12508_v47 = vpop.eup %12507 }
0x1468   :  { %v4908_v25 = vmul.f32 %v12508_v47, %v4818_v23 }
0x14cb   :  { %v4911_v61 = vpop.permute.xlu0 %4910 }
0x14cc   :  { %v4913_v62 = vmul.f32 %v12508_v47, %v4911_v61 }
0x14ce   :  { %4915 = vrot.lane.b32.xlu1 %v4913_v62, %s13281_s9 }
0x1540   :  { %v4916_v39 = vpop.permute.xlu1 %4915 }
0x1541   :  { %v4918_v0 = vadd.f32 %v4916_v39, %v4908_v25 }
0x1543   :  { %12509 = vtanh.f32 %v4918_v0 }
0x154d   :  { %v12510_v38 = vpop.eup %12509 }
0x154e   :  { %4921 = vrot.lane.b32.xlu0 %v12510_v38, %s13280_s18 }
0x15c0   :  { %v4922_v6 = vpop.permute.xlu0 %4921 }
0x15c1   :  { %v4924_v41 = vmul.f32 %v12508_v47, %v4922_v6 }
0x15c3   :  { %4926 = vrot.lane.b32.xlu1 %v4924_v41, %s13281_s9 }
0x1635   :  { %v4927_v59 = vpop.permute.xlu1 %4926 }
0x1636   :  { %6355 = vst.msk [vmem:[#allocation2 + $0x10] sm:$0xff] %vm446_vm0, %v4927_v59  ;;  %11079 = vmatmul.mubr.msk.f32.vlgmr.msra.gmra.mrb[82].mxu1 %vm446_vm0, %v4927_v59 }
0x1637   :  { %11992 = vmatpush3.bf16.msra.mxu1 %v14351_v34  ;;  %11100 = vmatprep.mubr.msk.f32.mxu1 %vm13279_vm8, %v13277_v29 }
0x1638   :  { %11993 = vmatprep.subr.bf16.mxu1 %v13278_v53 }
0x163b   :  { %11995 = vmatpush3.bf16.msra.mxu1 %v14370_v42 }
0x163c   :  { %12002 = vmatprep.subr.bf16.mxu1 %v13278_v53 }
0x1709   :  { %v4996_v15 = vpop.f32.mrb[82].mxu1 }
0x170a   :  { %v5000_v57 = vadd.f32 %v4996_v15, %v14447_v33  ;;  %v11080_v52 = vpop.f32.mrb[83].mxu1 }
0x170c   :  { %12511 = vtanh.f32 %v5000_v57  ;;  %v9485_v3 = vmul.f32 -1.442695, %v5000_v57 }
0x170e   :  { %12513 = vpow2.f32 %v9485_v3 }
0x1716   :  { %v12512_v45 = vpop.eup %12511 }
0x1717   :  { %5010 = vrot.lane.b32.xlu0 %v12512_v45, %s13280_s18 }
0x1718   :  { %v12514_v55 = vpop.eup %12513 }
0x1719   :  { %v5004_v16 = vadd.f32 1.0, %v12514_v55 }
0x171b   :  { %12515 = vrcp.f32 %v5004_v16  ;;  %v5426_v16 = vld [vmem:[#allocation15 + $0x8] sm:$0xff] }
0x1725   :  { %v12516_v17 = vpop.eup %12515 }
0x1726   :  { %v5008_v51 = vmul.f32 %v12516_v17, %v4918_v0 }
0x1789   :  { %v5011_v9 = vpop.permute.xlu0 %5010 }
0x178a   :  { %v5013_v13 = vmul.f32 %v12516_v17, %v5011_v9 }
0x178c   :  { %5015 = vrot.lane.b32.xlu1 %v5013_v13, %s13281_s9 }
0x17fe   :  { %v5016_v49 = vpop.permute.xlu1 %5015 }
0x17ff   :  { %v5018_v27 = vadd.f32 %v5016_v49, %v5008_v51  ;;  %v5427_v49 = vld [vmem:[#allocation15 + $0x10] sm:$0xff] }
0x1801   :  { %12517 = vtanh.f32 %v5018_v27 }
0x180b   :  { %v12518_v33 = vpop.eup %12517 }
0x180c   :  { %5021 = vrot.lane.b32.xlu0 %v12518_v33, %s13280_s18 }
0x187e   :  { %v5022_v18 = vpop.permute.xlu0 %5021 }
0x187f   :  { %v5024_v20 = vmul.f32 %v12516_v17, %v5022_v18 }
0x1881   :  { %5026 = vrot.lane.b32.xlu1 %v5024_v20, %s13281_s9 }
0x18f3   :  { %v5027_v23 = vpop.permute.xlu1 %5026 }
0x18f4   :  { %6361 = vst.msk [vmem:[#allocation2 + $0x18] sm:$0xff] %vm446_vm0, %v5027_v23  ;;  %11090 = vmatmul.mubr.msk.f32.vlgmr.msra.gmra.mrb[84].mxu0 %vm446_vm0, %v5027_v23 }
0x18f5   :  { %11998 = vmatpush3.bf16.msra.mxu0 %v14351_v34  ;;  %11111 = vmatprep.mubr.msk.f32.mxu0 %vm13279_vm8, %v13277_v29 }
0x18f6   :  { %11999 = vmatprep.subr.bf16.mxu0 %v13278_v53 }
0x18f9   :  { %12001 = vmatpush3.bf16.msra.mxu0 %v14370_v42 }
0x19c7   :  { %v5096_v21 = vpop.f32.mrb[84].mxu0 }
0x19c8   :  { %v5100_v24 = vadd.f32 %v5096_v21, %v14453_v60  ;;  %v11091_v28 = vpop.f32.mrb[85].mxu0 }
0x19ca   :  { %12519 = vtanh.f32 %v5100_v24  ;;  %v9487_v37 = vmul.f32 -1.442695, %v5100_v24 }
0x19cc   :  { %12521 = vpow2.f32 %v9487_v37 }
0x19d4   :  { %v12520_v31 = vpop.eup %12519 }
0x19d5   :  { %5110 = vrot.lane.b32.xlu0 %v12520_v31, %s13280_s18 }
0x19d6   :  { %v12522_v54 = vpop.eup %12521 }
0x19d7   :  { %v5104_v58 = vadd.f32 1.0, %v12522_v54 }
0x19d9   :  { %12523 = vrcp.f32 %v5104_v58 }
0x19e3   :  { %v12524_v12 = vpop.eup %12523 }
0x19e4   :  { %v5108_v46 = vmul.f32 %v12524_v12, %v5018_v27  ;;  %v5428_v27 = vld [vmem:[#allocation15 + $0x18] sm:$0xff] }
0x19e5   :  { %v12012_v33 = vpack.c.bf16 %v5428_v27, %v5427_v49 }
0x1a47   :  { %v5111_v22 = vpop.permute.xlu0 %5110 }
0x1a48   :  { %v5113_v32 = vmul.f32 %v12524_v12, %v5111_v22 }
0x1a4a   :  { %5115 = vrot.lane.b32.xlu1 %v5113_v32, %s13281_s9 }
0x1abc   :  { %v5116_v47 = vpop.permute.xlu1 %5115 }
0x1abd   :  { %v5118_v61 = vadd.f32 %v5116_v47, %v5108_v46  ;;  %v5541_v47 = vld [vmem:[#allocation16] sm:$0xff] }
0x1abf   :  { %12525 = vtanh.f32 %v5118_v61 }
0x1ac9   :  { %v12526_v60 = vpop.eup %12525 }
0x1aca   :  { %5121 = vrot.lane.b32.xlu0 %v12526_v60, %s13280_s18 }
0x1b3c   :  { %v5122_v62 = vpop.permute.xlu0 %5121 }
0x1b3d   :  { %v5124_v25 = vmul.f32 %v12524_v12, %v5122_v62  ;;  %v5543_v62 = vld [vmem:[#allocation16 + $0x10] sm:$0xff] }
0x1b3f   :  { %5126 = vrot.lane.b32.xlu1 %v5124_v25, %s13281_s9  ;;  %v5544_v25 = vld [vmem:[#allocation16 + $0x18] sm:$0xff] }
0x1bb1   :  { %v5127_v39 = vpop.permute.xlu1 %5126 }
0x1bb2   :  { %6367 = vst.msk [vmem:[#allocation2 + $0x20] sm:$0xff] %vm446_vm0, %v5127_v39  ;;  %11101 = vmatmul.mubr.msk.f32.vlgmr.msra.gmra.mrb[84].mxu1 %vm446_vm0, %v5127_v39  ;;  %v14589_v39 = vpack.c.bf16 %v5544_v25, %v5543_v62 }
0x1bb3   :  { %12004 = vmatpush3.bf16.msra.mxu1 %v14351_v34  ;;  %11122 = vmatprep.mubr.msk.f32.mxu1 %vm13279_vm8, %v13277_v29 }
0x1bb4   :  { %12005 = vmatprep.subr.bf16.mxu1 %v13278_v53 }
0x1bb7   :  { %12007 = vmatpush3.bf16.msra.mxu1 %v14370_v42 }
0x1bb8   :  { %12016 = vmatprep.subr.bf16.mxu1 %v13278_v53 }
0x1c85   :  { %v5196_v0 = vpop.f32.mrb[84].mxu1 }
0x1c86   :  { %v5200_v38 = vadd.f32 %v5196_v0, %v14451_v1  ;;  %v11102_v6 = vpop.f32.mrb[85].mxu1  ;;  %v5425_v1 = vld [vmem:[#allocation15] sm:$0xff] }
0x1c87   :  { %v12008_v17 = vpack.c.bf16 %v5426_v16, %v5425_v1 }
0x1c88   :  { %12527 = vtanh.f32 %v5200_v38  ;;  %v9489_v59 = vmul.f32 -1.442695, %v5200_v38 }
0x1c89   :  { %12009 = vmatprep.subr.bf16.mxu0 %v12008_v17 }
0x1c8a   :  { %12529 = vpow2.f32 %v9489_v59 }
0x1c92   :  { %v12528_v41 = vpop.eup %12527 }
0x1c93   :  { %5210 = vrot.lane.b32.xlu0 %v12528_v41, %s13280_s18 }
0x1c94   :  { %v12530_v34 = vpop.eup %12529 }
0x1c95   :  { %v5204_v15 = vadd.f32 1.0, %v12530_v34 }
0x1c97   :  { %12531 = vrcp.f32 %v5204_v15 }
0x1ca1   :  { %v12532_v57 = vpop.eup %12531 }
0x1ca2   :  { %v5208_v42 = vmul.f32 %v12532_v57, %v5118_v61  ;;  %v5542_v61 = vld [vmem:[#allocation16 + $0x8] sm:$0xff] }
0x1ca3   :  { %v14585_v60 = vpack.c.bf16 %v5542_v61, %v5541_v47 }
0x1d05   :  { %v5211_v52 = vpop.permute.xlu0 %5210 }
0x1d06   :  { %v5213_v45 = vmul.f32 %v12532_v57, %v5211_v52 }
0x1d08   :  { %5215 = vrot.lane.b32.xlu1 %v5213_v45, %s13281_s9 }
0x1d7a   :  { %v5216_v3 = vpop.permute.xlu1 %5215 }
0x1d7b   :  { %v5218_v55 = vadd.f32 %v5216_v3, %v5208_v42 }
0x1d7d   :  { %12533 = vtanh.f32 %v5218_v55 }
0x1d87   :  { %v12534_v9 = vpop.eup %12533 }
0x1d88   :  { %5221 = vrot.lane.b32.xlu0 %v12534_v9, %s13280_s18 }
0x1dfa   :  { %v5222_v13 = vpop.permute.xlu0 %5221 }
0x1dfb   :  { %v5224_v51 = vmul.f32 %v12532_v57, %v5222_v13 }
0x1dfd   :  { %5226 = vrot.lane.b32.xlu1 %v5224_v51, %s13281_s9 }
0x1e6f   :  { %v5227_v18 = vpop.permute.xlu1 %5226 }
0x1e70   :  { %6373 = vst.msk [vmem:[#allocation2 + $0x28] sm:$0xff] %vm446_vm0, %v5227_v18  ;;  %11112 = vmatmul.mubr.msk.f32.vlgmr.msra.gmra.mrb[86].mxu0 %vm446_vm0, %v5227_v18 }
0x1e71   :  { %12011 = vmatpush3.bf16.msra.mxu0 %v12008_v17  ;;  %11133 = vmatprep.mubr.msk.f32.mxu0 %vm446_vm0, %v4475_v8 }
0x1e72   :  { %12013 = vmatprep.subr.bf16.mxu0 %v12012_v33 }
0x1e75   :  { %12015 = vmatpush3.bf16.msra.mxu0 %v12012_v33 }
0x1e76   :  { %12028 = vmatprep.subr.bf16.mxu0 %v13278_v53 }
0x1e78   :  { %11134 = vmatmul.mubr.msk.f32.vlgmr.msra.gmra.mrb[88].mxu0 %vm446_vm0, %v4476_v30  ;;  %v14556_v30 = vld [vmem:[#allocation18] ss:$0 sm:$0xff] }
0x1e79   :  { %11136 = vmatprep.mubr.msk.f32.mxu0 %vm446_vm0, %v4477_v19  ;;  %12030 = vmatpush3.bf16.msra.mxu0 %v14585_v60 }
0x1e7a   :  { %12031 = vmatprep.subr.bf16.mxu0 %v13278_v53 }
0x1e7c   :  { %11137 = vmatmul.mubr.msk.f32.gmra.mrb[90].mxu0 %vm446_vm0, %v4478_v4 }
0x1e7d   :  { %11139 = vmatprep.mubr.msk.f32.mxu0 %vm446_vm0, %v4479_v43  ;;  %12033 = vmatpush3.bf16.msra.mxu0 %v14589_v39 }
0x1e7e   :  { %12040 = vmatprep.subr.bf16.mxu0 %v13278_v53 }
0x1e80   :  { %11140 = vmatmul.mubr.msk.f32.gmra.mrb[92].mxu0 %vm446_vm0, %v4480_v10 }
0x1e81   :  { %11142 = vmatprep.mubr.msk.f32.mxu0 %vm446_vm0, %v4481_v14 }
0x1e84   :  { %11143 = vmatmul.mubr.msk.f32.gmra.mrb[94].mxu0 %vm446_vm0, %v4482_v5 }
0x1e85   :  { %11175 = vmatprep.mubr.msk.f32.mxu0 %vm13279_vm8, %v13277_v29 }
0x1f43   :  { %v5296_v44 = vpop.f32.mrb[86].mxu0 }
0x1f44   :  { %v5300_v63 = vadd.f32 %v5296_v44, %v14457_v35  ;;  %v11113_v8 = vpop.f32.mrb[87].mxu0 }
0x1f46   :  { %12535 = vtanh.f32 %v5300_v63  ;;  %v9491_v24 = vmul.f32 -1.442695, %v5300_v63 }
0x1f48   :  { %12537 = vpow2.f32 %v9491_v24 }
0x1f4b   :  { %v11135_v40 = vpop.f32.mrb[88].mxu0 }
0x1f4c   :  { %v14559_v48 = vadd.f32 %v11135_v40, %v14556_v30  ;;  %v5502_v19 = vpop.f32.mrb[89].mxu0 }
0x1f4d   :  { %v14562_v4 = vadd.f32 %v14556_v30, %v5502_v19 }
0x1f4f   :  { %v11138_v56 = vpop.f32.mrb[90].mxu0 }
0x1f50   :  { %v12536_v7 = vpop.eup %12535  ;;  %v14565_v43 = vadd.f32 %v11138_v56, %v14556_v30  ;;  %v5512_v10 = vpop.f32.mrb[91].mxu0 }
0x1f51   :  { %v14568_v36 = vadd.f32 %v14556_v30, %v5512_v10  ;;  %5310 = vrot.lane.b32.xlu0 %v12536_v7, %s13280_s18 }
0x1f52   :  { %v12538_v28 = vpop.eup %12537 }
0x1f53   :  { %v11141_v11 = vpop.f32.mrb[92].mxu0  ;;  %v5304_v31 = vadd.f32 1.0, %v12538_v28 }
0x1f54   :  { %v14572_v14 = vadd.f32 %v11141_v11, %v14556_v30  ;;  %v5522_v5 = vpop.f32.mrb[93].mxu0 }
0x1f55   :  { %v14575_v35 = vadd.f32 %v14556_v30, %v5522_v5  ;;  %12539 = vrcp.f32 %v5304_v31 }
0x1f57   :  { %v11144_v20 = vpop.f32.mrb[94].mxu0 }
0x1f58   :  { %v5532_v23 = vpop.f32.mrb[95].mxu0  ;;  %v5538_v15 = vadd.f32 %v11144_v20, %v14556_v30 }
0x1f59   :  { %v14578_v21 = vadd.f32 %v14556_v30, %v5532_v23 }
0x1f5f   :  { %v12540_v37 = vpop.eup %12539 }
0x1f60   :  { %v5308_v12 = vmul.f32 %v12540_v37, %v5218_v55 }
0x1fc3   :  { %v5311_v54 = vpop.permute.xlu0 %5310 }
0x1fc4   :  { %v5313_v58 = vmul.f32 %v12540_v37, %v5311_v54 }
0x1fc6   :  { %5315 = vrot.lane.b32.xlu1 %v5313_v58, %s13281_s9 }
0x2038   :  { %v5316_v22 = vpop.permute.xlu1 %5315 }
0x2039   :  { %v14581_v32 = vadd.f32 %v5316_v22, %v5308_v12 }
0x203b   :  { %12541 = vtanh.f32 %v14581_v32 }
0x2045   :  { %v12542_v46 = vpop.eup %12541 }
0x2046   :  { %5321 = vrot.lane.b32.xlu0 %v12542_v46, %s13280_s18 }
0x20b8   :  { %v5322_v0 = vpop.permute.xlu0 %5321 }
0x20b9   :  { %v5324_v38 = vmul.f32 %v12540_v37, %v5322_v0 }
0x20bb   :  { %5326 = vrot.lane.b32.xlu1 %v5324_v38, %s13281_s9 }
0x212d   :  { %v5327_v6 = vpop.permute.xlu1 %5326 }
0x212e   :  { %6379 = vst.msk [vmem:[#allocation2 + $0x30] sm:$0xff] %vm446_vm0, %v5327_v6  ;;  %11123 = vmatmul.mubr.msk.f32.vlgmr.msra.gmra.mrb[86].mxu1 %vm446_vm0, %v5327_v6 }
0x212f   :  { %12018 = vmatpush3.bf16.msra.mxu1 %v14585_v60  ;;  %11153 = vmatprep.mubr.msk.f32.mxu1 %vm13279_vm8, %v13277_v29 }
0x2130   :  { %12019 = vmatprep.subr.bf16.mxu1 %v13278_v53 }
0x2133   :  { %12021 = vmatpush3.bf16.msra.mxu1 %v14589_v39 }
0x2134   :  { %12022 = vmatprep.subr.bf16.mxu1 %v13278_v53 }
0x2136   :  { %11154 = vmatmul.mubr.f32.vlgmr.msra.gmra.mrb[88].mxu1 %v13277_v29 }
0x2137   :  { %12024 = vmatpush3.bf16.msra.mxu1 %v14585_v60  ;;  %11164 = vmatprep.mubr.msk.f32.mxu1 %vm13279_vm8, %v13277_v29 }
0x2138   :  { %12025 = vmatprep.subr.bf16.mxu1 %v13278_v53 }
0x213b   :  { %12027 = vmatpush3.bf16.msra.mxu1 %v14589_v39 }
0x213c   :  { %12034 = vmatprep.subr.bf16.mxu1 %v13278_v53 }
0x2201   :  { %v5396_v41 = vpop.f32.mrb[86].mxu1 }
0x2202   :  { %v14610_v59 = vadd.f32 %v5396_v41, %v14455_v50  ;;  %v11124_v34 = vpop.f32.mrb[87].mxu1 }
0x2209   :  { %v5611_v57 = vpop.f32.mrb[88].mxu1 }
0x220a   :  { %v5615_v52 = vadd.f32 %v5611_v57, %v5538_v15  ;;  %v11155_v45 = vpop.f32.mrb[89].mxu1 }
0x220c   :  { %12543 = vtanh.f32 %v5615_v52  ;;  %v9503_v3 = vmul.f32 -1.442695, %v5615_v52 }
0x220e   :  { %12545 = vpow2.f32 %v9503_v3 }
0x2216   :  { %v12544_v42 = vpop.eup %12543 }
0x2217   :  { %5625 = vrot.lane.b32.xlu0 %v12544_v42, %s13280_s18 }
0x2218   :  { %v12546_v55 = vpop.eup %12545 }
0x2219   :  { %v5619_v1 = vadd.f32 1.0, %v12546_v55 }
0x221b   :  { %12547 = vrcp.f32 %v5619_v1 }
0x2225   :  { %v12548_v16 = vpop.eup %12547 }
0x2226   :  { %v5623_v50 = vmul.f32 0.0, %v12548_v16 }
0x2289   :  { %v5626_v17 = vpop.permute.xlu0 %5625 }
0x228a   :  { %v5628_v9 = vmul.f32 %v12548_v16, %v5626_v17 }
0x228c   :  { %5630 = vrot.lane.b32.xlu1 %v5628_v9, %s13281_s9 }
0x22fe   :  { %v5631_v13 = vpop.permute.xlu1 %5630 }
0x22ff   :  { %v5633_v51 = vadd.f32 %v5631_v13, %v5623_v50 }
0x2301   :  { %12549 = vtanh.f32 %v5633_v51 }
0x230b   :  { %v12550_v49 = vpop.eup %12549 }
0x230c   :  { %5636 = vrot.lane.b32.xlu0 %v12550_v49, %s13280_s18 }
0x237e   :  { %v5637_v27 = vpop.permute.xlu0 %5636 }
0x237f   :  { %v14616_v33 = vmul.f32 %v12548_v16, %v5637_v27 }
0x2381   :  { %5641 = vrot.lane.b32.xlu1 %v14616_v33, %s13281_s9 }
0x23f3   :  { %v5642_v18 = vpop.permute.xlu1 %5641 }
0x23f4   :  { %11165 = vmatmul.mubr.msk.f32.vlgmr.msra.gmra.mrb[90].mxu1 %vm446_vm0, %v5642_v18 }
0x23f5   :  { %12036 = vmatpush3.bf16.msra.mxu1 %v14585_v60  ;;  %11186 = vmatprep.mubr.msk.f32.mxu1 %vm13279_vm8, %v13277_v29 }
0x23f6   :  { %12037 = vmatprep.subr.bf16.mxu1 %v13278_v53 }
0x23f9   :  { %12039 = vmatpush3.bf16.msra.mxu1 %v14589_v39 }
0x23fa   :  { %12046 = vmatprep.subr.bf16.mxu1 %v13278_v53 }
0x24c7   :  { %v5711_v44 = vpop.f32.mrb[90].mxu1 }
0x24c8   :  { %v5715_v63 = vadd.f32 %v5711_v44, %v14578_v21  ;;  %v11166_v8 = vpop.f32.mrb[91].mxu1 }
0x24ca   :  { %12551 = vtanh.f32 %v5715_v63  ;;  %v9505_v40 = vmul.f32 -1.442695, %v5715_v63 }
0x24cc   :  { %12553 = vpow2.f32 %v9505_v40 }
0x24d4   :  { %v12552_v30 = vpop.eup %12551 }
0x24d5   :  { %5725 = vrot.lane.b32.xlu0 %v12552_v30, %s13280_s18 }
0x24d6   :  { %v12554_v19 = vpop.eup %12553 }
0x24d7   :  { %v5719_v56 = vadd.f32 1.0, %v12554_v19 }
0x24d9   :  { %12555 = vrcp.f32 %v5719_v56 }
0x24e3   :  { %v12556_v7 = vpop.eup %12555 }
0x24e4   :  { %v5723_v5 = vmul.f32 %v12556_v7, %v5633_v51 }
0x2547   :  { %v5726_v10 = vpop.permute.xlu0 %5725 }
0x2548   :  { %v5728_v11 = vmul.f32 %v12556_v7, %v5726_v10 }
0x254a   :  { %5730 = vrot.lane.b32.xlu1 %v5728_v11, %s13281_s9 }
0x25bc   :  { %v5731_v20 = vpop.permute.xlu1 %5730 }
0x25bd   :  { %v5733_v23 = vadd.f32 %v5731_v20, %v5723_v5 }
0x25bf   :  { %12557 = vtanh.f32 %v5733_v23 }
0x25c9   :  { %v12558_v21 = vpop.eup %12557 }
0x25ca   :  { %5736 = vrot.lane.b32.xlu0 %v12558_v21, %s13280_s18 }
0x263c   :  { %v5737_v24 = vpop.permute.xlu0 %5736 }
0x263d   :  { %v14631_v28 = vmul.f32 %v12556_v7, %v5737_v24 }
0x263f   :  { %5741 = vrot.lane.b32.xlu1 %v14631_v28, %s13281_s9 }
0x26b1   :  { %v5742_v31 = vpop.permute.xlu1 %5741 }
0x26b2   :  { %11176 = vmatmul.mubr.msk.f32.vlgmr.msra.gmra.mrb[96].mxu0 %vm446_vm0, %v5742_v31 }
0x26b3   :  { %12042 = vmatpush3.bf16.msra.mxu0 %v14585_v60  ;;  %11197 = vmatprep.mubr.msk.f32.mxu0 %vm13279_vm8, %v13277_v29 }
0x26b4   :  { %12043 = vmatprep.subr.bf16.mxu0 %v13278_v53 }
0x26b7   :  { %12045 = vmatpush3.bf16.msra.mxu0 %v14589_v39 }
0x26b8   :  { %12052 = vmatprep.subr.bf16.mxu0 %v13278_v53 }
0x2785   :  { %v5811_v37 = vpop.f32.mrb[96].mxu0 }
0x2786   :  { %v5815_v54 = vadd.f32 %v5811_v37, %v14572_v14  ;;  %v11177_v58 = vpop.f32.mrb[97].mxu0 }
0x2788   :  { %12559 = vtanh.f32 %v5815_v54  ;;  %v9507_v22 = vmul.f32 -1.442695, %v5815_v54 }
0x278a   :  { %12561 = vpow2.f32 %v9507_v22 }
0x2792   :  { %v12560_v12 = vpop.eup %12559 }
0x2793   :  { %5825 = vrot.lane.b32.xlu0 %v12560_v12, %s13280_s18 }
0x2794   :  { %v12562_v46 = vpop.eup %12561 }
0x2795   :  { %v5819_v47 = vadd.f32 1.0, %v12562_v46 }
0x2797   :  { %12563 = vrcp.f32 %v5819_v47 }
0x27a1   :  { %v12564_v61 = vpop.eup %12563 }
0x27a2   :  { %v5823_v0 = vmul.f32 %v12564_v61, %v5733_v23 }
0x2805   :  { %v5826_v62 = vpop.permute.xlu0 %5825 }
0x2806   :  { %v5828_v25 = vmul.f32 %v12564_v61, %v5826_v62 }
0x2808   :  { %5830 = vrot.lane.b32.xlu1 %v5828_v25, %s13281_s9 }
0x287a   :  { %v5831_v38 = vpop.permute.xlu1 %5830 }
0x287b   :  { %v5833_v6 = vadd.f32 %v5831_v38, %v5823_v0 }
0x287d   :  { %12565 = vtanh.f32 %v5833_v6 }
0x2887   :  { %v12566_v14 = vpop.eup %12565 }
0x2888   :  { %5836 = vrot.lane.b32.xlu0 %v12566_v14, %s13280_s18 }
0x28fa   :  { %v5837_v41 = vpop.permute.xlu0 %5836 }
0x28fb   :  { %v14646_v34 = vmul.f32 %v12564_v61, %v5837_v41 }
0x28fd   :  { %5841 = vrot.lane.b32.xlu1 %v14646_v34, %s13281_s9 }
0x296f   :  { %v5842_v15 = vpop.permute.xlu1 %5841 }
0x2970   :  { %11187 = vmatmul.mubr.msk.f32.vlgmr.msra.gmra.mrb[92].mxu1 %vm446_vm0, %v5842_v15 }
0x2971   :  { %12048 = vmatpush3.bf16.msra.mxu1 %v14585_v60  ;;  %11208 = vmatprep.mubr.msk.f32.mxu1 %vm13279_vm8, %v13277_v29 }
0x2972   :  { %12049 = vmatprep.subr.bf16.mxu1 %v13278_v53 }
0x2975   :  { %12051 = vmatpush3.bf16.msra.mxu1 %v14589_v39 }
0x2976   :  { %12058 = vmatprep.subr.bf16.mxu1 %v13278_v53 }
0x2a43   :  { %v5911_v57 = vpop.f32.mrb[92].mxu1 }
0x2a44   :  { %v5915_v52 = vadd.f32 %v5911_v57, %v14575_v35  ;;  %v11188_v45 = vpop.f32.mrb[93].mxu1 }
0x2a46   :  { %12567 = vtanh.f32 %v5915_v52  ;;  %v9509_v3 = vmul.f32 -1.442695, %v5915_v52 }
0x2a48   :  { %12569 = vpow2.f32 %v9509_v3 }
0x2a50   :  { %v12568_v42 = vpop.eup %12567 }
0x2a51   :  { %5925 = vrot.lane.b32.xlu0 %v12568_v42, %s13280_s18 }
0x2a52   :  { %v12570_v55 = vpop.eup %12569 }
0x2a53   :  { %v5919_v1 = vadd.f32 1.0, %v12570_v55 }
0x2a55   :  { %12571 = vrcp.f32 %v5919_v1 }
0x2a5f   :  { %v12572_v16 = vpop.eup %12571 }
0x2a60   :  { %v5923_v50 = vmul.f32 %v12572_v16, %v5833_v6 }
0x2ac3   :  { %v5926_v17 = vpop.permute.xlu0 %5925 }
0x2ac4   :  { %v5928_v9 = vmul.f32 %v12572_v16, %v5926_v17 }
0x2ac6   :  { %5930 = vrot.lane.b32.xlu1 %v5928_v9, %s13281_s9 }
0x2b38   :  { %v5931_v13 = vpop.permute.xlu1 %5930 }
0x2b39   :  { %v5933_v51 = vadd.f32 %v5931_v13, %v5923_v50 }
0x2b3b   :  { %12573 = vtanh.f32 %v5933_v51 }
0x2b45   :  { %v12574_v35 = vpop.eup %12573 }
0x2b46   :  { %5936 = vrot.lane.b32.xlu0 %v12574_v35, %s13280_s18 }
0x2bb8   :  { %v5937_v49 = vpop.permute.xlu0 %5936 }
0x2bb9   :  { %v14661_v27 = vmul.f32 %v12572_v16, %v5937_v49 }
0x2bbb   :  { %5941 = vrot.lane.b32.xlu1 %v14661_v27, %s13281_s9 }
0x2c2d   :  { %v5942_v18 = vpop.permute.xlu1 %5941 }
0x2c2e   :  { %11198 = vmatmul.mubr.msk.f32.vlgmr.msra.gmra.mrb[98].mxu0 %vm446_vm0, %v5942_v18 }
0x2c2f   :  { %12054 = vmatpush3.bf16.msra.mxu0 %v14585_v60  ;;  %11219 = vmatprep.mubr.msk.f32.mxu0 %vm13279_vm8, %v13277_v29 }
0x2c30   :  { %12055 = vmatprep.subr.bf16.mxu0 %v13278_v53 }
0x2c33   :  { %12057 = vmatpush3.bf16.msra.mxu0 %v14589_v39 }
0x2d01   :  { %v6011_v44 = vpop.f32.mrb[98].mxu0 }
0x2d02   :  { %v6015_v63 = vadd.f32 %v6011_v44, %v14565_v43  ;;  %v11199_v8 = vpop.f32.mrb[99].mxu0 }
0x2d04   :  { %12575 = vtanh.f32 %v6015_v63  ;;  %v9511_v40 = vmul.f32 -1.442695, %v6015_v63 }
0x2d06   :  { %12577 = vpow2.f32 %v9511_v40 }
0x2d0e   :  { %v12576_v30 = vpop.eup %12575 }
0x2d0f   :  { %6025 = vrot.lane.b32.xlu0 %v12576_v30, %s13280_s18 }
0x2d10   :  { %v12578_v19 = vpop.eup %12577 }
0x2d11   :  { %v6019_v56 = vadd.f32 1.0, %v12578_v19 }
0x2d13   :  { %12579 = vrcp.f32 %v6019_v56 }
0x2d1d   :  { %v12580_v7 = vpop.eup %12579 }
0x2d1e   :  { %v6023_v5 = vmul.f32 %v12580_v7, %v5933_v51 }
0x2d81   :  { %v6026_v10 = vpop.permute.xlu0 %6025 }
0x2d82   :  { %v6028_v11 = vmul.f32 %v12580_v7, %v6026_v10 }
0x2d84   :  { %6030 = vrot.lane.b32.xlu1 %v6028_v11, %s13281_s9 }
0x2df6   :  { %v6031_v20 = vpop.permute.xlu1 %6030 }
0x2df7   :  { %v6033_v23 = vadd.f32 %v6031_v20, %v6023_v5  ;;  %v6402_v20 = vld [vmem:[#allocation19 + $0x8] sm:$0xff] }
0x2df9   :  { %12581 = vtanh.f32 %v6033_v23 }
0x2e03   :  { %v12582_v43 = vpop.eup %12581 }
0x2e04   :  { %6036 = vrot.lane.b32.xlu0 %v12582_v43, %s13280_s18 }
0x2e76   :  { %v6037_v21 = vpop.permute.xlu0 %6036 }
0x2e77   :  { %v14675_v24 = vmul.f32 %v12580_v7, %v6037_v21  ;;  %v6404_v21 = vld [vmem:[#allocation19 + $0x18] sm:$0xff] }
0x2e79   :  { %6041 = vrot.lane.b32.xlu1 %v14675_v24, %s13281_s9 }
0x2eeb   :  { %v6042_v31 = vpop.permute.xlu1 %6041 }
0x2eec   :  { %11209 = vmatmul.mubr.msk.f32.vlgmr.msra.gmra.mrb[94].mxu1 %vm446_vm0, %v6042_v31 }
0x2eed   :  { %12060 = vmatpush3.bf16.msra.mxu1 %v14585_v60  ;;  %11230 = vmatprep.mubr.msk.f32.mxu1 %vm13279_vm8, %v13277_v29 }
0x2eee   :  { %12061 = vmatprep.subr.bf16.mxu1 %v13278_v53 }
0x2ef1   :  { %12063 = vmatpush3.bf16.msra.mxu1 %v14589_v39 }
0x2ef2   :  { %12080 = vmatprep.subr.bf16.mxu1 %v13278_v53 }
0x2fbf   :  { %v6111_v37 = vpop.f32.mrb[94].mxu1 }
0x2fc0   :  { %v6115_v54 = vadd.f32 %v6111_v37, %v14568_v36  ;;  %v11210_v58 = vpop.f32.mrb[95].mxu1 }
0x2fc1   :  { %v6406_v58 = vld [vmem:[#allocation19 + $0x28] sm:$0xff] }
0x2fc2   :  { %12583 = vtanh.f32 %v6115_v54  ;;  %v9513_v22 = vmul.f32 -1.442695, %v6115_v54  ;;  %v6405_v54 = vld [vmem:[#allocation19 + $0x20] sm:$0xff] }
0x2fc4   :  { %12585 = vpow2.f32 %v9513_v22  ;;  %v6545_v22 = vld [vmem:[#allocation21] sm:$0xff] }
0x2fcc   :  { %v12584_v12 = vpop.eup %12583 }
0x2fcd   :  { %6125 = vrot.lane.b32.xlu0 %v12584_v12, %s13280_s18  ;;  %v12072_v12 = vpack.c.bf16 %v6406_v58, %v6405_v54 }
0x2fce   :  { %v12586_v60 = vpop.eup %12585 }
0x2fcf   :  { %v6119_v46 = vadd.f32 1.0, %v12586_v60  ;;  %v6546_v60 = vld [vmem:[#allocation21 + $0x8] sm:$0xff] }
0x2fd1   :  { %12587 = vrcp.f32 %v6119_v46  ;;  %v6407_v46 = vld [vmem:[#allocation19 + $0x30] sm:$0xff] }
0x2fdb   :  { %v12588_v47 = vpop.eup %12587 }
0x2fdc   :  { %v6123_v39 = vmul.f32 %v12588_v47, %v6033_v23  ;;  %v6403_v23 = vld [vmem:[#allocation19 + $0x10] sm:$0xff] }
0x2fdd   :  { %v12068_v31 = vpack.c.bf16 %v6404_v21, %v6403_v23 }
0x303f   :  { %v6126_v61 = vpop.permute.xlu0 %6125 }
0x3040   :  { %v6128_v62 = vmul.f32 %v12588_v47, %v6126_v61  ;;  %v6408_v61 = vld [vmem:[#allocation19 + $0x38] sm:$0xff] }
0x3042   :  { %6130 = vrot.lane.b32.xlu1 %v6128_v62, %s13281_s9  ;;  %v12076_v62 = vpack.c.bf16 %v6408_v61, %v6407_v46 }
0x30b4   :  { %v6131_v25 = vpop.permute.xlu1 %6130 }
0x30b5   :  { %v6133_v0 = vadd.f32 %v6131_v25, %v6123_v39  ;;  %v6547_v39 = vld [vmem:[#allocation21 + $0x10] sm:$0xff]  ;;  %v6548_v25 = vld [vmem:[#allocation21 + $0x18] sm:$0xff] }
0x30b7   :  { %12589 = vtanh.f32 %v6133_v0 }
0x30c1   :  { %v12590_v36 = vpop.eup %12589 }
0x30c2   :  { %6136 = vrot.lane.b32.xlu0 %v12590_v36, %s13280_s18 }
0x3134   :  { %v6137_v38 = vpop.permute.xlu0 %6136 }
0x3135   :  { %v14690_v6 = vmul.f32 %v12588_v47, %v6137_v38  ;;  %v14708_v47 = vpack.c.bf16 %v6546_v60, %v6545_v22  ;;  %v9493_v60 = vmul.f32 -1.442695, %v14610_v59 }
0x3137   :  { %6141 = vrot.lane.b32.xlu1 %v14690_v6, %s13281_s9 }
0x31a9   :  { %v6142_v14 = vpop.permute.xlu1 %6141 }
0x31aa   :  { %11220 = vmatmul.mubr.msk.f32.vlgmr.msra.gmra.mrb[100].mxu0 %vm446_vm0, %v6142_v14 }
0x327d   :  { %v6211_v41 = vpop.f32.mrb[100].mxu0 }
0x327e   :  { %v6215_v15 = vadd.f32 %v6211_v41, %v14559_v48  ;;  %v11221_v57 = vpop.f32.mrb[101].mxu0 }
0x3280   :  { %12591 = vtanh.f32 %v6215_v15  ;;  %v9515_v45 = vmul.f32 -1.442695, %v6215_v15 }
0x3282   :  { %12593 = vpow2.f32 %v9515_v45 }
0x328a   :  { %v12592_v52 = vpop.eup %12591 }
0x328b   :  { %6225 = vrot.lane.b32.xlu0 %v12592_v52, %s13280_s18 }
0x328c   :  { %v12594_v42 = vpop.eup %12593 }
0x328d   :  { %v6219_v3 = vadd.f32 1.0, %v12594_v42  ;;  %v14739_v42 = vld [vmem:[#allocation22] ss:$0 sm:$0xff] }
0x328f   :  { %12595 = vrcp.f32 %v6219_v3 }
0x3299   :  { %v12596_v55 = vpop.eup %12595 }
0x329a   :  { %v6223_v17 = vmul.f32 %v12596_v55, %v6133_v0  ;;  %v14712_v0 = vpack.c.bf16 %v6548_v25, %v6547_v39 }
0x32fd   :  { %v6226_v1 = vpop.permute.xlu0 %6225 }
0x32fe   :  { %v6228_v16 = vmul.f32 %v12596_v55, %v6226_v1 }
0x3300   :  { %6230 = vrot.lane.b32.xlu1 %v6228_v16, %s13281_s9 }
0x3372   :  { %v6231_v9 = vpop.permute.xlu1 %6230 }
0x3373   :  { %v6233_v50 = vadd.f32 %v6231_v9, %v6223_v17 }
0x3375   :  { %12597 = vtanh.f32 %v6233_v50 }
0x337f   :  { %v12598_v48 = vpop.eup %12597 }
0x3380   :  { %6236 = vrot.lane.b32.xlu0 %v12598_v48, %s13280_s18 }
0x33f2   :  { %v6237_v13 = vpop.permute.xlu0 %6236 }
0x33f3   :  { %v6239_v51 = vmul.f32 %v12596_v55, %v6237_v13 }
0x33f5   :  { %6241 = vrot.lane.b32.xlu1 %v6239_v51, %s13281_s9 }
0x3467   :  { %v6242_v35 = vpop.permute.xlu1 %6241 }
0x3468   :  { %11231 = vmatmul.mubr.msk.f32.vlgmr.msra.gmra.mrb[96].mxu1 %vm446_vm0, %v6242_v35 }
0x3469   :  { %11269 = vmatprep.mubr.msk.f32.mxu1 %vm13279_vm8, %v13277_v29  ;;  %12082 = vmatpush3.bf16.msra.mxu1 %v14708_v47 }
0x346a   :  { %12083 = vmatprep.subr.bf16.mxu1 %v13278_v53 }
0x346d   :  { %12085 = vmatpush3.bf16.msra.mxu1 %v14712_v0 }
0x346e   :  { %12086 = vmatprep.subr.bf16.mxu1 %v13278_v53 }
0x3470   :  { %11270 = vmatmul.mubr.f32.vlgmr.msra.gmra.mrb[98].mxu1 %v13277_v29 }
0x3471   :  { %12088 = vmatpush3.bf16.msra.mxu1 %v14708_v47  ;;  %11280 = vmatprep.mubr.msk.f32.mxu1 %vm13279_vm8, %v13277_v29 }
0x3472   :  { %12089 = vmatprep.subr.bf16.mxu1 %v13278_v53 }
0x3475   :  { %12091 = vmatpush3.bf16.msra.mxu1 %v14712_v0 }
0x3476   :  { %12092 = vmatprep.subr.bf16.mxu1 %v13278_v53 }
0x353b   :  { %v6311_v49 = vpop.f32.mrb[96].mxu1 }
0x353c   :  { %v6315_v18 = vadd.f32 %v6311_v49, %v14562_v4  ;;  %v11232_v44 = vpop.f32.mrb[97].mxu1  ;;  %v6401_v4 = vld [vmem:[#allocation19] sm:$0xff] }
0x353d   :  { %v12064_v43 = vpack.c.bf16 %v6402_v20, %v6401_v4 }
0x353e   :  { %12599 = vtanh.f32 %v6315_v18  ;;  %v9517_v8 = vmul.f32 -1.442695, %v6315_v18 }
0x353f   :  { %12065 = vmatprep.subr.bf16.mxu0 %v12064_v43 }
0x3540   :  { %12601 = vpow2.f32 %v9517_v8  ;;  %12067 = vmatpush3.bf16.msra.mxu0 %v12064_v43 }
0x3541   :  { %12069 = vmatprep.subr.bf16.mxu0 %v12068_v31 }
0x3543   :  { %v6615_v52 = vpop.f32.mrb[98].mxu1 }
0x3544   :  { %12071 = vmatpush3.bf16.msra.mxu0 %v12068_v31  ;;  %v11271_v45 = vpop.f32.mrb[99].mxu1 }
0x3545   :  { %12073 = vmatprep.subr.bf16.mxu0 %v12072_v12 }
0x3548   :  { %v12600_v63 = vpop.eup %12599  ;;  %12075 = vmatpush3.bf16.msra.mxu0 %v12072_v12 }
0x3549   :  { %6325 = vrot.lane.b32.xlu0 %v12600_v63, %s13280_s18  ;;  %12077 = vmatprep.subr.bf16.mxu0 %v12076_v62 }
0x354a   :  { %v12602_v30 = vpop.eup %12601 }
0x354b   :  { %v6319_v40 = vadd.f32 1.0, %v12602_v30 }
0x354c   :  { %12079 = vmatpush3.bf16.msra.mxu0 %v12076_v62 }
0x354d   :  { %12603 = vrcp.f32 %v6319_v40  ;;  %12098 = vmatprep.subr.bf16.mxu0 %v13278_v53 }
0x3557   :  { %v12604_v19 = vpop.eup %12603 }
0x3558   :  { %v6323_v10 = vmul.f32 %v12604_v19, %v6233_v50 }
0x35bb   :  { %v6326_v56 = vpop.permute.xlu0 %6325 }
0x35bc   :  { %v6328_v7 = vmul.f32 %v12604_v19, %v6326_v56 }
0x35be   :  { %6330 = vrot.lane.b32.xlu1 %v6328_v7, %s13281_s9 }
0x3630   :  { %v6331_v11 = vpop.permute.xlu1 %6330 }
0x3631   :  { %v6333_v5 = vadd.f32 %v6331_v11, %v6323_v10 }
0x3633   :  { %12605 = vtanh.f32 %v6333_v5 }
0x363d   :  { %v12606_v37 = vpop.eup %12605 }
0x363e   :  { %6336 = vrot.lane.b32.xlu0 %v12606_v37, %s13280_s18 }
0x3642   :  { %6350 = vrot.lane.b32.xlu0 %v6239_v51, %s13280_s18 }
0x36b0   :  { %v6337_v36 = vpop.permute.xlu0 %6336 }
0x36b1   :  { %v6339_v38 = vmul.f32 %v12604_v19, %v6337_v36 }
0x36b3   :  { %6343 = vrot.lane.b32.xlu1 %v6339_v38, %s13280_s18 }
0x36b4   :  { %v6351_v14 = vpop.permute.xlu0 %6350 }
0x36b5   :  { %6353 = vst.msk [vmem:[#allocation2 + $0x8] sm:$0xff] %vm6346_vm9, %v6351_v14 }
0x36bc   :  { %v14731_v57 = vld [vmem:[#allocation2 + $0x8] sm:$0xff] }
0x3725   :  { %v6344_v41 = vpop.permute.xlu1 %6343 }
0x3726   :  { %6347 = vst.msk [vmem:[#allocation2] sm:$0xff] %vm6346_vm9, %v6344_v41 }
0x372d   :  { %v14727_v15 = vld [vmem:[#allocation2] sm:$0xff] }
0x372e   :  { %11249 = vmatprep.mubr.msk.f32.mxu0 %vm859_vm11, %v14727_v15 }
0x372f   :  { %11250 = vmatmul.mubr.msk.f32.vlgmr.msra.gmra.mrb[102].mxu0 %vm859_vm11, %v14731_v57 }
0x3730   :  { %12100 = vmatpush3.bf16.msra.mxu0 %v14708_v47 }
0x3731   :  { %12101 = vmatprep.subr.bf16.mxu0 %v13278_v53 }
0x3734   :  { %12103 = vmatpush3.bf16.msra.mxu0 %v14712_v0 }
0x3735   :  { %12110 = vmatprep.subr.bf16.mxu0 %v13278_v53 }
0x3802   :  { %v11251_v3 = vpop.f32.mrb[102].mxu0 }
0x3803   :  { %v6506_v55 = vpop.f32.mrb[103].mxu0  ;;  %v6512_v19 = vadd.f32 %v11251_v3, %v14739_v42 }
0x3804   :  { %v6507_v1 = vadd.f32 %v14739_v42, %v6506_v55 }
0x3806   :  { %v6619_v16 = vadd.f32 %v6615_v52, %v6507_v1 }
0x3808   :  { %12607 = vtanh.f32 %v6619_v16  ;;  %v9527_v9 = vmul.f32 -1.442695, %v6619_v16 }
0x380a   :  { %12609 = vpow2.f32 %v9527_v9 }
0x3812   :  { %v12608_v17 = vpop.eup %12607 }
0x3813   :  { %6629 = vrot.lane.b32.xlu1 %v12608_v17, %s13280_s18 }
0x3814   :  { %v12610_v50 = vpop.eup %12609 }
0x3815   :  { %v6623_v48 = vadd.f32 1.0, %v12610_v50 }
0x3817   :  { %12611 = vrcp.f32 %v6623_v48 }
0x3821   :  { %v12612_v13 = vpop.eup %12611 }
0x3822   :  { %v6627_v49 = vmul.f32 0.0, %v12612_v13 }
0x3885   :  { %v6630_v51 = vpop.permute.xlu1 %6629 }
0x3886   :  { %v6632_v35 = vmul.f32 %v12612_v13, %v6630_v51 }
0x3888   :  { %6634 = vrot.lane.b32.xlu0 %v6632_v35, %s13281_s9 }
0x38fa   :  { %v6635_v18 = vpop.permute.xlu0 %6634 }
0x38fb   :  { %v6637_v44 = vadd.f32 %v6635_v18, %v6627_v49 }
0x38fd   :  { %12613 = vtanh.f32 %v6637_v44 }
0x3907   :  { %v12614_v63 = vpop.eup %12613 }
0x3908   :  { %6640 = vrot.lane.b32.xlu1 %v12614_v63, %s13280_s18 }
0x397a   :  { %v6641_v8 = vpop.permute.xlu1 %6640 }
0x397b   :  { %v6643_v30 = vmul.f32 %v12612_v13, %v6641_v8 }
0x397d   :  { %6645 = vrot.lane.b32.xlu0 %v6643_v30, %s13281_s9 }
0x39ef   :  { %v6646_v40 = vpop.permute.xlu0 %6645 }
0x39f0   :  { %8264 = vst.msk [vmem:[#allocation3] sm:$0xff] %vm446_vm0, %v6646_v40  ;;  %11281 = vmatmul.mubr.msk.f32.vlgmr.msra.gmra.mrb[100].mxu1 %vm446_vm0, %v6646_v40 }
0x39f1   :  { %12094 = vmatpush3.bf16.msra.mxu1 %v14708_v47  ;;  %11291 = vmatprep.mubr.msk.f32.mxu1 %vm13279_vm8, %v13277_v29 }
0x39f2   :  { %12095 = vmatprep.subr.bf16.mxu1 %v13278_v53 }
0x39f5   :  { %12097 = vmatpush3.bf16.msra.mxu1 %v14712_v0 }
0x39f6   :  { %12104 = vmatprep.subr.bf16.mxu1 %v13278_v53 }
0x3ac3   :  { %v6715_v56 = vpop.f32.mrb[100].mxu1 }
0x3ac4   :  { %v6719_v7 = vadd.f32 %v6715_v56, %v6512_v19  ;;  %v11282_v10 = vpop.f32.mrb[101].mxu1 }
0x3ac6   :  { %12615 = vtanh.f32 %v6719_v7  ;;  %v9529_v5 = vmul.f32 -1.442695, %v6719_v7 }
0x3ac8   :  { %12617 = vpow2.f32 %v9529_v5 }
0x3ad0   :  { %v12616_v11 = vpop.eup %12615 }
0x3ad1   :  { %6729 = vrot.lane.b32.xlu1 %v12616_v11, %s13280_s18 }
0x3ad2   :  { %v12618_v4 = vpop.eup %12617 }
0x3ad3   :  { %v6723_v20 = vadd.f32 1.0, %v12618_v4 }
0x3ad5   :  { %12619 = vrcp.f32 %v6723_v20 }
0x3adf   :  { %v12620_v23 = vpop.eup %12619 }
0x3ae0   :  { %v6727_v31 = vmul.f32 %v12620_v23, %v6637_v44 }
0x3b43   :  { %v6730_v43 = vpop.permute.xlu1 %6729 }
0x3b44   :  { %v6732_v21 = vmul.f32 %v12620_v23, %v6730_v43 }
0x3b46   :  { %6734 = vrot.lane.b32.xlu0 %v6732_v21, %s13281_s9 }
0x3b4a   :  { %6356 = vrot.lane.b32.xlu0 %v14690_v6, %s13280_s18 }
0x3bb8   :  { %v6735_v37 = vpop.permute.xlu0 %6734 }
0x3bb9   :  { %v14759_v54 = vadd.f32 %v6735_v37, %v6727_v31 }
0x3bbb   :  { %12621 = vtanh.f32 %v14759_v54 }
0x3bbc   :  { %v6357_v58 = vpop.permute.xlu0 %6356  ;;  %12623 = vtanh.f32 %v14610_v59 }
0x3bbd   :  { %6359 = vst.msk [vmem:[#allocation2 + $0x10] sm:$0xff] %vm6346_vm9, %v6357_v58  ;;  %12625 = vpow2.f32 %v9493_v60 }
0x3bc4   :  { %v14764_v12 = vld [vmem:[#allocation2 + $0x10] sm:$0xff] }
0x3bc5   :  { %v12622_v22 = vpop.eup %12621  ;;  %11252 = vmatprep.mubr.msk.f32.mxu0 %vm859_vm11, %v14764_v12 }
0x3bc6   :  { %6740 = vrot.lane.b32.xlu1 %v12622_v22, %s13280_s18  ;;  %v12624_v6 = vpop.eup %12623 }
0x3bc7   :  { %v12626_v46 = vpop.eup %12625 }
0x3bc8   :  { %v5404_v61 = vadd.f32 1.0, %v12626_v46 }
0x3bca   :  { %6362 = vrot.lane.b32.xlu1 %v14675_v24, %s13280_s18  ;;  %12627 = vrcp.f32 %v5404_v61 }
0x3bce   :  { %5410 = vrot.lane.b32.xlu1 %v12624_v6, %s13280_s18 }
0x3bd4   :  { %v12628_v36 = vpop.eup %12627 }
0x3bd5   :  { %v5408_v41 = vmul.f32 %v12628_v36, %v14581_v32 }
0x3c38   :  { %v6741_v62 = vpop.permute.xlu1 %6740 }
0x3c39   :  { %v6743_v39 = vmul.f32 %v12620_v23, %v6741_v62 }
0x3c3b   :  { %6745 = vrot.lane.b32.xlu0 %v6743_v39, %s13281_s9 }
0x3c3c   :  { %v6363_v25 = vpop.permute.xlu1 %6362 }
0x3c3d   :  { %6365 = vst.msk [vmem:[#allocation2 + $0x18] sm:$0xff] %vm6346_vm9, %v6363_v25 }
0x3c40   :  { %v5411_v38 = vpop.permute.xlu1 %5410 }
0x3c41   :  { %v5413_v14 = vmul.f32 %v12628_v36, %v5411_v38 }
0x3c43   :  { %5415 = vrot.lane.b32.xlu1 %v5413_v14, %s13281_s9 }
0x3c44   :  { %v14776_v24 = vld [vmem:[#allocation2 + $0x18] sm:$0xff] }
0x3c45   :  { %11253 = vmatmul.mubr.msk.f32.gmra.mrb[104].mxu0 %vm859_vm11, %v14776_v24 }
0x3cad   :  { %v6746_v59 = vpop.permute.xlu0 %6745 }
0x3cae   :  { %8271 = vst.msk [vmem:[#allocation3 + $0x8] sm:$0xff] %vm446_vm0, %v6746_v59  ;;  %11292 = vmatmul.mubr.msk.f32.vlgmr.msra.gmra.mrb[102].mxu1 %vm446_vm0, %v6746_v59 }
0x3caf   :  { %12106 = vmatpush3.bf16.msra.mxu1 %v14708_v47  ;;  %11313 = vmatprep.mubr.msk.f32.mxu1 %vm13279_vm8, %v13277_v29 }
0x3cb0   :  { %12107 = vmatprep.subr.bf16.mxu1 %v13278_v53 }
0x3cb3   :  { %12109 = vmatpush3.bf16.msra.mxu1 %v14712_v0 }
0x3cb4   :  { %12116 = vmatprep.subr.bf16.mxu1 %v13278_v53 }
0x3cb5   :  { %v5416_v52 = vpop.permute.xlu1 %5415 }
0x3cb6   :  { %v5418_v45 = vadd.f32 %v5416_v52, %v5408_v41 }
0x3cb8   :  { %12629 = vtanh.f32 %v5418_v45 }
0x3cc2   :  { %v12630_v3 = vpop.eup %12629 }
0x3cc3   :  { %5421 = vrot.lane.b32.xlu1 %v12630_v3, %s13280_s18 }
0x3cc7   :  { %6368 = vrot.lane.b32.xlu1 %v14661_v27, %s13280_s18 }
0x3ccb   :  { %6380 = vrot.lane.b32.xlu1 %v14631_v28, %s13280_s18 }
0x3ccf   :  { %6389 = vrot.lane.b32.xlu1 %v14616_v33, %s13280_s18 }
0x3d18   :  { %v11254_v55 = vpop.f32.mrb[104].mxu0 }
0x3d19   :  { %v6516_v1 = vpop.f32.mrb[105].mxu0 }
0x3d1a   :  { %v6517_v27 = vadd.f32 %v14739_v42, %v6516_v1 }
0x3d35   :  { %v5422_v32 = vpop.permute.xlu1 %5421 }
0x3d36   :  { %v5424_v19 = vmul.f32 %v12628_v36, %v5422_v32 }
0x3d39   :  { %v6369_v16 = vpop.permute.xlu1 %6368 }
0x3d3a   :  { %6371 = vst.msk [vmem:[#allocation2 + $0x20] sm:$0xff] %vm6346_vm9, %v6369_v16 }
0x3d3d   :  { %v6381_v17 = vpop.permute.xlu1 %6380 }
0x3d3e   :  { %6383 = vst.msk [vmem:[#allocation2 + $0x30] sm:$0xff] %vm6346_vm9, %v6381_v17 }
0x3d41   :  { %v14798_v9 = vld [vmem:[#allocation2 + $0x20] sm:$0xff]  ;;  %v6390_v5 = vpop.permute.xlu1 %6389 }
0x3d42   :  { %11255 = vmatprep.mubr.msk.f32.mxu0 %vm859_vm11, %v14798_v9 }
0x3d81   :  { %v6815_v28 = vpop.f32.mrb[102].mxu1 }
0x3d82   :  { %v6819_v50 = vadd.f32 %v6815_v28, %v6517_v27  ;;  %v11293_v48 = vpop.f32.mrb[103].mxu1 }
0x3d84   :  { %12631 = vtanh.f32 %v6819_v50  ;;  %v9531_v13 = vmul.f32 -1.442695, %v6819_v50 }
0x3d86   :  { %12633 = vpow2.f32 %v9531_v13 }
0x3d8e   :  { %v12632_v33 = vpop.eup %12631 }
0x3d8f   :  { %6829 = vrot.lane.b32.xlu0 %v12632_v33, %s13280_s18 }
0x3d90   :  { %v12634_v51 = vpop.eup %12633 }
0x3d91   :  { %v6823_v35 = vadd.f32 1.0, %v12634_v51 }
0x3d93   :  { %12635 = vrcp.f32 %v6823_v35 }
0x3d9d   :  { %v12636_v49 = vpop.eup %12635 }
0x3d9e   :  { %v6827_v63 = vmul.f32 %v12636_v49, %v14759_v54  ;;  %v6522_v54 = vadd.f32 %v11254_v55, %v14739_v42 }
0x3e01   :  { %v6830_v18 = vpop.permute.xlu0 %6829 }
0x3e02   :  { %v6832_v44 = vmul.f32 %v12636_v49, %v6830_v18 }
0x3e04   :  { %6834 = vrot.lane.b32.xlu0 %v6832_v44, %s13281_s9 }
0x3e76   :  { %v6835_v8 = vpop.permute.xlu0 %6834 }
0x3e77   :  { %v6837_v30 = vadd.f32 %v6835_v8, %v6827_v63 }
0x3e79   :  { %12637 = vtanh.f32 %v6837_v30 }
0x3e83   :  { %v12638_v40 = vpop.eup %12637 }
0x3e84   :  { %6840 = vrot.lane.b32.xlu0 %v12638_v40, %s13280_s18 }
0x3e88   :  { %6374 = vrot.lane.b32.xlu0 %v14646_v34, %s13280_s18  ;;  %v14818_v34 = vld [vmem:[#allocation2 + $0x30] sm:$0xff] }
0x3e8c   :  { %6385 = vrot.lane.b32.xlu0 %v5424_v19, %s13281_s9 }
0x3ef6   :  { %v6841_v56 = vpop.permute.xlu0 %6840 }
0x3ef7   :  { %v6843_v7 = vmul.f32 %v12636_v49, %v6841_v56 }
0x3ef9   :  { %6845 = vrot.lane.b32.xlu0 %v6843_v7, %s13281_s9 }
0x3efa   :  { %v6375_v10 = vpop.permute.xlu0 %6374 }
0x3efb   :  { %6377 = vst.msk [vmem:[#allocation2 + $0x28] sm:$0xff] %vm6346_vm9, %v6375_v10 }
0x3efe   :  { %v6386_v11 = vpop.permute.xlu0 %6385 }
0x3eff   :  { %6388 = vst.msk [vmem:[#allocation2 + $0x38] sm:$0xff] %vm446_vm0, %v6386_v11 }
0x3f00   :  { %6392 = vst.msk [vmem:[#allocation2 + $0x38] sm:$0xff] %vm6346_vm9, %v6390_v5 }
0x3f02   :  { %v14814_v4 = vld [vmem:[#allocation2 + $0x28] sm:$0xff] }
0x3f03   :  { %11256 = vmatmul.mubr.msk.f32.gmra.mrb[106].mxu0 %vm859_vm11, %v14814_v4 }
0x3f04   :  { %11258 = vmatprep.mubr.msk.f32.mxu0 %vm859_vm11, %v14818_v34 }
0x3f07   :  { %v14822_v20 = vld [vmem:[#allocation2 + $0x38] sm:$0xff] }
0x3f08   :  { %11259 = vmatmul.mubr.msk.f32.gmra.mrb[108].mxu0 %vm859_vm11, %v14822_v20 }
0x3f09   :  { %11302 = vmatprep.mubr.msk.f32.mxu0 %vm13279_vm8, %v13277_v29 }
0x3f6b   :  { %v6846_v23 = vpop.permute.xlu0 %6845 }
0x3f6c   :  { %8277 = vst.msk [vmem:[#allocation3 + $0x10] sm:$0xff] %vm446_vm0, %v6846_v23  ;;  %11303 = vmatmul.mubr.msk.f32.vlgmr.msra.gmra.mrb[110].mxu0 %vm446_vm0, %v6846_v23 }
0x3f6d   :  { %12112 = vmatpush3.bf16.msra.mxu0 %v14708_v47  ;;  %11324 = vmatprep.mubr.msk.f32.mxu0 %vm13279_vm8, %v13277_v29 }
0x3f6e   :  { %12113 = vmatprep.subr.bf16.mxu0 %v13278_v53 }
0x3f71   :  { %12115 = vmatpush3.bf16.msra.mxu0 %v14712_v0 }
0x3f72   :  { %12122 = vmatprep.subr.bf16.mxu0 %v13278_v53 }
0x3fd6   :  { %v14836_v43 = vpop.f32.mrb[106].mxu0 }
0x3fd7   :  { %v6526_v21 = vpop.f32.mrb[107].mxu0 }
0x3fd8   :  { %v6527_v55 = vadd.f32 %v14739_v42, %v6526_v21 }
0x3fdb   :  { %v14838_v31 = vpop.f32.mrb[108].mxu0 }
0x3fdc   :  { %v14840_v37 = vpop.f32.mrb[109].mxu0 }
0x403f   :  { %v6915_v58 = vpop.f32.mrb[110].mxu0 }
0x4040   :  { %v6919_v22 = vadd.f32 %v6915_v58, %v6522_v54  ;;  %v11304_v6 = vpop.f32.mrb[111].mxu0  ;;  %v7344_v58 = vld [vmem:[#allocation24] sm:$0xff] }
0x4042   :  { %12639 = vtanh.f32 %v6919_v22  ;;  %v9533_v46 = vmul.f32 -1.442695, %v6919_v22  ;;  %v7345_v22 = vld [vmem:[#allocation24 + $0x8] sm:$0xff] }
0x4043   :  { %v12128_v6 = vpack.c.bf16 %v7345_v22, %v7344_v58 }
0x4044   :  { %12641 = vpow2.f32 %v9533_v46 }
0x404c   :  { %v12640_v60 = vpop.eup %12639 }
0x404d   :  { %6929 = vrot.lane.b32.xlu1 %v12640_v60, %s13280_s18 }
0x404e   :  { %v12642_v61 = vpop.eup %12641 }
0x404f   :  { %v6923_v62 = vadd.f32 1.0, %v12642_v61 }
0x4051   :  { %12643 = vrcp.f32 %v6923_v62  ;;  %v7346_v62 = vld [vmem:[#allocation24 + $0x10] sm:$0xff] }
0x405b   :  { %v12644_v39 = vpop.eup %12643 }
0x405c   :  { %v6927_v38 = vmul.f32 %v12644_v39, %v6837_v30  ;;  %v6532_v30 = vadd.f32 %v14836_v43, %v14739_v42 }
0x40bf   :  { %v6930_v25 = vpop.permute.xlu1 %6929 }
0x40c0   :  { %v6932_v36 = vmul.f32 %v12644_v39, %v6930_v25 }
0x40c2   :  { %6934 = vrot.lane.b32.xlu0 %v6932_v36, %s13281_s9 }
0x4134   :  { %v6935_v14 = vpop.permute.xlu0 %6934 }
0x4135   :  { %v6937_v59 = vadd.f32 %v6935_v14, %v6927_v38  ;;  %v7348_v38 = vld [vmem:[#allocation24 + $0x20] sm:$0xff]  ;;  %v7349_v14 = vld [vmem:[#allocation24 + $0x28] sm:$0xff] }
0x4137   :  { %12645 = vtanh.f32 %v6937_v59 }
0x4141   :  { %v12646_v41 = vpop.eup %12645 }
0x4142   :  { %6940 = vrot.lane.b32.xlu1 %v12646_v41, %s13280_s18  ;;  %v7350_v41 = vld [vmem:[#allocation24 + $0x30] sm:$0xff] }
0x41b4   :  { %v6941_v52 = vpop.permute.xlu1 %6940 }
0x41b5   :  { %v6943_v45 = vmul.f32 %v12644_v39, %v6941_v52  ;;  %v7347_v39 = vld [vmem:[#allocation24 + $0x18] sm:$0xff] }
0x41b6   :  { %v12132_v25 = vpack.c.bf16 %v7347_v39, %v7346_v62  ;;  %v7351_v52 = vld [vmem:[#allocation24 + $0x38] sm:$0xff] }
0x41b7   :  { %6945 = vrot.lane.b32.xlu0 %v6943_v45, %s13281_s9  ;;  %v12140_v45 = vpack.c.bf16 %v7351_v52, %v7350_v41 }
0x4229   :  { %v6946_v3 = vpop.permute.xlu0 %6945 }
0x422a   :  { %8283 = vst.msk [vmem:[#allocation3 + $0x18] sm:$0xff] %vm446_vm0, %v6946_v3  ;;  %11314 = vmatmul.mubr.msk.f32.vlgmr.msra.gmra.mrb[104].mxu1 %vm446_vm0, %v6946_v3 }
0x422b   :  { %12118 = vmatpush3.bf16.msra.mxu1 %v14708_v47  ;;  %11335 = vmatprep.mubr.msk.f32.mxu1 %vm13279_vm8, %v13277_v29 }
0x422c   :  { %12119 = vmatprep.subr.bf16.mxu1 %v13278_v53 }
0x422f   :  { %12121 = vmatpush3.bf16.msra.mxu1 %v14712_v0 }
0x4230   :  { %12129 = vmatprep.subr.bf16.mxu1 %v12128_v6 }
0x42fd   :  { %v7015_v1 = vpop.f32.mrb[104].mxu1 }
0x42fe   :  { %v7019_v32 = vadd.f32 %v7015_v1, %v6527_v55  ;;  %v11315_v16 = vpop.f32.mrb[105].mxu1 }
0x4300   :  { %12647 = vtanh.f32 %v7019_v32  ;;  %v9535_v27 = vmul.f32 -1.442695, %v7019_v32 }
0x4302   :  { %12649 = vpow2.f32 %v9535_v27 }
0x430a   :  { %v12648_v17 = vpop.eup %12647 }
0x430b   :  { %7029 = vrot.lane.b32.xlu1 %v12648_v17, %s13280_s18 }
0x430c   :  { %v12650_v28 = vpop.eup %12649 }
0x430d   :  { %v7023_v50 = vadd.f32 1.0, %v12650_v28 }
0x430f   :  { %12651 = vrcp.f32 %v7023_v50 }
0x4319   :  { %v12652_v48 = vpop.eup %12651 }
0x431a   :  { %v7027_v51 = vmul.f32 %v12652_v48, %v6937_v59  ;;  %v12136_v59 = vpack.c.bf16 %v7349_v14, %v7348_v38 }
0x437d   :  { %v7030_v33 = vpop.permute.xlu1 %7029 }
0x437e   :  { %v7032_v13 = vmul.f32 %v12652_v48, %v7030_v33 }
0x4380   :  { %7034 = vrot.lane.b32.xlu0 %v7032_v13, %s13281_s9 }
0x43f2   :  { %v7035_v35 = vpop.permute.xlu0 %7034 }
0x43f3   :  { %v7037_v49 = vadd.f32 %v7035_v35, %v7027_v51 }
0x43f5   :  { %12653 = vtanh.f32 %v7037_v49 }
0x43ff   :  { %v12654_v18 = vpop.eup %12653 }
0x4400   :  { %7040 = vrot.lane.b32.xlu1 %v12654_v18, %s13280_s18 }
0x4472   :  { %v7041_v44 = vpop.permute.xlu1 %7040 }
0x4473   :  { %v7043_v63 = vmul.f32 %v12652_v48, %v7041_v44 }
0x4475   :  { %7045 = vrot.lane.b32.xlu0 %v7043_v63, %s13281_s9 }
0x44e7   :  { %v7046_v8 = vpop.permute.xlu0 %7045 }
0x44e8   :  { %8289 = vst.msk [vmem:[#allocation3 + $0x20] sm:$0xff] %vm446_vm0, %v7046_v8  ;;  %11325 = vmatmul.mubr.msk.f32.vlgmr.msra.gmra.mrb[112].mxu0 %vm446_vm0, %v7046_v8 }
0x44e9   :  { %12124 = vmatpush3.bf16.msra.mxu0 %v14708_v47  ;;  %11346 = vmatprep.mubr.msk.f32.mxu0 %vm13279_vm8, %v13277_v29 }
0x44ea   :  { %12125 = vmatprep.subr.bf16.mxu0 %v13278_v53 }
0x44ed   :  { %12127 = vmatpush3.bf16.msra.mxu0 %v14712_v0 }
0x44ee   :  { %12144 = vmatprep.subr.bf16.mxu0 %v13278_v53 }
0x45bb   :  { %v7115_v40 = vpop.f32.mrb[112].mxu0 }
0x45bc   :  { %v7119_v19 = vadd.f32 %v7115_v40, %v6532_v30  ;;  %v11326_v56 = vpop.f32.mrb[113].mxu0 }
0x45bd   :  { %v7464_v56 = vld [vmem:[#allocation25] sm:$0xff] }
0x45be   :  { %12655 = vtanh.f32 %v7119_v19  ;;  %v9537_v47 = vmul.f32 -1.442695, %v7119_v19 }
0x45c0   :  { %12657 = vpow2.f32 %v9537_v47 }
0x45c8   :  { %v12656_v7 = vpop.eup %12655 }
0x45c9   :  { %7129 = vrot.lane.b32.xlu1 %v12656_v7, %s13280_s18  ;;  %v7465_v7 = vld [vmem:[#allocation25 + $0x8] sm:$0xff] }
0x45ca   :  { %v12658_v10 = vpop.eup %12657  ;;  %v14920_v47 = vpack.c.bf16 %v7465_v7, %v7464_v56 }
0x45cb   :  { %v7123_v11 = vadd.f32 1.0, %v12658_v10  ;;  %v7466_v10 = vld [vmem:[#allocation25 + $0x10] sm:$0xff] }
0x45cd   :  { %12659 = vrcp.f32 %v7123_v11  ;;  %v7467_v11 = vld [vmem:[#allocation25 + $0x18] sm:$0xff] }
0x45d7   :  { %v12660_v5 = vpop.eup %12659 }
0x45d8   :  { %v7127_v21 = vmul.f32 %v12660_v5, %v7037_v49 }
0x463b   :  { %v7130_v23 = vpop.permute.xlu1 %7129 }
0x463c   :  { %v7132_v0 = vmul.f32 %v12660_v5, %v7130_v23 }
0x463e   :  { %7134 = vrot.lane.b32.xlu0 %v7132_v0, %s13281_s9 }
0x46b0   :  { %v7135_v54 = vpop.permute.xlu0 %7134 }
0x46b1   :  { %v14871_v43 = vadd.f32 %v7135_v54, %v7127_v21  ;;  %v6542_v54 = vadd.f32 %v14838_v31, %v14739_v42 }
0x46b3   :  { %12661 = vtanh.f32 %v14871_v43 }
0x46bd   :  { %v12662_v60 = vpop.eup %12661 }
0x46be   :  { %7140 = vrot.lane.b32.xlu1 %v12662_v60, %s13280_s18 }
0x4730   :  { %v7141_v46 = vpop.permute.xlu1 %7140 }
0x4731   :  { %v7143_v61 = vmul.f32 %v12660_v5, %v7141_v46  ;;  %v14924_v5 = vpack.c.bf16 %v7467_v11, %v7466_v10 }
0x4733   :  { %7145 = vrot.lane.b32.xlu0 %v7143_v61, %s13281_s9 }
0x47a5   :  { %v7146_v36 = vpop.permute.xlu0 %7145 }
0x47a6   :  { %8295 = vst.msk [vmem:[#allocation3 + $0x28] sm:$0xff] %vm446_vm0, %v7146_v36  ;;  %11336 = vmatmul.mubr.msk.f32.vlgmr.msra.gmra.mrb[106].mxu1 %vm446_vm0, %v7146_v36 }
0x47a7   :  { %12131 = vmatpush3.bf16.msra.mxu1 %v12128_v6  ;;  %11365 = vmatprep.mubr.msk.f32.mxu1 %vm859_vm11, %v14727_v15  ;;  %v6537_v15 = vadd.f32 %v14739_v42, %v14840_v37 }
0x47a8   :  { %12133 = vmatprep.subr.bf16.mxu1 %v12132_v25 }
0x47ab   :  { %12135 = vmatpush3.bf16.msra.mxu1 %v12132_v25 }
0x47ac   :  { %12137 = vmatprep.subr.bf16.mxu1 %v12136_v59 }
0x47af   :  { %12139 = vmatpush3.bf16.msra.mxu1 %v12136_v59 }
0x47b0   :  { %12141 = vmatprep.subr.bf16.mxu1 %v12140_v45 }
0x47b3   :  { %12143 = vmatpush3.bf16.msra.mxu1 %v12140_v45 }
0x47b4   :  { %12162 = vmatprep.subr.bf16.mxu1 %v13278_v53 }
0x47b6   :  { %11366 = vmatmul.mubr.msk.f32.vlgmr.msra.gmra.mrb[108].mxu1 %vm859_vm11, %v14731_v57 }
0x47b7   :  { %11368 = vmatprep.mubr.msk.f32.mxu1 %vm859_vm11, %v14764_v12  ;;  %12164 = vmatpush3.bf16.msra.mxu1 %v14920_v47 }
0x47b8   :  { %12165 = vmatprep.subr.bf16.mxu1 %v13278_v53 }
0x47ba   :  { %11369 = vmatmul.mubr.msk.f32.gmra.mrb[110].mxu1 %vm859_vm11, %v14776_v24 }
0x47bb   :  { %11371 = vmatprep.mubr.msk.f32.mxu1 %vm859_vm11, %v14798_v9  ;;  %12167 = vmatpush3.bf16.msra.mxu1 %v14924_v5 }
0x47bc   :  { %12174 = vmatprep.subr.bf16.mxu1 %v13278_v53 }
0x47be   :  { %11372 = vmatmul.mubr.msk.f32.gmra.mrb[112].mxu1 %vm859_vm11, %v14814_v4  ;;  %v9542_v4 = vld [vmem:[#allocation27] ss:$0 sm:$0xff] }
0x47bf   :  { %11374 = vmatprep.mubr.msk.f32.mxu1 %vm859_vm11, %v14818_v34 }
0x47c2   :  { %11375 = vmatmul.mubr.msk.f32.gmra.mrb[114].mxu1 %vm859_vm11, %v14822_v20 }
0x47c3   :  { %11418 = vmatprep.mubr.msk.f32.mxu1 %vm13279_vm8, %v13277_v29 }
0x4879   :  { %v7215_v57 = vpop.f32.mrb[106].mxu1 }
0x487a   :  { %v7219_v12 = vadd.f32 %v7215_v57, %v6537_v15  ;;  %v11337_v24 = vpop.f32.mrb[107].mxu1 }
0x487c   :  { %12663 = vtanh.f32 %v7219_v12  ;;  %v9539_v51 = vmul.f32 -1.442695, %v7219_v12 }
0x487e   :  { %12665 = vpow2.f32 %v9539_v51 }
0x4886   :  { %v12664_v9 = vpop.eup %12663 }
0x4887   :  { %7229 = vrot.lane.b32.xlu1 %v12664_v9, %s13280_s18 }
0x4888   :  { %v12666_v35 = vpop.eup %12665 }
0x4889   :  { %v11367_v3 = vpop.f32.mrb[108].mxu1  ;;  %v7223_v49 = vadd.f32 1.0, %v12666_v35 }
0x488a   :  { %v14900_v55 = vadd.f32 %v11367_v3, %v9542_v4  ;;  %v7425_v34 = vpop.f32.mrb[109].mxu1 }
0x488b   :  { %v14902_v1 = vadd.f32 %v9542_v4, %v7425_v34  ;;  %12667 = vrcp.f32 %v7223_v49 }
0x488d   :  { %v11370_v20 = vpop.f32.mrb[110].mxu1 }
0x488e   :  { %v14904_v32 = vadd.f32 %v11370_v20, %v9542_v4  ;;  %v7435_v16 = vpop.f32.mrb[111].mxu1 }
0x488f   :  { %v14906_v17 = vadd.f32 %v9542_v4, %v7435_v16 }
0x4891   :  { %v11373_v37 = vpop.f32.mrb[112].mxu1 }
0x4892   :  { %v14908_v27 = vadd.f32 %v11373_v37, %v9542_v4  ;;  %v7445_v28 = vpop.f32.mrb[113].mxu1 }
0x4893   :  { %v14910_v50 = vadd.f32 %v9542_v4, %v7445_v28 }
0x4895   :  { %v11376_v48 = vpop.f32.mrb[114].mxu1  ;;  %v12668_v18 = vpop.eup %12667 }
0x4896   :  { %v7455_v33 = vpop.f32.mrb[115].mxu1  ;;  %v7227_v8 = vmul.f32 %v12668_v18, %v14871_v43  ;;  %v7461_v6 = vadd.f32 %v11376_v48, %v9542_v4 }
0x4897   :  { %v14912_v13 = vadd.f32 %v9542_v4, %v7455_v33 }
0x48f9   :  { %v7230_v44 = vpop.permute.xlu1 %7229 }
0x48fa   :  { %v7232_v63 = vmul.f32 %v12668_v18, %v7230_v44 }
0x48fc   :  { %7234 = vrot.lane.b32.xlu0 %v7232_v63, %s13281_s9 }
0x496e   :  { %v7235_v30 = vpop.permute.xlu0 %7234 }
0x496f   :  { %v14916_v40 = vadd.f32 %v7235_v30, %v7227_v8 }
0x4971   :  { %12669 = vtanh.f32 %v14916_v40 }
0x497b   :  { %v12670_v19 = vpop.eup %12669 }
0x497c   :  { %7240 = vrot.lane.b32.xlu1 %v12670_v19, %s13280_s18 }
0x49ee   :  { %v7241_v23 = vpop.permute.xlu1 %7240 }
0x49ef   :  { %v7243_v0 = vmul.f32 %v12668_v18, %v7241_v23 }
0x49f1   :  { %7245 = vrot.lane.b32.xlu0 %v7243_v0, %s13281_s9 }
0x4a63   :  { %v7246_v21 = vpop.permute.xlu0 %7245 }
0x4a64   :  { %8301 = vst.msk [vmem:[#allocation3 + $0x30] sm:$0xff] %vm446_vm0, %v7246_v21  ;;  %11347 = vmatmul.mubr.msk.f32.vlgmr.msra.gmra.mrb[114].mxu0 %vm446_vm0, %v7246_v21 }
0x4a65   :  { %12146 = vmatpush3.bf16.msra.mxu0 %v14920_v47  ;;  %11385 = vmatprep.mubr.msk.f32.mxu0 %vm13279_vm8, %v13277_v29 }
0x4a66   :  { %12147 = vmatprep.subr.bf16.mxu0 %v13278_v53 }
0x4a69   :  { %12149 = vmatpush3.bf16.msra.mxu0 %v14924_v5 }
0x4a6a   :  { %12150 = vmatprep.subr.bf16.mxu0 %v13278_v53 }
0x4a6c   :  { %11386 = vmatmul.mubr.f32.vlgmr.msra.gmra.mrb[116].mxu0 %v13277_v29 }
0x4a6d   :  { %12152 = vmatpush3.bf16.msra.mxu0 %v14920_v47  ;;  %11396 = vmatprep.mubr.msk.f32.mxu0 %vm13279_vm8, %v13277_v29 }
0x4a6e   :  { %12153 = vmatprep.subr.bf16.mxu0 %v13278_v53 }
0x4a71   :  { %12155 = vmatpush3.bf16.msra.mxu0 %v14924_v5 }
0x4a72   :  { %12156 = vmatprep.subr.bf16.mxu0 %v13278_v53 }
0x4b37   :  { %v7315_v43 = vpop.f32.mrb[114].mxu0 }
0x4b38   :  { %v14946_v58 = vadd.f32 %v7315_v43, %v6542_v54  ;;  %v11348_v22 = vpop.f32.mrb[115].mxu0 }
0x4b3f   :  { %v7534_v60 = vpop.f32.mrb[116].mxu0 }
0x4b40   :  { %v7538_v46 = vadd.f32 %v7534_v60, %v7461_v6  ;;  %v11387_v61 = vpop.f32.mrb[117].mxu0 }
0x4b42   :  { %12671 = vtanh.f32 %v7538_v46  ;;  %v9551_v39 = vmul.f32 -1.442695, %v7538_v46 }
0x4b44   :  { %12673 = vpow2.f32 %v9551_v39 }
0x4b4c   :  { %v12672_v62 = vpop.eup %12671 }
0x4b4d   :  { %7548 = vrot.lane.b32.xlu1 %v12672_v62, %s13280_s18 }
0x4b4e   :  { %v12674_v25 = vpop.eup %12673 }
0x4b4f   :  { %v7542_v36 = vadd.f32 1.0, %v12674_v25 }
0x4b51   :  { %12675 = vrcp.f32 %v7542_v36 }
0x4b5b   :  { %v12676_v38 = vpop.eup %12675 }
0x4b5c   :  { %v7546_v31 = vmul.f32 0.0, %v12676_v38 }
0x4bbf   :  { %v7549_v14 = vpop.permute.xlu1 %7548 }
0x4bc0   :  { %v7551_v42 = vmul.f32 %v12676_v38, %v7549_v14 }
0x4bc2   :  { %7553 = vrot.lane.b32.xlu0 %v7551_v42, %s13281_s9 }
0x4c34   :  { %v7554_v59 = vpop.permute.xlu0 %7553 }
0x4c35   :  { %v7556_v41 = vadd.f32 %v7554_v59, %v7546_v31 }
0x4c37   :  { %12677 = vtanh.f32 %v7556_v41 }
0x4c41   :  { %v12678_v52 = vpop.eup %12677 }
0x4c42   :  { %7559 = vrot.lane.b32.xlu1 %v12678_v52, %s13280_s18 }
0x4cb4   :  { %v7560_v45 = vpop.permute.xlu1 %7559 }
0x4cb5   :  { %v14951_v15 = vmul.f32 %v12676_v38, %v7560_v45 }
0x4cb7   :  { %7564 = vrot.lane.b32.xlu0 %v14951_v15, %s13281_s9 }
0x4d29   :  { %v7565_v57 = vpop.permute.xlu0 %7564 }
0x4d2a   :  { %11397 = vmatmul.mubr.msk.f32.vlgmr.msra.gmra.mrb[118].mxu0 %vm446_vm0, %v7565_v57 }
0x4d2b   :  { %12158 = vmatpush3.bf16.msra.mxu0 %v14920_v47  ;;  %11407 = vmatprep.mubr.msk.f32.mxu0 %vm13279_vm8, %v13277_v29 }
0x4d2c   :  { %12159 = vmatprep.subr.bf16.mxu0 %v13278_v53 }
0x4d2f   :  { %12161 = vmatpush3.bf16.msra.mxu0 %v14924_v5 }
0x4d30   :  { %12168 = vmatprep.subr.bf16.mxu0 %v13278_v53 }
0x4dfd   :  { %v7634_v12 = vpop.f32.mrb[118].mxu0 }
0x4dfe   :  { %v7638_v24 = vadd.f32 %v7634_v12, %v14912_v13  ;;  %v11398_v9 = vpop.f32.mrb[119].mxu0 }
0x4e00   :  { %12679 = vtanh.f32 %v7638_v24  ;;  %v9553_v3 = vmul.f32 -1.442695, %v7638_v24 }
0x4e02   :  { %12681 = vpow2.f32 %v9553_v3 }
0x4e0a   :  { %v12680_v4 = vpop.eup %12679 }
0x4e0b   :  { %7648 = vrot.lane.b32.xlu1 %v12680_v4, %s13280_s18 }
0x4e0c   :  { %v12682_v34 = vpop.eup %12681 }
0x4e0d   :  { %v7642_v20 = vadd.f32 1.0, %v12682_v34 }
0x4e0f   :  { %12683 = vrcp.f32 %v7642_v20 }
0x4e19   :  { %v12684_v16 = vpop.eup %12683 }
0x4e1a   :  { %v7646_v48 = vmul.f32 %v12684_v16, %v7556_v41 }
0x4e7d   :  { %v7649_v37 = vpop.permute.xlu1 %7648 }
0x4e7e   :  { %v7651_v28 = vmul.f32 %v12684_v16, %v7649_v37 }
0x4e80   :  { %7653 = vrot.lane.b32.xlu0 %v7651_v28, %s13281_s9 }
0x4ef2   :  { %v7654_v33 = vpop.permute.xlu0 %7653 }
0x4ef3   :  { %v7656_v51 = vadd.f32 %v7654_v33, %v7646_v48 }
0x4ef5   :  { %12685 = vtanh.f32 %v7656_v51 }
0x4eff   :  { %v12686_v13 = vpop.eup %12685 }
0x4f00   :  { %7659 = vrot.lane.b32.xlu1 %v12686_v13, %s13280_s18 }
0x4f72   :  { %v7660_v35 = vpop.permute.xlu1 %7659 }
0x4f73   :  { %v14966_v49 = vmul.f32 %v12684_v16, %v7660_v35 }
0x4f75   :  { %7664 = vrot.lane.b32.xlu0 %v14966_v49, %s13281_s9 }
0x4fe7   :  { %v7665_v18 = vpop.permute.xlu0 %7664 }
0x4fe8   :  { %11408 = vmatmul.mubr.msk.f32.vlgmr.msra.gmra.mrb[120].mxu0 %vm446_vm0, %v7665_v18 }
0x4fe9   :  { %12170 = vmatpush3.bf16.msra.mxu0 %v14920_v47  ;;  %11429 = vmatprep.mubr.msk.f32.mxu0 %vm13279_vm8, %v13277_v29 }
0x4fea   :  { %12171 = vmatprep.subr.bf16.mxu0 %v13278_v53 }
0x4fed   :  { %12173 = vmatpush3.bf16.msra.mxu0 %v14924_v5 }
0x4fee   :  { %12180 = vmatprep.subr.bf16.mxu0 %v13278_v53 }
0x50bb   :  { %v7734_v44 = vpop.f32.mrb[120].mxu0 }
0x50bc   :  { %v7738_v63 = vadd.f32 %v7734_v44, %v14908_v27  ;;  %v11409_v8 = vpop.f32.mrb[121].mxu0 }
0x50be   :  { %12687 = vtanh.f32 %v7738_v63  ;;  %v9555_v19 = vmul.f32 -1.442695, %v7738_v63 }
0x50c0   :  { %12689 = vpow2.f32 %v9555_v19 }
0x50c8   :  { %v12688_v30 = vpop.eup %12687 }
0x50c9   :  { %7748 = vrot.lane.b32.xlu1 %v12688_v30, %s13280_s18 }
0x50ca   :  { %v12690_v56 = vpop.eup %12689 }
0x50cb   :  { %v7742_v7 = vadd.f32 1.0, %v12690_v56 }
0x50cd   :  { %12691 = vrcp.f32 %v7742_v7 }
0x50d7   :  { %v12692_v10 = vpop.eup %12691 }
0x50d8   :  { %v7746_v0 = vmul.f32 %v12692_v10, %v7656_v51 }
0x513b   :  { %v7749_v11 = vpop.permute.xlu1 %7748 }
0x513c   :  { %v7751_v23 = vmul.f32 %v12692_v10, %v7749_v11 }
0x513e   :  { %7753 = vrot.lane.b32.xlu0 %v7751_v23, %s13281_s9 }
0x51b0   :  { %v7754_v21 = vpop.permute.xlu0 %7753 }
0x51b1   :  { %v7756_v54 = vadd.f32 %v7754_v21, %v7746_v0 }
0x51b3   :  { %12693 = vtanh.f32 %v7756_v54 }
0x51bd   :  { %v12694_v27 = vpop.eup %12693 }
0x51be   :  { %7759 = vrot.lane.b32.xlu1 %v12694_v27, %s13280_s18 }
0x5230   :  { %v7760_v43 = vpop.permute.xlu1 %7759 }
0x5231   :  { %v14981_v22 = vmul.f32 %v12692_v10, %v7760_v43 }
0x5233   :  { %7764 = vrot.lane.b32.xlu0 %v14981_v22, %s13281_s9 }
0x52a5   :  { %v7765_v6 = vpop.permute.xlu0 %7764 }
0x52a6   :  { %11419 = vmatmul.mubr.msk.f32.vlgmr.msra.gmra.mrb[116].mxu1 %vm446_vm0, %v7765_v6 }
0x52a7   :  { %12176 = vmatpush3.bf16.msra.mxu1 %v14920_v47  ;;  %11440 = vmatprep.mubr.msk.f32.mxu1 %vm13279_vm8, %v13277_v29 }
0x52a8   :  { %12177 = vmatprep.subr.bf16.mxu1 %v13278_v53 }
0x52ab   :  { %12179 = vmatpush3.bf16.msra.mxu1 %v14924_v5 }
0x52ac   :  { %12186 = vmatprep.subr.bf16.mxu1 %v13278_v53 }
0x5379   :  { %v7834_v60 = vpop.f32.mrb[116].mxu1 }
0x537a   :  { %v7838_v46 = vadd.f32 %v7834_v60, %v14910_v50  ;;  %v11420_v61 = vpop.f32.mrb[117].mxu1 }
0x537c   :  { %12695 = vtanh.f32 %v7838_v46  ;;  %v9557_v39 = vmul.f32 -1.442695, %v7838_v46 }
0x537e   :  { %12697 = vpow2.f32 %v9557_v39 }
0x5386   :  { %v12696_v62 = vpop.eup %12695 }
0x5387   :  { %7848 = vrot.lane.b32.xlu1 %v12696_v62, %s13280_s18 }
0x5388   :  { %v12698_v25 = vpop.eup %12697 }
0x5389   :  { %v7842_v36 = vadd.f32 1.0, %v12698_v25 }
0x538b   :  { %12699 = vrcp.f32 %v7842_v36 }
0x5395   :  { %v12700_v38 = vpop.eup %12699 }
0x5396   :  { %v7846_v31 = vmul.f32 %v12700_v38, %v7756_v54 }
0x53f9   :  { %v7849_v14 = vpop.permute.xlu1 %7848 }
0x53fa   :  { %v7851_v42 = vmul.f32 %v12700_v38, %v7849_v14 }
0x53fc   :  { %7853 = vrot.lane.b32.xlu0 %v7851_v42, %s13281_s9 }
0x546e   :  { %v7854_v59 = vpop.permute.xlu0 %7853 }
0x546f   :  { %v7856_v41 = vadd.f32 %v7854_v59, %v7846_v31 }
0x5471   :  { %12701 = vtanh.f32 %v7856_v41 }
0x547b   :  { %v12702_v50 = vpop.eup %12701 }
0x547c   :  { %7859 = vrot.lane.b32.xlu1 %v12702_v50, %s13280_s18 }
0x54ee   :  { %v7860_v52 = vpop.permute.xlu1 %7859 }
0x54ef   :  { %v14996_v45 = vmul.f32 %v12700_v38, %v7860_v52  ;;  %v9541_v52 = vmul.f32 -1.442695, %v14946_v58 }
0x54f1   :  { %7864 = vrot.lane.b32.xlu0 %v14996_v45, %s13281_s9 }
0x5563   :  { %v7865_v57 = vpop.permute.xlu0 %7864 }
0x5564   :  { %11430 = vmatmul.mubr.msk.f32.vlgmr.msra.gmra.mrb[122].mxu0 %vm446_vm0, %v7865_v57 }
0x5565   :  { %12182 = vmatpush3.bf16.msra.mxu0 %v14920_v47  ;;  %11451 = vmatprep.mubr.msk.f32.mxu0 %vm13279_vm8, %v13277_v29 }
0x5566   :  { %12183 = vmatprep.subr.bf16.mxu0 %v13278_v53 }
0x5569   :  { %12185 = vmatpush3.bf16.msra.mxu0 %v14924_v5 }
0x5637   :  { %v7934_v12 = vpop.f32.mrb[122].mxu0 }
0x5638   :  { %v7938_v24 = vadd.f32 %v7934_v12, %v14904_v32  ;;  %v11431_v9 = vpop.f32.mrb[123].mxu0 }
0x563a   :  { %12703 = vtanh.f32 %v7938_v24  ;;  %v9559_v3 = vmul.f32 -1.442695, %v7938_v24 }
0x563c   :  { %12705 = vpow2.f32 %v9559_v3 }
0x5644   :  { %v12704_v4 = vpop.eup %12703 }
0x5645   :  { %7948 = vrot.lane.b32.xlu1 %v12704_v4, %s13280_s18 }
0x5646   :  { %v12706_v34 = vpop.eup %12705 }
0x5647   :  { %v7942_v20 = vadd.f32 1.0, %v12706_v34 }
0x5649   :  { %12707 = vrcp.f32 %v7942_v20 }
0x5653   :  { %v12708_v16 = vpop.eup %12707 }
0x5654   :  { %v7946_v48 = vmul.f32 %v12708_v16, %v7856_v41 }
0x56b7   :  { %v7949_v37 = vpop.permute.xlu1 %7948 }
0x56b8   :  { %v7951_v28 = vmul.f32 %v12708_v16, %v7949_v37 }
0x56ba   :  { %7953 = vrot.lane.b32.xlu0 %v7951_v28, %s13281_s9 }
0x572c   :  { %v7954_v33 = vpop.permute.xlu0 %7953 }
0x572d   :  { %v7956_v51 = vadd.f32 %v7954_v33, %v7946_v48 }
0x572f   :  { %12709 = vtanh.f32 %v7956_v51 }
0x5739   :  { %v12710_v32 = vpop.eup %12709 }
0x573a   :  { %7959 = vrot.lane.b32.xlu1 %v12710_v32, %s13280_s18 }
0x57ac   :  { %v7960_v13 = vpop.permute.xlu1 %7959 }
0x57ad   :  { %v15010_v35 = vmul.f32 %v12708_v16, %v7960_v13 }
0x57af   :  { %7964 = vrot.lane.b32.xlu0 %v15010_v35, %s13281_s9 }
0x5821   :  { %v7965_v18 = vpop.permute.xlu0 %7964 }
0x5822   :  { %11441 = vmatmul.mubr.msk.f32.vlgmr.msra.gmra.mrb[118].mxu1 %vm446_vm0, %v7965_v18 }
0x5823   :  { %12188 = vmatpush3.bf16.msra.mxu1 %v14920_v47  ;;  %11462 = vmatprep.mubr.msk.f32.mxu1 %vm13279_vm8, %v13277_v29 }
0x5824   :  { %12189 = vmatprep.subr.bf16.mxu1 %v13278_v53 }
0x5827   :  { %12191 = vmatpush3.bf16.msra.mxu1 %v14924_v5 }
0x58f5   :  { %v8034_v44 = vpop.f32.mrb[118].mxu1 }
0x58f6   :  { %v8038_v63 = vadd.f32 %v8034_v44, %v14906_v17  ;;  %v11442_v8 = vpop.f32.mrb[119].mxu1 }
0x58f8   :  { %12711 = vtanh.f32 %v8038_v63  ;;  %v9561_v19 = vmul.f32 -1.442695, %v8038_v63 }
0x58fa   :  { %12713 = vpow2.f32 %v9561_v19 }
0x5902   :  { %v12712_v30 = vpop.eup %12711 }
0x5903   :  { %8048 = vrot.lane.b32.xlu1 %v12712_v30, %s13280_s18 }
0x5904   :  { %v12714_v56 = vpop.eup %12713 }
0x5905   :  { %v8042_v7 = vadd.f32 1.0, %v12714_v56 }
0x5907   :  { %12715 = vrcp.f32 %v8042_v7 }
0x5911   :  { %v12716_v47 = vpop.eup %12715 }
0x5912   :  { %v8046_v23 = vmul.f32 %v12716_v47, %v7956_v51 }
0x5975   :  { %v8049_v10 = vpop.permute.xlu1 %8048 }
0x5976   :  { %v8051_v11 = vmul.f32 %v12716_v47, %v8049_v10  ;;  %v8323_v10 = vld [vmem:[#allocation28] sm:$0xff] }
0x5978   :  { %8053 = vrot.lane.b32.xlu0 %v8051_v11, %s13281_s9  ;;  %v8324_v11 = vld [vmem:[#allocation28 + $0x8] sm:$0xff] }
0x59ea   :  { %v8054_v5 = vpop.permute.xlu0 %8053 }
0x59eb   :  { %v8056_v0 = vadd.f32 %v8054_v5, %v8046_v23  ;;  %v8325_v23 = vld [vmem:[#allocation28 + $0x10] sm:$0xff]  ;;  %v12192_v5 = vpack.c.bf16 %v8324_v11, %v8323_v10 }
0x59ed   :  { %12717 = vtanh.f32 %v8056_v0  ;;  %12193 = vmatprep.subr.bf16.mxu0 %v12192_v5 }
0x59f7   :  { %v12718_v17 = vpop.eup %12717 }
0x59f8   :  { %8059 = vrot.lane.b32.xlu1 %v12718_v17, %s13280_s18 }
0x5a6a   :  { %v8060_v21 = vpop.permute.xlu1 %8059 }
0x5a6b   :  { %v15024_v54 = vmul.f32 %v12716_v47, %v8060_v21  ;;  %v8327_v21 = vld [vmem:[#allocation28 + $0x20] sm:$0xff] }
0x5a6d   :  { %8064 = vrot.lane.b32.xlu0 %v15024_v54, %s13281_s9 }
0x5adf   :  { %v8065_v27 = vpop.permute.xlu0 %8064 }
0x5ae0   :  { %11452 = vmatmul.mubr.msk.f32.vlgmr.msra.gmra.mrb[124].mxu0 %vm446_vm0, %v8065_v27  ;;  %v8328_v27 = vld [vmem:[#allocation28 + $0x28] sm:$0xff] }
0x5ae1   :  { %12195 = vmatpush3.bf16.msra.mxu0 %v12192_v5 }
0x5bb3   :  { %v8134_v43 = vpop.f32.mrb[124].mxu0 }
0x5bb4   :  { %v8138_v6 = vadd.f32 %v8134_v43, %v14900_v55  ;;  %v11453_v60 = vpop.f32.mrb[125].mxu0  ;;  %v12200_v43 = vpack.c.bf16 %v8328_v27, %v8327_v21 }
0x5bb5   :  { %v8330_v60 = vld [vmem:[#allocation28 + $0x38] sm:$0xff] }
0x5bb6   :  { %12719 = vtanh.f32 %v8138_v6  ;;  %v9563_v61 = vmul.f32 -1.442695, %v8138_v6  ;;  %v8329_v6 = vld [vmem:[#allocation28 + $0x30] sm:$0xff] }
0x5bb8   :  { %12721 = vpow2.f32 %v9563_v61 }
0x5bc0   :  { %v12720_v46 = vpop.eup %12719 }
0x5bc1   :  { %8148 = vrot.lane.b32.xlu1 %v12720_v46, %s13280_s18  ;;  %v12204_v46 = vpack.c.bf16 %v8330_v60, %v8329_v6 }
0x5bc2   :  { %v12722_v62 = vpop.eup %12721 }
0x5bc3   :  { %v8142_v39 = vadd.f32 1.0, %v12722_v62 }
0x5bc5   :  { %12723 = vrcp.f32 %v8142_v39 }
0x5bcf   :  { %v12724_v25 = vpop.eup %12723 }
0x5bd0   :  { %v8146_v14 = vmul.f32 %v12724_v25, %v8056_v0  ;;  %v8326_v0 = vld [vmem:[#allocation28 + $0x18] sm:$0xff] }
0x5bd1   :  { %v12196_v17 = vpack.c.bf16 %v8326_v0, %v8325_v23 }
0x5bd3   :  { %12197 = vmatprep.subr.bf16.mxu0 %v12196_v17 }
0x5bd4   :  { %12199 = vmatpush3.bf16.msra.mxu0 %v12196_v17 }
0x5bd5   :  { %12201 = vmatprep.subr.bf16.mxu0 %v12200_v43 }
0x5bd8   :  { %12203 = vmatpush3.bf16.msra.mxu0 %v12200_v43 }
0x5bd9   :  { %12205 = vmatprep.subr.bf16.mxu0 %v12204_v46 }
0x5bdc   :  { %12207 = vmatpush3.bf16.msra.mxu0 %v12204_v46 }
0x5bdd   :  { %12224 = vmatprep.subr.bf16.mxu0 %v13278_v53 }
0x5c33   :  { %v8149_v36 = vpop.permute.xlu1 %8148 }
0x5c34   :  { %v8151_v38 = vmul.f32 %v12724_v25, %v8149_v36 }
0x5c36   :  { %8153 = vrot.lane.b32.xlu0 %v8151_v38, %s13281_s9 }
0x5ca8   :  { %v8154_v42 = vpop.permute.xlu0 %8153 }
0x5ca9   :  { %v8156_v31 = vadd.f32 %v8154_v42, %v8146_v14 }
0x5cab   :  { %12725 = vtanh.f32 %v8156_v31 }
0x5cac   :  { %12727 = vtanh.f32 %v14946_v58 }
0x5cad   :  { %12729 = vpow2.f32 %v9541_v52 }
0x5cb5   :  { %v12726_v55 = vpop.eup %12725 }
0x5cb6   :  { %8159 = vrot.lane.b32.xlu1 %v12726_v55, %s13280_s18  ;;  %v12728_v50 = vpop.eup %12727 }
0x5cb7   :  { %v12730_v57 = vpop.eup %12729 }
0x5cb8   :  { %v7323_v12 = vadd.f32 1.0, %v12730_v57  ;;  %v8477_v57 = vld [vmem:[%s15244_s22 + $0x10] sm:$0xff] }
0x5cba   :  { %12731 = vrcp.f32 %v7323_v12  ;;  %v8478_v12 = vld [vmem:[%s15244_s22 + $0x18] sm:$0xff] }
0x5cc4   :  { %v12732_v9 = vpop.eup %12731 }
0x5cc5   :  { %v7327_v34 = vmul.f32 %v12732_v9, %v14916_v40 }
0x5d28   :  { %v8160_v59 = vpop.permute.xlu1 %8159 }
0x5d29   :  { %v8162_v41 = vmul.f32 %v12724_v25, %v8160_v59 }
0x5d2b   :  { %8164 = vrot.lane.b32.xlu0 %v8162_v41, %s13281_s9 }
0x5d2f   :  { %7329 = vrot.lane.b32.xlu0 %v12728_v50, %s13280_s18  ;;  %v8476_v50 = vld [vmem:[%s15244_s22 + $0x8] sm:$0xff] }
0x5d9d   :  { %v8165_v24 = vpop.permute.xlu0 %8164 }
0x5d9e   :  { %11463 = vmatmul.mubr.msk.f32.vlgmr.msra.gmra.mrb[120].mxu1 %vm446_vm0, %v8165_v24  ;;  %v12212_v24 = vpack.c.bf16 %v8478_v12, %v8477_v57 }
0x5da1   :  { %v7330_v4 = vpop.permute.xlu0 %7329 }
0x5da2   :  { %v7332_v3 = vmul.f32 %v12732_v9, %v7330_v4  ;;  %v8480_v4 = vld [vmem:[%s15244_s22 + $0x28] sm:$0xff] }
0x5da4   :  { %7334 = vrot.lane.b32.xlu0 %v7332_v3, %s13281_s9 }
0x5e16   :  { %v7335_v20 = vpop.permute.xlu0 %7334 }
0x5e17   :  { %v7337_v16 = vadd.f32 %v7335_v20, %v7327_v34  ;;  %v8481_v34 = vld [vmem:[%s15244_s22 + $0x30] sm:$0xff]  ;;  %v8482_v20 = vld [vmem:[%s15244_s22 + $0x38] sm:$0xff] }
0x5e19   :  { %12733 = vtanh.f32 %v7337_v16  ;;  %v12220_v16 = vpack.c.bf16 %v8482_v20, %v8481_v34 }
0x5e23   :  { %v12734_v37 = vpop.eup %12733 }
0x5e24   :  { %7340 = vrot.lane.b32.xlu0 %v12734_v37, %s13280_s18  ;;  %v9566_v37 = vld [vmem:[#allocation30] ss:$0 sm:$0xff] }
0x5e28   :  { %8272 = vrot.lane.b32.xlu0 %v8162_v41, %s13280_s18  ;;  %v8475_v41 = vld [vmem:[%s15244_s22] sm:$0xff] }
0x5e29   :  { %v12208_v52 = vpack.c.bf16 %v8476_v50, %v8475_v41 }
0x5e2b   :  { %12209 = vmatprep.subr.bf16.mxu1 %v12208_v52 }
0x5e2c   :  { %8284 = vrot.lane.b32.xlu0 %v15010_v35, %s13280_s18  ;;  %12211 = vmatpush3.bf16.msra.mxu1 %v12208_v52 }
0x5e2d   :  { %12213 = vmatprep.subr.bf16.mxu1 %v12212_v24 }
0x5e30   :  { %8296 = vrot.lane.b32.xlu0 %v14981_v22, %s13280_s18  ;;  %12215 = vmatpush3.bf16.msra.mxu1 %v12212_v24 }
0x5e71   :  { %v8234_v58 = vpop.f32.mrb[120].mxu1 }
0x5e72   :  { %v8238_v28 = vadd.f32 %v8234_v58, %v14902_v1  ;;  %v11464_v48 = vpop.f32.mrb[121].mxu1 }
0x5e74   :  { %12735 = vtanh.f32 %v8238_v28  ;;  %v9565_v22 = vmul.f32 -1.442695, %v8238_v28 }
0x5e76   :  { %12737 = vpow2.f32 %v9565_v22 }
0x5e7e   :  { %v12736_v40 = vpop.eup %12735 }
0x5e7f   :  { %8248 = vrot.lane.b32.xlu1 %v12736_v40, %s13280_s18 }
0x5e80   :  { %v12738_v1 = vpop.eup %12737 }
0x5e81   :  { %v8242_v18 = vadd.f32 1.0, %v12738_v1 }
0x5e83   :  { %12739 = vrcp.f32 %v8242_v18 }
0x5e8d   :  { %v12740_v44 = vpop.eup %12739 }
0x5e8e   :  { %v8246_v19 = vmul.f32 %v12740_v44, %v8156_v31 }
0x5e96   :  { %v7341_v33 = vpop.permute.xlu0 %7340 }
0x5e97   :  { %v7343_v51 = vmul.f32 %v12732_v9, %v7341_v33  ;;  %v8479_v9 = vld [vmem:[%s15244_s22 + $0x20] sm:$0xff] }
0x5e98   :  { %v12216_v3 = vpack.c.bf16 %v8480_v4, %v8479_v9 }
0x5e99   :  { %8307 = vrot.lane.b32.xlu0 %v7343_v51, %s13281_s9 }
0x5e9a   :  { %v8273_v32 = vpop.permute.xlu0 %8272  ;;  %12217 = vmatprep.subr.bf16.mxu1 %v12216_v3 }
0x5e9b   :  { %8275 = vst.msk [vmem:[#allocation3 + $0x8] sm:$0xff] %vm6346_vm9, %v8273_v32  ;;  %12219 = vmatpush3.bf16.msra.mxu1 %v12216_v3 }
0x5e9c   :  { %12221 = vmatprep.subr.bf16.mxu1 %v12220_v16 }
0x5e9e   :  { %v8285_v13 = vpop.permute.xlu0 %8284 }
0x5e9f   :  { %8287 = vst.msk [vmem:[#allocation3 + $0x18] sm:$0xff] %vm6346_vm9, %v8285_v13  ;;  %12223 = vmatpush3.bf16.msra.mxu1 %v12220_v16 }
0x5ea0   :  { %12236 = vmatprep.subr.bf16.mxu1 %v13278_v53 }
0x5ea2   :  { %v8297_v35 = vpop.permute.xlu0 %8296 }
0x5ea3   :  { %8299 = vst.msk [vmem:[#allocation3 + $0x28] sm:$0xff] %vm6346_vm9, %v8297_v35 }
0x5eaa   :  { %v15090_v31 = vld [vmem:[#allocation3 + $0x28] sm:$0xff] }
0x5ef1   :  { %v8249_v63 = vpop.permute.xlu1 %8248 }
0x5ef2   :  { %v8251_v8 = vmul.f32 %v12740_v44, %v8249_v63 }
0x5ef4   :  { %8253 = vrot.lane.b32.xlu1 %v8251_v8, %s13281_s9 }
0x5f0b   :  { %v8308_v30 = vpop.permute.xlu0 %8307 }
0x5f0c   :  { %8310 = vst.msk [vmem:[#allocation3 + $0x38] sm:$0xff] %vm446_vm0, %v8308_v30 }
0x5f66   :  { %v8254_v56 = vpop.permute.xlu1 %8253 }
0x5f67   :  { %v8256_v7 = vadd.f32 %v8254_v56, %v8246_v19 }
0x5f69   :  { %12741 = vtanh.f32 %v8256_v7 }
0x5f73   :  { %v12742_v47 = vpop.eup %12741 }
0x5f74   :  { %8259 = vrot.lane.b32.xlu1 %v12742_v47, %s13280_s18 }
0x5fe6   :  { %v8260_v61 = vpop.permute.xlu1 %8259 }
0x5fe7   :  { %v8262_v62 = vmul.f32 %v12740_v44, %v8260_v61 }
0x5fe9   :  { %8266 = vrot.lane.b32.xlu1 %v8262_v62, %s13280_s18 }
0x5fed   :  { %8278 = vrot.lane.b32.xlu1 %v15024_v54, %s13280_s18  ;;  %v15081_v54 = vld [vmem:[#allocation3 + $0x18] sm:$0xff] }
0x5ff1   :  { %8290 = vrot.lane.b32.xlu1 %v14996_v45, %s13280_s18  ;;  %v15072_v45 = vld [vmem:[#allocation3 + $0x8] sm:$0xff] }
0x5ff5   :  { %8302 = vrot.lane.b32.xlu1 %v14966_v49, %s13280_s18 }
0x5ff9   :  { %8311 = vrot.lane.b32.xlu1 %v14951_v15, %s13280_s18 }
0x605b   :  { %v8267_v39 = vpop.permute.xlu1 %8266 }
0x605c   :  { %8269 = vst.msk [vmem:[#allocation3] sm:$0xff] %vm6346_vm9, %v8267_v39 }
0x605f   :  { %v8279_v25 = vpop.permute.xlu1 %8278 }
0x6060   :  { %8281 = vst.msk [vmem:[#allocation3 + $0x10] sm:$0xff] %vm6346_vm9, %v8279_v25 }
0x6063   :  { %v8291_v36 = vpop.permute.xlu1 %8290  ;;  %v15067_v38 = vld [vmem:[#allocation3] sm:$0xff] }
0x6064   :  { %8293 = vst.msk [vmem:[#allocation3 + $0x20] sm:$0xff] %vm6346_vm9, %v8291_v36  ;;  %11481 = vmatprep.mubr.msk.f32.mxu0 %vm859_vm11, %v15067_v38 }
0x6065   :  { %11482 = vmatmul.mubr.msk.f32.vlgmr.msra.gmra.mrb[126].mxu0 %vm859_vm11, %v15072_v45 }
0x6067   :  { %v8303_v15 = vpop.permute.xlu1 %8302  ;;  %v15076_v49 = vld [vmem:[#allocation3 + $0x10] sm:$0xff] }
0x6068   :  { %8305 = vst.msk [vmem:[#allocation3 + $0x30] sm:$0xff] %vm6346_vm9, %v8303_v15  ;;  %11484 = vmatprep.mubr.msk.f32.mxu0 %vm859_vm11, %v15076_v49 }
0x6069   :  { %11485 = vmatmul.mubr.msk.f32.gmra.mrb[128].mxu0 %vm859_vm11, %v15081_v54 }
0x606b   :  { %v8312_v14 = vpop.permute.xlu1 %8311  ;;  %v15085_v42 = vld [vmem:[#allocation3 + $0x20] sm:$0xff] }
0x606c   :  { %8314 = vst.msk [vmem:[#allocation3 + $0x38] sm:$0xff] %vm6346_vm9, %v8312_v14  ;;  %11487 = vmatprep.mubr.msk.f32.mxu0 %vm859_vm11, %v15085_v42 }
0x606d   :  { %11488 = vmatmul.mubr.msk.f32.gmra.mrb[130].mxu0 %vm859_vm11, %v15090_v31 }
0x606f   :  { %v15094_v55 = vld [vmem:[#allocation3 + $0x30] sm:$0xff] }
0x6070   :  { %11490 = vmatprep.mubr.msk.f32.mxu0 %vm859_vm11, %v15094_v55 }
0x6073   :  { %v15098_v59 = vld [vmem:[#allocation3 + $0x38] sm:$0xff] }
0x6074   :  { %11491 = vmatmul.mubr.msk.f32.gmra.mrb[132].mxu0 %vm859_vm11, %v15098_v59 }
0x6075   :  { %11537 = vmatprep.mubr.msk.f32.mxu0 %vm13279_vm8, %v13277_v29 }
0x6138   :  { %v11483_v58 = vpop.f32.mrb[126].mxu0 }
0x6139   :  { %v8434_v28 = vadd.f32 %v11483_v58, %v9566_v37  ;;  %v8428_v48 = vpop.f32.mrb[127].mxu0 }
0x613a   :  { %v8429_v40 = vadd.f32 %v9566_v37, %v8428_v48 }
0x613c   :  { %12743 = vtanh.f32 %v8429_v40  ;;  %v11486_v33 = vpop.f32.mrb[128].mxu0 }
0x613d   :  { %12745 = vtanh.f32 %v8434_v28  ;;  %v8444_v51 = vadd.f32 %v11486_v33, %v9566_v37  ;;  %v8438_v32 = vpop.f32.mrb[129].mxu0 }
0x613e   :  { %v8439_v13 = vadd.f32 %v9566_v37, %v8438_v32 }
0x6140   :  { %12747 = vtanh.f32 %v8439_v13  ;;  %v11489_v35 = vpop.f32.mrb[130].mxu0 }
0x6141   :  { %12749 = vtanh.f32 %v8444_v51  ;;  %v8454_v22 = vadd.f32 %v11489_v35, %v9566_v37  ;;  %v8448_v1 = vpop.f32.mrb[131].mxu0 }
0x6142   :  { %v8449_v18 = vadd.f32 %v9566_v37, %v8448_v1 }
0x6144   :  { %12751 = vtanh.f32 %v8449_v18 }
0x6145   :  { %12753 = vtanh.f32 %v8454_v22 }
0x6146   :  { %v12744_v44 = vpop.eup %12743 }
0x6147   :  { %v12746_v63 = vpop.eup %12745  ;;  %v11492_v8 = vpop.f32.mrb[132].mxu0  ;;  %11509 = vmatprep.mubr.msk.f32.mxu1 %vm859_vm11, %v12744_v44 }
0x6148   :  { %v8464_v30 = vadd.f32 %v11492_v8, %v9566_v37  ;;  %v8458_v19 = vpop.f32.mrb[133].mxu0  ;;  %11510 = vmatmul.mubr.msk.f32.vlgmr.msra.gmra.mrb[122].mxu1 %vm859_vm11, %v12746_v63 }
0x6149   :  { %v8459_v56 = vadd.f32 %v9566_v37, %v8458_v19 }
0x614a   :  { %v12748_v7 = vpop.eup %12747 }
0x614b   :  { %v12750_v47 = vpop.eup %12749  ;;  %12755 = vtanh.f32 %v8459_v56  ;;  %11512 = vmatprep.mubr.msk.f32.mxu1 %vm859_vm11, %v12748_v7 }
0x614c   :  { %12757 = vtanh.f32 %v8464_v30  ;;  %11513 = vmatmul.mubr.msk.f32.gmra.mrb[124].mxu1 %vm859_vm11, %v12750_v47 }
0x614e   :  { %v12752_v10 = vpop.eup %12751 }
0x614f   :  { %v12754_v11 = vpop.eup %12753  ;;  %11515 = vmatprep.mubr.msk.f32.mxu1 %vm859_vm11, %v12752_v10 }
0x6150   :  { %11516 = vmatmul.mubr.msk.f32.gmra.mrb[126].mxu1 %vm859_vm11, %v12754_v11 }
0x6155   :  { %v12756_v23 = vpop.eup %12755 }
0x6156   :  { %v12758_v5 = vpop.eup %12757  ;;  %11518 = vmatprep.mubr.msk.f32.mxu1 %vm859_vm11, %v12756_v23 }
0x6157   :  { %11519 = vmatmul.mubr.msk.f32.gmra.mrb[128].mxu1 %vm859_vm11, %v12758_v5 }
0x6158   :  { %11556 = vmatprep.mubr.msk.f32.mxu1 %vm13279_vm8, %v13277_v29 }
0x621b   :  { %v11511_v0 = vpop.f32.mrb[122].mxu1 }
0x621c   :  { %v8573_v17 = vpop.f32.mrb[123].mxu1  ;;  %v8614_v6 = vsel %vm8612_vm10, %v11511_v0, -inf }
0x621d   :  { %v8613_v61 = vsel %vm8612_vm10, %v8573_v17, -inf }
0x621f   :  { %v11514_v21 = vpop.f32.mrb[124].mxu1 }
0x6220   :  { %v8583_v27 = vpop.f32.mrb[125].mxu1  ;;  %v8616_v14 = vsel %vm8612_vm10, %v11514_v21, -inf }
0x6221   :  { %v8615_v52 = vsel %vm8612_vm10, %v8583_v27, -inf }
0x6223   :  { %v11517_v43 = vpop.f32.mrb[126].mxu1 }
0x6224   :  { %v8619_v60 = vsel %vm8612_vm10, %v11517_v43, -inf  ;;  %v8593_v46 = vpop.f32.mrb[127].mxu1 }
0x6225   :  { %v8620_v62 = vmax.f32 %v8614_v6, %v8619_v60  ;;  %v8617_v39 = vsel %vm8612_vm10, %v8593_v46, -inf  ;;  %v8662_v6 = vand.u32 7, %v13594_v26  ;;  %v8870_v26 = vld [vmem:[%s15245_s26] sm:$0xff] }
0x6226   :  { %v8618_v25 = vmax.f32 %v8613_v61, %v8617_v39  ;;  %v8872_v61 = vld [vmem:[%s15245_s26 + $0x10] sm:$0xff]  ;;  %v8873_v39 = vld [vmem:[%s15245_s26 + $0x18] sm:$0xff] }
0x6227   :  { %vm8670_vm12 = vcmp.eq.s32.totalorder %v8662_v6, %v13694_v2  ;;  %v8874_v2 = vld [vmem:[%s15245_s26 + $0x20] sm:$0xff]  ;;  %v9056_v6 = vld [vmem:[%s13453_s29 + $0x30] sm:$0xff] }
0x6228   :  { %v8625_v36 = vmax.f32 %v8618_v25, %v8620_v62  ;;  %v8671_v60 = vsel %vm8670_vm12, 1.0, %v13277_v29  ;;  %v12252_v25 = vpack.c.bf16 %v8873_v39, %v8872_v61 }
0x622a   :  { %v11520_v15 = vpop.f32.mrb[128].mxu1 }
0x622b   :  { %v8623_v41 = vsel %vm8612_vm10, %v11520_v15, -inf  ;;  %v8603_v50 = vpop.f32.mrb[129].mxu1 }
0x622c   :  { %v8624_v57 = vmax.f32 %v8616_v14, %v8623_v41  ;;  %v8621_v12 = vsel %vm8612_vm10, %v8603_v50, -inf }
0x622d   :  { %v8622_v24 = vmax.f32 %v8615_v52, %v8621_v12 }
0x622f   :  { %v8626_v9 = vmax.f32 %v8622_v24, %v8624_v57 }
0x6231   :  { %v8627_v4 = vmax.f32 %v8625_v36, %v8626_v9  ;;  %v8875_v36 = vld [vmem:[%s15245_s26 + $0x28] sm:$0xff] }
0x6233   :  { %v8628_v3 = vrot.slane %v8627_v4, 4 }
0x6235   :  { %v8629_v34 = vmax.f32 %v8627_v4, %v8628_v3 }
0x6237   :  { %v8630_v20 = vrot.slane %v8629_v34, 2 }
0x6239   :  { %v8631_v16 = vmax.f32 %v8629_v34, %v8630_v20 }
0x623b   :  { %v8632_v37 = vrot.slane %v8631_v16, 1 }
0x623d   :  { %v8633_v58 = vmax.f32 %v8631_v16, %v8632_v37 }
0x623f   :  { %v8640_v28 = vsub.f32 %v8603_v50, %v8633_v58  ;;  %v8635_v48 = vsub.f32 %v11511_v0, %v8633_v58  ;;  %v8634_v40 = vsub.f32 %v8573_v17, %v8633_v58  ;;  %v8637_v33 = vsub.f32 %v11514_v21, %v8633_v58 }
0x6240   :  { %v8636_v51 = vsub.f32 %v8583_v27, %v8633_v58  ;;  %v8639_v32 = vsub.f32 %v11517_v43, %v8633_v58  ;;  %v8638_v13 = vsub.f32 %v8593_v46, %v8633_v58  ;;  %v8641_v35 = vsub.f32 %v11520_v15, %v8633_v58  ;;  %v8871_v46 = vld [vmem:[%s15245_s26 + $0x8] sm:$0xff] }
0x6241   :  { %v8654_v22 = vmul.f32 1.442695, %v8640_v28  ;;  %v8644_v1 = vmul.f32 1.442695, %v8635_v48  ;;  %v8642_v18 = vmul.f32 1.442695, %v8634_v40  ;;  %v12249_v62 = vpack.c.bf16 %v8871_v46, %v8870_v26 }
0x6242   :  { %v8648_v44 = vmul.f32 1.442695, %v8637_v33  ;;  %v8646_v63 = vmul.f32 1.442695, %v8636_v51  ;;  %v8652_v8 = vmul.f32 1.442695, %v8639_v32  ;;  %v12255_v15 = vpack.c.bf16 %v8875_v36, %v8874_v2 }
0x6243   :  { %12759 = vpow2.f32 %v8654_v22  ;;  %v8650_v30 = vmul.f32 1.442695, %v8638_v13  ;;  %v8656_v19 = vmul.f32 1.442695, %v8641_v35  ;;  %v8876_v48 = vld [vmem:[%s15245_s26 + $0x30] sm:$0xff]  ;;  %v8959_v51 = vld [vmem:[%s15246_s14] sm:$0xff] }
0x6244   :  { %12761 = vpow2.f32 %v8644_v1  ;;  %v8960_v32 = vld [vmem:[%s15246_s14 + $0x8] sm:$0xff] }
0x6245   :  { %12763 = vpow2.f32 %v8642_v18  ;;  %v12261_v13 = vpack.c.bf16 %v8960_v32, %v8959_v51 }
0x6246   :  { %12765 = vpow2.f32 %v8648_v44  ;;  %v8961_v44 = vld [vmem:[%s15246_s14 + $0x10] sm:$0xff] }
0x6247   :  { %12767 = vpow2.f32 %v8646_v63  ;;  %v8962_v63 = vld [vmem:[%s15246_s14 + $0x18] sm:$0xff] }
0x6248   :  { %12769 = vpow2.f32 %v8652_v8  ;;  %v12264_v8 = vpack.c.bf16 %v8962_v63, %v8961_v44 }
0x6249   :  { %12771 = vpow2.f32 %v8650_v30  ;;  %v9585_v30 = vld [vmem:[#allocation31] ss:$0 sm:$0xff] }
0x624a   :  { %12773 = vpow2.f32 %v8656_v19  ;;  %v9050_v19 = vld [vmem:[%s13453_s29] sm:$0xff] }
0x624d   :  { %v12760_v56 = vpop.eup %12759 }
0x624e   :  { %v12762_v7 = vpop.eup %12761 }
0x624f   :  { %v12764_v47 = vpop.eup %12763  ;;  %8752 = vperm.xlu1 %12486, %v12762_v7  }
0x6250   :  { %v12766_v10 = vpop.eup %12765  ;;  %8747 = vperm.xlu0 %12485, %v12764_v47   ;;  %v12225_v11 = vpack.c.bf16 %v12762_v7, %v12764_v47 }
0x6251   :  { %v12768_v23 = vpop.eup %12767 }
0x6252   :  { %v12770_v5 = vpop.eup %12769  ;;  %12226 = vmatpush3.bf16.msra.mxu0 %v12225_v11  ;;  %v12228_v0 = vpack.c.bf16 %v12766_v10, %v12768_v23 }
0x6253   :  { %v12772_v17 = vpop.eup %12771  ;;  %8762 = vperm.xlu1 %12486, %v12766_v10   ;;  %12227 = vmatprep.subr.bf16.mxu0 %v13278_v53 }
0x6254   :  { %v12774_v21 = vpop.eup %12773  ;;  %8757 = vperm.xlu0 %12485, %v12768_v23   ;;  %v12231_v27 = vpack.c.bf16 %v12770_v5, %v12772_v17 }
0x6255   :  { %v12234_v43 = vpack.c.bf16 %v12774_v21, %v12760_v56 }
0x6256   :  { %12229 = vmatpush3.bf16.msra.mxu0 %v12228_v0  ;;  %v9053_v0 = vld [vmem:[%s13453_s29 + $0x18] sm:$0xff] }
0x6257   :  { %8772 = vperm.xlu1 %12486, %v12770_v5   ;;  %12230 = vmatprep.subr.bf16.mxu0 %v13278_v53  ;;  %v9052_v5 = vld [vmem:[%s13453_s29 + $0x10] sm:$0xff] }
0x6258   :  { %8767 = vperm.xlu0 %12485, %v12772_v17   ;;  %v12270_v17 = vpack.c.bf16 %v9053_v0, %v9052_v5 }
0x625a   :  { %12232 = vmatpush3.bf16.msra.mxu0 %v12231_v27  ;;  %v9055_v27 = vld [vmem:[%s13453_s29 + $0x28] sm:$0xff] }
0x625b   :  { %8782 = vperm.xlu1 %12486, %v12774_v21   ;;  %12233 = vmatprep.subr.bf16.mxu0 %v13278_v53  ;;  %v9054_v21 = vld [vmem:[%s13453_s29 + $0x20] sm:$0xff] }
0x625c   :  { %8777 = vperm.xlu0 %12485, %v12760_v56   ;;  %v9051_v56 = vld [vmem:[%s13453_s29 + $0x8] sm:$0xff] }
0x625d   :  { %v12267_v11 = vpack.c.bf16 %v9051_v56, %v9050_v19 }
0x625e   :  { %12235 = vmatpush3.bf16.msra.mxu0 %v12234_v43  ;;  %v12273_v43 = vpack.c.bf16 %v9055_v27, %v9054_v21 }
0x625f   :  { %12248 = vmatprep.subr.bf16.mxu0 %v13278_v53 }
0x6261   :  { %11538 = vmatmul.mubr.msk.f32.vlgmr.msra.gmra.mrb[134].mxu0 %vm859_vm11, %v8671_v60 }
0x6262   :  { %11575 = vmatprep.mubr.msk.f32.mxu0 %vm13279_vm8, %v13277_v29  ;;  %12250 = vmatpush3.bf16.msra.mxu0 %v12249_v62 }
0x6263   :  { %12251 = vmatprep.subr.bf16.mxu0 %v13278_v53 }
0x6266   :  { %12253 = vmatpush3.bf16.msra.mxu0 %v12252_v25  ;;  %v9590_v25 = vld [vmem:[#allocation33] ss:$0 sm:$0xff] }
0x6267   :  { %12254 = vmatprep.subr.bf16.mxu0 %v13278_v53 }
0x626a   :  { %12256 = vmatpush3.bf16.msra.mxu0 %v12255_v15 }
0x626b   :  { %12257 = vmatprep.subr.bf16.mxu0 %v13278_v53 }
0x62ce   :  { %v8753_v14 = vpop.permute.xlu1 %8752 }
0x62cf   :  { %v8786_v41 = vmul.f32 %v8753_v14, %v15072_v45  ;;  %v8748_v50 = vpop.permute.xlu0 %8747 }
0x62d0   :  { %v8785_v52 = vmul.f32 %v8748_v50, %v15067_v38 }
0x62d2   :  { %v12237_v57 = vpack.c.bf16 %v8786_v41, %v8785_v52  ;;  %v8763_v12 = vpop.permute.xlu1 %8762 }
0x62d3   :  { %v8788_v24 = vmul.f32 %v8763_v12, %v15081_v54  ;;  %v8758_v9 = vpop.permute.xlu0 %8757 }
0x62d4   :  { %v8787_v4 = vmul.f32 %v8758_v9, %v15076_v49  ;;  %12238 = vmatpush3.bf16.msra.mxu1 %v12237_v57 }
0x62d5   :  { %12239 = vmatprep.subr.bf16.mxu1 %v13278_v53 }
0x62d6   :  { %v12240_v3 = vpack.c.bf16 %v8788_v24, %v8787_v4  ;;  %v8773_v34 = vpop.permute.xlu1 %8772 }
0x62d7   :  { %v8790_v20 = vmul.f32 %v8773_v34, %v15090_v31  ;;  %v8768_v16 = vpop.permute.xlu0 %8767 }
0x62d8   :  { %v8789_v45 = vmul.f32 %v8768_v16, %v15085_v42  ;;  %12241 = vmatpush3.bf16.msra.mxu1 %v12240_v3 }
0x62d9   :  { %12242 = vmatprep.subr.bf16.mxu1 %v13278_v53 }
0x62da   :  { %v12243_v38 = vpack.c.bf16 %v8790_v20, %v8789_v45  ;;  %v8783_v54 = vpop.permute.xlu1 %8782 }
0x62db   :  { %v8792_v37 = vmul.f32 %v8783_v54, %v15098_v59  ;;  %v8778_v49 = vpop.permute.xlu0 %8777 }
0x62dc   :  { %v8791_v58 = vmul.f32 %v8778_v49, %v15094_v55  ;;  %12244 = vmatpush3.bf16.msra.mxu1 %v12243_v38  ;;  %v8877_v55 = vld [vmem:[%s15245_s26 + $0x38] sm:$0xff] }
0x62dd   :  { %12245 = vmatprep.subr.bf16.mxu1 %v13278_v53  ;;  %v12258_v40 = vpack.c.bf16 %v8877_v55, %v8876_v48 }
0x62de   :  { %v12246_v31 = vpack.c.bf16 %v8792_v37, %v8791_v58 }
0x62df   :  { %12259 = vmatpush3.bf16.msra.mxu0 %v12258_v40 }
0x62e0   :  { %12247 = vmatpush3.bf16.msra.mxu1 %v12246_v31 }
0x62e1   :  { %12260 = vmatprep.subr.bf16.mxu1 %v13278_v53 }
0x62e3   :  { %11557 = vmatmul.mubr.msk.f32.vlgmr.msra.gmra.mrb[130].mxu1 %vm859_vm11, %v8671_v60  ;;  %v9057_v60 = vld [vmem:[%s13453_s29 + $0x38] sm:$0xff] }
0x62e4   :  { %11586 = vmatprep.mubr.msk.f32.mxu1 %vm13279_vm8, %v13277_v29  ;;  %12262 = vmatpush3.bf16.msra.mxu1 %v12261_v13  ;;  %v12276_v26 = vpack.c.bf16 %v9057_v60, %v9056_v6 }
0x62e5   :  { %12263 = vmatprep.subr.bf16.mxu1 %v13278_v53 }
0x62e8   :  { %12265 = vmatpush3.bf16.msra.mxu1 %v12264_v8 }
0x62e9   :  { %12266 = vmatprep.subr.bf16.mxu1 %v13278_v53 }
0x6334   :  { %v8741_v42 = vpop.f32.mrb[134].mxu0 }
0x6335   :  { %12775 = vrcp.f32 %v8741_v42  ;;  %v11539_v28 = vpop.f32.mrb[135].mxu0 }
0x633f   :  { %v12776_v33 = vpop.eup %12775 }
0x6340   :  { %8866 = vperm.xlu0 %12485, %v12776_v33  }
0x63b6   :  { %v8859_v35 = vpop.f32.mrb[130].mxu1 }
0x63b7   :  { %v11558_v22 = vpop.f32.mrb[131].mxu1 }
0x63bf   :  { %v8867_v1 = vpop.permute.xlu0 %8866 }
0x63c0   :  { %v8869_v18 = vmul.f32 %v8867_v1, %v8859_v35 }
0x63c2   :  { %11576 = vmatmul.mubr.msk.f32.vlgmr.msra.gmra.mrb[136].mxu0 %vm859_vm11, %v8869_v18 }
0x6495   :  { %v8954_v7 = vpop.f32.mrb[136].mxu0 }
0x6496   :  { %v8955_v47 = vadd.f32 %v9585_v30, %v8954_v7  ;;  %v11577_v10 = vpop.f32.mrb[137].mxu0 }
0x6498   :  { %v8958_v23 = vmax.f32 %v8955_v47, 0.0 }
0x649a   :  { %11587 = vmatmul.mubr.msk.f32.vlgmr.msra.gmra.mrb[132].mxu1 %vm446_vm0, %v8958_v23 }
0x649b   :  { %12268 = vmatpush3.bf16.msra.mxu1 %v12267_v11  ;;  %11605 = vmatprep.mubr.msk.f32.mxu1 %vm13279_vm8, %v13277_v29  ;;  %v9587_v29 = vld [vmem:[#allocation4] ss:$0 sm:$0xff] }
0x649c   :  { %12269 = vmatprep.subr.bf16.mxu1 %v13278_v53 }
0x649f   :  { %12271 = vmatpush3.bf16.msra.mxu1 %v12270_v17 }
0x64a0   :  { %12272 = vmatprep.subr.bf16.mxu1 %v13278_v53 }
0x64a3   :  { %12274 = vmatpush3.bf16.msra.mxu1 %v12273_v43 }
0x64a4   :  { %12275 = vmatprep.subr.bf16.mxu1 %v13278_v53 }
0x64a7   :  { %12277 = vmatpush3.bf16.msra.mxu1 %v12276_v26 }
0x64aa   :  { %11606 = vmatmul.mubr.msk.f32.vlgmr.msra.gmra.mrb[134].mxu1 %vm859_vm11, %v15098_v59 }
0x656d   :  { %v9039_v46 = vpop.f32.mrb[132].mxu1 }
0x656e   :  { %v9040_v61 = vadd.f32 %v9587_v29, %v9039_v46  ;;  %v11588_v62 = vpop.f32.mrb[133].mxu1 }
0x6570   :  { %v9589_v39 = vmul.f32 -1.442695, %v9040_v61 }
0x6572   :  { %12777 = vpow2.f32 %v9589_v39 }
0x657c   :  { %v12778_v2 = vpop.eup %12777 }
0x657d   :  { %v9046_v36 = vadd.f32 1.0, %v12778_v2  ;;  %v9131_v15 = vpop.f32.mrb[134].mxu1 }
0x657e   :  { %v9132_v14 = vadd.f32 %v9590_v25, %v9131_v15  ;;  %v11607_v41 = vpop.f32.mrb[135].mxu1 }
0x657f   :  { %12779 = vrcp.f32 %v9046_v36 }
0x6580   :  { %9135 = vst.msk [vmem:[%s13468_s24] sm:$0xff] %vm446_vm0, %v9132_v14 }
0x6589   :  { %v12780_v53 = vpop.eup %12779 }
0x658a   :  { %9049 = vst.msk [vmem:[%s13463_s13] sm:$0xff] %vm8612_vm10, %v12780_v53 }
0x658b   :  { %9144 = vsyncpa [#allocation6], 1 }
0x658c   :  { %9145 = vsyncpa [#allocation8], 1 }
0x658d   :  { %9146 = vsyncpa [#allocation11], 1 }
0x658e   :  { %9147 = vsyncpa [#allocation14], 1 }
0x658f   :  { %9148 = vsyncpa [#allocation17], 1 }
0x6590   :  { %9149 = vsyncpa [#allocation20], 1 }
0x6591   :  { %9150 = vsyncpa [#allocation23], 1 }
0x6592   :  { %9151 = vsyncpa [#allocation26], 1 }
0x6593   :  { %9152 = vsyncpa [#allocation29], 1 }
0x6594   :  { %9153 = vsyncpa [#allocation32], 1 }

</bundles_post_ra>
